<compile_context>
chip_gen: v7x
topology: tpu7x:2x2x1
jax: 0.10.0
libtpu: 0.0.40
codegen_flags: <defaults>
</compile_context>

<pallas_src>
import math
from functools import partial

import jax
import jax.numpy as jnp
import numpy as np
from jax.experimental import pallas as pl
from jax.experimental.pallas import tpu as pltpu


# ---------------------------------------------------------------------------
# static planning helpers
# ---------------------------------------------------------------------------
def _choose_cblk(total, cap=16):
    """Channels per grid step: largest divisor <= cap, preferring >= 2 steps."""
    divisors = [d for d in range(1, min(cap, total) + 1) if total % d == 0]
    two_step = [d for d in divisors if total // d >= 2]
    return max(two_step) if two_step else max(divisors)


def _chunk_plan(hw, budget_bytes=4 << 20):
    """Static (start, size) chunks along the lane axis of the equality slab."""
    max_chunk = max(128, (budget_bytes // (4 * hw)) // 128 * 128)
    chunk = min(hw, max_chunk)
    plan, c0 = [], 0
    while c0 < hw:
        sz = min(chunk, hw - c0)
        plan.append((c0, sz))
        c0 += sz
    return plan


# ---------------------------------------------------------------------------
# ij = center*100 + (3x3 neighbour sum - center)/8 on a flattened spatial axis
# ---------------------------------------------------------------------------
def _ij_flat(x, pad_ref, axis, H, W):
    """`x` carries the flat spatial axis (row-major y*W+x) at position `axis`;
    `pad_ref` is a zero-halo VMEM scratch whose `axis` is longer by 2*(W+1).
    Vertical out-of-image neighbours are handled by the zero halo, horizontal
    ones by a column mask (no wrapper-side jnp.pad anywhere)."""
    HW = H * W
    P = W + 1
    ndim = x.ndim

    def axslice(start, size):
        idx = [slice(None)] * ndim
        idx[axis] = slice(start, start + size)
        return tuple(idx)

    def shifted(buf, d):
        return buf[axslice(P + d, HW)]

    col = jax.lax.broadcasted_iota(jnp.int32, x.shape, axis) % W
    zero = jnp.zeros_like(x)

    # halo-padded copy of x
    pad_ref[...] = jnp.zeros_like(pad_ref)
    pad_ref[axslice(P, HW)] = x
    p = pad_ref[...]

    # separable 3x3 sum: horizontal (masked at row boundaries) ...
    hsum = (x
            + jnp.where(col > 0, shifted(p, -1), zero)
            + jnp.where(col < W - 1, shifted(p, 1), zero))

    # ... then vertical (zero halo handles the image top/bottom rows)
    pad_ref[axslice(P, HW)] = hsum
    ph = pad_ref[...]
    total = hsum + shifted(ph, -W) + shifted(ph, W)

    # NOTE: reordering the summation vs. torch is fine for the demo's quantized
    # inputs (sums are exact); equality counting only needs self-consistency.
    return x * 100.0 + (total - x) * 0.125


# ---------------------------------------------------------------------------
# fused kernel: ij (both layouts) + per-channel entropy, Cblk channels / step
# ---------------------------------------------------------------------------
def _fused_kernel(xr_ref, xc_ref, ent_ref, padr_ref, padc_ref, *, H, W, n_total):
    HW = H * W
    cblk = ent_ref.shape[0]

    xr = xr_ref[...]                                    # (Cblk, 1, HW)
    xc = xc_ref[...]                                    # (Cblk, HW, 1)

    # identical arithmetic in both layouts -> identical ij values, so the
    # exact-equality counting is consistent between the two operands.
    ij_r = _ij_flat(xr, padr_ref, axis=2, H=H, W=W)     # (Cblk, 1, HW)
    ij_c = _ij_flat(xc, padc_ref, axis=1, H=H, W=W)     # (Cblk, HW, 1)

    inv_ln2 = 1.0 / math.log(2.0)
    coef = -(1.0 / n_total) * inv_ln2                   # -1/(N ln2)
    const = HW * (math.log(n_total) * inv_ln2) / n_total  # HW*log2(N)/N

    chunks = _chunk_plan(HW)
    ones = {sz: jnp.ones((sz, 1), jnp.float32) for _, sz in chunks}

    for c in range(cblk):                               # static unrolled loop
        vc = ij_c[c]                                    # (HW, 1)
        vr = ij_r[c]                                    # (1, HW)
        counts = None
        for c0, sz in chunks:
            eq = (vc == vr[:, c0:c0 + sz]).astype(jnp.float32)      # (HW, sz)
            part = jnp.dot(eq, ones[sz],
                           preferred_element_type=jnp.float32)      # MXU reduce
            counts = part if counts is None else counts + part
        # sum over unique values of -(c/N)*log2(c/N)
        #   == -(1/(N ln2)) * sum_i ln(counts_i) + HW*log2(N)/N
        slog = jnp.sum(jnp.log(counts), axis=0, keepdims=True)      # (1, 1)
        ent_ref[c] = coef * slog + const


# ---------------------------------------------------------------------------
# wrappers
# ---------------------------------------------------------------------------
def cnn_entropy_entropies(img):
    """Per-channel 2D entropies, shape (B, C), via one fused Pallas kernel."""
    B, C, H, W = img.shape
    BC, HW = B * C, H * W
    n_total = (H + 2) * (W + 2)     # faithful to the torch module's normalizer
    P = W + 1

    cblk = _choose_cblk(BC)
    grid = (BC // cblk,)

    x = img.astype(jnp.float32).reshape(BC, HW)         # free row-major reshape
    x_row = x.reshape(BC, 1, HW)                        # flat axis on lanes
    x_col = x.reshape(BC, HW, 1)                        # flat axis on sublanes

    ent = pl.pallas_call(
        partial(_fused_kernel, H=H, W=W, n_total=n_total),
        out_shape=jax.ShapeDtypeStruct((BC, 1, 1), jnp.float32),
        grid=grid,
        in_specs=[pl.BlockSpec((cblk, 1, HW), lambda i: (i, 0, 0)),
                  pl.BlockSpec((cblk, HW, 1), lambda i: (i, 0, 0))],
        out_specs=pl.BlockSpec((cblk, 1, 1), lambda i: (i, 0, 0)),
        scratch_shapes=[pltpu.VMEM((cblk, 1, HW + 2 * P), jnp.float32),
                        pltpu.VMEM((cblk, HW + 2 * P, 1), jnp.float32)],
        compiler_params=pltpu.CompilerParams(
            dimension_semantics=("parallel",)),
    )(x_row, x_col)

    return ent.reshape(B, C)


def cnn_entropy_forward(img, ratio):
    B, C, H, W = img.shape
    k = int(ratio * C)
    ent = cnn_entropy_entropies(img)                    # (B, C)
    # TODO(synk): jax.lax.top_k may break exact-entropy ties differently from torch.topk.
    _, idx = jax.lax.top_k(ent, k)                      # (B, k)
    selected = jnp.take_along_axis(img, idx[:, :, None, None], axis=1)
    return selected, ent, idx


# ---------------------------------------------------------------------------
# pure-JAX reference (independent formulation, for a correctness check)
# ---------------------------------------------------------------------------
def _reference_entropies(img):
    B, C, H, W = img.shape
    pad = jnp.pad(img.astype(jnp.float32), ((0, 0), (0, 0), (1, 1), (1, 1)))
    s = sum(pad[:, :, dy:dy + H, dx:dx + W] for dy in range(3) for dx in range(3))
    center = img.astype(jnp.float32)
    ij = center * 100.0 + (s - center) / 8.0
    v = ij.reshape(B * C, H * W)
    counts = (v[:, :, None] == v[:, None, :]).astype(jnp.float32).sum(-1)
    n = (H + 2) * (W + 2)
    h = -(1.0 / n) * (jnp.log(counts / n) / math.log(2.0))
    return h.sum(-1).reshape(B, C)


if __name__ == "__main__":
    key = jax.random.PRNGKey(0)
    B, C, H, W = 2, 4, 16, 16
    ratio = 0.5
    # quantized values so duplicate ij values (and distinct entropies) occur,
    # and so every floating-point sum involved is exact.
    img = jnp.floor(jax.random.uniform(key, (B, C, H, W), dtype=jnp.float32) * 3.0)

    selected, ent, idx = cnn_entropy_forward(img, ratio)
    selected = jax.block_until_ready(selected)
    ent = jax.block_until_ready(ent)

    ent_ref = _reference_entropies(img)
    assert selected.shape == (B, int(ratio * C), H, W), selected.shape
    assert np.allclose(np.asarray(ent), np.asarray(ent_ref), rtol=1e-5, atol=1e-5), (
        np.asarray(ent), np.asarray(ent_ref))

    print("KERNEL_OK")
</pallas_src>

<mosaic_0001>
module attributes {stable_mosaic.version = 11 : i64} {
  func.func @_fused_kernel(%arg0: i32, %arg1: memref<4x1x256xf32, #tpu.memory_space<vmem>>, %arg2: memref<4x256x1xf32, #tpu.memory_space<vmem>>, %arg3: memref<4x1x1xf32, #tpu.memory_space<vmem>>, %arg4: memref<4x1x290xf32, #tpu.memory_space<vmem>>, %arg5: memref<4x290x1xf32, #tpu.memory_space<vmem>>) attributes {dimension_semantics = [#tpu.dimension_semantics<parallel>], iteration_bounds = array<i64: 2>, scalar_prefetch = 0 : i64, scratch_operands = 2 : i64, tpu.core_type = #tpu.core_type<tc>, window_params = [{transform_indices = @transform_0, window_bounds = array<i64: 4, 1, 256>}, {transform_indices = @transform_1, window_bounds = array<i64: 4, 256, 1>}, {transform_indices = @transform_2, window_bounds = array<i64: 4, 1, 1>}]} {
    %c0 = arith.constant 0 : index
    %c0_0 = arith.constant 0 : index
    %c0_1 = arith.constant 0 : index
    %0 = vector.load %arg1[%c0, %c0_0, %c0_1] : memref<4x1x256xf32, #tpu.memory_space<vmem>>, vector<4x1x256xf32>
    %c0_2 = arith.constant 0 : index
    %c0_3 = arith.constant 0 : index
    %c0_4 = arith.constant 0 : index
    %1 = vector.load %arg2[%c0_2, %c0_3, %c0_4] : memref<4x256x1xf32, #tpu.memory_space<vmem>>, vector<4x256x1xf32>
    %2 = tpu.iota {dimensions = array<i32: 2>} : vector<4x1x256xi32>
    %c16_i32 = arith.constant 16 : i32
    %c0_i32 = arith.constant 0 : i32
    %3 = arith.cmpi eq, %c16_i32, %c0_i32 : i32
    %c1_i32 = arith.constant 1 : i32
    %4 = arith.select %3, %c1_i32, %c16_i32 : i32
    %5 = vector.broadcast %4 : i32 to vector<4x1x256xi32>
    %6 = arith.remsi %2, %5 : vector<4x1x256xi32>
    %c0_i32_5 = arith.constant 0 : i32
    %7 = vector.broadcast %c0_i32_5 : i32 to vector<4x1x256xi32>
    %8 = arith.cmpi ne, %6, %7 : vector<4x1x256xi32>
    %c0_i32_6 = arith.constant 0 : i32
    %9 = vector.broadcast %c0_i32_6 : i32 to vector<4x1x256xi32>
    %10 = arith.cmpi slt, %6, %9 : vector<4x1x256xi32>
    %c0_i32_7 = arith.constant 0 : i32
    %11 = arith.cmpi slt, %4, %c0_i32_7 : i32
    %12 = vector.broadcast %11 : i1 to vector<4x1x256xi1>
    %13 = vector.broadcast %12 : vector<4x1x256xi1> to vector<4x1x256xi1>
    %14 = arith.xori %10, %13 : vector<4x1x256xi1>
    %15 = arith.andi %14, %8 : vector<4x1x256xi1>
    %16 = vector.broadcast %4 : i32 to vector<4x1x256xi32>
    %17 = arith.addi %6, %16 : vector<4x1x256xi32>
    %18 = arith.select %15, %17, %6 : vector<4x1x256xi1>, vector<4x1x256xi32>
    %cst = arith.constant 0.000000e+00 : f32
    %19 = vector.broadcast %cst : f32 to vector<4x1x256xf32>
    %cst_8 = arith.constant 0.000000e+00 : f32
    %20 = vector.broadcast %cst_8 : f32 to vector<4x1x290xf32>
    %c0_9 = arith.constant 0 : index
    %c0_10 = arith.constant 0 : index
    %c0_11 = arith.constant 0 : index
    %21 = vector.load %arg4[%c0_9, %c0_10, %c0_11] : memref<4x1x290xf32, #tpu.memory_space<vmem>>, vector<4x1x290xf32>
    tpu.vector_store %arg4[%c0_9, %c0_10, %c0_11], %20 {strides = array<i32>} : memref<4x1x290xf32, #tpu.memory_space<vmem>>, vector<4x1x290xf32>,
    %c0_12 = arith.constant 0 : index
    %c0_13 = arith.constant 0 : index
    %c17 = arith.constant 17 : index
    %22 = vector.load %arg4[%c0_12, %c0_13, %c17] : memref<4x1x290xf32, #tpu.memory_space<vmem>>, vector<4x1x256xf32>
    tpu.vector_store %arg4[%c0_12, %c0_13, %c17], %0 {strides = array<i32>} : memref<4x1x290xf32, #tpu.memory_space<vmem>>, vector<4x1x256xf32>,
    %c0_14 = arith.constant 0 : index
    %c0_15 = arith.constant 0 : index
    %c0_16 = arith.constant 0 : index
    %23 = vector.load %arg4[%c0_14, %c0_15, %c0_16] : memref<4x1x290xf32, #tpu.memory_space<vmem>>, vector<4x1x290xf32>
    %c0_i32_17 = arith.constant 0 : i32
    %24 = vector.broadcast %c0_i32_17 : i32 to vector<4x1x256xi32>
    %25 = arith.cmpi sgt, %18, %24 : vector<4x1x256xi32>
    %26 = vector.extract_strided_slice %23 {offsets = [0, 0, 16], sizes = [4, 1, 256], strides = [1, 1, 1]} : vector<4x1x290xf32> to vector<4x1x256xf32>
    %27 = arith.select %25, %26, %19 : vector<4x1x256xi1>, vector<4x1x256xf32>
    %28 = arith.addf %0, %27 : vector<4x1x256xf32>
    %c15_i32 = arith.constant 15 : i32
    %29 = vector.broadcast %c15_i32 : i32 to vector<4x1x256xi32>
    %30 = arith.cmpi slt, %18, %29 : vector<4x1x256xi32>
    %31 = vector.extract_strided_slice %23 {offsets = [0, 0, 18], sizes = [4, 1, 256], strides = [1, 1, 1]} : vector<4x1x290xf32> to vector<4x1x256xf32>
    %32 = arith.select %30, %31, %19 : vector<4x1x256xi1>, vector<4x1x256xf32>
    %33 = arith.addf %28, %32 : vector<4x1x256xf32>
    %c0_18 = arith.constant 0 : index
    %c0_19 = arith.constant 0 : index
    %c17_20 = arith.constant 17 : index
    %34 = vector.load %arg4[%c0_18, %c0_19, %c17_20] : memref<4x1x290xf32, #tpu.memory_space<vmem>>, vector<4x1x256xf32>
    tpu.vector_store %arg4[%c0_18, %c0_19, %c17_20], %33 {strides = array<i32>} : memref<4x1x290xf32, #tpu.memory_space<vmem>>, vector<4x1x256xf32>,
    %c0_21 = arith.constant 0 : index
    %c0_22 = arith.constant 0 : index
    %c0_23 = arith.constant 0 : index
    %35 = vector.load %arg4[%c0_21, %c0_22, %c0_23] : memref<4x1x290xf32, #tpu.memory_space<vmem>>, vector<4x1x290xf32>
    %36 = vector.extract_strided_slice %35 {offsets = [0, 0, 1], sizes = [4, 1, 256], strides = [1, 1, 1]} : vector<4x1x290xf32> to vector<4x1x256xf32>
    %37 = arith.addf %33, %36 : vector<4x1x256xf32>
    %38 = vector.extract_strided_slice %35 {offsets = [0, 0, 33], sizes = [4, 1, 256], strides = [1, 1, 1]} : vector<4x1x290xf32> to vector<4x1x256xf32>
    %39 = arith.addf %37, %38 : vector<4x1x256xf32>
    %cst_24 = arith.constant 1.000000e+02 : f32
    %40 = vector.broadcast %cst_24 : f32 to vector<4x1x256xf32>
    %41 = arith.mulf %0, %40 : vector<4x1x256xf32>
    %42 = arith.subf %39, %0 : vector<4x1x256xf32>
    %cst_25 = arith.constant 1.250000e-01 : f32
    %43 = vector.broadcast %cst_25 : f32 to vector<4x1x256xf32>
    %44 = arith.mulf %42, %43 : vector<4x1x256xf32>
    %45 = arith.addf %41, %44 : vector<4x1x256xf32>
    %46 = tpu.iota {dimensions = array<i32: 1>} : vector<4x256x1xi32>
    %c16_i32_26 = arith.constant 16 : i32
    %c0_i32_27 = arith.constant 0 : i32
    %47 = arith.cmpi eq, %c16_i32_26, %c0_i32_27 : i32
    %c1_i32_28 = arith.constant 1 : i32
    %48 = arith.select %47, %c1_i32_28, %c16_i32_26 : i32
    %49 = vector.broadcast %48 : i32 to vector<4x256x1xi32>
    %50 = arith.remsi %46, %49 : vector<4x256x1xi32>
    %c0_i32_29 = arith.constant 0 : i32
    %51 = vector.broadcast %c0_i32_29 : i32 to vector<4x256x1xi32>
    %52 = arith.cmpi ne, %50, %51 : vector<4x256x1xi32>
    %c0_i32_30 = arith.constant 0 : i32
    %53 = vector.broadcast %c0_i32_30 : i32 to vector<4x256x1xi32>
    %54 = arith.cmpi slt, %50, %53 : vector<4x256x1xi32>
    %c0_i32_31 = arith.constant 0 : i32
    %55 = arith.cmpi slt, %48, %c0_i32_31 : i32
    %56 = vector.broadcast %55 : i1 to vector<4x256x1xi1>
    %57 = vector.broadcast %56 : vector<4x256x1xi1> to vector<4x256x1xi1>
    %58 = arith.xori %54, %57 : vector<4x256x1xi1>
    %59 = arith.andi %58, %52 : vector<4x256x1xi1>
    %60 = vector.broadcast %48 : i32 to vector<4x256x1xi32>
    %61 = arith.addi %50, %60 : vector<4x256x1xi32>
    %62 = arith.select %59, %61, %50 : vector<4x256x1xi1>, vector<4x256x1xi32>
    %cst_32 = arith.constant 0.000000e+00 : f32
    %63 = vector.broadcast %cst_32 : f32 to vector<4x256x1xf32>
    %cst_33 = arith.constant 0.000000e+00 : f32
    %64 = vector.broadcast %cst_33 : f32 to vector<4x290x1xf32>
    %c0_34 = arith.constant 0 : index
    %c0_35 = arith.constant 0 : index
    %c0_36 = arith.constant 0 : index
    %65 = vector.load %arg5[%c0_34, %c0_35, %c0_36] : memref<4x290x1xf32, #tpu.memory_space<vmem>>, vector<4x290x1xf32>
    tpu.vector_store %arg5[%c0_34, %c0_35, %c0_36], %64 {strides = array<i32>} : memref<4x290x1xf32, #tpu.memory_space<vmem>>, vector<4x290x1xf32>,
    %c0_37 = arith.constant 0 : index
    %c17_38 = arith.constant 17 : index
    %c0_39 = arith.constant 0 : index
    %66 = vector.load %arg5[%c0_37, %c17_38, %c0_39] : memref<4x290x1xf32, #tpu.memory_space<vmem>>, vector<4x256x1xf32>
    tpu.vector_store %arg5[%c0_37, %c17_38, %c0_39], %1 {strides = array<i32>} : memref<4x290x1xf32, #tpu.memory_space<vmem>>, vector<4x256x1xf32>,
    %c0_40 = arith.constant 0 : index
    %c0_41 = arith.constant 0 : index
    %c0_42 = arith.constant 0 : index
    %67 = vector.load %arg5[%c0_40, %c0_41, %c0_42] : memref<4x290x1xf32, #tpu.memory_space<vmem>>, vector<4x290x1xf32>
    %c0_i32_43 = arith.constant 0 : i32
    %68 = vector.broadcast %c0_i32_43 : i32 to vector<4x256x1xi32>
    %69 = arith.cmpi sgt, %62, %68 : vector<4x256x1xi32>
    %70 = vector.extract_strided_slice %67 {offsets = [0, 16, 0], sizes = [4, 256, 1], strides = [1, 1, 1]} : vector<4x290x1xf32> to vector<4x256x1xf32>
    %71 = arith.select %69, %70, %63 : vector<4x256x1xi1>, vector<4x256x1xf32>
    %72 = arith.addf %1, %71 : vector<4x256x1xf32>
    %c15_i32_44 = arith.constant 15 : i32
    %73 = vector.broadcast %c15_i32_44 : i32 to vector<4x256x1xi32>
    %74 = arith.cmpi slt, %62, %73 : vector<4x256x1xi32>
    %75 = vector.extract_strided_slice %67 {offsets = [0, 18, 0], sizes = [4, 256, 1], strides = [1, 1, 1]} : vector<4x290x1xf32> to vector<4x256x1xf32>
    %76 = arith.select %74, %75, %63 : vector<4x256x1xi1>, vector<4x256x1xf32>
    %77 = arith.addf %72, %76 : vector<4x256x1xf32>
    %c0_45 = arith.constant 0 : index
    %c17_46 = arith.constant 17 : index
    %c0_47 = arith.constant 0 : index
    %78 = vector.load %arg5[%c0_45, %c17_46, %c0_47] : memref<4x290x1xf32, #tpu.memory_space<vmem>>, vector<4x256x1xf32>
    tpu.vector_store %arg5[%c0_45, %c17_46, %c0_47], %77 {strides = array<i32>} : memref<4x290x1xf32, #tpu.memory_space<vmem>>, vector<4x256x1xf32>,
    %c0_48 = arith.constant 0 : index
    %c0_49 = arith.constant 0 : index
    %c0_50 = arith.constant 0 : index
    %79 = vector.load %arg5[%c0_48, %c0_49, %c0_50] : memref<4x290x1xf32, #tpu.memory_space<vmem>>, vector<4x290x1xf32>
    %80 = vector.extract_strided_slice %79 {offsets = [0, 1, 0], sizes = [4, 256, 1], strides = [1, 1, 1]} : vector<4x290x1xf32> to vector<4x256x1xf32>
    %81 = arith.addf %77, %80 : vector<4x256x1xf32>
    %82 = vector.extract_strided_slice %79 {offsets = [0, 33, 0], sizes = [4, 256, 1], strides = [1, 1, 1]} : vector<4x290x1xf32> to vector<4x256x1xf32>
    %83 = arith.addf %81, %82 : vector<4x256x1xf32>
    %cst_51 = arith.constant 1.000000e+02 : f32
    %84 = vector.broadcast %cst_51 : f32 to vector<4x256x1xf32>
    %85 = arith.mulf %1, %84 : vector<4x256x1xf32>
    %86 = arith.subf %83, %1 : vector<4x256x1xf32>
    %cst_52 = arith.constant 1.250000e-01 : f32
    %87 = vector.broadcast %cst_52 : f32 to vector<4x256x1xf32>
    %88 = arith.mulf %86, %87 : vector<4x256x1xf32>
    %89 = arith.addf %85, %88 : vector<4x256x1xf32>
    %cst_53 = arith.constant 1.000000e+00 : f32
    %90 = vector.broadcast %cst_53 : f32 to vector<256x1xf32>
    %91 = vector.extract_strided_slice %89 {offsets = [0, 0, 0], sizes = [1, 256, 1], strides = [1, 1, 1]} : vector<4x256x1xf32> to vector<1x256x1xf32>
    %92 = vector.shape_cast %91 : vector<1x256x1xf32> to vector<256x1xf32>
    %93 = vector.extract_strided_slice %45 {offsets = [0, 0, 0], sizes = [1, 1, 256], strides = [1, 1, 1]} : vector<4x1x256xf32> to vector<1x1x256xf32>
    %94 = vector.shape_cast %93 : vector<1x1x256xf32> to vector<1x256xf32>
    %95 = vector.broadcast %92 : vector<256x1xf32> to vector<256x256xf32>
    %96 = vector.broadcast %94 : vector<1x256xf32> to vector<256x256xf32>
    %97 = arith.cmpf oeq, %95, %96 : vector<256x256xf32>
    %98 = arith.extui %97 : vector<256x256xi1> to vector<256x256xi32>
    %99 = arith.sitofp %98 : vector<256x256xi32> to vector<256x256xf32>
    %cst_54 = arith.constant dense<0.000000e+00> : vector<256x1xf32>
    %100 = tpu.matmul %99, %90, %cst_54 {dimension_numbers = #tpu.dot_dimension_numbers<[1], [0], [0], [1], [0, 0, 1, 1], [], []>} : vector<256x256xf32>, vector<256x1xf32>, vector<256x1xf32> -> vector<256x1xf32>
    %101 = math.log %100 : vector<256x1xf32>
    %cst_55 = arith.constant dense<0.000000e+00> : vector<1xf32>
    %102 = vector.multi_reduction <add>, %101, %cst_55 [0] : vector<256x1xf32> to vector<1xf32>
    %103 = vector.shape_cast %102 : vector<1xf32> to vector<1x1xf32>
    %cst_56 = arith.constant -0.00445276266 : f32
    %104 = vector.broadcast %cst_56 : f32 to vector<1x1xf32>
    %105 = arith.mulf %104, %103 : vector<1x1xf32>
    %cst_57 = arith.constant 6.58951091 : f32
    %106 = vector.broadcast %cst_57 : f32 to vector<1x1xf32>
    %107 = arith.addf %105, %106 : vector<1x1xf32>
    %c0_58 = arith.constant 0 : index
    %c0_59 = arith.constant 0 : index
    %c0_60 = arith.constant 0 : index
    %108 = vector.load %arg3[%c0_58, %c0_59, %c0_60] : memref<4x1x1xf32, #tpu.memory_space<vmem>>, vector<1x1x1xf32>
    %109 = vector.shape_cast %108 : vector<1x1x1xf32> to vector<1x1xf32>
    %110 = vector.shape_cast %107 : vector<1x1xf32> to vector<1x1x1xf32>
    tpu.vector_store %arg3[%c0_58, %c0_59, %c0_60], %110 {strides = array<i32>} : memref<4x1x1xf32, #tpu.memory_space<vmem>>, vector<1x1x1xf32>,
    %111 = vector.extract_strided_slice %89 {offsets = [1, 0, 0], sizes = [1, 256, 1], strides = [1, 1, 1]} : vector<4x256x1xf32> to vector<1x256x1xf32>
    %112 = vector.shape_cast %111 : vector<1x256x1xf32> to vector<256x1xf32>
    %113 = vector.extract_strided_slice %45 {offsets = [1, 0, 0], sizes = [1, 1, 256], strides = [1, 1, 1]} : vector<4x1x256xf32> to vector<1x1x256xf32>
    %114 = vector.shape_cast %113 : vector<1x1x256xf32> to vector<1x256xf32>
    %115 = vector.broadcast %112 : vector<256x1xf32> to vector<256x256xf32>
    %116 = vector.broadcast %114 : vector<1x256xf32> to vector<256x256xf32>
    %117 = arith.cmpf oeq, %115, %116 : vector<256x256xf32>
    %118 = arith.extui %117 : vector<256x256xi1> to vector<256x256xi32>
    %119 = arith.sitofp %118 : vector<256x256xi32> to vector<256x256xf32>
    %cst_61 = arith.constant dense<0.000000e+00> : vector<256x1xf32>
    %120 = tpu.matmul %119, %90, %cst_61 {dimension_numbers = #tpu.dot_dimension_numbers<[1], [0], [0], [1], [0, 0, 1, 1], [], []>} : vector<256x256xf32>, vector<256x1xf32>, vector<256x1xf32> -> vector<256x1xf32>
    %121 = math.log %120 : vector<256x1xf32>
    %cst_62 = arith.constant dense<0.000000e+00> : vector<1xf32>
    %122 = vector.multi_reduction <add>, %121, %cst_62 [0] : vector<256x1xf32> to vector<1xf32>
    %123 = vector.shape_cast %122 : vector<1xf32> to vector<1x1xf32>
    %cst_63 = arith.constant -0.00445276266 : f32
    %124 = vector.broadcast %cst_63 : f32 to vector<1x1xf32>
    %125 = arith.mulf %124, %123 : vector<1x1xf32>
    %cst_64 = arith.constant 6.58951091 : f32
    %126 = vector.broadcast %cst_64 : f32 to vector<1x1xf32>
    %127 = arith.addf %125, %126 : vector<1x1xf32>
    %c1 = arith.constant 1 : index
    %c0_65 = arith.constant 0 : index
    %c0_66 = arith.constant 0 : index
    %128 = vector.load %arg3[%c1, %c0_65, %c0_66] : memref<4x1x1xf32, #tpu.memory_space<vmem>>, vector<1x1x1xf32>
    %129 = vector.shape_cast %128 : vector<1x1x1xf32> to vector<1x1xf32>
    %130 = vector.shape_cast %127 : vector<1x1xf32> to vector<1x1x1xf32>
    tpu.vector_store %arg3[%c1, %c0_65, %c0_66], %130 {strides = array<i32>} : memref<4x1x1xf32, #tpu.memory_space<vmem>>, vector<1x1x1xf32>,
    %131 = vector.extract_strided_slice %89 {offsets = [2, 0, 0], sizes = [1, 256, 1], strides = [1, 1, 1]} : vector<4x256x1xf32> to vector<1x256x1xf32>
    %132 = vector.shape_cast %131 : vector<1x256x1xf32> to vector<256x1xf32>
    %133 = vector.extract_strided_slice %45 {offsets = [2, 0, 0], sizes = [1, 1, 256], strides = [1, 1, 1]} : vector<4x1x256xf32> to vector<1x1x256xf32>
    %134 = vector.shape_cast %133 : vector<1x1x256xf32> to vector<1x256xf32>
    %135 = vector.broadcast %132 : vector<256x1xf32> to vector<256x256xf32>
    %136 = vector.broadcast %134 : vector<1x256xf32> to vector<256x256xf32>
    %137 = arith.cmpf oeq, %135, %136 : vector<256x256xf32>
    %138 = arith.extui %137 : vector<256x256xi1> to vector<256x256xi32>
    %139 = arith.sitofp %138 : vector<256x256xi32> to vector<256x256xf32>
    %cst_67 = arith.constant dense<0.000000e+00> : vector<256x1xf32>
    %140 = tpu.matmul %139, %90, %cst_67 {dimension_numbers = #tpu.dot_dimension_numbers<[1], [0], [0], [1], [0, 0, 1, 1], [], []>} : vector<256x256xf32>, vector<256x1xf32>, vector<256x1xf32> -> vector<256x1xf32>
    %141 = math.log %140 : vector<256x1xf32>
    %cst_68 = arith.constant dense<0.000000e+00> : vector<1xf32>
    %142 = vector.multi_reduction <add>, %141, %cst_68 [0] : vector<256x1xf32> to vector<1xf32>
    %143 = vector.shape_cast %142 : vector<1xf32> to vector<1x1xf32>
    %cst_69 = arith.constant -0.00445276266 : f32
    %144 = vector.broadcast %cst_69 : f32 to vector<1x1xf32>
    %145 = arith.mulf %144, %143 : vector<1x1xf32>
    %cst_70 = arith.constant 6.58951091 : f32
    %146 = vector.broadcast %cst_70 : f32 to vector<1x1xf32>
    %147 = arith.addf %145, %146 : vector<1x1xf32>
    %c2 = arith.constant 2 : index
    %c0_71 = arith.constant 0 : index
    %c0_72 = arith.constant 0 : index
    %148 = vector.load %arg3[%c2, %c0_71, %c0_72] : memref<4x1x1xf32, #tpu.memory_space<vmem>>, vector<1x1x1xf32>
    %149 = vector.shape_cast %148 : vector<1x1x1xf32> to vector<1x1xf32>
    %150 = vector.shape_cast %147 : vector<1x1xf32> to vector<1x1x1xf32>
    tpu.vector_store %arg3[%c2, %c0_71, %c0_72], %150 {strides = array<i32>} : memref<4x1x1xf32, #tpu.memory_space<vmem>>, vector<1x1x1xf32>,
    %151 = vector.extract_strided_slice %89 {offsets = [3, 0, 0], sizes = [1, 256, 1], strides = [1, 1, 1]} : vector<4x256x1xf32> to vector<1x256x1xf32>
    %152 = vector.shape_cast %151 : vector<1x256x1xf32> to vector<256x1xf32>
    %153 = vector.extract_strided_slice %45 {offsets = [3, 0, 0], sizes = [1, 1, 256], strides = [1, 1, 1]} : vector<4x1x256xf32> to vector<1x1x256xf32>
    %154 = vector.shape_cast %153 : vector<1x1x256xf32> to vector<1x256xf32>
    %155 = vector.broadcast %152 : vector<256x1xf32> to vector<256x256xf32>
    %156 = vector.broadcast %154 : vector<1x256xf32> to vector<256x256xf32>
    %157 = arith.cmpf oeq, %155, %156 : vector<256x256xf32>
    %158 = arith.extui %157 : vector<256x256xi1> to vector<256x256xi32>
    %159 = arith.sitofp %158 : vector<256x256xi32> to vector<256x256xf32>
    %cst_73 = arith.constant dense<0.000000e+00> : vector<256x1xf32>
    %160 = tpu.matmul %159, %90, %cst_73 {dimension_numbers = #tpu.dot_dimension_numbers<[1], [0], [0], [1], [0, 0, 1, 1], [], []>} : vector<256x256xf32>, vector<256x1xf32>, vector<256x1xf32> -> vector<256x1xf32>
    %161 = math.log %160 : vector<256x1xf32>
    %cst_74 = arith.constant dense<0.000000e+00> : vector<1xf32>
    %162 = vector.multi_reduction <add>, %161, %cst_74 [0] : vector<256x1xf32> to vector<1xf32>
    %163 = vector.shape_cast %162 : vector<1xf32> to vector<1x1xf32>
    %cst_75 = arith.constant -0.00445276266 : f32
    %164 = vector.broadcast %cst_75 : f32 to vector<1x1xf32>
    %165 = arith.mulf %164, %163 : vector<1x1xf32>
    %cst_76 = arith.constant 6.58951091 : f32
    %166 = vector.broadcast %cst_76 : f32 to vector<1x1xf32>
    %167 = arith.addf %165, %166 : vector<1x1xf32>
    %c3 = arith.constant 3 : index
    %c0_77 = arith.constant 0 : index
    %c0_78 = arith.constant 0 : index
    %168 = vector.load %arg3[%c3, %c0_77, %c0_78] : memref<4x1x1xf32, #tpu.memory_space<vmem>>, vector<1x1x1xf32>
    %169 = vector.shape_cast %168 : vector<1x1x1xf32> to vector<1x1xf32>
    %170 = vector.shape_cast %167 : vector<1x1xf32> to vector<1x1x1xf32>
    tpu.vector_store %arg3[%c3, %c0_77, %c0_78], %170 {strides = array<i32>} : memref<4x1x1xf32, #tpu.memory_space<vmem>>, vector<1x1x1xf32>,
    return
  }
  func.func @transform_0(%arg0: i32) -> (i32, i32, i32) {
    %c0_i32 = arith.constant 0 : i32
    %c0_i32_0 = arith.constant 0 : i32
    %c0_i32_1 = arith.constant 0 : i32
    return %arg0, %c0_i32, %c0_i32_0 : i32, i32, i32
  }
  func.func @transform_1(%arg0: i32) -> (i32, i32, i32) {
    %c0_i32 = arith.constant 0 : i32
    %c0_i32_0 = arith.constant 0 : i32
    %c0_i32_1 = arith.constant 0 : i32
    return %arg0, %c0_i32, %c0_i32_0 : i32, i32, i32
  }
  func.func @transform_2(%arg0: i32) -> (i32, i32, i32) {
    %c0_i32 = arith.constant 0 : i32
    %c0_i32_0 = arith.constant 0 : i32
    %c0_i32_1 = arith.constant 0 : i32
    return %arg0, %c0_i32, %c0_i32_0 : i32, i32, i32
  }
}

</mosaic_0001>

<bundles_post_ra>
// kernel: tpu_custom_call.1
= control target key start
LH: loop header
LB: loop body
LE: loop exit
PB: predicated region body
PF: predicated region fallthrough
CT: control target
= control target key end

     0   :  { %s8272_s9 = smov 0   ;;  %s14733_s0 = inlined_call_operand.vmem [shape: f32[8,1,256], index: 0, kind: input, shape index: {}]   ;;  %s14734_s1 = inlined_call_operand.vmem [shape: f32[8,256,1], index: 1, kind: input, shape index: {}]   ;;  %s14735_s2 = inlined_call_operand.vmem [shape: f32[8,1,1], index: 2, kind: output, shape index: {}]  }
   0x1 LB: > { %s7296_s10 = sadd.s32 4294967295, %s8244_s9   ;;  %p7300_p0 = scmp.ge.s32.totalorder %s8244_s9, 1  ;;  %s8244_s9 = sphi %s8272_s9, %s12_s9  }
   0x2   : > { %p125_p1 = scmp.lt.s32.totalorder %s8244_s9, 3 }
   0x4   : > { %p126_p2 = pnand %p7300_p0, %p125_p1 }
   0x6   : > { %129 = sbr.rel (%p126_p2) target bundleno = 1273 (0x4f9), region = 28 }
   0xd   : > { %s7301_s11 = sshll.u32 %s7296_s10, 2  ;;  %v302_v0 = vlaneseq  ;;  %v14736_v1 = vmov 0.0   ;;  %s8247_s16 = smov 17   ;;  %vm14756_vm3 = vcmask 138240   ;;  %v15176_v5 = vmov 0 }
   0xe   : > { %p153_p3 = scmp.lt.s32.totalorder %s7301_s11, 7  ;;  %s8248_s17 = smov 112   ;;  %v8250_v29 = vmov 0   ;;  %vm14792_vm5 = vcmask 7168   ;;  %v15186_v49 = vmov 0  ;;  %v15189_v50 = vmov 0 }
   0xf   : > { %vm331_vm0 = vcmp.lt.s32.totalorder %v302_v0, 290  ;;  %vm362_vm1 = vcmp.ge.s32.totalorder %v302_v0, 17  ;;  %vm363_vm2 = vcmp.lt.s32.totalorder %v302_v0, 273  ;;  %v8308_v8 = vshrl.u32 %v302_v0, 7  ;;  %s8249_s18 = smov 110   ;;  %7972 = vset.pattern.permute.xlu0 %v8250_v29  ;;  %7973 = vset.pattern.permute.xlu1 %v8250_v29  ;;  %1199 = vst.msk [vmem:[#allocation3] sm:$0xff] %vm14792_vm5, %v14736_v1 }
  0x10   : > { %s16498_s11 = smov (!%p153_p3, %s7301_s11), 7  ;;  %333 = vst.msk [vmem:[#allocation2] sm:$0x7] %vm331_vm0, %v14736_v1  ;;  %334 = vst.msk [vmem:[#allocation2 + $0x3] sm:$0x7] %vm331_vm0, %v14736_v1  ;;  %v15192_v51 = vmov 0 }
  0x11   : > { %335 = vst.msk [vmem:[#allocation2 + $0x6] sm:$0x7] %vm331_vm0, %v14736_v1  ;;  %336 = vst.msk [vmem:[#allocation2 + $0x9] sm:$0x7] %vm331_vm0, %v14736_v1  ;;  %s7302_s12 = sshll.u32 %s16498_s11, 1  ;;  %v8316_v12 = vsub.s32 2, %v8308_v8  ;;  %s14664_s27 = scalar_lea.vmem %s14735_s2, %s16498_s11 }
  0x12   : > { %s8291_s15 = scalar_lea.vmem %s14733_s0, %s7302_s12  ;;  %vm8302_vm4 = vmand %vm362_vm1, %vm363_vm2  ;;  %v8319_v13 = vsub.s32 0, %v8308_v8  ;;  %v8324_v17 = vsub.s32 1, %v8308_v8  ;;  %s7824_s19 = sshll.u32 %s16498_s11, 8  ;;  %v8362_v28 = vadd.s32 16, %v8308_v8  ;;  %v8374_v33 = vadd.s32 8, %v8308_v8  ;;  %1200 = vst.msk [vmem:[#allocation3 + $0x8] sm:$0xff] %vm14792_vm5, %v14736_v1 }
  0x13   : > { %v8294_v2 = vld [vmem:[%s8291_s15] sm:$0x3]  ;;  %v171_v3 = vld [vmem:[%s8291_s15 + $0x2] sm:$0x3]  ;;  %v15177_v5 = vsel %vm8302_vm4, 4294967295, %v15176_v5  ;;  %s8350_s22 = scalar_lea.vmem %s14734_s1, %s7824_s19  ;;  %v8377_v34 = vadd.s32 24, %v8308_v8 }
  0x14   : > { %341 = vrot.lane.b32.xlu0 %v8294_v2, %s8247_s16  ;;  %15178 = vst [vmem:[#allocation4_spill] sm:$0xff] %v15177_v5  ;;  %15179 = vst [vmem:[#allocation5_spill] sm:$0xff] %v8319_v13  ;;  %v172_v23 = vld [vmem:[%s8291_s15 + $0x4] sm:$0x3]  ;;  %v173_v24 = vld [vmem:[%s8291_s15 + $0x6] sm:$0x3] }
  0x15   : > { %15180 = vst [vmem:[#allocation6_spill] sm:$0xff] %v8324_v17  ;;  %v8353_v25 = vld [vmem:[%s8350_s22] sm:$0xff]  ;;  %v8356_v26 = vld [vmem:[%s8350_s22 + $0x8] sm:$0xff]  ;;  %v8359_v27 = vld [vmem:[%s8350_s22 + $0x10] sm:$0xff]  ;;  %v832_v40 = vand.u32 15, %v8362_v28  ;;  %v786_v43 = vadd.s32 32, %v8308_v8 }
  0x16   : > { %v8365_v30 = vld [vmem:[%s8350_s22 + $0x18] sm:$0xff]  ;;  %v8368_v31 = vld [vmem:[%s8350_s22 + $0x20] sm:$0xff]  ;;  %v8371_v32 = vld [vmem:[%s8350_s22 + $0x28] sm:$0xff]  ;;  %1201 = vst.msk [vmem:[#allocation3 + $0x10] sm:$0xff] %vm14792_vm5, %v14736_v1  ;;  %v818_v44 = vand.u32 15, %v8308_v8  ;;  %v825_v45 = vand.u32 15, %v8374_v33 }
  0x17   : > { %15181 = vst [vmem:[#allocation7_spill] sm:$0xff] %v8365_v30  ;;  %15182 = vst [vmem:[#allocation8_spill] sm:$0xff] %v8368_v31  ;;  %v8668_v35 = vld [vmem:[%s8350_s22 + $0x100] sm:$0xff]  ;;  %v8671_v36 = vld [vmem:[%s8350_s22 + $0x108] sm:$0xff]  ;;  %v787_v46 = vadd.s32 40, %v8308_v8  ;;  %v839_v47 = vand.u32 15, %v8377_v34 }
  0x18   : > { %343 = vrot.lane.b32.xlu0 %v171_v3, %s8247_s16  ;;  %15183 = vst [vmem:[#allocation9_spill] sm:$0xff] %v8371_v32  ;;  %1202 = vst.msk [vmem:[#allocation3 + $0x18] sm:$0xff] %vm14792_vm5, %v14736_v1  ;;  %v8686_v37 = vld [vmem:[%s8350_s22 + $0x110] sm:$0xff]  ;;  %v8689_v38 = vld [vmem:[%s8350_s22 + $0x118] sm:$0xff]  ;;  %v846_v48 = vand.u32 15, %v786_v43  ;;  %vm8720_vm6 = vcmp.gt.s32.totalorder %v832_v40, 0 }
  0x19   : > { %1203 = vst.msk [vmem:[#allocation3 + $0x20] sm:$0xff] %vm14792_vm5, %v14736_v1  ;;  %1204 = vst.msk [vmem:[#allocation3 + $0x28] sm:$0xff] %vm14792_vm5, %v14736_v1  ;;  %v8692_v39 = vld [vmem:[%s8350_s22 + $0x120] sm:$0xff]  ;;  %v8700_v41 = vld [vmem:[%s8350_s22 + $0x128] sm:$0xff]  ;;  %v15187_v49 = vsel %vm8720_vm6, 4294967295, %v15186_v49  ;;  %vm8724_vm7 = vcmp.gt.s32.totalorder %v818_v44, 0 }
  0x1a   : > { %1205 = vst.msk [vmem:[#allocation3 + $0x30] sm:$0xff] %vm14792_vm5, %v14736_v1  ;;  %1206 = vst.msk [vmem:[#allocation3 + $0x38] sm:$0xff] %vm14792_vm5, %v14736_v1  ;;  %v8703_v42 = vld [vmem:[%s8350_s22 + $0x130] sm:$0xff]  ;;  %v15190_v50 = vsel %vm8724_vm7, 4294967295, %v15189_v50  ;;  %vm8728_vm8 = vcmp.lt.s32.totalorder %v825_v45, 15  ;;  %vm14801_vm9 = vcmask 1045504  }
  0x1b   : > { %1207 = vst.msk [vmem:[#allocation3 + $0x40] sm:$0xff] %vm14792_vm5, %v14736_v1  ;;  %1208 = vst.msk [vmem:[#allocation3 + $0x48] sm:$0xff] %vm14792_vm5, %v14736_v1  ;;  %v15193_v51 = vsel %vm8728_vm8, 4294967295, %v15192_v51  ;;  %v8732_v52 = vld [vmem:[#allocation3] sm:$0xff]  ;;  %v8734_v53 = vld [vmem:[#allocation3 + $0x8] sm:$0xff]  ;;  %v853_v54 = vand.u32 15, %v787_v46 }
  0x1c   : > { %1209 = vst.msk [vmem:[#allocation3 + $0x50] sm:$0xff] %vm14792_vm5, %v14736_v1  ;;  %1210 = vst.msk [vmem:[#allocation3 + $0x58] sm:$0xff] %vm14792_vm5, %v14736_v1  ;;  %vm8736_vm10 = vcmp.lt.s32.totalorder %v839_v47, 15  ;;  %v15195_v58 = vmov 0  ;;  %v3114_v59 = vrot.slane %v8732_v52, 1  ;;  %vm8741_vm11 = vcmp.gt.s32.totalorder %v846_v48, 0 }
  0x1d   : > { %1211 = vst.msk [vmem:[#allocation3 + $0x60] sm:$0xff] %vm14792_vm5, %v14736_v1  ;;  %1212 = vst.msk [vmem:[#allocation3 + $0x68] sm:$0xff] %vm14792_vm5, %v14736_v1  ;;  %v15196_v58 = vsel %vm8736_vm10, 4294967295, %v15195_v58  ;;  %v15198_v60 = vmov 0  ;;  %vm14773_vm12 = vcmask 1046528   ;;  %vm8755_vm13 = vcmp.lt.s32.totalorder %v853_v54, 15 }
  0x1e   : > { %1213 = vst.msk [vmem:[#allocation3 + $0x70] sm:$0xff] %vm14792_vm5, %v14736_v1  ;;  %1214 = vst.msk [vmem:[#allocation3 + $0x78] sm:$0xff] %vm14792_vm5, %v14736_v1  ;;  %v15199_v60 = vsel %vm8741_vm11, 4294967295, %v15198_v60  ;;  %vm14757_vm14 = vcmask 916480   ;;  %v9269_v5 = vld [vmem:[%s8350_s22 + $0x180] sm:$0xff]  ;;  %s8254_s23 = smov 127  }
  0x1f   : > { %1215 = vst.msk [vmem:[#allocation3 + $0x80] sm:$0xff] %vm14792_vm5, %v14736_v1  ;;  %1216 = vst.msk [vmem:[#allocation3 + $0x88] sm:$0xff] %vm14792_vm5, %v14736_v1  ;;  %s8255_s24 = smov 95  }
  0x20   : > { %1217 = vst.msk [vmem:[#allocation3 + $0x90] sm:$0xff] %vm14792_vm5, %v14736_v1  ;;  %1218 = vst.msk [vmem:[#allocation3 + $0x98] sm:$0xff] %vm14792_vm5, %v14736_v1 }
  0x21   : > { %1219 = vst.msk [vmem:[#allocation3 + $0xa0] sm:$0xff] %vm14792_vm5, %v14736_v1  ;;  %1220 = vst.msk [vmem:[#allocation3 + $0xa8] sm:$0xff] %vm14792_vm5, %v14736_v1 }
  0x22   : > { %1221 = vst.msk [vmem:[#allocation3 + $0xb0] sm:$0xff] %vm14792_vm5, %v14736_v1  ;;  %1222 = vst.msk [vmem:[#allocation3 + $0xb8] sm:$0xff] %vm14792_vm5, %v14736_v1 }
  0x23   : > { %1223 = vst.msk [vmem:[#allocation3 + $0xc0] sm:$0xff] %vm14792_vm5, %v14736_v1  ;;  %1224 = vst.msk [vmem:[#allocation3 + $0xc8] sm:$0xff] %vm14792_vm5, %v14736_v1 }
  0x24   : > { %1225 = vst.msk [vmem:[#allocation3 + $0xd0] sm:$0xff] %vm14792_vm5, %v14736_v1  ;;  %1226 = vst.msk [vmem:[#allocation3 + $0xd8] sm:$0xff] %vm14792_vm5, %v14736_v1 }
  0x25   : > { %1227 = vst.msk [vmem:[#allocation3 + $0xe0] sm:$0xff] %vm14792_vm5, %v14736_v1  ;;  %1228 = vst.msk [vmem:[#allocation3 + $0xe8] sm:$0xff] %vm14792_vm5, %v14736_v1 }
  0x26   : > { %1229 = vst.msk [vmem:[#allocation3 + $0xf0] sm:$0xff] %vm14792_vm5, %v14736_v1  ;;  %1230 = vst.msk [vmem:[#allocation3 + $0xf8] sm:$0xff] %vm14792_vm5, %v14736_v1 }
  0x27   : > { %1231 = vst.msk [vmem:[#allocation3 + $0x100] sm:$0xff] %vm14792_vm5, %v14736_v1  ;;  %1232 = vst.msk [vmem:[#allocation3 + $0x108] sm:$0xff] %vm14792_vm5, %v14736_v1 }
  0x28   : > { %1233 = vst.msk [vmem:[#allocation3 + $0x110] sm:$0xff] %vm14792_vm5, %v14736_v1  ;;  %1234 = vst.msk [vmem:[#allocation3 + $0x118] sm:$0xff] %vm14792_vm5, %v14736_v1 }
  0x29   : > { %1237 = vst.msk [vmem:[#allocation3 + $0x128] sm:$0xff] %vm14792_vm5, %v14736_v1  ;;  %1238 = vst.msk [vmem:[#allocation3 + $0x130] sm:$0xff] %vm14792_vm5, %v14736_v1 }
  0x2a   : > { %1239 = vst.msk [vmem:[#allocation3 + $0x138] sm:$0xff] %vm14792_vm5, %v14736_v1  ;;  %1240 = vst.msk [vmem:[#allocation3 + $0x140] sm:$0xff] %vm14792_vm5, %v14736_v1 }
  0x2b   : > { %1241 = vst.msk [vmem:[#allocation3 + $0x148] sm:$0xff] %vm14792_vm5, %v14736_v1  ;;  %1242 = vst.msk [vmem:[#allocation3 + $0x150] sm:$0xff] %vm14792_vm5, %v14736_v1 }
  0x2c   : > { %1243 = vst.msk [vmem:[#allocation3 + $0x158] sm:$0xff] %vm14792_vm5, %v14736_v1  ;;  %1244 = vst.msk [vmem:[#allocation3 + $0x160] sm:$0xff] %vm14792_vm5, %v14736_v1 }
  0x2d   : > { %1245 = vst.msk [vmem:[#allocation3 + $0x168] sm:$0xff] %vm14792_vm5, %v14736_v1  ;;  %1246 = vst.msk [vmem:[#allocation3 + $0x170] sm:$0xff] %vm14792_vm5, %v14736_v1 }
  0x2e   : > { %1247 = vst.msk [vmem:[#allocation3 + $0x178] sm:$0xff] %vm14792_vm5, %v14736_v1  ;;  %1248 = vst.msk [vmem:[#allocation3 + $0x180] sm:$0xff] %vm14792_vm5, %v14736_v1 }
  0x2f   : > { %1249 = vst.msk [vmem:[#allocation3 + $0x188] sm:$0xff] %vm14792_vm5, %v14736_v1  ;;  %1250 = vst.msk [vmem:[#allocation3 + $0x190] sm:$0xff] %vm14792_vm5, %v14736_v1 }
  0x30   : > { %1251 = vst.msk [vmem:[#allocation3 + $0x198] sm:$0xff] %vm14792_vm5, %v14736_v1  ;;  %1252 = vst.msk [vmem:[#allocation3 + $0x1a0] sm:$0xff] %vm14792_vm5, %v14736_v1 }
  0x31   : > { %1253 = vst.msk [vmem:[#allocation3 + $0x1a8] sm:$0xff] %vm14792_vm5, %v14736_v1  ;;  %1254 = vst.msk [vmem:[#allocation3 + $0x1b0] sm:$0xff] %vm14792_vm5, %v14736_v1 }
  0x32   : > { %1255 = vst.msk [vmem:[#allocation3 + $0x1b8] sm:$0xff] %vm14792_vm5, %v14736_v1  ;;  %1256 = vst.msk [vmem:[#allocation3 + $0x1c0] sm:$0xff] %vm14792_vm5, %v14736_v1 }
  0x33   : > { %1257 = vst.msk [vmem:[#allocation3 + $0x1c8] sm:$0xff] %vm14792_vm5, %v14736_v1  ;;  %1258 = vst.msk [vmem:[#allocation3 + $0x1d0] sm:$0xff] %vm14792_vm5, %v14736_v1 }
  0x34   : > { %1259 = vst.msk [vmem:[#allocation3 + $0x1d8] sm:$0xff] %vm14792_vm5, %v14736_v1  ;;  %1260 = vst.msk [vmem:[#allocation3 + $0x1e0] sm:$0xff] %vm14792_vm5, %v14736_v1 }
  0x35   : > { %1261 = vst.msk [vmem:[#allocation3 + $0x1e8] sm:$0xff] %vm14792_vm5, %v14736_v1  ;;  %1262 = vst.msk [vmem:[#allocation3 + $0x1f0] sm:$0xff] %vm14792_vm5, %v14736_v1 }
  0x36   : > { %1263 = vst.msk [vmem:[#allocation3 + $0x1f8] sm:$0xff] %vm14792_vm5, %v14736_v1  ;;  %1264 = vst.msk [vmem:[#allocation3 + $0x200] sm:$0xff] %vm14792_vm5, %v14736_v1 }
  0x37   : > { %1265 = vst.msk [vmem:[#allocation3 + $0x208] sm:$0xff] %vm14792_vm5, %v14736_v1  ;;  %1266 = vst.msk [vmem:[#allocation3 + $0x210] sm:$0xff] %vm14792_vm5, %v14736_v1 }
  0x38   : > { %1267 = vst.msk [vmem:[#allocation3 + $0x218] sm:$0xff] %vm14792_vm5, %v14736_v1  ;;  %1268 = vst.msk [vmem:[#allocation3 + $0x220] sm:$0xff] %vm14792_vm5, %v14736_v1 }
  0x39   : > { %1269 = vst.msk [vmem:[#allocation3 + $0x228] sm:$0xff] %vm14792_vm5, %v14736_v1  ;;  %1270 = vst.msk [vmem:[#allocation3 + $0x230] sm:$0xff] %vm14792_vm5, %v14736_v1 }
  0x3a   : > { %1271 = vst.msk [vmem:[#allocation3 + $0x238] sm:$0xff] %vm14792_vm5, %v14736_v1  ;;  %1272 = vst.msk [vmem:[#allocation3 + $0x240] sm:$0xff] %vm14792_vm5, %v14736_v1 }
  0x3b   : > { %1274 = vst.msk [vmem:[#allocation3 + $0x250] sm:$0xff] %vm14792_vm5, %v14736_v1  ;;  %1275 = vst.msk [vmem:[#allocation3 + $0x258] sm:$0xff] %vm14792_vm5, %v14736_v1 }
  0x3c   : > { %1276 = vst.msk [vmem:[#allocation3 + $0x260] sm:$0xff] %vm14792_vm5, %v14736_v1  ;;  %1277 = vst.msk [vmem:[#allocation3 + $0x268] sm:$0xff] %vm14792_vm5, %v14736_v1 }
  0x3d   : > { %1278 = vst.msk [vmem:[#allocation3 + $0x270] sm:$0xff] %vm14792_vm5, %v14736_v1  ;;  %1279 = vst.msk [vmem:[#allocation3 + $0x278] sm:$0xff] %vm14792_vm5, %v14736_v1 }
  0x3e   : > { %1280 = vst.msk [vmem:[#allocation3 + $0x280] sm:$0xff] %vm14792_vm5, %v14736_v1  ;;  %1281 = vst.msk [vmem:[#allocation3 + $0x288] sm:$0xff] %vm14792_vm5, %v14736_v1 }
  0x3f   : > { %1282 = vst.msk [vmem:[#allocation3 + $0x290] sm:$0xff] %vm14792_vm5, %v14736_v1  ;;  %1283 = vst.msk [vmem:[#allocation3 + $0x298] sm:$0xff] %vm14792_vm5, %v14736_v1 }
  0x40   : > { %1284 = vst.msk [vmem:[#allocation3 + $0x2a0] sm:$0xff] %vm14792_vm5, %v14736_v1  ;;  %1285 = vst.msk [vmem:[#allocation3 + $0x2a8] sm:$0xff] %vm14792_vm5, %v14736_v1 }
  0x41   : > { %1286 = vst.msk [vmem:[#allocation3 + $0x2b0] sm:$0xff] %vm14792_vm5, %v14736_v1  ;;  %1287 = vst.msk [vmem:[#allocation3 + $0x2b8] sm:$0xff] %vm14792_vm5, %v14736_v1 }
  0x42   : > { %1288 = vst.msk [vmem:[#allocation3 + $0x2c0] sm:$0xff] %vm14792_vm5, %v14736_v1  ;;  %1289 = vst.msk [vmem:[#allocation3 + $0x2c8] sm:$0xff] %vm14792_vm5, %v14736_v1 }
  0x43   : > { %1290 = vst.msk [vmem:[#allocation3 + $0x2d0] sm:$0xff] %vm14792_vm5, %v14736_v1  ;;  %1291 = vst.msk [vmem:[#allocation3 + $0x2d8] sm:$0xff] %vm14792_vm5, %v14736_v1 }
  0x44   : > { %1292 = vst.msk [vmem:[#allocation3 + $0x2e0] sm:$0xff] %vm14792_vm5, %v14736_v1  ;;  %1293 = vst.msk [vmem:[#allocation3 + $0x2e8] sm:$0xff] %vm14792_vm5, %v14736_v1 }
  0x45   : > { %1294 = vst.msk [vmem:[#allocation3 + $0x2f0] sm:$0xff] %vm14792_vm5, %v14736_v1  ;;  %1295 = vst.msk [vmem:[#allocation3 + $0x2f8] sm:$0xff] %vm14792_vm5, %v14736_v1 }
  0x46   : > { %1296 = vst.msk [vmem:[#allocation3 + $0x300] sm:$0xff] %vm14792_vm5, %v14736_v1  ;;  %1297 = vst.msk [vmem:[#allocation3 + $0x308] sm:$0xff] %vm14792_vm5, %v14736_v1 }
  0x47   : > { %1298 = vst.msk [vmem:[#allocation3 + $0x310] sm:$0xff] %vm14792_vm5, %v14736_v1  ;;  %1299 = vst.msk [vmem:[#allocation3 + $0x318] sm:$0xff] %vm14792_vm5, %v14736_v1 }
  0x48   : > { %1300 = vst.msk [vmem:[#allocation3 + $0x320] sm:$0xff] %vm14792_vm5, %v14736_v1  ;;  %1301 = vst.msk [vmem:[#allocation3 + $0x328] sm:$0xff] %vm14792_vm5, %v14736_v1 }
  0x49   : > { %1302 = vst.msk [vmem:[#allocation3 + $0x330] sm:$0xff] %vm14792_vm5, %v14736_v1  ;;  %1303 = vst.msk [vmem:[#allocation3 + $0x338] sm:$0xff] %vm14792_vm5, %v14736_v1 }
  0x4a   : > { %1304 = vst.msk [vmem:[#allocation3 + $0x340] sm:$0xff] %vm14792_vm5, %v14736_v1  ;;  %1305 = vst.msk [vmem:[#allocation3 + $0x348] sm:$0xff] %vm14792_vm5, %v14736_v1 }
  0x4b   : > { %1306 = vst.msk [vmem:[#allocation3 + $0x350] sm:$0xff] %vm14792_vm5, %v14736_v1  ;;  %1307 = vst.msk [vmem:[#allocation3 + $0x358] sm:$0xff] %vm14792_vm5, %v14736_v1 }
  0x4c   : > { %1308 = vst.msk [vmem:[#allocation3 + $0x360] sm:$0xff] %vm14792_vm5, %v14736_v1  ;;  %1309 = vst.msk [vmem:[#allocation3 + $0x368] sm:$0xff] %vm14792_vm5, %v14736_v1 }
  0x4d   : > { %1311 = vst.msk [vmem:[#allocation3 + $0x378] sm:$0xff] %vm14792_vm5, %v14736_v1  ;;  %1312 = vst.msk [vmem:[#allocation3 + $0x380] sm:$0xff] %vm14792_vm5, %v14736_v1 }
  0x4e   : > { %1313 = vst.msk [vmem:[#allocation3 + $0x388] sm:$0xff] %vm14792_vm5, %v14736_v1  ;;  %1314 = vst.msk [vmem:[#allocation3 + $0x390] sm:$0xff] %vm14792_vm5, %v14736_v1 }
  0x4f   : > { %1315 = vst.msk [vmem:[#allocation3 + $0x398] sm:$0xff] %vm14792_vm5, %v14736_v1  ;;  %1316 = vst.msk [vmem:[#allocation3 + $0x3a0] sm:$0xff] %vm14792_vm5, %v14736_v1 }
  0x50   : > { %1317 = vst.msk [vmem:[#allocation3 + $0x3a8] sm:$0xff] %vm14792_vm5, %v14736_v1  ;;  %1318 = vst.msk [vmem:[#allocation3 + $0x3b0] sm:$0xff] %vm14792_vm5, %v14736_v1 }
  0x51   : > { %1319 = vst.msk [vmem:[#allocation3 + $0x3b8] sm:$0xff] %vm14792_vm5, %v14736_v1  ;;  %1320 = vst.msk [vmem:[#allocation3 + $0x3c0] sm:$0xff] %vm14792_vm5, %v14736_v1 }
  0x52   : > { %1321 = vst.msk [vmem:[#allocation3 + $0x3c8] sm:$0xff] %vm14792_vm5, %v14736_v1  ;;  %1322 = vst.msk [vmem:[#allocation3 + $0x3d0] sm:$0xff] %vm14792_vm5, %v14736_v1 }
  0x53   : > { %1323 = vst.msk [vmem:[#allocation3 + $0x3d8] sm:$0xff] %vm14792_vm5, %v14736_v1  ;;  %1324 = vst.msk [vmem:[#allocation3 + $0x3e0] sm:$0xff] %vm14792_vm5, %v14736_v1 }
  0x54   : > { %1325 = vst.msk [vmem:[#allocation3 + $0x3e8] sm:$0xff] %vm14792_vm5, %v14736_v1  ;;  %1326 = vst.msk [vmem:[#allocation3 + $0x3f0] sm:$0xff] %vm14792_vm5, %v14736_v1 }
  0x55   : > { %1327 = vst.msk [vmem:[#allocation3 + $0x3f8] sm:$0xff] %vm14792_vm5, %v14736_v1  ;;  %1328 = vst.msk [vmem:[#allocation3 + $0x400] sm:$0xff] %vm14792_vm5, %v14736_v1 }
  0x56   : > { %1329 = vst.msk [vmem:[#allocation3 + $0x408] sm:$0xff] %vm14792_vm5, %v14736_v1  ;;  %1330 = vst.msk [vmem:[#allocation3 + $0x410] sm:$0xff] %vm14792_vm5, %v14736_v1 }
  0x57   : > { %1331 = vst.msk [vmem:[#allocation3 + $0x418] sm:$0xff] %vm14792_vm5, %v14736_v1  ;;  %1332 = vst.msk [vmem:[#allocation3 + $0x420] sm:$0xff] %vm14792_vm5, %v14736_v1 }
  0x58   : > { %1333 = vst.msk [vmem:[#allocation3 + $0x428] sm:$0xff] %vm14792_vm5, %v14736_v1  ;;  %1334 = vst.msk [vmem:[#allocation3 + $0x430] sm:$0xff] %vm14792_vm5, %v14736_v1 }
  0x59   : > { %1335 = vst.msk [vmem:[#allocation3 + $0x438] sm:$0xff] %vm14792_vm5, %v14736_v1  ;;  %1336 = vst.msk [vmem:[#allocation3 + $0x440] sm:$0xff] %vm14792_vm5, %v14736_v1 }
  0x5a   : > { %1337 = vst.msk [vmem:[#allocation3 + $0x448] sm:$0xff] %vm14792_vm5, %v14736_v1  ;;  %1338 = vst.msk [vmem:[#allocation3 + $0x450] sm:$0xff] %vm14792_vm5, %v14736_v1 }
  0x5b   : > { %1339 = vst.msk [vmem:[#allocation3 + $0x458] sm:$0xff] %vm14792_vm5, %v14736_v1  ;;  %1340 = vst.msk [vmem:[#allocation3 + $0x460] sm:$0xff] %vm14792_vm5, %v14736_v1 }
  0x5c   : > { %1341 = vst.msk [vmem:[#allocation3 + $0x468] sm:$0xff] %vm14792_vm5, %v14736_v1  ;;  %1342 = vst.msk [vmem:[#allocation3 + $0x470] sm:$0xff] %vm14792_vm5, %v14736_v1 }
  0x5d   : > { %1343 = vst.msk [vmem:[#allocation3 + $0x478] sm:$0xff] %vm14792_vm5, %v14736_v1  ;;  %1344 = vst.msk [vmem:[#allocation3 + $0x480] sm:$0xff] %vm14792_vm5, %v14736_v1 }
  0x5e   : > { %1345 = vst.msk [vmem:[#allocation3 + $0x488] sm:$0xff] %vm14792_vm5, %v14736_v1  ;;  %1346 = vst.msk [vmem:[#allocation3 + $0x490] sm:$0xff] %vm14792_vm5, %v14736_v1 }
  0x5f   : > { %1348 = vst.msk [vmem:[#allocation3 + $0x11] sm:$0xff] %vm14792_vm5, %v8353_v25  ;;  %1349 = vst.msk [vmem:[#allocation3 + $0x19] sm:$0xff] %vm14792_vm5, %v8356_v26 }
  0x60   : > { %1350 = vst.msk [vmem:[#allocation3 + $0x21] sm:$0xff] %vm14792_vm5, %v8359_v27  ;;  %1351 = vst.msk [vmem:[#allocation3 + $0x29] sm:$0xff] %vm14792_vm5, %v8365_v30 }
  0x61   : > { %1352 = vst.msk [vmem:[#allocation3 + $0x31] sm:$0xff] %vm14792_vm5, %v8368_v31  ;;  %1353 = vst.msk [vmem:[#allocation3 + $0x39] sm:$0xff] %vm14792_vm5, %v8371_v32 }
  0x62   : > { %1380 = vst.msk [vmem:[#allocation3 + $0x139] sm:$0xff] %vm14792_vm5, %v8668_v35  ;;  %1381 = vst.msk [vmem:[#allocation3 + $0x141] sm:$0xff] %vm14792_vm5, %v8671_v36 }
  0x63   : > { %15184 = vst [vmem:[#allocation10_spill] sm:$0xff] %v8700_v41  ;;  %15185 = vst [vmem:[#allocation11_spill] sm:$0xff] %v8703_v42 }
  0x64   : > { %1382 = vst.msk [vmem:[#allocation3 + $0x149] sm:$0xff] %vm14792_vm5, %v8686_v37  ;;  %1383 = vst.msk [vmem:[#allocation3 + $0x151] sm:$0xff] %vm14792_vm5, %v8689_v38 }
  0x65   : > { %1384 = vst.msk [vmem:[#allocation3 + $0x159] sm:$0xff] %vm14792_vm5, %v8692_v39  ;;  %1385 = vst.msk [vmem:[#allocation3 + $0x161] sm:$0xff] %vm14792_vm5, %v8700_v41 }
  0x66   : > { %1386 = vst.msk [vmem:[#allocation3 + $0x169] sm:$0xff] %vm14792_vm5, %v8703_v42  ;;  %15188 = vst [vmem:[#allocation12_spill] sm:$0xff] %v15187_v49  ;;  %v1476_v55 = vld [vmem:[#allocation3 + $0x10] sm:$0xff]  ;;  %v1477_v56 = vld [vmem:[#allocation3 + $0x18] sm:$0xff]  ;;  %v15219_v49 = vmov 0 }
  0x67   : > { %15191 = vst [vmem:[#allocation13_spill] sm:$0xff] %v15190_v50  ;;  %15194 = vst [vmem:[#allocation14_spill] sm:$0xff] %v15193_v51  ;;  %v1478_v57 = vld [vmem:[#allocation3 + $0x20] sm:$0xff]  ;;  %v1479_v61 = vld [vmem:[#allocation3 + $0x28] sm:$0xff]  ;;  %v1640_v3 = vsel %vm8724_vm7, %v1476_v55, 0.0 }
  0x68   : > { %15197 = vst [vmem:[#allocation15_spill] sm:$0xff] %v15196_v58  ;;  %15200 = vst [vmem:[#allocation16_spill] sm:$0xff] %v15199_v60  ;;  %v1480_v62 = vld [vmem:[#allocation3 + $0x30] sm:$0xff]  ;;  %v8745_v63 = vld [vmem:[#allocation3 + $0x38] sm:$0xff]  ;;  %v788_v58 = vadd.s32 48, %v8308_v8 }
  0x69   : > { %v1644_v29 = vsel %vm8741_vm11, %v1480_v62, 0.0  ;;  %v1510_v54 = vld [vmem:[#allocation3 + $0x140] sm:$0xff]  ;;  %v8957_v50 = vld [vmem:[%s8350_s22 + $0x38] sm:$0xff]  ;;  %15270 = vst [vmem:[#allocation43_spill] sm:$0xff] %v9269_v5 }
  0x6a   : > { %1355 = vst.msk [vmem:[#allocation3 + $0x49] sm:$0xff] %vm14792_vm5, %v8957_v50 }
  0x6c   : > { %v1513_v28 = vld [vmem:[#allocation3 + $0x158] sm:$0xff] }
  0x86   : > { %v342_v4 = vpop.permute.xlu0 %341 }
  0x87   : > { %v349_v6 = vrot.slane %v342_v4, 7 }
  0x89   : > { %v354_v7 = vsel %vm14756_vm3, %v349_v6, %v342_v4  ;;  %v1642_v4 = vsel %vm8720_vm6, %v1478_v57, 0.0  ;;  %v2061_v6 = vrot.slane %v1476_v55, 2  ;;  %v1512_v55 = vld [vmem:[#allocation3 + $0x150] sm:$0xff] }
  0x8a   : > { %365 = vst.msk [vmem:[#allocation2] sm:$0x7] %vm8302_vm4, %v354_v7  ;;  %v344_v9 = vpop.permute.xlu0 %343  ;;  %v1768_v7 = vadd.f32 %v1640_v3, %v8353_v25  ;;  %v8789_v3 = vld [vmem:[#allocation3 + $0x168] sm:$0xff] }
  0x8b   : > { %v350_v10 = vrot.slane %v344_v9, 7 }
  0x8d   : > { %v355_v11 = vsel %vm14756_vm3, %v350_v10, %v344_v9  ;;  %v1769_v9 = vadd.f32 %v1477_v56, %v8356_v26  ;;  %v1770_v10 = vadd.f32 %v1642_v4, %v8359_v27  ;;  %v1772_v4 = vadd.f32 %v1644_v29, %v8368_v31 }
  0x8e   : > { %366 = vst.msk [vmem:[#allocation2 + $0x3] sm:$0x7] %vm8302_vm4, %v355_v11  ;;  %v2062_v11 = vrot.slane %v1477_v56, 2  ;;  %v2133_v29 = vrot.slane %v1513_v28, 2  ;;  %vm14783_vm3 = vcmask 900096  }
  0x91   : > { %v369_v14 = vld [vmem:[#allocation2] sm:$0x7] }
  0x92   : > { %v390_v15 = vrot.slane %v369_v14, %v8316_v12  ;;  %v382_v16 = vrot.slane %v369_v14, %v8319_v13  ;;  %v386_v19 = vrot.slane %v369_v14, %v8324_v17  ;;  %v1509_v14 = vld [vmem:[#allocation3 + $0x138] sm:$0xff] }
  0x93   : > { %v1672_v43 = vsel %vm8724_vm7, %v1509_v14, 0.0 }
  0x94   : > { %431 = vrot.lane.b32.xlu0 %v390_v15, %s8248_s17  ;;  %427 = vrot.lane.b32.xlu1 %v382_v16, %s8248_s17 }
  0x95   : > { %v370_v18 = vld [vmem:[#allocation2 + $0x3] sm:$0x7] }
  0x96   : > { %v398_v20 = vrot.slane %v370_v18, %v8324_v17  ;;  %v394_v21 = vrot.slane %v370_v18, %v8319_v13  ;;  %v402_v22 = vrot.slane %v370_v18, %v8316_v12  ;;  %v2066_v18 = vrot.slane %v1479_v61, 2 }
  0x98   : > { %429 = vrot.lane.b32.xlu1 %v386_v19, %s8248_s17  ;;  %435 = vrot.lane.b32.xlu0 %v398_v20, %s8248_s17 }
  0x9c   : > { %554 = vrot.lane.b32.xlu0 %v382_v16, %s8249_s18  ;;  %433 = vrot.lane.b32.xlu1 %v394_v21, %s8248_s17  ;;  %v2064_v16 = vrot.slane %v1478_v57, 2  ;;  %v1676_v57 = vsel %vm8741_vm11, %v1513_v28, 0.0 }
  0x9e   : > { %v2065_v33 = vsel %vm14801_vm9, %v2062_v11, %v2064_v16  ;;  %v2067_v34 = vsel %vm14801_vm9, %v2064_v16, %v2066_v18  ;;  %v2126_v16 = vrot.slane %v1509_v14, 2 }
  0x9f   : > { %v2450_v44 = vsel %vm8728_vm8, %v2065_v33, 0.0  ;;  %v8773_v47 = vadd.f32 %v2067_v34, %v1770_v10  ;;  %v1803_v10 = vadd.f32 %v1512_v55, %v8689_v38  ;;  %v14743_v34 = vrot.slane %v8789_v3, 2 }
  0xa0   : > { %558 = vrot.lane.b32.xlu0 %v390_v15, %s8249_s18  ;;  %437 = vrot.lane.b32.xlu1 %v402_v22, %s8248_s17  ;;  %v1771_v15 = vadd.f32 %v1479_v61, %v8365_v30  ;;  %v8775_v48 = vadd.f32 %v2450_v44, %v1769_v9 }
  0xa1   : > { %2707 = vst.msk [vmem:[#allocation3 + $0x21] sm:$0xff] %vm14792_vm5, %v8773_v47 }
  0xa2   : > { %2706 = vst.msk [vmem:[#allocation3 + $0x19] sm:$0xff] %vm14792_vm5, %v8775_v48 }
  0xa4   : > { %562 = vrot.lane.b32.xlu0 %v398_v20, %s8249_s18  ;;  %556 = vrot.lane.b32.xlu1 %v386_v19, %s8249_s18  ;;  %v2068_v19 = vrot.slane %v1480_v62, 2  ;;  %v15201_v20 = vmov 0  ;;  %v1514_v62 = vld [vmem:[#allocation3 + $0x160] sm:$0xff] }
  0xa5   : > { %v15202_v20 = vsel %vm8755_vm13, 4294967295, %v15201_v20  ;;  %v2135_v33 = vrot.slane %v1514_v62, 2 }
  0xa6   : > { %15203 = vst [vmem:[#allocation17_spill] sm:$0xff] %v15202_v20  ;;  %v2069_v40 = vsel %vm14801_vm9, %v2066_v18, %v2068_v19  ;;  %v2127_v18 = vrot.slane %v1510_v54, 2 }
  0xa7   : > { %v2452_v45 = vsel %vm8736_vm10, %v2069_v40, 0.0  ;;  %v2138_v28 = vsel %vm14801_vm9, %v2135_v33, %v14743_v34 }
  0xa8   : > { %560 = vrot.lane.b32.xlu1 %v394_v21, %s8249_s18  ;;  %345 = vrot.lane.b32.xlu0 %v172_v23, %s8247_s16  ;;  %v2063_v21 = vsel %vm14801_vm9, %v2061_v6, %v2062_v11  ;;  %v3115_v23 = vrot.slane %v8734_v53, 1  ;;  %v8777_v52 = vadd.f32 %v2452_v45, %v1771_v15  ;;  %v1800_v6 = vadd.f32 %v1672_v43, %v8668_v35  ;;  %v8931_v53 = vld [vmem:[%s8350_s22 + $0x140] sm:$0xff] }
  0xa9   : > { %v2577_v46 = vadd.f32 %v2063_v21, %v1768_v7  ;;  %v1801_v7 = vadd.f32 %v1510_v54, %v8671_v36  ;;  %v1804_v11 = vadd.f32 %v1676_v57, %v8692_v39  ;;  %v1805_v15 = vadd.f32 %v1514_v62, %v8700_v41  ;;  %v2870_v62 = vld [vmem:[#allocation3 + $0x128] sm:$0xff]  ;;  %1388 = vst.msk [vmem:[#allocation3 + $0x179] sm:$0xff] %vm14792_vm5, %v8931_v53 }
  0xaa   : > { %2708 = vst.msk [vmem:[#allocation3 + $0x29] sm:$0xff] %vm14792_vm5, %v8777_v52  ;;  %v2131_v21 = vrot.slane %v1512_v55, 2  ;;  %v3116_v43 = vsel %vm14773_vm12, %v3114_v59, %v3115_v23  ;;  %v2128_v44 = vsel %vm14801_vm9, %v2126_v16, %v2127_v18  ;;  %v2486_v55 = vsel %vm8755_vm13, %v2138_v28, 0.0 }
  0xab   : > { %2705 = vst.msk [vmem:[#allocation3 + $0x11] sm:$0xff] %vm14792_vm5, %v2577_v46  ;;  %v2609_v57 = vadd.f32 %v2128_v44, %v1800_v6  ;;  %v2871_v6 = vld [vmem:[#allocation3 + $0x130] sm:$0xff]  ;;  %v3822_v44 = vmul.f32 100.0, %v8353_v25 }
  0xac   : > { %564 = vrot.lane.b32.xlu1 %v402_v22, %s8249_s18  ;;  %v14742_v22 = vrot.slane %v8745_v63, 2  ;;  %v2134_v14 = vsel %vm14801_vm9, %v2131_v21, %v2133_v29 }
  0xad   : > { %v2484_v59 = vsel %vm8736_vm10, %v2134_v14, 0.0  ;;  %2737 = vst.msk [vmem:[#allocation3 + $0x139] sm:$0xff] %vm14792_vm5, %v2609_v57  ;;  %vm15372_vm10 = vcmask 1045504  }
  0xae   : > { %v2071_v61 = vsel %vm14801_vm9, %v2068_v19, %v14742_v22  ;;  %v8826_v16 = vadd.f32 %v2484_v59, %v1803_v10 }
  0xaf   : > { %v8803_v40 = vadd.f32 %v2071_v61, %v1772_v4 }
  0xb0   : > { %347 = vrot.lane.b32.xlu1 %v173_v24, %s8247_s16  ;;  %v1511_v24 = vld [vmem:[#allocation3 + $0x148] sm:$0xff]  ;;  %2740 = vst.msk [vmem:[#allocation3 + $0x151] sm:$0xff] %vm14792_vm5, %v8826_v16 }
  0xb1   : > { %v1674_v56 = vsel %vm8720_vm6, %v1511_v24, 0.0  ;;  %v2129_v19 = vrot.slane %v1511_v24, 2  ;;  %15204 = vst [vmem:[#allocation18_spill] sm:$0xff] %v8803_v40  ;;  %v2136_v24 = vsel %vm14801_vm9, %v2133_v29, %v2135_v33  ;;  %2709 = vst.msk [vmem:[#allocation3 + $0x31] sm:$0xff] %vm14792_vm5, %v8803_v40  ;;  %v8834_v29 = vld [vmem:[#allocation3 + $0x28] sm:$0xff]  ;;  %v3502_v33 = vadd.f32 %v3116_v43, %v2577_v46 }
  0xb2   : > { %v1802_v9 = vadd.f32 %v1674_v56, %v8686_v37  ;;  %v3179_v46 = vrot.slane %v2870_v62, 1 }
  0xb3   : > { %v2130_v45 = vsel %vm14801_vm9, %v2127_v18, %v2129_v19  ;;  %v2132_v56 = vsel %vm14801_vm9, %v2129_v19, %v2131_v21  ;;  %v8828_v18 = vadd.f32 %v2136_v24, %v1804_v11  ;;  %v8830_v19 = vadd.f32 %v2486_v55, %v1805_v15  ;;  %v8832_v21 = vld [vmem:[#allocation3 + $0x20] sm:$0xff] }
  0xb4   : > { %v2482_v54 = vsel %vm8728_vm8, %v2130_v45, 0.0  ;;  %v8824_v4 = vadd.f32 %v2132_v56, %v1802_v9  ;;  %v14744_v9 = vrot.slane %v8834_v29, 1  ;;  %v3180_v11 = vrot.slane %v2871_v6, 1  ;;  %v8859_v56 = vld [vmem:[#allocation3 + $0x138] sm:$0xff] }
  0xb5   : > { %v2610_v61 = vadd.f32 %v2482_v54, %v1801_v7  ;;  %v14738_v7 = vrot.slane %v8832_v21, 1  ;;  %2741 = vst.msk [vmem:[#allocation3 + $0x159] sm:$0xff] %vm14792_vm5, %v8828_v18  ;;  %2742 = vst.msk [vmem:[#allocation3 + $0x161] sm:$0xff] %vm14792_vm5, %v8830_v19  ;;  %v14741_v54 = vrot.slane %v8859_v56, 1  ;;  %v15237_v20 = vrot.slane %v8859_v56, 1 }
  0xb6   : > { %2739 = vst.msk [vmem:[#allocation3 + $0x149] sm:$0xff] %vm14792_vm5, %v8824_v4  ;;  %v3181_v43 = vsel %vm14773_vm12, %v3179_v46, %v3180_v11 }
  0xb7   : > { %2738 = vst.msk [vmem:[#allocation3 + $0x141] sm:$0xff] %vm14792_vm5, %v2610_v61  ;;  %v8853_v10 = vsel %vm14773_vm12, %v14738_v7, %v14744_v9  ;;  %v3534_v55 = vadd.f32 %v3181_v43, %v2609_v57 }
  0xb8   : > { %15205 = vst [vmem:[#allocation19_spill] sm:$0xff] %v8853_v10  ;;  %v3694_v15 = vadd.f32 %v3502_v33, %v8853_v10 }
  0xba   : > { %v3950_v45 = vsub.f32 %v3694_v15, %v8353_v25  ;;  %v3183_v25 = vsel %vm14773_vm12, %v3180_v11, %v14741_v54  ;;  %v3855_v11 = vmul.f32 100.0, %v8671_v36  ;;  %v8251_v54 = vmov 1966171168  }
  0xbb   : > { %v486_v22 = vunpack.c.l.s4 %v8251_v54 }
  0xbc   : > { %v4078_v14 = vmul.f32 0.125, %v3950_v45  ;;  %v8861_v28 = vld [vmem:[#allocation3 + $0x158] sm:$0xff]  ;;  %v3535_v45 = vadd.f32 %v3183_v25, %v2610_v61 }
  0xbd   : > { %v2875_v24 = vld [vmem:[#allocation3 + $0x150] sm:$0xff]  ;;  %v14739_v33 = vrot.slane %v8861_v28, 1 }
  0xbe   : > { %v8864_v59 = vld [vmem:[#allocation3 + $0x148] sm:$0xff]  ;;  %v3188_v62 = vrot.slane %v2875_v24, 1  ;;  %v8868_v46 = vadd.f32 %v4078_v14, %v3822_v44  ;;  %v3854_v14 = vmul.f32 100.0, %v8668_v35 }
  0xbf   : > { %v14740_v6 = vrot.slane %v8864_v59, 1 }
  0xc0   : > { %15206 = vst [vmem:[#allocation20_spill] sm:$0xff] %v8868_v46  ;;  %v8876_v15 = vsel %vm14773_vm12, %v3188_v62, %v14739_v33 }
  0xc1   : > { %v8881_v57 = vsel %vm14773_vm12, %v14740_v6, %v3188_v62  ;;  %v3727_v44 = vadd.f32 %v3535_v45, %v8876_v15  ;;  %v303_v62 = vand.u32 127, %v302_v0  ;;  %v487_v0 = vunpack.c.0.s8 %v486_v22 }
  0xc2   : > { %v3726_v43 = vadd.f32 %v3534_v55, %v8881_v57 }
  0xc3   : > { %v3983_v1 = vsub.f32 %v3727_v44, %v8671_v36  ;;  %v304_v6 = vadd.s32 128, %v303_v62  ;;  %v309_v55 = vand.u32 15, %v303_v62  ;;  %v15209_v36 = vmov 0  ;;  %v8908_v44 = vld [vmem:[%s8350_s22 + $0x138] sm:$0xff] }
  0xc4   : > { %v3982_v24 = vsub.f32 %v3726_v43, %v8668_v35  ;;  %v8894_v43 = vld [vmem:[#allocation3 + $0x10] sm:$0xff]  ;;  %1387 = vst.msk [vmem:[#allocation3 + $0x171] sm:$0xff] %vm14792_vm5, %v8908_v44 }
  0xc5   : > { %v4111_v33 = vmul.f32 0.125, %v3983_v1  ;;  %v316_v45 = vand.u32 15, %v304_v6  ;;  %vm8896_vm15 = vcmp.gt.s32.totalorder %v309_v55, 0  ;;  %v15212_v1 = vmov 0  ;;  %v8905_v6 = vld [vmem:[#allocation3 + $0x30] sm:$0xff] }
  0xc6   : > { %v4110_v7 = vmul.f32 0.125, %v3982_v24  ;;  %v15210_v36 = vsel %vm8896_vm15, 4294967295, %v15209_v36  ;;  %vm8972_vm2 = vcmp.lt.s32.totalorder %v309_v55, 15  ;;  %v15228_v55 = vrot.slane %v8789_v3, 2 }
  0xc7   : > { %v8891_v25 = vadd.f32 %v4111_v33, %v3855_v11  ;;  %15211 = vst [vmem:[#allocation23_spill] sm:$0xff] %v15210_v36  ;;  %vm8900_vm0 = vcmp.gt.s32.totalorder %v316_v45, 0  ;;  %v9021_v36 = vmul.f32 100.0, %v8356_v26 }
  0xc8   : > { %v8889_v61 = vadd.f32 %v4110_v7, %v3854_v14  ;;  %v15213_v1 = vsel %vm8900_vm0, 4294967295, %v15212_v1  ;;  %v14745_v7 = vrot.slane %v8894_v43, 1 }
  0xc9   : > { %15208 = vst [vmem:[#allocation22_spill] sm:$0xff] %v8891_v25  ;;  %15214 = vst [vmem:[#allocation24_spill] sm:$0xff] %v15213_v1 }
  0xca   : > { %15207 = vst [vmem:[#allocation21_spill] sm:$0xff] %v8889_v61  ;;  %v3118_v11 = vsel %vm14773_vm12, %v3115_v23, %v14745_v7 }
  0xcb   : > { %v3503_v22 = vadd.f32 %v3118_v11, %v8775_v48  ;;  %v8950_v60 = vld [vmem:[#allocation3 + $0x170] sm:$0xff]  ;;  %v8990_v31 = vld [vmem:[#allocation3 + $0x178] sm:$0xff] }
  0xcc   : > { %v15236_v10 = vrot.slane %v8990_v31, 2 }
 0x106   : > { %v428_v34 = vpop.permute.xlu1 %427  ;;  %v432_v35 = vpop.permute.xlu0 %431 }
 0x10a   : > { %v430_v33 = vpop.permute.xlu1 %429  ;;  %v436_v54 = vpop.permute.xlu0 %435 }
 0x10b   : > { %v452_v14 = vsel %vm14757_vm14, %v428_v34, %v430_v33  ;;  %v453_v24 = vsel %vm14757_vm14, %v430_v33, %v432_v35  ;;  %v8925_v34 = vsub.s32 %v487_v0, %v8308_v8  ;;  %v8928_v33 = vld [vmem:[%s8350_s22 + $0x30] sm:$0xff]  ;;  %v15217_v0 = vrot.slane %v8834_v29, 1  ;;  %v8960_v29 = vld [vmem:[%s8350_s22 + $0x148] sm:$0xff] }
 0x10c   : > { %v468_v62 = vsel %vm8896_vm15, %v452_v14, 0.0  ;;  %v469_v9 = vsel %vm8900_vm0, %v453_v24, 0.0  ;;  %1354 = vst.msk [vmem:[#allocation3 + $0x41] sm:$0xff] %vm14792_vm5, %v8928_v33  ;;  %v860_v24 = vand.u32 15, %v788_v58  ;;  %1389 = vst.msk [vmem:[#allocation3 + $0x181] sm:$0xff] %vm14792_vm5, %v8960_v29 }
 0x10d   : > { %15215 = vst [vmem:[#allocation25_spill] sm:$0xff] %v8925_v34  ;;  %v484_v35 = vcombine.low %v468_v62, %v469_v9  ;;  %v15216_v9 = vrot.slane %v8905_v6, 1 }
 0x10e   : > { %v434_v23 = vpop.permute.xlu1 %433  ;;  %v555_v7 = vpop.permute.xlu0 %554  ;;  %vm8952_vm1 = vcmp.gt.s32.totalorder %v860_v24, 0  ;;  %v15225_v24 = vmov 0 }
 0x10f   : > { %v8944_v14 = vsel %vm14773_vm12, %v15217_v0, %v15216_v9  ;;  %v491_v62 = vrot.slane %v484_v35, %v8925_v34  ;;  %v15220_v49 = vsel %vm8952_vm1, 4294967295, %v15219_v49  ;;  %v454_v9 = vsel %vm14757_vm14, %v434_v23, %v436_v54 }
 0x110   : > { %15218 = vst [vmem:[#allocation26_spill] sm:$0xff] %v8944_v14  ;;  %v8948_v11 = vadd.f32 %v3503_v22, %v8944_v14  ;;  %15221 = vst [vmem:[#allocation27_spill] sm:$0xff] %v15220_v49  ;;  %v1678_v22 = vsel %vm8952_vm1, %v8789_v3, 0.0  ;;  %v2139_v35 = vrot.slane %v8950_v60, 2  ;;  %v15222_v0 = vmov 0  ;;  %v9003_v3 = vld [vmem:[%s8350_s22 + $0x150] sm:$0xff] }
 0x111   : > { %v15223_v0 = vsel %vm8972_vm2, 4294967295, %v15222_v0  ;;  %v1806_v23 = vadd.f32 %v1678_v22, %v8703_v42  ;;  %v498_v61 = vrot.slane %v491_v62, %v8925_v34  ;;  %v8993_v22 = vld [vmem:[%s8350_s22 + $0x40] sm:$0xff]  ;;  %v470_v1 = vsel %vm8896_vm15, %v454_v9, 0.0  ;;  %15230 = vst [vmem:[#allocation31_spill] sm:$0xff] %v9003_v3  ;;  %1390 = vst.msk [vmem:[#allocation3 + $0x189] sm:$0xff] %vm14792_vm5, %v9003_v3 }
 0x112   : > { %v438_v51 = vpop.permute.xlu1 %437  ;;  %v559_v48 = vpop.permute.xlu0 %558  ;;  %15224 = vst [vmem:[#allocation28_spill] sm:$0xff] %v15223_v0  ;;  %v2140_v25 = vsel %vm14801_vm9, %v15228_v55, %v2139_v35  ;;  %15229 = vst [vmem:[#allocation30_spill] sm:$0xff] %v8993_v22  ;;  %v1773_v3 = vadd.f32 %v8745_v63, %v8371_v32 }
 0x113   : > { %v455_v58 = vsel %vm14757_vm14, %v436_v54, %v438_v51  ;;  %v789_v51 = vadd.s32 56, %v8308_v8  ;;  %vm8980_vm14 = vcmp.lt.s32.totalorder %v316_v45, 15  ;;  %v8988_v46 = vld [vmem:[#allocation3 + $0x40] sm:$0xff]  ;;  %v8997_v42 = vadd.f32 %v2140_v25, %v1806_v23  ;;  %1356 = vst.msk [vmem:[#allocation3 + $0x51] sm:$0xff] %vm14792_vm5, %v8993_v22 }
 0x114   : > { %v471_v54 = vsel %vm8900_vm0, %v455_v58, 0.0  ;;  %v15226_v24 = vsel %vm8980_vm14, 4294967295, %v15225_v24  ;;  %v14774_v41 = vrot.slane %v8988_v46, 2  ;;  %v9061_v22 = vld [vmem:[%s8350_s22 + $0x50] sm:$0xff] }
 0x115   : > { %15227 = vst [vmem:[#allocation29_spill] sm:$0xff] %v15226_v24  ;;  %v867_v62 = vand.u32 15, %v789_v51  ;;  %v499_v25 = vcombine.low %v470_v1, %v471_v54  ;;  %2743 = vst.msk [vmem:[#allocation3 + $0x169] sm:$0xff] %vm14792_vm5, %v8997_v42  ;;  %v2873_v1 = vld [vmem:[#allocation3 + $0x140] sm:$0xff]  ;;  %v15231_v54 = vrot.slane %v8745_v63, 2  ;;  %v2142_v63 = vsel %vm14801_vm9, %v2139_v35, %v15236_v10 }
 0x116   : > { %v557_v58 = vpop.permute.xlu1 %556  ;;  %v563_v45 = vpop.permute.xlu0 %562  ;;  %v3184_v14 = vrot.slane %v2873_v1, 1  ;;  %v2877_v1 = vld [vmem:[#allocation3 + $0x160] sm:$0xff]  ;;  %1358 = vst.msk [vmem:[#allocation3 + $0x61] sm:$0xff] %vm14792_vm5, %v9061_v22 }
 0x117   : > { %v579_v55 = vsel %vm14783_vm3, %v555_v7, %v557_v58  ;;  %v580_v30 = vsel %vm14783_vm3, %v557_v58, %v559_v48  ;;  %v790_v7 = vadd.s32 64, %v8308_v8  ;;  %v548_v58 = vadd.f32 %v498_v61, %v8294_v2 }
 0x118   : > { %v595_v23 = vsel %vm8972_vm2, %v579_v55, 0.0  ;;  %v596_v51 = vsel %vm8980_vm14, %v580_v30, 0.0  ;;  %v2073_v55 = vsel %vm14801_vm9, %v15231_v54, %v14774_v41  ;;  %vm9032_vm12 = vcmp.lt.s32.totalorder %v867_v62, 15  ;;  %v9047_v62 = vld [vmem:[%s8350_s22 + $0x158] sm:$0xff] }
 0x119   : > { %v611_v48 = vcombine.low %v595_v23, %v596_v51  ;;  %v2454_v2 = vsel %vm8755_vm13, %v2073_v55, 0.0  ;;  %v15232_v61 = vmov 0  ;;  %v9037_v23 = vld [vmem:[%s8350_s22 + $0x48] sm:$0xff]  ;;  %v506_v55 = vrot.slane %v499_v25, %v8925_v34  ;;  %1391 = vst.msk [vmem:[#allocation3 + $0x191] sm:$0xff] %vm14792_vm5, %v9047_v62  ;;  %v9064_v25 = vld [vmem:[%s8350_s22 + $0x160] sm:$0xff] }
 0x11a   : > { %v561_v30 = vpop.permute.xlu1 %560  ;;  %v346_v9 = vpop.permute.xlu0 %345  ;;  %v15233_v61 = vsel %vm9032_vm12, 4294967295, %v15232_v61  ;;  %15235 = vst [vmem:[#allocation33_spill] sm:$0xff] %v9037_v23  ;;  %1357 = vst.msk [vmem:[#allocation3 + $0x59] sm:$0xff] %vm14792_vm5, %v9037_v23  ;;  %vm15238_vm13 = vcmask 1046528   ;;  %v3192_v32 = vrot.slane %v2877_v1, 1  ;;  %v1807_v23 = vadd.f32 %v8950_v60, %v8908_v44 }
 0x11b   : > { %15234 = vst [vmem:[#allocation32_spill] sm:$0xff] %v15233_v61  ;;  %v618_v51 = vrot.slane %v611_v48, %v8925_v34  ;;  %v581_v54 = vsel %vm14783_vm3, %v561_v30, %v563_v45  ;;  %v351_v41 = vrot.slane %v346_v9, 7  ;;  %v3185_v48 = vsel %vm15238_vm13, %v15237_v20, %v3184_v14  ;;  %1392 = vst.msk [vmem:[#allocation3 + $0x199] sm:$0xff] %vm14792_vm5, %v9064_v25 }
 0x11c   : > { %v874_v30 = vand.u32 15, %v790_v7  ;;  %vm15239_vm3 = vcmask 138240   ;;  %v3536_v35 = vadd.f32 %v3185_v48, %v8824_v4  ;;  %v597_v20 = vsel %vm8972_vm2, %v581_v54, 0.0  ;;  %v9089_v54 = vld [vmem:[#allocation3 + $0x168] sm:$0xff] }
 0x11d   : > { %v625_v40 = vrot.slane %v618_v51, %v8925_v34  ;;  %v356_v10 = vsel %vm15239_vm3, %v351_v41, %v346_v9  ;;  %v15240_v7 = vrot.slane %v8861_v28, 1  ;;  %v9075_v4 = vadd.f32 %v2454_v2, %v1773_v3  ;;  %v9094_v2 = vld [vmem:[#allocation3 + $0x48] sm:$0xff] }
 0x11e   : > { %v565_v56 = vpop.permute.xlu1 %564  ;;  %367 = vst.msk [vmem:[#allocation2 + $0x6] sm:$0x7] %vm8302_vm4, %v356_v10  ;;  %v2488_v60 = vsel %vm9032_vm12, %v2142_v63, 0.0  ;;  %vm15241_vm3 = vcmask 900096   ;;  %v1646_v3 = vsel %vm8952_vm1, %v8988_v46, 0.0  ;;  %v15243_v63 = vrot.slane %v8864_v59, 1 }
 0x11f   : > { %v9073_v41 = vsel %vm15238_vm13, %v15240_v7, %v3192_v32  ;;  %v582_v9 = vsel %vm15241_vm3, %v563_v45, %v565_v56  ;;  %v9084_v51 = vadd.f32 %v625_v40, %v548_v58  ;;  %v14788_v45 = vrot.slane %v9089_v54, 1  ;;  %2710 = vst.msk [vmem:[#allocation3 + $0x39] sm:$0xff] %vm14792_vm5, %v9075_v4 }
 0x120   : > { %v9087_v28 = vadd.f32 %v3536_v35, %v9073_v41  ;;  %v598_v1 = vsel %vm8980_vm14, %v582_v9, 0.0  ;;  %v3187_v40 = vsel %vm15238_vm13, %v3184_v14, %v15243_v63  ;;  %vm9104_vm3 = vcmp.gt.s32.totalorder %v874_v30, 0  ;;  %v9112_v35 = vld [vmem:[#allocation3 + $0x18] sm:$0xff]  ;;  %v9127_v9 = vld [vmem:[%s8350_s22 + $0x58] sm:$0xff] }
 0x121   : > { %15242 = vst [vmem:[#allocation34_spill] sm:$0xff] %v9084_v51  ;;  %v15244_v58 = vmov 0  ;;  %v513_v48 = vrot.slane %v506_v55, %v8925_v34  ;;  %v626_v10 = vcombine.low %v597_v20, %v598_v1  ;;  %683 = vrot.lane.b32.xlu0 %v9084_v51, %s8247_s16  ;;  %v3537_v59 = vadd.f32 %v3187_v40, %v8826_v16  ;;  %v9130_v1 = vld [vmem:[%s8350_s22 + $0x168] sm:$0xff]  ;;  %1359 = vst.msk [vmem:[#allocation3 + $0x69] sm:$0xff] %vm14792_vm5, %v9127_v9 }
 0x122   : > { %v15245_v58 = vsel %vm9104_vm3, 4294967295, %v15244_v58  ;;  %v9114_v14 = vadd.f32 %v2488_v60, %v1807_v23  ;;  %v348_v56 = vpop.permute.xlu1 %347  ;;  %v15247_v30 = vsub.f32 %v8948_v11, %v8356_v26  ;;  %v9122_v55 = vsel %vm15238_vm13, %v3192_v32, %v14788_v45  ;;  %1393 = vst.msk [vmem:[#allocation3 + $0x1a1] sm:$0xff] %vm14792_vm5, %v9130_v1  ;;  %v8230_v32 = vld [vmem:[%s8291_s15] sm:$0x3]  ;;  %v8231_v45 = vld [vmem:[%s8291_s15 + $0x2] sm:$0x3] }
 0x123   : > { %15246 = vst [vmem:[#allocation35_spill] sm:$0xff] %v15245_v58  ;;  %v3119_v20 = vrot.slane %v9112_v35, 1  ;;  %v2074_v16 = vrot.slane %v9094_v2, 2  ;;  %v633_v23 = vrot.slane %v626_v10, %v8925_v34  ;;  %v352_v60 = vrot.slane %v348_v56, 7 }
 0x124   : > { %v4079_v7 = vmul.f32 0.125, %v15247_v30  ;;  %v1774_v26 = vadd.f32 %v1646_v3, %v8928_v33  ;;  %v1680_v11 = vsel %vm9104_vm3, %v8990_v31, 0.0  ;;  %2744 = vst.msk [vmem:[#allocation3 + $0x171] sm:$0xff] %vm14792_vm5, %v9114_v14  ;;  %v9144_v63 = vmul.f32 100.0, %v8230_v32 }
 0x125   : > { %v3729_v40 = vadd.f32 %v3537_v59, %v9122_v55  ;;  %v15249_v3 = vrot.slane %v8894_v43, 1  ;;  %v15250_v35 = vrot.slane %v8988_v46, 2  ;;  %v549_v51 = vadd.f32 %v8231_v45, %v513_v48  ;;  %v371_v32 = vld [vmem:[#allocation2 + $0x6] sm:$0x7] }
 0x126   : > { %15248 = vst [vmem:[#allocation36_spill] sm:$0xff] %v9144_v63  ;;  %v640_v49 = vrot.slane %v633_v23, %v8925_v34  ;;  %vm15251_vm5 = vcmask 138240   ;;  %v3984_v59 = vsub.f32 %v9087_v28, %v8686_v37  ;;  %v9158_v63 = vld [vmem:[#allocation3 + $0x180] sm:$0xff]  ;;  %v9160_v43 = vmul.f32 100.0, %v8231_v45 }
 0x127   : > { %v3120_v10 = vsel %vm15238_vm13, %v15249_v3, %v3119_v20  ;;  %v2075_v30 = vsel %vm14801_vm9, %v15250_v35, %v2074_v16  ;;  %v357_v24 = vsel %vm15251_vm5, %v352_v60, %v348_v56  ;;  %v9165_v46 = vrot.slane %v371_v32, %v8319_v13  ;;  %v9171_v56 = vld [vmem:[#allocation3 + $0x50] sm:$0xff]  ;;  %v9177_v28 = vld [vmem:[%s8350_s22 + $0x170] sm:$0xff]  ;;  %v9182_v35 = vld [vmem:[#allocation3 + $0x38] sm:$0xff] }
 0x128   : > { %15252 = vst [vmem:[#allocation37_spill] sm:$0xff] %v9160_v43  ;;  %368 = vst.msk [vmem:[#allocation2 + $0x9] sm:$0x7] %vm8302_vm4, %v357_v24  ;;  %v9168_v48 = vadd.f32 %v4079_v7, %v9021_v36  ;;  %v1808_v23 = vadd.f32 %v1680_v11, %v8931_v53  ;;  %v9174_v60 = vld [vmem:[%s8350_s22 + $0x60] sm:$0xff]  ;;  %v9179_v3 = vadd.f32 %v640_v49, %v549_v51  ;;  %vm15254_vm5 = vcmask 7168  }
 0x129   : > { %v3985_v45 = vsub.f32 %v3729_v40, %v8689_v38  ;;  %v3504_v24 = vadd.f32 %v3120_v10, %v8773_v47  ;;  %v9185_v43 = vadd.f32 %v2075_v30, %v1774_v26  ;;  %1360 = vst.msk [vmem:[#allocation3 + $0x71] sm:$0xff] %vm15254_vm5, %v9174_v60  ;;  %vm15255_vm13 = vmmov %vm15254_vm5  ;;  %439 = vrot.lane.b32.xlu0 %v9165_v46, %s8248_s17  ;;  %v14800_v36 = vrot.slane %v9182_v35, 1 }
 0x12a   : > { %15253 = vst [vmem:[#allocation38_spill] sm:$0xff] %v9179_v3  ;;  %1394 = vst.msk [vmem:[#allocation3 + $0x1a9] sm:$0xff] %vm15255_vm13, %v9177_v28  ;;  %v9194_v49 = vrot.slane %v371_v32, %v8316_v12  ;;  %v1775_v51 = vadd.f32 %v9094_v2, %v8957_v50  ;;  %v2143_v47 = vrot.slane %v9158_v63, 2  ;;  %685 = vrot.lane.b32.xlu1 %v9179_v3, %s8247_s16  ;;  %v3856_v26 = vmul.f32 100.0, %v8686_v37 }
 0x12b   : > { %v9203_v7 = vrot.slane %v371_v32, %v8324_v17  ;;  %v4112_v11 = vmul.f32 0.125, %v3984_v59  ;;  %2711 = vst.msk [vmem:[#allocation3 + $0x41] sm:$0xff] %vm15254_vm5, %v9185_v43  ;;  %v3857_v2 = vmul.f32 100.0, %v8689_v38  ;;  %v15256_v10 = vrot.slane %v8905_v6, 1  ;;  %v9217_v3 = vld [vmem:[#allocation3 + $0x170] sm:$0xff] }
 0x12c   : > { %vm15257_vm13 = vcmask 1046528   ;;  %v3538_v37 = vadd.f32 %v8881_v57, %v8828_v18  ;;  %v15258_v32 = vrot.slane %v8990_v31, 2  ;;  %v4113_v0 = vmul.f32 0.125, %v3985_v45 }
 0x12d   : > { %v9215_v30 = vsel %vm15257_vm13, %v15256_v10, %v14800_v36  ;;  %v14804_v38 = vrot.slane %v9217_v3, 1  ;;  %v15259_v34 = vrot.slane %v8832_v21, 1  ;;  %vm15260_vm5 = vmmov %vm15257_vm13  ;;  %v9230_v10 = vld [vmem:[%s8350_s22 + $0x68] sm:$0xff]  ;;  %v9233_v36 = vld [vmem:[%s8350_s22 + $0x178] sm:$0xff]  ;;  %443 = vrot.lane.b32.xlu0 %v9194_v49, %s8248_s17  ;;  %v15263_v18 = vrot.slane %v9171_v56, 2 }
 0x12e   : > { %v2144_v59 = vsel %vm14801_vm9, %v15258_v32, %v2143_v47  ;;  %v3696_v40 = vadd.f32 %v3504_v24, %v9215_v30  ;;  %15261 = vst [vmem:[#allocation39_spill] sm:$0xff] %v9230_v10  ;;  %15262 = vst [vmem:[#allocation40_spill] sm:$0xff] %v9233_v36  ;;  %v791_v45 = vadd.s32 72, %v8308_v8  ;;  %v792_v21 = vadd.s32 80, %v8308_v8  ;;  %441 = vrot.lane.b32.xlu1 %v9203_v7, %s8248_s17 }
 0x12f   : > { %v3122_v6 = vsel %vm15260_vm5, %v3119_v20, %v15259_v34  ;;  %v9237_v31 = vadd.f32 %v2144_v59, %v1808_v23  ;;  %v2077_v57 = vsel %vm14801_vm9, %v2074_v16, %v15263_v18  ;;  %v9244_v34 = vld [vmem:[#allocation3 + $0x188] sm:$0xff]  ;;  %vm15264_vm13 = vcmask 7168   ;;  %v372_v20 = vld [vmem:[#allocation2 + $0x9] sm:$0x7] }
 0x130   : > { %1361 = vst.msk [vmem:[#allocation3 + $0x79] sm:$0xff] %vm15264_vm13, %v9230_v10  ;;  %vm15265_vm5 = vmmov %vm15264_vm13  ;;  %v9252_v23 = vadd.f32 %v4112_v11, %v3856_v26  ;;  %v15267_v16 = vrot.slane %v9089_v54, 1  ;;  %vm15268_vm9 = vcmask 1046528   ;;  %v1809_v32 = vadd.f32 %v9158_v63, %v8960_v29  ;;  %v9266_v18 = vld [vmem:[%s8350_s22 + $0x70] sm:$0xff] }
 0x131   : > { %1395 = vst.msk [vmem:[#allocation3 + $0x1b1] sm:$0xff] %vm15265_vm5, %v9233_v36  ;;  %v2456_v59 = vsel %vm9032_vm12, %v2077_v57, 0.0  ;;  %15269 = vst [vmem:[#allocation42_spill] sm:$0xff] %v9266_v18  ;;  %v9272_v26 = vrot.slane %v372_v20, %v8319_v13  ;;  %v9275_v11 = vrot.slane %v372_v20, %v8324_v17  ;;  %v3952_v63 = vsub.f32 %v3696_v40, %v8359_v27  ;;  %v9380_v10 = vld [vmem:[#allocation3 + $0x60] sm:$0xff] }
 0x132   : > { %15266 = vst [vmem:[#allocation41_spill] sm:$0xff] %v9252_v23  ;;  %v9259_v24 = vsel %vm15268_vm9, %v15267_v16, %v14804_v38  ;;  %v3505_v16 = vadd.f32 %v3122_v6, %v8777_v52  ;;  %vm15271_vm9 = vmmov %vm15265_vm5  ;;  %v3539_v57 = vadd.f32 %v8876_v15, %v8830_v19  ;;  %v9291_v38 = vadd.f32 %v2456_v59, %v1775_v51  ;;  %v9297_v6 = vld [vmem:[#allocation3 + $0x40] sm:$0xff] }
 0x133   : > { %v3730_v54 = vadd.f32 %v3538_v37, %v9259_v24  ;;  %2745 = vst.msk [vmem:[#allocation3 + $0x179] sm:$0xff] %vm15271_vm9, %v9237_v31  ;;  %vm15272_vm13 = vmmov %vm15265_vm5  ;;  %v1648_v37 = vsel %vm9104_vm3, %v9171_v56, 0.0  ;;  %447 = vrot.lane.b32.xlu0 %v9275_v11, %s8248_s17  ;;  %v9295_v52 = vadd.f32 %v4113_v0, %v3857_v2  ;;  %v881_v17 = vand.u32 15, %v791_v45  ;;  %445 = vrot.lane.b32.xlu1 %v9272_v26, %s8248_s17 }
 0x134   : > { %1362 = vst.msk [vmem:[#allocation3 + $0x81] sm:$0xff] %vm15272_vm13, %v9266_v18  ;;  %v888_v13 = vand.u32 15, %v792_v21  ;;  %v2145_v40 = vrot.slane %v9244_v34, 2  ;;  %v9303_v19 = vrot.slane %v372_v20, %v8316_v12  ;;  %v3824_v15 = vmul.f32 100.0, %v8359_v27  ;;  %vm15274_vm9 = vmmov %vm15265_vm5  ;;  %v1485_v21 = vld [vmem:[#allocation3 + $0x58] sm:$0xff]  ;;  %v9324_v20 = vld [vmem:[%s8350_s22 + $0x78] sm:$0xff] }
 0x135   : > { %1396 = vst.msk [vmem:[#allocation3 + $0x1b9] sm:$0xff] %vm15265_vm5, %v9269_v5  ;;  %15273 = vst [vmem:[#allocation44_spill] sm:$0xff] %v9295_v52  ;;  %v3129_v51 = vrot.slane %v9297_v6, 1  ;;  %v9311_v0 = vadd.f32 %v9073_v41, %v8997_v42  ;;  %v3986_v2 = vsub.f32 %v3730_v54, %v8692_v39  ;;  %v15275_v45 = vmov 0  ;;  %v9336_v41 = vld [vmem:[#allocation3 + $0x190] sm:$0xff]  ;;  %v15289_v52 = vld [vmem:[#allocation31_spill] sm:$0xff] }
 0x136   : > { %2712 = vst.msk [vmem:[#allocation3 + $0x49] sm:$0xff] %vm15274_vm9, %v9291_v38  ;;  %vm9314_vm13 = vcmp.gt.s32.totalorder %v888_v13, 0  ;;  %vm9318_vm5 = vcmp.lt.s32.totalorder %v881_v17, 15  ;;  %v15278_v12 = vmov 0  ;;  %vm15281_vm3 = vcmask 1045504   ;;  %15282 = vst [vmem:[#allocation47_spill] sm:$0xff] %v9324_v20 }
 0x137   : > { %v15276_v45 = vsel %vm9314_vm13, 4294967295, %v15275_v45  ;;  %v15279_v12 = vsel %vm9318_vm5, 4294967295, %v15278_v12  ;;  %v2146_v27 = vsel %vm15281_vm3, %v2143_v47, %v2145_v40  ;;  %v4080_v59 = vmul.f32 0.125, %v3952_v63  ;;  %566 = vrot.lane.b32.xlu0 %v9165_v46, %s8249_s18  ;;  %v15286_v47 = vld [vmem:[#allocation30_spill] sm:$0xff]  ;;  %449 = vrot.lane.b32.xlu1 %v9303_v19, %s8248_s17 }
 0x138   : > { %15277 = vst [vmem:[#allocation45_spill] sm:$0xff] %v15276_v45  ;;  %15280 = vst [vmem:[#allocation46_spill] sm:$0xff] %v15279_v12  ;;  %v15283_v6 = vrot.slane %v9182_v35, 1  ;;  %vm15284_vm9 = vcmask 1046528   ;;  %v1682_v13 = vsel %vm9314_vm13, %v9244_v34, 0.0  ;;  %v2490_v17 = vsel %vm9318_vm5, %v2146_v27, 0.0 }
 0x139   : > { %vm15285_vm3 = vcmask 7168   ;;  %v3858_v35 = vmul.f32 100.0, %v8692_v39  ;;  %v1776_v54 = vadd.f32 %v1648_v37, %v15286_v47  ;;  %v15287_v63 = vld [vmem:[#allocation18_spill] sm:$0xff]  ;;  %v9346_v58 = vadd.f32 %v2490_v17, %v1809_v32 }
 0x13a   : > { %v9329_v42 = vsel %vm15284_vm9, %v15283_v6, %v3129_v51  ;;  %1363 = vst.msk [vmem:[#allocation3 + $0x89] sm:$0xff] %vm15285_vm3, %v9324_v20  ;;  %v15288_v6 = vld [vmem:[#allocation19_spill] sm:$0xff]  ;;  %v1810_v46 = vadd.f32 %v1682_v13, %v15289_v52  ;;  %v2078_v23 = vrot.slane %v1485_v21, 2  ;;  %v15290_v39 = vld [vmem:[#allocation26_spill] sm:$0xff]  ;;  %v4114_v37 = vmul.f32 0.125, %v3986_v2  ;;  %vm15292_vm9 = vmmov %vm15285_vm3 }
 0x13b   : > { %v3506_v34 = vadd.f32 %v15288_v6, %v15287_v63  ;;  %v3697_v27 = vadd.f32 %v3505_v16, %v9329_v42  ;;  %v9351_v61 = vld [vmem:[#allocation3 + $0x178] sm:$0xff]  ;;  %v9356_v5 = vadd.f32 %v15290_v39, %v9075_v4  ;;  %2746 = vst.msk [vmem:[#allocation3 + $0x181] sm:$0xff] %vm15292_vm9, %v9346_v58  ;;  %v2147_v16 = vrot.slane %v9336_v41, 2  ;;  %v15296_v6 = vld [vmem:[#allocation10_spill] sm:$0xff]  ;;  %v15297_v2 = vld [vmem:[#allocation33_spill] sm:$0xff]  ;;  %570 = vrot.lane.b32.xlu0 %v9194_v49, %s8249_s18 }
 0x13c   : > { %v15291_v20 = vld [vmem:[#allocation7_spill] sm:$0xff]  ;;  %v3198_v32 = vrot.slane %v9351_v61, 1  ;;  %v9371_v13 = vadd.f32 %v4080_v59, %v3824_v15  ;;  %v9374_v4 = vmul.f32 100.0, %v15296_v6  ;;  %v1777_v39 = vadd.f32 %v1485_v21, %v15297_v2  ;;  %vm15300_vm12 = vmmov %vm15292_vm9  ;;  %568 = vrot.lane.b32.xlu1 %v9203_v7, %s8249_s18  ;;  %v9411_v52 = vld [vmem:[%s8350_s22 + $0x190] sm:$0xff] }
 0x13d   : > { %v9359_v18 = vmul.f32 100.0, %v15291_v20  ;;  %v9366_v17 = vld [vmem:[%s8350_s22 + $0x80] sm:$0xff]  ;;  %v9369_v63 = vld [vmem:[%s8350_s22 + $0x188] sm:$0xff]  ;;  %v15298_v36 = vrot.slane %v9171_v56, 2  ;;  %vm15299_vm3 = vcmask 1045504   ;;  %v15301_v15 = vrot.slane %v9217_v3, 1 }
 0x13e   : > { %15293 = vst [vmem:[#allocation18_spill] sm:$0xff] %v9366_v17  ;;  %15294 = vst [vmem:[#allocation19_spill] sm:$0xff] %v9369_v63  ;;  %vm15302_vm1 = vcmask 1046528   ;;  %v9393_v56 = vld [vmem:[#allocation3 + $0x48] sm:$0xff]  ;;  %v9408_v2 = vld [vmem:[#allocation3 + $0x198] sm:$0xff]  ;;  %v9413_v47 = vadd.f32 %v4114_v37, %v3858_v35  ;;  %v9420_v7 = vadd.f32 %v9215_v30, %v9185_v43  ;;  %v1811_v35 = vadd.f32 %v9336_v41, %v9047_v62 }
 0x13f   : > { %15295 = vst [vmem:[#allocation26_spill] sm:$0xff] %v9371_v13  ;;  %v2079_v61 = vsel %vm15299_vm3, %v15298_v36, %v2078_v23  ;;  %1364 = vst.msk [vmem:[#allocation3 + $0x91] sm:$0xff] %vm15292_vm9, %v9366_v17  ;;  %v9391_v21 = vsel %vm15302_vm1, %v15301_v15, %v3198_v32  ;;  %v15303_v36 = vld [vmem:[#allocation8_spill] sm:$0xff]  ;;  %v2148_v17 = vsel %vm15299_vm3, %v2145_v40, %v2147_v16  ;;  %v14833_v3 = vrot.slane %v9393_v56, 1 }
 0x140   : > { %1397 = vst.msk [vmem:[#allocation3 + $0x1c1] sm:$0xff] %vm15300_vm12, %v9369_v63  ;;  %v9396_v59 = vmul.f32 100.0, %v15303_v36  ;;  %v9398_v13 = vadd.f32 %v2079_v61, %v1776_v54  ;;  %v3953_v63 = vsub.f32 %v3697_v27, %v15291_v20  ;;  %v3731_v49 = vadd.f32 %v3539_v57, %v9391_v21  ;;  %15304 = vst [vmem:[#allocation7_spill] sm:$0xff] %v9413_v47 }
 0x141   : > { %v9406_v15 = vadd.f32 %v2148_v17, %v1810_v46  ;;  %vm15305_vm12 = vmmov %vm15292_vm9  ;;  %v14840_v40 = vrot.slane %v9380_v10, 2  ;;  %v793_v57 = vadd.s32 88, %v8308_v8  ;;  %v1650_v43 = vsel %vm9314_vm13, %v9380_v10, 0.0  ;;  %574 = vrot.lane.b32.xlu0 %v9275_v11, %s8249_s18  ;;  %572 = vrot.lane.b32.xlu1 %v9272_v26, %s8249_s18  ;;  %v15313_v26 = vld [vmem:[#allocation11_spill] sm:$0xff] }
 0x142   : > { %2713 = vst.msk [vmem:[#allocation3 + $0x51] sm:$0xff] %vm15305_vm12, %v9398_v13  ;;  %vm15306_vm1 = vmmov %vm15292_vm9  ;;  %vm15307_vm9 = vcmask 1046528   ;;  %v794_v30 = vadd.s32 96, %v8308_v8  ;;  %vm15309_vm12 = vcmask 1045504   ;;  %v2149_v27 = vrot.slane %v9408_v2, 2  ;;  %v2881_v17 = vld [vmem:[#allocation3 + $0x180] sm:$0xff] }
 0x143   : > { %1398 = vst.msk [vmem:[#allocation3 + $0x1c9] sm:$0xff] %vm15306_vm1, %v9411_v52  ;;  %v9428_v20 = vsel %vm15307_vm9, %v3129_v51, %v14833_v3  ;;  %vm15308_vm3 = vmmov %vm15306_vm1  ;;  %v2081_v51 = vsel %vm15309_vm12, %v2078_v23, %v14840_v40  ;;  %v895_v41 = vand.u32 15, %v793_v57  ;;  %v4081_v46 = vmul.f32 0.125, %v3953_v63  ;;  %v9458_v57 = vld [vmem:[%s8350_s22 + $0x88] sm:$0xff]  ;;  %v9504_v40 = vld [vmem:[%s8350_s22 + $0x90] sm:$0xff] }
 0x144   : > { %2747 = vst.msk [vmem:[#allocation3 + $0x189] sm:$0xff] %vm15308_vm3, %v9406_v15  ;;  %v3698_v54 = vadd.f32 %v3506_v34, %v9428_v20  ;;  %v3987_v37 = vsub.f32 %v3731_v49, %v15296_v6  ;;  %v2458_v11 = vsel %vm9318_vm5, %v2081_v51, 0.0  ;;  %v902_v61 = vand.u32 15, %v794_v30  ;;  %vm15317_vm3 = vmmov %vm15309_vm12  ;;  %v9475_v30 = vld [vmem:[%s8350_s22 + $0x198] sm:$0xff] }
 0x145   : > { %v3200_v3 = vrot.slane %v2881_v17, 1  ;;  %v9451_v45 = vadd.f32 %v2458_v11, %v1777_v39  ;;  %vm9453_vm1 = vcmp.lt.s32.totalorder %v895_v41, 15  ;;  %v15310_v23 = vmov 0  ;;  %v9470_v39 = vld [vmem:[#allocation3 + $0x68] sm:$0xff]  ;;  %15319 = vst [vmem:[#allocation11_spill] sm:$0xff] %v9475_v30  ;;  %576 = vrot.lane.b32.xlu1 %v9303_v19, %s8249_s18 }
 0x146   : > { %v3954_v34 = vsub.f32 %v3698_v54, %v15303_v36  ;;  %v15311_v23 = vsel %vm9453_vm1, 4294967295, %v15310_v23  ;;  %v9461_v63 = vmul.f32 100.0, %v15313_v26  ;;  %v3541_v6 = vadd.f32 %v9122_v55, %v9114_v14  ;;  %v15320_v54 = vld [vmem:[#allocation20_spill] sm:$0xff]  ;;  %v15322_v14 = vld [vmem:[#allocation9_spill] sm:$0xff] }
 0x147   : > { %15312 = vst [vmem:[#allocation10_spill] sm:$0xff] %v15311_v23  ;;  %vm9465_vm9 = vcmp.gt.s32.totalorder %v902_v61, 0  ;;  %v15314_v49 = vmov 0  ;;  %v2150_v36 = vsel %vm15317_vm3, %v2147_v16, %v2149_v27  ;;  %vm15318_vm12 = vcmask 7168   ;;  %4336 = vperm.xlu0 %7972, %v15320_v54   ;;  %15325 = vst [vmem:[#allocation20_spill] sm:$0xff] %v9504_v40  ;;  %v9673_v23 = vld [vmem:[#allocation3 + $0x1b0] sm:$0xff] }
 0x148   : > { %v15315_v49 = vsel %vm9465_vm9, 4294967295, %v15314_v49  ;;  %1365 = vst.msk [vmem:[#allocation3 + $0x99] sm:$0xff] %vm15318_vm12, %v9458_v57  ;;  %vm15321_vm5 = vcmask 1046528   ;;  %v9482_v55 = vmul.f32 100.0, %v15322_v14  ;;  %vm15323_vm13 = vmmov %vm15318_vm12  ;;  %v1684_v16 = vsel %vm9465_vm9, %v9408_v2, 0.0  ;;  %v9501_v2 = vld [vmem:[#allocation3 + $0x1a0] sm:$0xff] }
 0x149   : > { %15316 = vst [vmem:[#allocation8_spill] sm:$0xff] %v15315_v49  ;;  %v9479_v51 = vsel %vm15321_vm5, %v3198_v32, %v3200_v3  ;;  %2714 = vst.msk [vmem:[#allocation3 + $0x59] sm:$0xff] %vm15323_vm13, %v9451_v45  ;;  %v2492_v41 = vsel %vm9453_vm1, %v2150_v36, 0.0  ;;  %v4115_v32 = vmul.f32 0.125, %v3987_v37  ;;  %v2843_v17 = vld [vmem:[#allocation3 + $0x50] sm:$0xff]  ;;  %v9496_v11 = vmul.f32 100.0, %v8908_v44 }
 0x14a   : > { %vm15324_vm3 = vmmov %vm15318_vm12  ;;  %v1778_v61 = vadd.f32 %v1650_v43, %v9061_v22  ;;  %v9499_v54 = vadd.f32 %v2492_v41, %v1811_v35  ;;  %v9507_v36 = vadd.f32 %v4081_v46, %v9359_v18  ;;  %v4082_v12 = vmul.f32 0.125, %v3954_v34  ;;  %v9515_v37 = vld [vmem:[%s8350_s22 + $0x1a0] sm:$0xff] }
 0x14b   : > { %1399 = vst.msk [vmem:[#allocation3 + $0x1d1] sm:$0xff] %vm15324_vm3, %v9475_v30  ;;  %v3133_v47 = vrot.slane %v2843_v17, 1  ;;  %v9509_v30 = vld [vmem:[#allocation3 + $0x188] sm:$0xff]  ;;  %v2082_v19 = vrot.slane %v9470_v39, 2  ;;  %vm15327_vm13 = vmmov %vm15324_vm3  ;;  %v9519_v35 = vadd.f32 %v9311_v0, %v9479_v51  ;;  %v9523_v18 = vmul.f32 100.0, %v8928_v33  ;;  %v15331_v34 = vld [vmem:[#allocation22_spill] sm:$0xff] }
 0x14c   : > { %15326 = vst [vmem:[#allocation9_spill] sm:$0xff] %v9507_v36  ;;  %1366 = vst.msk [vmem:[#allocation3 + $0xa1] sm:$0xff] %vm15327_vm13, %v9504_v40  ;;  %v3202_v43 = vrot.slane %v9509_v30, 1  ;;  %v1812_v46 = vadd.f32 %v1684_v16, %v9064_v25  ;;  %5066 = vperm.xlu0 %7972, %v15331_v34   ;;  %v15332_v41 = vrot.slane %v9393_v56, 1  ;;  %v3542_v30 = vadd.f32 %v9259_v24, %v9237_v31  ;;  %v15336_v40 = vld [vmem:[#allocation21_spill] sm:$0xff]  ;;  %v9554_v31 = vld [vmem:[#allocation3 + $0x70] sm:$0xff] }
 0x14d   : > { %15328 = vst [vmem:[#allocation48_spill] sm:$0xff] %v9515_v37  ;;  %vm15329_vm5 = vmmov %vm15324_vm3  ;;  %v15334_v16 = vrot.slane %v9380_v10, 2  ;;  %vm15335_vm13 = vcmask 1045504   ;;  %v2151_v36 = vrot.slane %v9501_v2, 2  ;;  %5061 = vperm.xlu1 %7973, %v15336_v40   ;;  %v9550_v34 = vmul.f32 100.0, %v8931_v53 }
 0x14e   : > { %2748 = vst.msk [vmem:[#allocation3 + $0x191] sm:$0xff] %vm15329_vm5, %v9499_v54  ;;  %vm15330_vm12 = vmmov %vm15324_vm3  ;;  %vm15333_vm3 = vcmask 1046528   ;;  %v9557_v10 = vadd.f32 %v4082_v12, %v9396_v59  ;;  %v1779_v40 = vadd.f32 %v9470_v39, %v9127_v9  ;;  %v9577_v12 = vadd.f32 %v9329_v42, %v9291_v38 }
 0x14f   : > { %1400 = vst.msk [vmem:[#allocation3 + $0x1d9] sm:$0xff] %vm15330_vm12, %v9515_v37  ;;  %v9534_v0 = vsel %vm15333_vm3, %v15332_v41, %v3133_v47  ;;  %v2083_v17 = vsel %vm15335_vm13, %v15334_v16, %v2082_v19  ;;  %v9544_v37 = vadd.f32 %v4115_v32, %v9374_v4  ;;  %vm15338_vm5 = vmmov %vm15333_vm3  ;;  %v9564_v32 = vld [vmem:[%s8350_s22 + $0x98] sm:$0xff]  ;;  %vm15342_vm3 = vcmask 7168  }
 0x150   : > { %v9547_v56 = vsel %vm15338_vm5, %v3200_v3, %v3202_v43  ;;  %v9552_v41 = vadd.f32 %v2083_v17, %v1778_v61  ;;  %15339 = vst [vmem:[#allocation21_spill] sm:$0xff] %v9557_v10  ;;  %vm15340_vm12 = vmmov %vm15335_vm13  ;;  %v9567_v3 = vld [vmem:[%s8350_s22 + $0x1a8] sm:$0xff]  ;;  %v3988_v61 = vsub.f32 %v9519_v35, %v15313_v26  ;;  %v3699_v16 = vadd.f32 %v9356_v5, %v9534_v0 }
 0x151   : > { %15337 = vst [vmem:[#allocation22_spill] sm:$0xff] %v9544_v37  ;;  %v3733_v24 = vadd.f32 %v3541_v6, %v9547_v56  ;;  %v2152_v4 = vsel %vm15340_vm12, %v2149_v27, %v2151_v36  ;;  %15341 = vst [vmem:[#allocation49_spill] sm:$0xff] %v9567_v3  ;;  %v2844_v17 = vld [vmem:[#allocation3 + $0x58] sm:$0xff]  ;;  %v9581_v27 = vld [vmem:[#allocation3 + $0x1a8] sm:$0xff]  ;;  %v9589_v6 = vmul.f32 100.0, %v8957_v50  ;;  %v14849_v38 = vrot.slane %v9554_v31, 2  ;;  %4341 = vperm.xlu1 %7973, %v9168_v48  }
 0x152   : > { %2715 = vst.msk [vmem:[#allocation3 + $0x61] sm:$0xff] %vm15342_vm3, %v9552_v41  ;;  %v9579_v59 = vadd.f32 %v2152_v4, %v1812_v46  ;;  %vm15343_vm13 = vmmov %vm15342_vm3  ;;  %v3135_v26 = vrot.slane %v2844_v17, 1  ;;  %v1813_v42 = vadd.f32 %v9501_v2, %v9130_v1  ;;  %v9599_v39 = vadd.f32 %v9391_v21, %v9346_v58  ;;  %v9604_v46 = vld [vmem:[%s8350_s22 + $0xa0] sm:$0xff]  ;;  %v9616_v58 = vld [vmem:[%s8350_s22 + $0x1b0] sm:$0xff] }
 0x153   : > { %1367 = vst.msk [vmem:[#allocation3 + $0xa9] sm:$0xff] %vm15343_vm13, %v9564_v32  ;;  %vm15344_vm5 = vmmov %vm15342_vm3  ;;  %v3989_v5 = vsub.f32 %v3733_v24, %v8908_v44  ;;  %v795_v44 = vadd.s32 104, %v8308_v8  ;;  %v796_v35 = vadd.s32 112, %v8308_v8  ;;  %vm15348_vm13 = vcmask 1045504  }
 0x154   : > { %1401 = vst.msk [vmem:[#allocation3 + $0x1e1] sm:$0xff] %vm15344_vm5, %v9567_v3  ;;  %vm15345_vm12 = vmmov %vm15342_vm3  ;;  %vm15347_vm3 = vcmask 1046528   ;;  %v2085_v2 = vsel %vm15348_vm13, %v2082_v19, %v14849_v38  ;;  %v3955_v21 = vsub.f32 %v3699_v16, %v15322_v14  ;;  %v1652_v16 = vsel %vm9465_vm9, %v9554_v31, 0.0 }
 0x155   : > { %2749 = vst.msk [vmem:[#allocation3 + $0x199] sm:$0xff] %vm15345_vm12, %v9579_v59  ;;  %15346 = vst [vmem:[#allocation50_spill] sm:$0xff] %v9604_v46  ;;  %v4117_v24 = vmul.f32 0.125, %v3989_v5  ;;  %v9607_v4 = vsel %vm15347_vm3, %v3133_v47, %v3135_v26  ;;  %v2883_v48 = vld [vmem:[#allocation3 + $0x190] sm:$0xff]  ;;  %v2460_v47 = vsel %vm9453_vm1, %v2085_v2, 0.0  ;;  %v909_v17 = vand.u32 15, %v795_v44 }
 0x156   : > { %1368 = vst.msk [vmem:[#allocation3 + $0xb1] sm:$0xff] %vm15344_vm5, %v9604_v46  ;;  %15349 = vst [vmem:[#allocation51_spill] sm:$0xff] %v9616_v58  ;;  %v3700_v5 = vadd.f32 %v9420_v7, %v9607_v4  ;;  %v3204_v10 = vrot.slane %v2883_v48, 1  ;;  %v9628_v38 = vadd.f32 %v2460_v47, %v1779_v40  ;;  %v916_v37 = vand.u32 15, %v796_v35  ;;  %v9653_v35 = vld [vmem:[#allocation3 + $0x78] sm:$0xff] }
 0x157   : > { %vm15350_vm12 = vmmov %vm15344_vm5  ;;  %v9626_v19 = vadd.f32 %v4117_v24, %v9496_v11  ;;  %v15352_v48 = vrot.slane %v9581_v27, 2  ;;  %v4116_v24 = vmul.f32 0.125, %v3988_v61  ;;  %v9662_v61 = vld [vmem:[%s8350_s22 + $0xa8] sm:$0xff]  ;;  %vm15363_vm1 = vcmask 1046528  }
 0x158   : > { %1402 = vst.msk [vmem:[#allocation3 + $0x1e9] sm:$0xff] %vm15350_vm12, %v9616_v58  ;;  %v3956_v14 = vsub.f32 %v3700_v5, %v8928_v33  ;;  %v9632_v7 = vsel %vm15347_vm3, %v3202_v43, %v3204_v10  ;;  %vm9645_vm12 = vcmp.gt.s32.totalorder %v916_v37, 0  ;;  %v15353_v33 = vmov 0  ;;  %15359 = vst [vmem:[#allocation55_spill] sm:$0xff] %v9662_v61 }
 0x159   : > { %15351 = vst [vmem:[#allocation52_spill] sm:$0xff] %v9626_v19  ;;  %v2154_v11 = vsel %vm15348_vm13, %v2151_v36, %v15352_v48  ;;  %v3734_v40 = vadd.f32 %v3542_v30, %v9632_v7  ;;  %v9641_v44 = vld [vmem:[#allocation3 + $0x60] sm:$0xff]  ;;  %2716 = vst.msk [vmem:[#allocation3 + $0x69] sm:$0xff] %vm15344_vm5, %v9628_v38  ;;  %v15354_v33 = vsel %vm9645_vm12, 4294967295, %v15353_v33  ;;  %vm9649_vm3 = vcmp.lt.s32.totalorder %v909_v17, 15  ;;  %v9665_v17 = vld [vmem:[%s8350_s22 + $0x1b8] sm:$0xff] }
 0x15a   : > { %15355 = vst [vmem:[#allocation53_spill] sm:$0xff] %v15354_v33  ;;  %v15356_v43 = vmov 0  ;;  %v4084_v2 = vmul.f32 0.125, %v3956_v14  ;;  %v3137_v36 = vrot.slane %v9641_v44, 1  ;;  %v1686_v30 = vsel %vm9645_vm12, %v9581_v27, 0.0  ;;  %15360 = vst [vmem:[#allocation56_spill] sm:$0xff] %v9665_v17 }
 0x15b   : > { %v15357_v43 = vsel %vm9649_vm3, 4294967295, %v15356_v43  ;;  %v2494_v37 = vsel %vm9649_vm3, %v2154_v11, 0.0  ;;  %v4083_v5 = vmul.f32 0.125, %v3955_v21  ;;  %v3990_v47 = vsub.f32 %v3734_v40, %v8931_v53  ;;  %vm15361_vm13 = vmmov %vm15344_vm5  ;;  %1403 = vst.msk [vmem:[#allocation3 + $0x1f1] sm:$0xff] %vm15344_vm5, %v9665_v17  ;;  %v9691_v40 = vld [vmem:[%s8350_s22 + $0x1c0] sm:$0xff] }
 0x15c   : > { %15358 = vst [vmem:[#allocation54_spill] sm:$0xff] %v15357_v43  ;;  %v9668_v48 = vld [vmem:[#allocation3 + $0x198] sm:$0xff]  ;;  %v1780_v14 = vadd.f32 %v1652_v16, %v9174_v60  ;;  %v9671_v44 = vadd.f32 %v2494_v37, %v1813_v42  ;;  %1369 = vst.msk [vmem:[#allocation3 + $0xb9] sm:$0xff] %vm15361_vm13, %v9662_v61  ;;  %v9680_v11 = vadd.f32 %v4084_v2, %v9523_v18  ;;  %v2086_v16 = vrot.slane %v9653_v35, 2  ;;  %v9688_v42 = vld [vmem:[%s8350_s22 + $0xb0] sm:$0xff] }
 0x15d   : > { %v9683_v21 = vsel %vm15363_vm1, %v3135_v26, %v3137_v36  ;;  %v14862_v53 = vrot.slane %v9668_v48, 1  ;;  %15364 = vst [vmem:[#allocation58_spill] sm:$0xff] %v9688_v42  ;;  %15365 = vst [vmem:[#allocation59_spill] sm:$0xff] %v9691_v40  ;;  %v9694_v37 = vadd.f32 %v4116_v24, %v9461_v63  ;;  %v9697_v49 = vmul.f32 100.0, %v8960_v29  ;;  %v15373_v19 = vld [vmem:[#allocation30_spill] sm:$0xff] }
 0x15e   : > { %15362 = vst [vmem:[#allocation57_spill] sm:$0xff] %v9680_v11  ;;  %v3510_v18 = vadd.f32 %v9428_v20, %v9398_v13  ;;  %v1814_v26 = vadd.f32 %v1686_v30, %v9177_v28  ;;  %vm15367_vm1 = vmmov %vm15344_vm5  ;;  %v3701_v63 = vadd.f32 %v9577_v12, %v9683_v21  ;;  %vm15370_vm9 = vcmask 1046528   ;;  %v9845_v33 = vld [vmem:[#allocation3 + $0x90] sm:$0xff] }
 0x15f   : > { %15366 = vst [vmem:[#allocation60_spill] sm:$0xff] %v9694_v37  ;;  %2750 = vst.msk [vmem:[#allocation3 + $0x1a1] sm:$0xff] %vm15367_vm1, %v9671_v44  ;;  %v9713_v24 = vsel %vm15370_vm9, %v3204_v10, %v14862_v53  ;;  %v15371_v13 = vrot.slane %v9554_v31, 2  ;;  %v2155_v2 = vrot.slane %v9673_v23, 2  ;;  %v4118_v30 = vmul.f32 0.125, %v3990_v47 }
 0x160   : > { %vm15368_vm13 = vmmov %vm15367_vm1  ;;  %v3735_v11 = vadd.f32 %v9599_v39, %v9713_v24  ;;  %v9722_v37 = vmul.f32 100.0, %v15373_v19  ;;  %v9729_v10 = vadd.f32 %v4083_v5, %v9482_v55  ;;  %v9731_v31 = vld [vmem:[#allocation3 + $0x68] sm:$0xff]  ;;  %v3544_v47 = vadd.f32 %v9479_v51, %v9406_v15  ;;  %v9752_v51 = vld [vmem:[#allocation3 + $0x1b8] sm:$0xff] }
 0x161   : > { %1370 = vst.msk [vmem:[#allocation3 + $0xc1] sm:$0xff] %vm15368_vm13, %v9688_v42  ;;  %vm15369_vm5 = vmmov %vm15367_vm1  ;;  %v2087_v20 = vsel %vm15372_vm10, %v15371_v13, %v2086_v16  ;;  %v15375_v13 = vld [vmem:[#allocation31_spill] sm:$0xff]  ;;  %v15376_v39 = vrot.slane %v9581_v27, 2  ;;  %v9748_v55 = vadd.f32 %v9534_v0, %v9451_v45  ;;  %v9755_v5 = vld [vmem:[%s8350_s22 + $0xb8] sm:$0xff]  ;;  %v9772_v45 = vadd.f32 %v4118_v30, %v9550_v34 }
 0x162   : > { %1404 = vst.msk [vmem:[#allocation3 + $0x1f9] sm:$0xff] %vm15369_vm5, %v9691_v40  ;;  %v9724_v12 = vadd.f32 %v2087_v20, %v1780_v14  ;;  %v9726_v40 = vld [vmem:[#allocation3 + $0x80] sm:$0xff]  ;;  %15374 = vst [vmem:[#allocation30_spill] sm:$0xff] %v9729_v10  ;;  %v9736_v53 = vmul.f32 100.0, %v15375_v13  ;;  %v3139_v14 = vrot.slane %v9731_v31, 1  ;;  %v15377_v20 = vld [vmem:[#allocation39_spill] sm:$0xff]  ;;  %v3957_v31 = vsub.f32 %v3701_v63, %v8957_v50 }
 0x163   : > { %v2156_v42 = vsel %vm15372_vm10, %v15376_v39, %v2155_v2  ;;  %v1781_v17 = vadd.f32 %v9653_v35, %v15377_v20  ;;  %vm15378_vm9 = vmmov %vm15367_vm1  ;;  %15379 = vst [vmem:[#allocation31_spill] sm:$0xff] %v9755_v5  ;;  %v9758_v27 = vld [vmem:[%s8350_s22 + $0x1c8] sm:$0xff]  ;;  %v15381_v39 = vld [vmem:[#allocation33_spill] sm:$0xff]  ;;  %v2088_v58 = vrot.slane %v9726_v40, 2  ;;  %v3991_v50 = vsub.f32 %v3735_v11, %v8960_v29 }
 0x164   : > { %2717 = vst.msk [vmem:[#allocation3 + $0x71] sm:$0xff] %vm15378_vm9, %v9724_v12  ;;  %v9750_v15 = vadd.f32 %v2156_v42, %v1814_v26  ;;  %15380 = vst [vmem:[#allocation39_spill] sm:$0xff] %v9758_v27  ;;  %v9762_v10 = vmul.f32 100.0, %v15381_v39  ;;  %v15382_v35 = vld [vmem:[#allocation40_spill] sm:$0xff]  ;;  %vm15385_vm5 = vcmask 1046528   ;;  %vm15387_vm9 = vcmask 1045504  }
 0x165   : > { %v1815_v61 = vadd.f32 %v9673_v23, %v15382_v35  ;;  %1371 = vst.msk [vmem:[#allocation3 + $0xc9] sm:$0xff] %vm15367_vm1, %v9755_v5  ;;  %vm15383_vm13 = vmmov %vm15367_vm1  ;;  %v9776_v0 = vsel %vm15385_vm5, %v3137_v36, %v3139_v14  ;;  %v797_v23 = vadd.s32 120, %v8308_v8  ;;  %v2089_v63 = vsel %vm15387_vm9, %v2086_v16, %v2088_v58  ;;  %v9794_v5 = vld [vmem:[%s8350_s22 + $0x1d0] sm:$0xff] }
 0x166   : > { %1405 = vst.msk [vmem:[#allocation3 + $0x201] sm:$0xff] %vm15383_vm13, %v9758_v27  ;;  %15384 = vst [vmem:[#allocation33_spill] sm:$0xff] %v9772_v45  ;;  %v3702_v42 = vadd.f32 %v3510_v18, %v9776_v0  ;;  %v2885_v26 = vld [vmem:[#allocation3 + $0x1a0] sm:$0xff]  ;;  %v798_v27 = vadd.s32 128, %v8308_v8  ;;  %v14877_v34 = vrot.slane %v9752_v51, 2  ;;  %v1654_v29 = vsel %vm9645_vm12, %v9726_v40, 0.0 }
 0x167   : > { %vm15386_vm10 = vmmov %vm15367_vm1  ;;  %v3208_v30 = vrot.slane %v2885_v26, 1  ;;  %v2462_v36 = vsel %vm9649_vm3, %v2089_v63, 0.0  ;;  %v923_v11 = vand.u32 15, %v797_v23  ;;  %v9791_v45 = vld [vmem:[%s8350_s22 + $0xc0] sm:$0xff]  ;;  %15389 = vst [vmem:[#allocation61_spill] sm:$0xff] %v9794_v5  ;;  %v4085_v18 = vmul.f32 0.125, %v3957_v31 }
 0x168   : > { %2751 = vst.msk [vmem:[#allocation3 + $0x1a9] sm:$0xff] %vm15386_vm10, %v9750_v15  ;;  %15388 = vst [vmem:[#allocation40_spill] sm:$0xff] %v9791_v45  ;;  %v9796_v46 = vadd.f32 %v2462_v36, %v1781_v17  ;;  %v930_v16 = vand.u32 15, %v798_v27  ;;  %v3958_v40 = vsub.f32 %v3702_v42, %v15373_v19  ;;  %v15393_v23 = vrot.slane %v9668_v48, 1  ;;  %v15402_v42 = vld [vmem:[#allocation42_spill] sm:$0xff] }
 0x169   : > { %vm15390_vm1 = vmmov %vm15387_vm9  ;;  %v3545_v17 = vadd.f32 %v9547_v56, %v9499_v54  ;;  %vm9813_vm9 = vcmp.lt.s32.totalorder %v923_v11, 15  ;;  %v15395_v27 = vmov 0  ;;  %v4119_v63 = vmul.f32 0.125, %v3991_v50 }
 0x16a   : > { %v2158_v26 = vsel %vm15390_vm1, %v2155_v2, %v14877_v34  ;;  %vm15391_vm13 = vmmov %vm15386_vm10  ;;  %v15396_v27 = vsel %vm9813_vm9, 4294967295, %v15395_v27  ;;  %v1491_v2 = vld [vmem:[#allocation3 + $0x88] sm:$0xff]  ;;  %v15399_v19 = vmov 0  ;;  %v9827_v48 = vmul.f32 100.0, %v9047_v62 }
 0x16b   : > { %1372 = vst.msk [vmem:[#allocation3 + $0xd1] sm:$0xff] %vm15391_vm13, %v9791_v45  ;;  %vm15392_vm5 = vmmov %vm15386_vm10  ;;  %vm15394_vm10 = vcmask 1046528   ;;  %v2847_v34 = vld [vmem:[#allocation3 + $0x70] sm:$0xff]  ;;  %vm9820_vm13 = vcmp.gt.s32.totalorder %v930_v16, 0  ;;  %v2496_v54 = vsel %vm9813_vm9, %v2158_v26, 0.0  ;;  %v1782_v50 = vadd.f32 %v1654_v29, %v15402_v42 }
 0x16c   : > { %1406 = vst.msk [vmem:[#allocation3 + $0x209] sm:$0xff] %vm15392_vm5, %v9794_v5  ;;  %v9809_v31 = vsel %vm15394_vm10, %v15393_v23, %v3208_v30  ;;  %15397 = vst [vmem:[#allocation62_spill] sm:$0xff] %v15396_v27  ;;  %v15400_v19 = vsel %vm9820_vm13, 4294967295, %v15399_v19  ;;  %v3141_v56 = vrot.slane %v2847_v34, 1  ;;  %v9830_v11 = vadd.f32 %v2496_v54, %v1815_v61  ;;  %v9850_v61 = vld [vmem:[%s8350_s22 + $0x1d8] sm:$0xff]  ;;  %v15409_v54 = vld [vmem:[#allocation47_spill] sm:$0xff] }
 0x16d   : > { %v3736_v36 = vadd.f32 %v3544_v47, %v9809_v31  ;;  %vm15398_vm1 = vmmov %vm15392_vm5  ;;  %15401 = vst [vmem:[#allocation63_spill] sm:$0xff] %v15400_v19  ;;  %v9833_v47 = vld [vmem:[%s8350_s22 + $0xc8] sm:$0xff]  ;;  %v9836_v23 = vadd.f32 %v4085_v18, %v9589_v6  ;;  %v3512_v43 = vadd.f32 %v9607_v4, %v9552_v41  ;;  %v9843_v26 = vmul.f32 100.0, %v9061_v22  ;;  %v9873_v5 = vld [vmem:[%s8350_s22 + $0x1e0] sm:$0xff] }
 0x16e   : > { %2718 = vst.msk [vmem:[#allocation3 + $0x79] sm:$0xff] %vm15398_vm1, %v9796_v46  ;;  %15403 = vst [vmem:[#allocation42_spill] sm:$0xff] %v9833_v47  ;;  %v2090_v34 = vrot.slane %v1491_v2, 2  ;;  %v4086_v6 = vmul.f32 0.125, %v3958_v40  ;;  %v9853_v29 = vsel %vm15394_vm10, %v3139_v14, %v3141_v56  ;;  %v1688_v41 = vsel %vm9820_vm13, %v9752_v51, 0.0 }
 0x16f   : > { %15404 = vst [vmem:[#allocation64_spill] sm:$0xff] %v9836_v23  ;;  %v9838_v16 = vld [vmem:[#allocation3 + $0x1a8] sm:$0xff]  ;;  %vm15405_vm5 = vmmov %vm15398_vm1  ;;  %v9864_v4 = vadd.f32 %v4119_v63, %v9697_v49  ;;  %v3992_v40 = vsub.f32 %v3736_v36, %v15375_v13  ;;  %v1783_v14 = vadd.f32 %v1491_v2, %v15409_v54  ;;  %v3703_v45 = vadd.f32 %v9748_v55, %v9853_v29  ;;  %v15414_v13 = vld [vmem:[#allocation43_spill] sm:$0xff] }
 0x170   : > { %1373 = vst.msk [vmem:[#allocation3 + $0xd9] sm:$0xff] %vm15405_vm5, %v9833_v47  ;;  %15406 = vst [vmem:[#allocation65_spill] sm:$0xff] %v9850_v61  ;;  %v3210_v18 = vrot.slane %v9838_v16, 1  ;;  %vm15410_vm5 = vcmask 1045504   ;;  %v1526_v16 = vld [vmem:[#allocation3 + $0x1c0] sm:$0xff]  ;;  %v14896_v49 = vrot.slane %v9845_v33, 2  ;;  %v1816_v2 = vadd.f32 %v1688_v41, %v15414_v13 }
 0x171   : > { %2752 = vst.msk [vmem:[#allocation3 + $0x1b1] sm:$0xff] %vm15398_vm1, %v9830_v11  ;;  %vm15407_vm3 = vmmov %vm15398_vm1  ;;  %v2091_v23 = vsel %vm15410_vm5, %v2088_v58, %v2090_v34  ;;  %v9870_v47 = vld [vmem:[%s8350_s22 + $0xd0] sm:$0xff]  ;;  %v3546_v55 = vadd.f32 %v9632_v7, %v9579_v59  ;;  %v9895_v63 = vadd.f32 %v4086_v6, %v9722_v37  ;;  %v2159_v7 = vrot.slane %v1526_v16, 2 }
 0x172   : > { %1407 = vst.msk [vmem:[#allocation3 + $0x211] sm:$0xff] %vm15407_vm3, %v9850_v61  ;;  %15408 = vst [vmem:[#allocation66_spill] sm:$0xff] %v9864_v4  ;;  %v9878_v3 = vsel %vm15394_vm10, %v3208_v30, %v3210_v18  ;;  %v9880_v61 = vadd.f32 %v2091_v23, %v1782_v50  ;;  %v9892_v30 = vmul.f32 100.0, %v9064_v25  ;;  %vm15417_vm10 = vcmask 1045504  }
 0x173   : > { %15411 = vst [vmem:[#allocation47_spill] sm:$0xff] %v9870_v47  ;;  %15412 = vst [vmem:[#allocation67_spill] sm:$0xff] %v9873_v5  ;;  %v3737_v58 = vadd.f32 %v3545_v17, %v9878_v3  ;;  %v1656_v17 = vsel %vm9820_vm13, %v9845_v33, 0.0  ;;  %v2093_v59 = vsel %vm15417_vm10, %v2090_v34, %v14896_v49  ;;  %v4120_v50 = vmul.f32 0.125, %v3992_v40  ;;  %v9920_v40 = vld [vmem:[#allocation3 + $0x1c8] sm:$0xff] }
 0x174   : > { %vm15413_vm3 = vmmov %vm15398_vm1  ;;  %1408 = vst.msk [vmem:[#allocation3 + $0x219] sm:$0xff] %vm15398_vm1, %v9873_v5  ;;  %v9907_v37 = vadd.f32 %v9683_v21, %v9628_v38  ;;  %v2464_v6 = vsel %vm9813_vm9, %v2093_v59, 0.0  ;;  %v3959_v41 = vsub.f32 %v3703_v45, %v15381_v39  ;;  %v15418_v4 = vrot.slane %v9752_v51, 2  ;;  %v9926_v38 = vld [vmem:[%s8350_s22 + $0xd8] sm:$0xff] }
 0x175   : > { %1374 = vst.msk [vmem:[#allocation3 + $0xe1] sm:$0xff] %vm15413_vm3, %v9870_v47  ;;  %15415 = vst [vmem:[#allocation43_spill] sm:$0xff] %v9895_v63  ;;  %v2848_v36 = vld [vmem:[#allocation3 + $0x78] sm:$0xff]  ;;  %v9913_v63 = vmul.f32 100.0, %v9127_v9  ;;  %v9915_v19 = vadd.f32 %v2464_v6, %v1783_v14  ;;  %v3993_v21 = vsub.f32 %v3737_v58, %v9047_v62  ;;  %v15423_v45 = vld [vmem:[#allocation18_spill] sm:$0xff]  ;;  %v2161_v49 = vrot.slane %v9920_v40, 2 }
 0x176   : > { %vm15416_vm5 = vmmov %vm15398_vm1  ;;  %v3143_v23 = vrot.slane %v2848_v36, 1  ;;  %v9923_v36 = vld [vmem:[%s8350_s22 + $0x1e8] sm:$0xff]  ;;  %15421 = vst [vmem:[#allocation69_spill] sm:$0xff] %v9926_v38  ;;  %vm15422_vm1 = vcmask 1046528   ;;  %v1784_v14 = vadd.f32 %v1656_v17, %v15423_v45  ;;  %v3514_v17 = vadd.f32 %v9776_v0, %v9724_v12  ;;  %v9959_v62 = vld [vmem:[%s8350_s22 + $0xe0] sm:$0xff] }
 0x177   : > { %2719 = vst.msk [vmem:[#allocation3 + $0x81] sm:$0xff] %vm15416_vm5, %v9880_v61  ;;  %vm15419_vm3 = vmmov %vm15417_vm10  ;;  %v9947_v58 = vld [vmem:[#allocation3 + $0x98] sm:$0xff]  ;;  %v4087_v27 = vmul.f32 0.125, %v3959_v41  ;;  %v9969_v12 = vld [vmem:[%s8350_s22 + $0x1f0] sm:$0xff] }
 0x178   : > { %v2160_v34 = vsel %vm15419_vm3, %v15418_v4, %v2159_v7  ;;  %15420 = vst [vmem:[#allocation68_spill] sm:$0xff] %v9923_v36  ;;  %v9930_v59 = vsel %vm15422_vm1, %v3141_v56, %v3143_v23  ;;  %v9932_v39 = vld [vmem:[#allocation3 + $0x1b0] sm:$0xff]  ;;  %1409 = vst.msk [vmem:[#allocation3 + $0x221] sm:$0xff] %vm15416_vm5, %v9923_v36  ;;  %v799_v56 = vadd.s32 136, %v8308_v8  ;;  %v800_v4 = vadd.s32 144, %v8308_v8 }
 0x179   : > { %v9935_v6 = vadd.f32 %v2160_v34, %v1816_v2  ;;  %vm15424_vm10 = vmmov %vm15416_vm5  ;;  %v3704_v51 = vadd.f32 %v3512_v43, %v9930_v59  ;;  %v9950_v2 = vadd.f32 %v4120_v50, %v9736_v53  ;;  %v15427_v34 = vld [vmem:[#allocation19_spill] sm:$0xff]  ;;  %v15430_v36 = vrot.slane %v9932_v39, 1  ;;  %15433 = vst [vmem:[#allocation70_spill] sm:$0xff] %v9969_v12  ;;  %v10352_v47 = vld [vmem:[%s8350_s22 + $0x3d8] sm:$0xff] }
 0x17a   : > { %1375 = vst.msk [vmem:[#allocation3 + $0xe9] sm:$0xff] %vm15424_vm10, %v9926_v38  ;;  %vm15425_vm3 = vmmov %vm15416_vm5  ;;  %v1817_v43 = vadd.f32 %v1526_v16, %v15427_v34  ;;  %vm15431_vm5 = vcmask 1046528   ;;  %v937_v53 = vand.u32 15, %v799_v56  ;;  %v944_v50 = vand.u32 15, %v800_v4 }
 0x17b   : > { %2720 = vst.msk [vmem:[#allocation3 + $0x89] sm:$0xff] %vm15425_vm3, %v9915_v19  ;;  %15426 = vst [vmem:[#allocation18_spill] sm:$0xff] %v9950_v2  ;;  %v9964_v38 = vsel %vm15431_vm5, %v3210_v18, %v15430_v36  ;;  %v3960_v0 = vsub.f32 %v3704_v51, %v9061_v22  ;;  %v2094_v41 = vrot.slane %v9947_v58, 2  ;;  %v4121_v18 = vmul.f32 0.125, %v3993_v21 }
 0x17c   : > { %vm15428_vm1 = vmmov %vm15425_vm3  ;;  %15429 = vst [vmem:[#allocation19_spill] sm:$0xff] %v9959_v62  ;;  %v3738_v16 = vadd.f32 %v3546_v55, %v9964_v38  ;;  %vm15434_vm3 = vcmask 1045504   ;;  %vm9977_vm5 = vcmp.gt.s32.totalorder %v944_v50, 0  ;;  %v15435_v56 = vmov 0 }
 0x17d   : > { %2753 = vst.msk [vmem:[#allocation3 + $0x1b9] sm:$0xff] %vm15428_vm1, %v9935_v6  ;;  %vm15432_vm10 = vmmov %vm15428_vm1  ;;  %v2162_v5 = vsel %vm15434_vm3, %v2159_v7, %v2161_v49  ;;  %v15436_v56 = vsel %vm9977_vm5, 4294967295, %v15435_v56  ;;  %v15438_v4 = vmov 0  ;;  %v1690_v55 = vsel %vm9977_vm5, %v9920_v40, 0.0  ;;  %v10007_v40 = vld [vmem:[%s8350_s22 + $0xe8] sm:$0xff] }
 0x17e   : > { %1376 = vst.msk [vmem:[#allocation3 + $0xf1] sm:$0xff] %vm15432_vm10, %v9959_v62  ;;  %v2849_v2 = vld [vmem:[#allocation3 + $0x80] sm:$0xff]  ;;  %15437 = vst [vmem:[#allocation71_spill] sm:$0xff] %v15436_v56  ;;  %vm9981_vm10 = vcmp.lt.s32.totalorder %v937_v53, 15  ;;  %v3994_v22 = vsub.f32 %v3738_v16, %v9064_v25  ;;  %v15441_v21 = vrot.slane %v9845_v33, 2  ;;  %v10000_v50 = vmul.f32 100.0, %v9174_v60 }
 0x17f   : > { %1410 = vst.msk [vmem:[#allocation3 + $0x229] sm:$0xff] %vm15428_vm1, %v9969_v12  ;;  %v3145_v36 = vrot.slane %v2849_v2, 1  ;;  %v15439_v4 = vsel %vm9981_vm10, 4294967295, %v15438_v4  ;;  %v2498_v7 = vsel %vm9981_vm10, %v2162_v5, 0.0  ;;  %v9994_v2 = vld [vmem:[#allocation3 + $0x1d0] sm:$0xff]  ;;  %vm15442_vm1 = vcmask 1046528  }
 0x180   : > { %15440 = vst [vmem:[#allocation72_spill] sm:$0xff] %v15439_v4  ;;  %v2095_v51 = vsel %vm15434_vm3, %v15441_v21, %v2094_v41  ;;  %v3547_v25 = vadd.f32 %v9713_v24, %v9671_v44  ;;  %v10004_v16 = vadd.f32 %v2498_v7, %v1817_v43  ;;  %15443 = vst [vmem:[#allocation73_spill] sm:$0xff] %v10007_v40  ;;  %v4088_v5 = vmul.f32 0.125, %v3960_v0  ;;  %v10018_v62 = vld [vmem:[%s8350_s22 + $0x1f8] sm:$0xff] }
 0x181   : > { %v9997_v53 = vsel %vm15442_vm1, %v3143_v23, %v3145_v36  ;;  %v10012_v33 = vmul.f32 100.0, %v9130_v1  ;;  %v1818_v21 = vadd.f32 %v1690_v55, %v9411_v52  ;;  %v10015_v23 = vadd.f32 %v2095_v51, %v1784_v14  ;;  %15444 = vst [vmem:[#allocation74_spill] sm:$0xff] %v10018_v62  ;;  %15516 = vst [vmem:[#allocation91_spill] sm:$0xff] %v10352_v47 }
 0x182   : > { %v10009_v12 = vld [vmem:[#allocation3 + $0x88] sm:$0xff]  ;;  %vm15445_vm3 = vcmask 7168   ;;  %v10023_v44 = vadd.f32 %v4087_v27, %v9762_v10  ;;  %v10026_v24 = vadd.f32 %v4121_v18, %v9827_v48  ;;  %v2163_v14 = vrot.slane %v9994_v2, 2  ;;  %v10040_v48 = vld [vmem:[#allocation3 + $0xa0] sm:$0xff] }
 0x183   : > { %1377 = vst.msk [vmem:[#allocation3 + $0xf9] sm:$0xff] %vm15445_vm3, %v10007_v40  ;;  %v3147_v43 = vrot.slane %v10009_v12, 1  ;;  %vm15448_vm1 = vmmov %vm15445_vm3  ;;  %v4122_v55 = vmul.f32 0.125, %v3994_v22  ;;  %v3705_v7 = vadd.f32 %v9907_v37, %v9997_v53  ;;  %v3548_v27 = vadd.f32 %v9809_v31, %v9750_v15  ;;  %v10043_v12 = vld [vmem:[%s8350_s22 + $0xf0] sm:$0xff] }
 0x184   : > { %15446 = vst [vmem:[#allocation75_spill] sm:$0xff] %v10023_v44  ;;  %15447 = vst [vmem:[#allocation76_spill] sm:$0xff] %v10026_v24  ;;  %v2888_v0 = vld [vmem:[#allocation3 + $0x1b8] sm:$0xff]  ;;  %v10049_v51 = vmul.f32 100.0, %v9177_v28  ;;  %v1785_v37 = vadd.f32 %v9947_v58, %v9458_v57  ;;  %v10057_v15 = vadd.f32 %v4088_v5, %v9843_v26  ;;  %v15456_v31 = vrot.slane %v9932_v39, 1 }
 0x185   : > { %2754 = vst.msk [vmem:[#allocation3 + $0x1c1] sm:$0xff] %vm15448_vm1, %v10004_v16  ;;  %vm15449_vm9 = vmmov %vm15448_vm1  ;;  %v3214_v10 = vrot.slane %v2888_v0, 1  ;;  %v10068_v58 = vld [vmem:[#allocation3 + $0x1d8] sm:$0xff]  ;;  %v14917_v39 = vrot.slane %v10040_v48, 2  ;;  %v15463_v44 = vmov 0 }
 0x186   : > { %1411 = vst.msk [vmem:[#allocation3 + $0x231] sm:$0xff] %vm15449_vm9, %v10018_v62  ;;  %vm15450_vm3 = vmmov %vm15448_vm1  ;;  %vm15452_vm1 = vcmask 1046528   ;;  %vm15453_vm9 = vcmask 1045504   ;;  %v15458_v26 = vld [vmem:[#allocation11_spill] sm:$0xff] }
 0x187   : > { %2721 = vst.msk [vmem:[#allocation3 + $0x91] sm:$0xff] %vm15450_vm3, %v10015_v23  ;;  %15451 = vst [vmem:[#allocation77_spill] sm:$0xff] %v10043_v12  ;;  %v10046_v18 = vsel %vm15452_vm1, %v3145_v36, %v3147_v43  ;;  %v2164_v22 = vsel %vm15453_vm9, %v2161_v49, %v2163_v14  ;;  %v3515_v36 = vadd.f32 %v9853_v29, %v9796_v46 }
 0x188   : > { %vm15454_vm13 = vmmov %vm15450_vm3  ;;  %15455 = vst [vmem:[#allocation78_spill] sm:$0xff] %v10057_v15  ;;  %v10066_v62 = vadd.f32 %v2164_v22, %v1818_v21  ;;  %v3706_v49 = vadd.f32 %v3514_v17, %v10046_v18  ;;  %v1819_v5 = vadd.f32 %v9994_v2, %v15458_v26  ;;  %v3961_v46 = vsub.f32 %v3705_v7, %v9127_v9 }
 0x189   : > { %1378 = vst.msk [vmem:[#allocation3 + $0x101] sm:$0xff] %vm15454_vm13, %v10043_v12  ;;  %vm15457_vm3 = vmmov %vm15452_vm1  ;;  %v10072_v12 = vmul.f32 100.0, %v15377_v20  ;;  %v801_v17 = vadd.s32 152, %v8308_v8  ;;  %v3549_v21 = vadd.f32 %v9878_v3, %v9830_v11  ;;  %v802_v22 = vadd.s32 160, %v8308_v8 }
 0x18a   : > { %v10062_v0 = vsel %vm15457_vm3, %v15456_v31, %v3214_v10  ;;  %v10078_v31 = vadd.f32 %v4122_v55, %v9892_v30  ;;  %2755 = vst.msk [vmem:[#allocation3 + $0x1c9] sm:$0xff] %vm15454_vm13, %v10066_v62  ;;  %vm15460_vm1 = vmmov %vm15453_vm9  ;;  %v2165_v30 = vrot.slane %v10068_v58, 2  ;;  %v10093_v55 = vld [vmem:[%s8350_s22 + $0xf8] sm:$0xff]  ;;  %v1658_v7 = vsel %vm9977_vm5, %v10040_v48, 0.0 }
 0x18b   : > { %v3739_v29 = vadd.f32 %v3547_v25, %v10062_v0  ;;  %v2097_v2 = vsel %vm15460_vm1, %v2094_v41, %v14917_v39  ;;  %15461 = vst [vmem:[#allocation79_spill] sm:$0xff] %v10093_v55  ;;  %v10096_v25 = vmul.f32 100.0, %v15382_v35  ;;  %v951_v11 = vand.u32 15, %v801_v17  ;;  %vm15462_vm9 = vmmov %vm15454_vm13 }
 0x18c   : > { %15459 = vst [vmem:[#allocation11_spill] sm:$0xff] %v10078_v31  ;;  %v2889_v9 = vld [vmem:[#allocation3 + $0x1c0] sm:$0xff]  ;;  %v2466_v3 = vsel %vm9981_vm10, %v2097_v2, 0.0  ;;  %1379 = vst.msk [vmem:[#allocation3 + $0x109] sm:$0xff] %vm15462_vm9, %v10093_v55  ;;  %v3962_v41 = vsub.f32 %v3706_v49, %v9174_v60  ;;  %v958_v40 = vand.u32 15, %v802_v22  ;;  %v4089_v2 = vmul.f32 0.125, %v3961_v46 }
 0x18d   : > { %v3216_v39 = vrot.slane %v2889_v9, 1  ;;  %v10108_v15 = vadd.f32 %v2466_v3, %v1785_v37  ;;  %v3995_v24 = vsub.f32 %v3739_v29, %v9130_v1  ;;  %vm10112_vm3 = vcmp.lt.s32.totalorder %v951_v11, 15  ;;  %vm15466_vm13 = vmmov %vm15460_vm1  ;;  %v15472_v9 = vld [vmem:[#allocation20_spill] sm:$0xff] }
 0x18e   : > { %v10106_v31 = vld [vmem:[#allocation3 + $0x90] sm:$0xff]  ;;  %v15464_v44 = vsel %vm10112_vm3, 4294967295, %v15463_v44  ;;  %v2166_v17 = vsel %vm15466_vm13, %v2163_v14, %v2165_v30  ;;  %vm15467_vm1 = vcmask 1046528   ;;  %vm10122_vm10 = vcmp.gt.s32.totalorder %v958_v40, 0  ;;  %v1495_v40 = vld [vmem:[#allocation3 + $0xa8] sm:$0xff] }
 0x18f   : > { %v14928_v56 = vrot.slane %v10106_v31, 1  ;;  %15465 = vst [vmem:[#allocation80_spill] sm:$0xff] %v15464_v44  ;;  %v10118_v4 = vsel %vm15467_vm1, %v3214_v10, %v3216_v39  ;;  %2722 = vst.msk [vmem:[#allocation3 + $0x99] sm:$0xff] %vm15462_vm9, %v10108_v15  ;;  %v15468_v60 = vmov 0  ;;  %v2500_v1 = vsel %vm10112_vm3, %v2166_v17, 0.0 }
 0x190   : > { %v15469_v60 = vsel %vm10122_vm10, 4294967295, %v15468_v60  ;;  %v3740_v37 = vadd.f32 %v3548_v27, %v10118_v4  ;;  %vm15471_vm5 = vmmov %vm15467_vm1  ;;  %v1692_v10 = vsel %vm10122_vm10, %v10068_v58, 0.0  ;;  %v10137_v49 = vadd.f32 %v2500_v1, %v1819_v5  ;;  %v10143_v27 = vld [vmem:[#allocation3 + $0x1e0] sm:$0xff] }
 0x191   : > { %15470 = vst [vmem:[#allocation81_spill] sm:$0xff] %v15469_v60  ;;  %v10132_v14 = vsel %vm15471_vm5, %v3147_v43, %v14928_v56  ;;  %v4090_v46 = vmul.f32 0.125, %v3962_v41  ;;  %v10140_v22 = vld [vmem:[#allocation3 + $0x1c8] sm:$0xff]  ;;  %v1786_v3 = vadd.f32 %v1658_v7, %v15472_v9  ;;  %v4123_v11 = vmul.f32 0.125, %v3995_v24  ;;  %vm15473_vm5 = vmmov %vm15462_vm9  ;;  %v15475_v24 = vld [vmem:[#allocation48_spill] sm:$0xff] }
 0x192   : > { %v3707_v29 = vadd.f32 %v3515_v36, %v10132_v14  ;;  %v3218_v43 = vrot.slane %v10140_v22, 1  ;;  %v3516_v17 = vadd.f32 %v9930_v59, %v9880_v61  ;;  %2756 = vst.msk [vmem:[#allocation3 + $0x1d1] sm:$0xff] %vm15473_vm5, %v10137_v49  ;;  %v14929_v58 = vmov 0.0|0.0   ;;  %vm15476_vm13 = vmmov %vm15467_vm1  ;;  %v10317_v60 = vld [vmem:[%s8350_s22 + $0x2e0] sm:$0xff] }
 0x193   : > { %7825 = vmatprep.subr.bf16.mxu0 %v14929_v58  ;;  %7857 = vmatprep.subr.bf16.mxu1 %v14929_v58  ;;  %v10153_v36 = vadd.f32 %v4089_v2, %v9913_v63  ;;  %v10156_v5 = vmul.f32 100.0, %v15402_v42  ;;  %v1820_v7 = vadd.f32 %v1692_v10, %v15475_v24  ;;  %v14931_v41 = vmov 1.0|1.0  }
 0x194   : > { %7826 = vmatpush1.bf16.msra.mxu0 %v14931_v41  ;;  %v2098_v61 = vrot.slane %v1495_v40, 2  ;;  %7858 = vmatpush1.bf16.msra.mxu1 %v14931_v41  ;;  %v3996_v59 = vsub.f32 %v3740_v37, %v9177_v28  ;;  %v10163_v1 = vsel %vm15476_vm13, %v3216_v39, %v3218_v43  ;;  %v3550_v63 = vadd.f32 %v9964_v38, %v9935_v6  ;;  %v10178_v37 = vld [vmem:[#allocation3 + $0xb0] sm:$0xff] }
 0x195   : > { %15474 = vst [vmem:[#allocation20_spill] sm:$0xff] %v10153_v36  ;;  %v2167_v2 = vrot.slane %v10143_v27, 2  ;;  %7827 = vmatprep.subr.bf16.mxu0 %v14929_v58  ;;  %7859 = vmatprep.subr.bf16.mxu1 %v14929_v58  ;;  %v10171_v10 = vadd.f32 %v4090_v46, %v10000_v50  ;;  %v3963_v22 = vsub.f32 %v3707_v29, %v15377_v20  ;;  %v15478_v28 = vrot.slane %v10040_v48, 2 }
 0x196   : > { %v3741_v56 = vadd.f32 %v3549_v21, %v10163_v1  ;;  %vm15479_vm1 = vcmask 1045504   ;;  %v10181_v38 = vadd.f32 %v4123_v11, %v10012_v33  ;;  %v10183_v6 = vld [vmem:[#allocation3 + $0x98] sm:$0xff]  ;;  %v10186_v58 = vmul.f32 100.0, %v15414_v13 }
 0x197   : > { %15477 = vst [vmem:[#allocation48_spill] sm:$0xff] %v10171_v10  ;;  %v2099_v39 = vsel %vm15479_vm1, %v15478_v28, %v2098_v61  ;;  %vm15481_vm9 = vmmov %vm15479_vm1  ;;  %v14933_v21 = vrot.slane %v10183_v6, 1  ;;  %v1787_v48 = vadd.f32 %v1495_v40, %v9564_v32  ;;  %v10195_v46 = vadd.f32 %v9997_v53, %v9915_v19  ;;  %v10209_v19 = vld [vmem:[#allocation3 + $0x1e8] sm:$0xff] }
 0x198   : > { %15480 = vst [vmem:[#allocation82_spill] sm:$0xff] %v10181_v38  ;;  %v10188_v50 = vadd.f32 %v2099_v39, %v1786_v3  ;;  %v2168_v20 = vsel %vm15481_vm9, %v2165_v30, %v2167_v2  ;;  %7828 = vmatpush1.bf16.msra.mxu0 %v14931_v41  ;;  %7860 = vmatpush1.bf16.msra.mxu1 %v14931_v41  ;;  %v4124_v33 = vmul.f32 0.125, %v3996_v59  ;;  %v10204_v30 = vmul.f32 100.0, %v15409_v54  ;;  %v15482_v3 = vld [vmem:[#allocation49_spill] sm:$0xff]  ;;  %vm15485_vm1 = vmmov %vm15473_vm5 }
 0x199   : > { %v10197_v29 = vadd.f32 %v2168_v20, %v1820_v7  ;;  %v1821_v40 = vadd.f32 %v10143_v27, %v15482_v3  ;;  %v14936_v11 = vrot.slane %v10178_v37, 2  ;;  %v15483_v53 = vmov 0.0|0.0   ;;  %v10221_v20 = vld [vmem:[#allocation3 + $0x1d0] sm:$0xff] }
 0x19a   : > { %2723 = vst.msk [vmem:[#allocation3 + $0xa1] sm:$0xff] %vm15473_vm5, %v10188_v50  ;;  %7829 = vmatprep.subr.bf16.mxu0 %v15483_v53  ;;  %7861 = vmatprep.subr.bf16.mxu1 %v15483_v53  ;;  %v4091_v7 = vmul.f32 0.125, %v3963_v22  ;;  %v3997_v59 = vsub.f32 %v3741_v56, %v15382_v35  ;;  %v15484_v28 = vrot.slane %v10106_v31, 1  ;;  %v803_v27 = vadd.s32 168, %v8308_v8  ;;  %vm15487_vm5 = vmmov %vm15476_vm13 }
 0x19b   : > { %2757 = vst.msk [vmem:[#allocation3 + $0x1d9] sm:$0xff] %vm15485_vm1, %v10197_v29  ;;  %v14937_v22 = vrot.slane %v10221_v20, 1  ;;  %v2101_v35 = vsel %vm15481_vm9, %v2098_v61, %v14936_v11  ;;  %v804_v56 = vadd.s32 176, %v8308_v8  ;;  %v10234_v31 = vadd.f32 %v10062_v0, %v10004_v16  ;;  %vm15491_vm1 = vmmov %vm15481_vm9 }
 0x19c   : > { %v10219_v39 = vsel %vm15476_vm13, %v15484_v28, %v14933_v21  ;;  %v2468_v28 = vsel %vm10112_vm3, %v2101_v35, 0.0  ;;  %v965_v21 = vand.u32 15, %v803_v27  ;;  %v14938_v55 = vrot.slane %v10209_v19, 2 }
 0x19d   : > { %v3708_v41 = vadd.f32 %v3516_v17, %v10219_v39  ;;  %v15486_v38 = vmov 1.0|1.0   ;;  %v10244_v17 = vsel %vm15487_vm5, %v3218_v43, %v14937_v22  ;;  %v1660_v16 = vsel %vm10122_vm10, %v10178_v37, 0.0  ;;  %v10262_v22 = vld [vmem:[#allocation3 + $0xb8] sm:$0xff] }
 0x19e   : > { %7830 = vmatpush1.bf16.msra.mxu0 %v15486_v38  ;;  %7862 = vmatpush1.bf16.msra.mxu1 %v15486_v38  ;;  %v10249_v0 = vadd.f32 %v2468_v28, %v1787_v48  ;;  %v972_v61 = vand.u32 15, %v804_v56  ;;  %v3742_v35 = vadd.f32 %v3550_v63, %v10244_v17  ;;  %vm10255_vm13 = vcmp.lt.s32.totalorder %v965_v21, 15  ;;  %v15497_v21 = vld [vmem:[#allocation50_spill] sm:$0xff] }
 0x19f   : > { %7831 = vmatprep.subr.bf16.mxu0 %v15483_v53  ;;  %7863 = vmatprep.subr.bf16.mxu1 %v15483_v53  ;;  %v3964_v27 = vsub.f32 %v3708_v41, %v15402_v42  ;;  %v15488_v11 = vmov 0  ;;  %v2170_v43 = vsel %vm15491_vm1, %v2167_v2, %v14938_v55  ;;  %v10265_v48 = vadd.f32 %v4124_v33, %v10049_v51  ;;  %v10284_v28 = vld [vmem:[#allocation3 + $0x1f0] sm:$0xff] }
 0x1a0   : > { %v15489_v11 = vsel %vm10255_vm13, 4294967295, %v15488_v11  ;;  %v4125_v56 = vmul.f32 0.125, %v3997_v59  ;;  %vm15493_vm9 = vcmask 7168   ;;  %vm10269_vm5 = vcmp.gt.s32.totalorder %v972_v61, 0 }
 0x1a1   : > { %15490 = vst [vmem:[#allocation49_spill] sm:$0xff] %v15489_v11  ;;  %15492 = vst [vmem:[#allocation83_spill] sm:$0xff] %v10265_v48  ;;  %v15494_v42 = vmov 0  ;;  %v2502_v41 = vsel %vm10255_vm13, %v2170_v43, 0.0  ;;  %v3998_v63 = vsub.f32 %v3742_v35, %v15414_v13  ;;  %v10276_v2 = vld [vmem:[#allocation3 + $0xa0] sm:$0xff]  ;;  %v1788_v51 = vadd.f32 %v1660_v16, %v15497_v21 }
 0x1a2   : > { %2724 = vst.msk [vmem:[#allocation3 + $0xa9] sm:$0xff] %vm15493_vm9, %v10249_v0  ;;  %v15495_v42 = vsel %vm10269_vm5, 4294967295, %v15494_v42  ;;  %v1694_v33 = vsel %vm10269_vm5, %v10209_v19, 0.0  ;;  %v10282_v59 = vadd.f32 %v2502_v41, %v1821_v40  ;;  %7832 = vmatpush1.bf16.msra.mxu0 %v15486_v38  ;;  %7864 = vmatpush1.bf16.msra.mxu1 %v15486_v38  ;;  %v10289_v13 = vadd.f32 %v4091_v7, %v10072_v12  ;;  %v10292_v16 = vld [vmem:[#allocation3 + $0x1d8] sm:$0xff]  ;;  %v10298_v43 = vld [vmem:[#allocation3 + $0xc0] sm:$0xff]  ;;  %v10306_v12 = vld [vmem:[%s8350_s22 + $0x2d8] sm:$0xff] }
 0x1a3   : > { %15496 = vst [vmem:[#allocation84_spill] sm:$0xff] %v15495_v42  ;;  %v10295_v35 = vmul.f32 100.0, %v15427_v34  ;;  %7833 = vmatprep.subr.bf16.mxu0 %v15483_v53  ;;  %7865 = vmatprep.subr.bf16.mxu1 %v15483_v53  ;;  %v10303_v41 = vld [vmem:[%s8350_s22 + $0x2d0] sm:$0xff]  ;;  %15500 = vst [vmem:[#allocation86_spill] sm:$0xff] %v10306_v12  ;;  %v4092_v7 = vmul.f32 0.125, %v3964_v27  ;;  %v10311_v61 = vadd.f32 %v10046_v18, %v10015_v23  ;;  %v15501_v40 = vld [vmem:[#allocation51_spill] sm:$0xff] }
 0x1a4   : > { %15498 = vst [vmem:[#allocation50_spill] sm:$0xff] %v10289_v13  ;;  %15499 = vst [vmem:[#allocation85_spill] sm:$0xff] %v10303_v41  ;;  %v1822_v44 = vadd.f32 %v1694_v33, %v15501_v40  ;;  %v10320_v13 = vld [vmem:[%s8350_s22 + $0x2e8] sm:$0xff]  ;;  %v10323_v48 = vld [vmem:[%s8350_s22 + $0x2f0] sm:$0xff]  ;;  %v15508_v23 = vrot.slane %v10276_v2, 1  ;;  %v15509_v18 = vrot.slane %v10183_v6, 1 }
 0x1a5   : > { %vm15502_vm1 = vmmov %vm15493_vm9  ;;  %15503 = vst [vmem:[#allocation51_spill] sm:$0xff] %v10317_v60  ;;  %vm15510_vm10 = vcmask 1046528   ;;  %v10337_v33 = vmul.f32 100.0, %v15423_v45  ;;  %v15511_v55 = vrot.slane %v10262_v22, 2  ;;  %v15512_v10 = vrot.slane %v10178_v37, 2  ;;  %v10349_v6 = vld [vmem:[%s8350_s22 + $0x3d0] sm:$0xff] }
 0x1a6   : > { %2758 = vst.msk [vmem:[#allocation3 + $0x1e1] sm:$0xff] %vm15502_vm1, %v10282_v59  ;;  %15504 = vst [vmem:[#allocation87_spill] sm:$0xff] %v10320_v13  ;;  %v10334_v27 = vsel %vm15510_vm10, %v15509_v18, %v15508_v23  ;;  %v10361_v37 = vadd.f32 %v4125_v56, %v10096_v25  ;;  %v15521_v23 = vrot.slane %v10221_v20, 1  ;;  %7834 = vmatpush1.bf16.msra.mxu0 %v15486_v38  ;;  %v10391_v20 = vmul.f32 100.0, %v9411_v52  ;;  %v15528_v56 = vld [vmem:[#allocation55_spill] sm:$0xff] }
 0x1a7   : > { %15505 = vst [vmem:[#allocation88_spill] sm:$0xff] %v10323_v48  ;;  %vm15506_vm9 = vmmov %vm15502_vm1  ;;  %v3552_v25 = vadd.f32 %v10118_v4, %v10066_v62  ;;  %7835 = vmatprep.subr.bf16.mxu0 %v15483_v53  ;;  %7866 = vmatpush1.bf16.msra.mxu1 %v15486_v38  ;;  %v10412_v62 = vadd.f32 %v4092_v7, %v10156_v5 }
 0x1a8   : > { %1438 = vst.msk [vmem:[#allocation3 + $0x331] sm:$0xff] %vm15506_vm9, %v10303_v41  ;;  %vm15507_vm3 = vmmov %vm15502_vm1  ;;  %vm15513_vm1 = vcmask 1045504   ;;  %v3709_v4 = vadd.f32 %v10195_v46, %v10334_v27  ;;  %7867 = vmatprep.subr.bf16.mxu1 %v15483_v53  ;;  %v10428_v46 = vadd.f32 %v10132_v14, %v10108_v15  ;;  %v805_v15 = vadd.s32 184, %v8308_v8  ;;  %v684_v14 = vpop.permute.xlu0 %683 }
 0x1a9   : > { %1439 = vst.msk [vmem:[#allocation3 + $0x339] sm:$0xff] %vm15507_vm3, %v10306_v12  ;;  %v2103_v41 = vsel %vm15513_vm1, %v15512_v10, %v15511_v55  ;;  %v10346_v12 = vld [vmem:[%s8350_s22 + $0x2f8] sm:$0xff]  ;;  %15515 = vst [vmem:[#allocation90_spill] sm:$0xff] %v10349_v6  ;;  %v4126_v55 = vmul.f32 0.125, %v3998_v63  ;;  %v15520_v10 = vrot.slane %v10292_v16, 1  ;;  %vm15522_vm1 = vcmask 1046528  }
 0x1aa   : > { %15514 = vst [vmem:[#allocation89_spill] sm:$0xff] %v10346_v12  ;;  %vm15517_vm10 = vmmov %vm15507_vm3  ;;  %v10370_v36 = vadd.f32 %v2103_v41, %v1788_v51  ;;  %v1789_v63 = vadd.f32 %v10262_v22, %v15528_v56  ;;  %v15529_v51 = vrot.slane %v10284_v28, 2  ;;  %v15530_v41 = vrot.slane %v10209_v19, 2  ;;  %v2854_v19 = vld [vmem:[#allocation3 + $0xa8] sm:$0xff]  ;;  %7836 = vmatpush1.bf16.msra.mxu0 %v15486_v38 }
 0x1ab   : > { %1440 = vst.msk [vmem:[#allocation3 + $0x341] sm:$0xff] %vm15517_vm10, %v10317_v60  ;;  %vm15518_vm9 = vmmov %vm15507_vm3  ;;  %v10368_v18 = vsel %vm15522_vm1, %v15521_v23, %v15520_v10  ;;  %v10377_v60 = vld [vmem:[%s8350_s22 + $0x3e8] sm:$0xff]  ;;  %vm15531_vm1 = vcmask 1045504   ;;  %v10403_v23 = vld [vmem:[%s8350_s22 + $0x3f8] sm:$0xff]  ;;  %v3155_v7 = vrot.slane %v2854_v19, 1  ;;  %7837 = vmatprep.subr.bf16.mxu0 %v15483_v53  ;;  %7868 = vmatpush1.bf16.msra.mxu1 %v15486_v38 }
 0x1ac   : > { %1441 = vst.msk [vmem:[#allocation3 + $0x349] sm:$0xff] %vm15507_vm3, %v10320_v13  ;;  %15519 = vst [vmem:[#allocation92_spill] sm:$0xff] %v10361_v37  ;;  %v10374_v13 = vld [vmem:[%s8350_s22 + $0x3e0] sm:$0xff]  ;;  %v2172_v10 = vsel %vm15531_vm1, %v15530_v41, %v15529_v51  ;;  %v3743_v5 = vadd.f32 %v10234_v31, %v10368_v18  ;;  %v15542_v31 = vrot.slane %v10262_v22, 2  ;;  %v806_v22 = vadd.s32 192, %v8308_v8  ;;  %7869 = vmatprep.subr.bf16.mxu1 %v15483_v53 }
 0x1ad   : > { %1442 = vst.msk [vmem:[#allocation3 + $0x351] sm:$0xff] %vm15518_vm9, %v10323_v48  ;;  %15523 = vst [vmem:[#allocation93_spill] sm:$0xff] %v10374_v13  ;;  %v10380_v48 = vld [vmem:[%s8350_s22 + $0x3f0] sm:$0xff]  ;;  %v10418_v51 = vadd.f32 %v2172_v10, %v1822_v44  ;;  %v10434_v44 = vadd.f32 %v4126_v55, %v10186_v58  ;;  %v15544_v58 = vrot.slane %v10276_v2, 1  ;;  %v3965_v2 = vsub.f32 %v3709_v4, %v15409_v54 }
 0x1ae   : > { %15524 = vst [vmem:[#allocation94_spill] sm:$0xff] %v10377_v60  ;;  %15525 = vst [vmem:[#allocation95_spill] sm:$0xff] %v10380_v48  ;;  %v15539_v10 = vld [vmem:[#allocation56_spill] sm:$0xff]  ;;  %v986_v11 = vand.u32 15, %v806_v22  ;;  %v1662_v54 = vsel %vm10269_vm5, %v10298_v43, 0.0  ;;  %7838 = vmatpush1.bf16.msra.mxu0 %v15486_v38  ;;  %v15557_v4 = vrot.slane %v10284_v28, 2 }
 0x1af   : > { %vm15526_vm10 = vmmov %vm15507_vm3  ;;  %1470 = vst.msk [vmem:[#allocation3 + $0x459] sm:$0xff] %vm15507_vm3, %v10349_v6  ;;  %v10431_v6 = vmul.f32 100.0, %v9458_v57  ;;  %v1823_v41 = vadd.f32 %v10284_v28, %v15539_v10  ;;  %7839 = vmatprep.subr.bf16.mxu0 %v15483_v53  ;;  %7870 = vmatpush1.bf16.msra.mxu1 %v15486_v38  ;;  %vm15575_vm5 = vcmask 1045504  }
 0x1b0   : > { %1443 = vst.msk [vmem:[#allocation3 + $0x359] sm:$0xff] %vm15526_vm10, %v10346_v12  ;;  %vm15527_vm9 = vmmov %vm15507_vm3  ;;  %v2893_v12 = vld [vmem:[#allocation3 + $0x1e0] sm:$0xff]  ;;  %7871 = vmatprep.subr.bf16.mxu1 %v15483_v53 }
 0x1b1   : > { %1471 = vst.msk [vmem:[#allocation3 + $0x461] sm:$0xff] %vm15527_vm9, %v10352_v47  ;;  %15532 = vst [vmem:[#allocation55_spill] sm:$0xff] %v10403_v23  ;;  %v3224_v37 = vrot.slane %v2893_v12, 1 }
 0x1b2   : > { %vm15533_vm10 = vmmov %vm15507_vm3  ;;  %1473 = vst.msk [vmem:[#allocation3 + $0x471] sm:$0xff] %vm15507_vm3, %v10377_v60  ;;  %v15547_v60 = vrot.slane %v10292_v16, 1  ;;  %v15551_v16 = vmov 0  ;;  %7840 = vmatpush1.bf16.msra.mxu0 %v15486_v38 }
 0x1b3   : > { %1472 = vst.msk [vmem:[#allocation3 + $0x469] sm:$0xff] %vm15533_vm10, %v10374_v13  ;;  %vm15534_vm9 = vmmov %vm15507_vm3  ;;  %7841 = vmatprep.subr.bf16.mxu0 %v15483_v53  ;;  %7872 = vmatpush1.bf16.msra.mxu1 %v15486_v38 }
 0x1b4   : > { %1474 = vst.msk [vmem:[#allocation3 + $0x479] sm:$0xff] %vm15534_vm9, %v10380_v48  ;;  %15535 = vst [vmem:[#allocation96_spill] sm:$0xff] %v10412_v62  ;;  %vm15543_vm9 = vcmask 1045504   ;;  %7873 = vmatprep.subr.bf16.mxu1 %v15483_v53 }
 0x1b5   : > { %vm15536_vm1 = vmmov %vm15507_vm3  ;;  %15538 = vst [vmem:[#allocation97_spill] sm:$0xff] %v10434_v44  ;;  %v3553_v44 = vadd.f32 %v10163_v1, %v10137_v49  ;;  %v3999_v49 = vsub.f32 %v3743_v5, %v15427_v34 }
 0x1b6   : > { %2725 = vst.msk [vmem:[#allocation3 + $0xb1] sm:$0xff] %vm15536_vm1, %v10370_v36  ;;  %vm15537_vm10 = vmmov %vm15536_vm1  ;;  %7842 = vmatpush1.bf16.msra.mxu0 %v15486_v38 }
 0x1b7   : > { %1475 = vst.msk [vmem:[#allocation3 + $0x481] sm:$0xff] %vm15537_vm10, %v10403_v23  ;;  %vm15540_vm3 = vmmov %vm15536_vm1  ;;  %v15541_v23 = vrot.slane %v10298_v43, 2  ;;  %vm15545_vm1 = vcmask 1046528   ;;  %vm15546_vm10 = vcmask 138240   ;;  %7843 = vmatprep.subr.bf16.mxu0 %v15483_v53  ;;  %7874 = vmatpush1.bf16.msra.mxu1 %v15486_v38 }
 0x1b8   : > { %2759 = vst.msk [vmem:[#allocation3 + $0x1e9] sm:$0xff] %vm15540_vm3, %v10418_v51  ;;  %v10450_v55 = vsel %vm15545_vm1, %v15544_v58, %v3155_v7  ;;  %vm15548_vm3 = vmmov %vm15545_vm1  ;;  %7875 = vmatprep.subr.bf16.mxu1 %v15483_v53 }
 0x1b9   : > { %v2105_v19 = vsel %vm15543_vm9, %v15542_v31, %v15541_v23  ;;  %v10457_v23 = vld [vmem:[#allocation3 + $0x1f8] sm:$0xff]  ;;  %v691_v31 = vrot.slane %v684_v14, 7  ;;  %v3710_v58 = vadd.f32 %v10311_v61, %v10450_v55  ;;  %v10472_v13 = vsel %vm15548_vm3, %v15547_v60, %v3224_v37 }
 0x1ba   : > { %v2470_v62 = vsel %vm10255_vm13, %v2105_v19, 0.0  ;;  %v979_v19 = vand.u32 15, %v805_v15  ;;  %v14973_v61 = vrot.slane %v10457_v23, 2  ;;  %v10486_v60 = vmul.f32 100.0, %v15458_v26  ;;  %v10506_v15 = vld [vmem:[#allocation3 + $0xc8] sm:$0xff]  ;;  %7844 = vmatpush1.bf16.msra.mxu0 %v15486_v38 }
 0x1bb   : > { %v10466_v1 = vadd.f32 %v2470_v62, %v1789_v63  ;;  %v695_v48 = vsel %vm15546_vm10, %v691_v31, %v684_v14  ;;  %v3966_v12 = vsub.f32 %v3710_v58, %v15423_v45  ;;  %v3744_v63 = vadd.f32 %v3552_v25, %v10472_v13  ;;  %v15559_v31 = vld [vmem:[#allocation58_spill] sm:$0xff]  ;;  %7845 = vmatprep.subr.bf16.mxu0 %v15483_v53 }
 0x1bc   : > { %703 = vst.msk [vmem:[#allocation2] sm:$0x7] %vm8302_vm4, %v695_v48  ;;  %vm15550_vm9 = vcmask 7168   ;;  %vm10490_vm1 = vcmp.lt.s32.totalorder %v979_v19, 15  ;;  %v4093_v48 = vmul.f32 0.125, %v3965_v2  ;;  %vm10497_vm10 = vcmp.gt.s32.totalorder %v986_v11, 0  ;;  %v440_v19 = vpop.permute.xlu0 %439  ;;  %7876 = vmatpush1.bf16.msra.mxu1 %v15486_v38 }
 0x1bd   : > { %v10483_v62 = vld [vmem:[#allocation3 + $0xb0] sm:$0xff]  ;;  %2726 = vst.msk [vmem:[#allocation3 + $0xb9] sm:$0xff] %vm15550_vm9, %v10466_v1  ;;  %v15552_v16 = vsel %vm10490_vm1, 4294967295, %v15551_v16  ;;  %v15554_v25 = vmov 0  ;;  %vm15558_vm3 = vcmask 1045504   ;;  %v4127_v14 = vmul.f32 0.125, %v3999_v49  ;;  %7877 = vmatprep.subr.bf16.mxu1 %v15483_v53 }
 0x1be   : > { %15553 = vst [vmem:[#allocation56_spill] sm:$0xff] %v15552_v16  ;;  %v14974_v45 = vrot.slane %v10483_v62, 1  ;;  %v15555_v25 = vsel %vm10497_vm10, 4294967295, %v15554_v25  ;;  %v2174_v5 = vsel %vm15558_vm3, %v15557_v4, %v14973_v61  ;;  %v1790_v2 = vadd.f32 %v1662_v54, %v15559_v31  ;;  %7846 = vmatpush1.bf16.msra.mxu0 %v15486_v38 }
 0x1bf   : > { %15556 = vst [vmem:[#allocation98_spill] sm:$0xff] %v15555_v25  ;;  %v10509_v22 = vld [vmem:[#allocation3 + $0x1e8] sm:$0xff]  ;;  %v10514_v11 = vadd.f32 %v10219_v39, %v10188_v50  ;;  %v2504_v58 = vsel %vm10490_vm1, %v2174_v5, 0.0  ;;  %vm15560_vm9 = vcmask 1046528   ;;  %v10525_v49 = vmul.f32 100.0, %v15472_v9  ;;  %v686_v50 = vpop.permute.xlu1 %685  ;;  %7847 = vmatprep.subr.bf16.mxu0 %v15483_v53 }
 0x1c0   : > { %v10521_v28 = vsel %vm15560_vm9, %v3155_v7, %v14974_v45  ;;  %v14977_v4 = vrot.slane %v10509_v22, 1  ;;  %v10527_v61 = vadd.f32 %v2504_v58, %v1823_v41  ;;  %v4094_v39 = vmul.f32 0.125, %v3966_v12  ;;  %v10535_v45 = vld [vmem:[#allocation3 + $0x200] sm:$0xff]  ;;  %vm15562_vm3 = vmmov %vm15560_vm9  ;;  %7878 = vmatpush1.bf16.msra.mxu1 %v15486_v38 }
 0x1c1   : > { %v4000_v54 = vsub.f32 %v3744_v63, %v9411_v52  ;;  %v1696_v5 = vsel %vm10497_vm10, %v10457_v23, 0.0  ;;  %v692_v41 = vrot.slane %v686_v50, 7  ;;  %v10540_v58 = vadd.f32 %v4093_v48, %v10204_v30  ;;  %7879 = vmatprep.subr.bf16.mxu1 %v15483_v53 }
 0x1c2   : > { %v3711_v12 = vadd.f32 %v10428_v46, %v10521_v28  ;;  %v10547_v52 = vsel %vm15562_vm3, %v3224_v37, %v14977_v4  ;;  %vm15563_vm9 = vcmask 7168   ;;  %v10553_v63 = vadd.f32 %v4127_v14, %v10295_v35  ;;  %v15569_v35 = vld [vmem:[#allocation59_spill] sm:$0xff]  ;;  %7848 = vmatpush1.bf16.msra.mxu0 %v15486_v38 }
 0x1c3   : > { %15561 = vst [vmem:[#allocation58_spill] sm:$0xff] %v10540_v58  ;;  %2760 = vst.msk [vmem:[#allocation3 + $0x1f1] sm:$0xff] %vm15563_vm9, %v10527_v61  ;;  %v3745_v7 = vadd.f32 %v3553_v44, %v10547_v52  ;;  %v10558_v30 = vadd.f32 %v10244_v17, %v10197_v29  ;;  %v15565_v46 = vrot.slane %v10506_v15, 2  ;;  %v15566_v48 = vrot.slane %v10298_v43, 2  ;;  %v707_v42 = vld [vmem:[#allocation2] sm:$0x7]  ;;  %v444_v58 = vpop.permute.xlu0 %443  ;;  %v442_v29 = vpop.permute.xlu1 %441  ;;  %7849 = vmatprep.subr.bf16.mxu0 %v15483_v53 }
 0x1c4   : > { %15564 = vst [vmem:[#allocation99_spill] sm:$0xff] %v10553_v63  ;;  %vm15567_vm3 = vcmask 1045504   ;;  %vm15568_vm13 = vcmask 138240   ;;  %v10566_v47 = vld [vmem:[#allocation3 + $0xb8] sm:$0xff]  ;;  %v1824_v14 = vadd.f32 %v1696_v5, %v15569_v35  ;;  %v14984_v44 = vrot.slane %v10535_v45, 2  ;;  %715 = vrot.lane.b32.xlu0 %v707_v42, %s8254_s23  ;;  %7880 = vmatpush1.bf16.msra.mxu1 %v15486_v38 }
 0x1c5   : > { %v2107_v37 = vsel %vm15567_vm3, %v15566_v48, %v15565_v46  ;;  %v696_v4 = vsel %vm15568_vm13, %v692_v41, %v686_v50  ;;  %v10577_v17 = vadd.f32 %v4094_v39, %v10337_v33  ;;  %v4128_v43 = vmul.f32 0.125, %v4000_v54  ;;  %v10594_v54 = vld [vmem:[#allocation3 + $0xd0] sm:$0xff]  ;;  %v10684_v46 = vld [vmem:[#allocation3 + $0x208] sm:$0xff]  ;;  %7881 = vmatprep.subr.bf16.mxu1 %v15483_v53 }
 0x1c6   : > { %v10569_v63 = vadd.f32 %v2107_v37, %v1790_v2  ;;  %704 = vst.msk [vmem:[#allocation2 + $0x3] sm:$0x7] %vm8302_vm4, %v696_v4  ;;  %v14985_v50 = vrot.slane %v10566_v47, 1  ;;  %v10581_v2 = vmul.f32 100.0, %v15475_v24  ;;  %vm15571_vm13 = vcmask 916480   ;;  %7850 = vmatpush1.bf16.msra.mxu0 %v15486_v38 }
 0x1c7   : > { %15570 = vst [vmem:[#allocation59_spill] sm:$0xff] %v10577_v17  ;;  %v456_v5 = vsel %vm15571_vm13, %v440_v19, %v442_v29  ;;  %vm15572_vm9 = vmmov %vm15571_vm13  ;;  %v3967_v4 = vsub.f32 %v3711_v12, %v9458_v57  ;;  %vm15573_vm3 = vcmask 7168   ;;  %v15574_v33 = vrot.slane %v10457_v23, 2  ;;  %v15578_v12 = vld [vmem:[#allocation31_spill] sm:$0xff]  ;;  %7851 = vmatprep.subr.bf16.mxu0 %v15483_v53 }
 0x1c8   : > { %v457_v41 = vsel %vm15572_vm9, %v442_v29, %v444_v58  ;;  %2727 = vst.msk [vmem:[#allocation3 + $0xc1] sm:$0xff] %vm15573_vm3, %v10569_v63  ;;  %v472_v19 = vsel %vm8896_vm15, %v456_v5, 0.0  ;;  %v4001_v57 = vsub.f32 %v3745_v7, %v15458_v26  ;;  %v1791_v37 = vadd.f32 %v10506_v15, %v15578_v12  ;;  %v448_v29 = vpop.permute.xlu0 %447  ;;  %740 = vrot.lane.b32.xlu0 %v707_v42, %s8255_s24  ;;  %v446_v26 = vpop.permute.xlu1 %445  ;;  %vm15583_vm13 = vmmov %vm15572_vm9 }
 0x1c9   : > { %v2176_v39 = vsel %vm15575_vm5, %v15574_v33, %v14984_v44  ;;  %v473_v58 = vsel %vm8900_vm0, %v457_v41, 0.0  ;;  %v15579_v33 = vrot.slane %v10483_v62, 1  ;;  %vm15580_vm5 = vcmask 1046528   ;;  %vm15584_vm9 = vmmov %vm15573_vm3  ;;  %7882 = vmatpush1.bf16.msra.mxu1 %v15486_v38 }
 0x1ca   : > { %v10605_v23 = vcombine.low %v472_v19, %v473_v58  ;;  %v3521_v5 = vadd.f32 %v10334_v27, %v10249_v0  ;;  %v10616_v41 = vadd.f32 %v2176_v39, %v1824_v14  ;;  %v10621_v7 = vadd.f32 %v4128_v43, %v10391_v20  ;;  %v10623_v19 = vld [vmem:[#allocation3 + $0x1f0] sm:$0xff]  ;;  %v15582_v58 = vld [vmem:[#allocation39_spill] sm:$0xff]  ;;  %v15587_v14 = vld [vmem:[#allocation25_spill] sm:$0xff]  ;;  %7883 = vmatprep.subr.bf16.mxu1 %v15483_v53 }
 0x1cb   : > { %v10612_v44 = vsel %vm15580_vm5, %v15579_v33, %v14985_v50  ;;  %v10626_v62 = vmul.f32 100.0, %v9564_v32  ;;  %v10630_v33 = vadd.f32 %v10535_v45, %v15582_v58  ;;  %v14989_v0 = vrot.slane %v10594_v54, 2  ;;  %7852 = vmatpush1.bf16.msra.mxu0 %v15486_v38 }
 0x1cc   : > { %15581 = vst [vmem:[#allocation23_spill] sm:$0xff] %v10621_v7  ;;  %v458_v27 = vsel %vm15583_vm13, %v446_v26, %v448_v29  ;;  %v4095_v42 = vmul.f32 0.125, %v3967_v4  ;;  %v3712_v20 = vadd.f32 %v10514_v11, %v10612_v44  ;;  %2761 = vst.msk [vmem:[#allocation3 + $0x1f9] sm:$0xff] %vm15584_vm9, %v10616_v41  ;;  %v4129_v43 = vmul.f32 0.125, %v4001_v57  ;;  %v567_v34 = vpop.permute.xlu0 %566  ;;  %7853 = vmatprep.subr.bf16.mxu0 %v15483_v53 }
 0x1cd   : > { %v10643_v39 = vadd.f32 %v10368_v18, %v10282_v59  ;;  %v1664_v26 = vsel %vm10497_vm10, %v10594_v54, 0.0  ;;  %v15585_v11 = vrot.slane %v10506_v15, 2  ;;  %vm15586_vm3 = vcmask 1045504   ;;  %v708_v50 = vld [vmem:[#allocation2 + $0x3] sm:$0x7]  ;;  %7884 = vmatpush1.bf16.msra.mxu1 %v15486_v38 }
 0x1ce   : > { %v521_v57 = vrot.slane %v10605_v23, %v15587_v14  ;;  %v15588_v59 = vrot.slane %v10623_v19, 1  ;;  %v15589_v18 = vrot.slane %v10509_v22, 1  ;;  %v807_v15 = vadd.s32 200, %v8308_v8  ;;  %717 = vrot.lane.b32.xlu1 %v708_v50, %s8254_s23  ;;  %v450_v23 = vpop.permute.xlu1 %449  ;;  %7885 = vmatprep.subr.bf16.mxu1 %v15483_v53 }
 0x1cf   : > { %v2109_v4 = vsel %vm15586_vm3, %v15585_v11, %v14989_v0  ;;  %v15590_v11 = vld [vmem:[#allocation41_spill] sm:$0xff]  ;;  %v474_v0 = vsel %vm8896_vm15, %v458_v27, 0.0  ;;  %v459_v16 = vsel %vm15583_vm13, %v448_v29, %v450_v23  ;;  %v10680_v17 = vadd.f32 %v4095_v42, %v10431_v6  ;;  %v15593_v29 = vld [vmem:[#allocation40_spill] sm:$0xff]  ;;  %vm15594_vm15 = vmmov %vm15584_vm9  ;;  %7854 = vmatpush1.bf16.msra.mxu0 %v15486_v38 }
 0x1d0   : > { %v10661_v25 = vsel %vm15580_vm5, %v15589_v18, %v15588_v59  ;;  %v2472_v7 = vsel %vm10490_vm1, %v2109_v4, 0.0  ;;  %5071 = vperm.xlu0 %7972, %v15590_v11   ;;  %v10673_v59 = vld [vmem:[#allocation3 + $0xc0] sm:$0xff]  ;;  %v808_v4 = vadd.s32 208, %v8308_v8  ;;  %v3968_v11 = vsub.f32 %v3712_v20, %v15472_v9  ;;  %v571_v27 = vpop.permute.xlu0 %570  ;;  %7855 = vmatprep.subr.bf16.mxu0 %v15483_v53 }
 0x1d1   : > { %v3746_v22 = vadd.f32 %v10558_v30, %v10661_v25  ;;  %v10675_v18 = vadd.f32 %v2472_v7, %v1791_v37  ;;  %15591 = vst [vmem:[#allocation24_spill] sm:$0xff] %v10680_v17  ;;  %v14993_v58 = vrot.slane %v10673_v59, 1  ;;  %v475_v30 = vsel %vm8900_vm0, %v459_v16, 0.0  ;;  %vm15596_vm0 = vmmov %vm15580_vm5  ;;  %v15597_v20 = vld [vmem:[#allocation44_spill] sm:$0xff]  ;;  %7886 = vmatpush1.bf16.msra.mxu1 %v15486_v38 }
 0x1d2   : > { %v10691_v37 = vadd.f32 %v4129_v43, %v10486_v60  ;;  %v10694_v7 = vadd.f32 %v1664_v26, %v15593_v29  ;;  %v993_v9 = vand.u32 15, %v807_v15  ;;  %v529_v6 = vcombine.low %v474_v0, %v475_v30  ;;  %742 = vrot.lane.b32.xlu1 %v708_v50, %s8255_s24  ;;  %v569_v0 = vpop.permute.xlu1 %568  ;;  %vm15606_vm13 = vmmov %vm15596_vm0  ;;  %7887 = vmatprep.subr.bf16.mxu1 %v15483_v53  ;;  %v15711_v17 = vld [vmem:[#allocation20_spill] sm:$0xff] }
 0x1d3   : > { %2728 = vst.msk [vmem:[#allocation3 + $0xc9] sm:$0xff] %vm15594_vm15, %v10675_v18  ;;  %v4002_v42 = vsub.f32 %v3746_v22, %v15475_v24  ;;  %v15595_v16 = vrot.slane %v10566_v47, 1  ;;  %v1000_v48 = vand.u32 15, %v808_v4  ;;  %v528_v43 = vrot.slane %v521_v57, %v15587_v14  ;;  %v10712_v24 = vld [vmem:[#allocation3 + $0x1f8] sm:$0xff]  ;;  %v15622_v57 = vld [vmem:[#allocation61_spill] sm:$0xff]  ;;  %7856 = vmatpush1.bf16.msra.mxu0 %v15486_v38 }
 0x1d4   : > { %15592 = vst [vmem:[#allocation31_spill] sm:$0xff] %v10691_v37  ;;  %5076 = vperm.xlu0 %7972, %v15597_v20   ;;  %v10716_v47 = vadd.f32 %v10450_v55, %v10370_v36  ;;  %v14995_v15 = vrot.slane %v10684_v46, 2  ;;  %vm15598_vm9 = vcmask 900096   ;;  %v4096_v50 = vmul.f32 0.125, %v3968_v11  ;;  %v575_v11 = vpop.permute.xlu0 %574  ;;  %7889 = vmatprep.subr.bf16.mxu0 %v15483_v53 }
 0x1d5   : > { %v10705_v60 = vsel %vm15596_vm0, %v15595_v16, %v14993_v58  ;;  %v583_v23 = vsel %vm15598_vm9, %v567_v34, %v569_v0  ;;  %vm15599_vm3 = vmmov %vm15598_vm9  ;;  %v14992_v4 = vrot.slane %v10712_v24, 1  ;;  %vm10729_vm5 = vcmp.lt.s32.totalorder %v993_v9, 15  ;;  %v15610_v9 = vld [vmem:[#allocation26_spill] sm:$0xff]  ;;  %7888 = vmatpush1.bf16.msra.mxu1 %v15486_v38 }
 0x1d6   : > { %v3713_v26 = vadd.f32 %v3521_v5, %v10705_v60  ;;  %v584_v22 = vsel %vm15599_vm3, %v569_v0, %v571_v27  ;;  %v536_v5 = vrot.slane %v529_v6, %v15587_v14  ;;  %v599_v30 = vsel %vm8972_vm2, %v583_v23, 0.0  ;;  %4346 = vperm.xlu1 %7973, %v15610_v9   ;;  %v15611_v23 = vld [vmem:[#allocation7_spill] sm:$0xff]  ;;  %vm15614_vm9 = vmmov %vm15599_vm3  ;;  %7921 = vmatprep.subr.bf16.mxu1 %v15483_v53 }
 0x1d7   : > { %v600_v55 = vsel %vm8980_vm14, %v584_v22, 0.0  ;;  %v15602_v16 = vmov 0  ;;  %v4130_v27 = vmul.f32 0.125, %v4002_v42  ;;  %v15605_v6 = vrot.slane %v10623_v19, 1  ;;  %v573_v22 = vpop.permute.xlu1 %572  ;;  %vm15620_vm3 = vmmov %vm15606_vm13 }
 0x1d8   : > { %v15603_v16 = vsel %vm10729_vm5, 4294967295, %v15602_v16  ;;  %v641_v34 = vcombine.low %v599_v30, %v600_v55  ;;  %vm10741_vm15 = vcmp.gt.s32.totalorder %v1000_v48, 0  ;;  %v15607_v0 = vmov 0  ;;  %5081 = vperm.xlu0 %7972, %v15611_v23  }
 0x1d9   : > { %15604 = vst [vmem:[#allocation25_spill] sm:$0xff] %v15603_v16  ;;  %v10739_v20 = vsel %vm15606_vm13, %v15605_v6, %v14992_v4  ;;  %v15608_v0 = vsel %vm10741_vm15, 4294967295, %v15607_v0  ;;  %v3969_v42 = vsub.f32 %v3713_v26, %v9564_v32  ;;  %v3875_v19 = vmul.f32 100.0, %v15482_v3  ;;  %v8232_v4 = vld [vmem:[%s8291_s15 + $0x4] sm:$0x3]  ;;  %vm15621_vm13 = vmmov %vm15614_vm9 }
 0x1da   : > { %15609 = vst [vmem:[#allocation41_spill] sm:$0xff] %v15608_v0  ;;  %v3747_v30 = vadd.f32 %v10643_v39, %v10739_v20  ;;  %v15612_v48 = vrot.slane %v10535_v45, 2  ;;  %vm15613_vm0 = vcmask 1045504   ;;  %v648_v6 = vrot.slane %v641_v34, %v15587_v14  ;;  %v10760_v58 = vld [vmem:[#allocation3 + $0xc8] sm:$0xff]  ;;  %v1501_v39 = vld [vmem:[#allocation3 + $0xd8] sm:$0xff] }
 0x1db   : > { %v585_v9 = vsel %vm15614_vm9, %v573_v22, %v575_v11  ;;  %v550_v23 = vadd.f32 %v8232_v4, %v528_v43  ;;  %v543_v45 = vrot.slane %v536_v5, %v15587_v14  ;;  %v14994_v34 = vrot.slane %v10760_v58, 1  ;;  %v15617_v5 = vld [vmem:[#allocation9_spill] sm:$0xff]  ;;  %vm15633_vm9 = vmmov %vm15613_vm0 }
 0x1dc   : > { %v2178_v55 = vsel %vm15613_vm0, %v15612_v48, %v14995_v15  ;;  %v4003_v26 = vsub.f32 %v3747_v30, %v15482_v3  ;;  %v1698_v43 = vsel %vm10741_vm15, %v10684_v46, 0.0  ;;  %v10774_v4 = vadd.f32 %v4096_v50, %v10525_v49  ;;  %4351 = vperm.xlu1 %7973, %v15617_v5   ;;  %v15618_v30 = vld [vmem:[#allocation22_spill] sm:$0xff] }
 0x1dd   : > { %v2506_v32 = vsel %vm10729_vm5, %v2178_v55, 0.0  ;;  %v10777_v22 = vadd.f32 %v4130_v27, %v10581_v2  ;;  %v10784_v3 = vadd.f32 %v10472_v13, %v10418_v51  ;;  %5086 = vperm.xlu0 %7972, %v15618_v30   ;;  %v577_v55 = vpop.permute.xlu1 %576  ;;  %v601_v49 = vsel %vm8972_vm2, %v585_v9, 0.0  ;;  %v10798_v51 = vld [vmem:[#allocation3 + $0x210] sm:$0xff] }
 0x1de   : > { %15615 = vst [vmem:[#allocation40_spill] sm:$0xff] %v10774_v4  ;;  %v10780_v48 = vadd.f32 %v2506_v32, %v10630_v33  ;;  %v4097_v2 = vmul.f32 0.125, %v3969_v42  ;;  %v15619_v33 = vrot.slane %v10673_v59, 1  ;;  %v2110_v13 = vrot.slane %v1501_v39, 2  ;;  %v10808_v42 = vld [vmem:[#allocation3 + $0xe0] sm:$0xff] }
 0x1df   : > { %15616 = vst [vmem:[#allocation44_spill] sm:$0xff] %v10777_v22  ;;  %v586_v27 = vsel %vm15621_vm13, %v575_v11, %v577_v55  ;;  %v655_v32 = vrot.slane %v648_v6, %v15587_v14  ;;  %v10803_v5 = vmul.f32 100.0, %v15497_v21  ;;  %v1826_v9 = vadd.f32 %v1698_v43, %v15622_v57  ;;  %v10815_v11 = vld [vmem:[%s8291_s15 + $0x6] sm:$0x3] }
 0x1e0   : > { %v10796_v50 = vsel %vm15620_vm3, %v15619_v33, %v14994_v34  ;;  %vm15623_vm2 = vcmask 7168   ;;  %v602_v59 = vsel %vm8980_vm14, %v586_v27, 0.0  ;;  %15624 = vst [vmem:[#allocation28_spill] sm:$0xff] %v10815_v11  ;;  %v10818_v6 = vadd.f32 %v10815_v11, %v543_v45  ;;  %v15626_v45 = vld [vmem:[#allocation21_spill] sm:$0xff]  ;;  %vm15635_vm3 = vmmov %vm15613_vm0 }
 0x1e1   : > { %2762 = vst.msk [vmem:[#allocation3 + $0x201] sm:$0xff] %vm15623_vm2, %v10780_v48  ;;  %v4131_v30 = vmul.f32 0.125, %v4003_v26  ;;  %v15625_v43 = vrot.slane %v10594_v54, 2  ;;  %v656_v33 = vcombine.low %v601_v49, %v602_v59  ;;  %v3714_v34 = vadd.f32 %v10716_v47, %v10796_v50  ;;  %4356 = vperm.xlu1 %7973, %v15626_v45   ;;  %v15627_v26 = vld [vmem:[#allocation60_spill] sm:$0xff]  ;;  %v15629_v49 = vld [vmem:[#allocation42_spill] sm:$0xff]  ;;  %vm15631_vm14 = vmmov %vm15623_vm2 }
 0x1e2   : > { %v2179_v36 = vrot.slane %v10798_v51, 2  ;;  %5091 = vperm.xlu0 %7972, %v15627_v26   ;;  %v10834_v54 = vadd.f32 %v4097_v2, %v10626_v62  ;;  %v10837_v27 = vmul.f32 100.0, %v15501_v40  ;;  %v1793_v59 = vadd.f32 %v1501_v39, %v15629_v49  ;;  %v10855_v45 = vld [vmem:[#allocation3 + $0x218] sm:$0xff]  ;;  %vm15639_vm13 = vmmov %vm15623_vm2 }
 0x1e3   : > { %v2111_v55 = vsel %vm15613_vm0, %v15625_v43, %v2110_v13  ;;  %v2112_v47 = vrot.slane %v10808_v42, 2  ;;  %v10847_v43 = vadd.f32 %v10521_v28, %v10466_v1  ;;  %v15632_v62 = vrot.slane %v10684_v46, 2 }
 0x1e4   : > { %v10827_v15 = vadd.f32 %v2111_v55, %v10694_v7  ;;  %15628 = vst [vmem:[#allocation29_spill] sm:$0xff] %v10834_v54  ;;  %v10841_v7 = vadd.f32 %v655_v32, %v550_v23  ;;  %v10850_v55 = vmul.f32 100.0, %v15528_v56  ;;  %v10859_v23 = vadd.f32 %v4131_v30, %v3875_v19  ;;  %v1503_v30 = vld [vmem:[#allocation3 + $0xe8] sm:$0xff] }
 0x1e5   : > { %v2180_v2 = vsel %vm15633_vm9, %v15632_v62, %v2179_v36  ;;  %v1666_v1 = vsel %vm10741_vm15, %v10808_v42, 0.0  ;;  %v2113_v28 = vsel %vm15635_vm3, %v2110_v13, %v2112_v47  ;;  %v663_v46 = vrot.slane %v656_v33, %v15587_v14  ;;  %v15637_v62 = vld [vmem:[#allocation52_spill] sm:$0xff]  ;;  %v15638_v13 = vld [vmem:[#allocation65_spill] sm:$0xff] }
 0x1e6   : > { %15630 = vst [vmem:[#allocation26_spill] sm:$0xff] %v10841_v7  ;;  %2729 = vst.msk [vmem:[#allocation3 + $0xd1] sm:$0xff] %vm15631_vm14, %v10827_v15  ;;  %v10861_v39 = vadd.f32 %v2180_v2, %v1826_v9  ;;  %v3970_v32 = vsub.f32 %v3714_v34, %v15497_v21  ;;  %v2474_v26 = vsel %vm10729_vm5, %v2113_v28, 0.0  ;;  %v809_v19 = vadd.s32 216, %v8308_v8  ;;  %v15636_v9 = vld [vmem:[#allocation30_spill] sm:$0xff]  ;;  %5096 = vperm.xlu0 %7972, %v15637_v62  }
 0x1e7   : > { %15634 = vst [vmem:[#allocation7_spill] sm:$0xff] %v10859_v23  ;;  %4361 = vperm.xlu1 %7973, %v15636_v9   ;;  %v1827_v2 = vadd.f32 %v10798_v51, %v15638_v13  ;;  %v10880_v21 = vadd.f32 %v2474_v26, %v1793_v59  ;;  %v810_v34 = vadd.s32 224, %v8308_v8  ;;  %v2181_v33 = vrot.slane %v10855_v45, 2  ;;  %v15640_v9 = vld [vmem:[#allocation47_spill] sm:$0xff]  ;;  %v10906_v23 = vld [vmem:[#allocation3 + $0x220] sm:$0xff] }
 0x1e8   : > { %v2897_v42 = vld [vmem:[#allocation3 + $0x200] sm:$0xff]  ;;  %2763 = vst.msk [vmem:[#allocation3 + $0x209] sm:$0xff] %vm15639_vm13, %v10861_v39  ;;  %v3557_v16 = vadd.f32 %v10547_v52, %v10527_v61  ;;  %v1794_v0 = vadd.f32 %v1666_v1, %v15640_v9  ;;  %v1007_v62 = vand.u32 15, %v809_v19  ;;  %v10890_v51 = vmul.f32 100.0, %v15539_v10  ;;  %vm15649_vm13 = vmmov %vm15613_vm0  ;;  %v1604_v9 = vld [vmem:[#allocation3 + $0x470] sm:$0xff] }
 0x1e9   : > { %v3232_v28 = vrot.slane %v2897_v42, 1  ;;  %2730 = vst.msk [vmem:[#allocation3 + $0xd9] sm:$0xff] %vm15623_vm2, %v10880_v21  ;;  %v1014_v59 = vand.u32 15, %v810_v34  ;;  %v2182_v26 = vsel %vm15613_vm0, %v2179_v36, %v2181_v33  ;;  %v2114_v42 = vrot.slane %v1503_v30, 2  ;;  %v15645_v34 = vld [vmem:[#allocation57_spill] sm:$0xff]  ;;  %v15719_v13 = vld [vmem:[#allocation91_spill] sm:$0xff] }
 0x1ea   : > { %v670_v61 = vrot.slane %v663_v46, %v15587_v14  ;;  %v4098_v52 = vmul.f32 0.125, %v3970_v32  ;;  %v15641_v1 = vrot.slane %v10712_v24, 1  ;;  %vm15642_vm14 = vcmask 1046528   ;;  %v15646_v36 = vld [vmem:[#allocation33_spill] sm:$0xff]  ;;  %v15696_v46 = vld [vmem:[#allocation78_spill] sm:$0xff] }
 0x1eb   : > { %vm10902_vm9 = vcmp.lt.s32.totalorder %v1007_v62, 15  ;;  %4366 = vperm.xlu1 %7973, %v15645_v34   ;;  %5101 = vperm.xlu0 %7972, %v15646_v36   ;;  %vm10912_vm3 = vcmp.gt.s32.totalorder %v1014_v59, 0  ;;  %v2115_v32 = vsel %vm15649_vm13, %v2112_v47, %v2114_v42  ;;  %v10919_v62 = vld [vmem:[#allocation3 + $0xf0] sm:$0xff]  ;;  %v3524_v59 = vadd.f32 %v10612_v44, %v10569_v63  ;;  %vm15653_vm2 = vmmov %vm15642_vm14  ;;  %v15656_v44 = vld [vmem:[#allocation64_spill] sm:$0xff] }
 0x1ec   : > { %v10900_v19 = vsel %vm15642_vm14, %v15641_v1, %v3232_v28  ;;  %v2508_v24 = vsel %vm10902_vm9, %v2182_v26, 0.0  ;;  %v1700_v34 = vsel %vm10912_vm3, %v10855_v45, 0.0  ;;  %v10931_v54 = vmul.f32 100.0, %v15559_v31  ;;  %v15650_v26 = vld [vmem:[#allocation67_spill] sm:$0xff] }
 0x1ed   : > { %v3748_v53 = vadd.f32 %v10784_v3, %v10900_v19  ;;  %v2859_v14 = vld [vmem:[#allocation3 + $0xd0] sm:$0xff]  ;;  %v10924_v36 = vadd.f32 %v2508_v24, %v1827_v2  ;;  %v10926_v3 = vadd.f32 %v2115_v32, %v1794_v0  ;;  %v1828_v22 = vadd.f32 %v1700_v34, %v15650_v26 }
 0x1ee   : > { %v3165_v1 = vrot.slane %v2859_v14, 1  ;;  %v15002_v47 = vrot.slane %v10906_v23, 2  ;;  %v10936_v14 = vadd.f32 %v4098_v52, %v10803_v5  ;;  %v15652_v45 = vrot.slane %v10760_v58, 1  ;;  %v15657_v5 = vld [vmem:[#allocation66_spill] sm:$0xff]  ;;  %v15658_v58 = vld [vmem:[#allocation69_spill] sm:$0xff] }
 0x1ef   : > { %v4004_v4 = vsub.f32 %v3748_v53, %v15501_v40  ;;  %v10944_v2 = vld [vmem:[#allocation3 + $0x208] sm:$0xff]  ;;  %vm15654_vm0 = vcmask 7168   ;;  %v15003_v63 = vrot.slane %v10919_v62, 2  ;;  %4371 = vperm.xlu1 %7973, %v15656_v44   ;;  %5106 = vperm.xlu0 %7972, %v15657_v5   ;;  %v1795_v52 = vadd.f32 %v1503_v30, %v15658_v58  ;;  %v10981_v5 = vld [vmem:[%s8350_s22 + $0x308] sm:$0xff] }
 0x1f0   : > { %15651 = vst [vmem:[#allocation9_spill] sm:$0xff] %v10936_v14  ;;  %v10942_v0 = vsel %vm15653_vm2, %v15652_v45, %v3165_v1  ;;  %2764 = vst.msk [vmem:[#allocation3 + $0x211] sm:$0xff] %vm15654_vm0, %v10924_v36  ;;  %v3234_v40 = vrot.slane %v10944_v2, 1  ;;  %v2184_v24 = vsel %vm15649_vm13, %v2181_v33, %v15002_v47  ;;  %v10961_v32 = vadd.f32 %v670_v61, %v10818_v6  ;;  %v2860_v34 = vld [vmem:[#allocation3 + $0xd8] sm:$0xff]  ;;  %v11105_v58 = vld [vmem:[%s8350_s22 + $0x330] sm:$0xff] }
 0x1f1   : > { %vm15655_vm14 = vmmov %vm15654_vm0  ;;  %v3715_v53 = vadd.f32 %v10847_v43, %v10942_v0  ;;  %v3558_v45 = vadd.f32 %v10661_v25, %v10616_v41  ;;  %v10965_v44 = vadd.f32 %v2184_v24, %v1828_v22  ;;  %vm15662_vm0 = vcmask 1046528   ;;  %v10978_v61 = vld [vmem:[%s8350_s22 + $0x300] sm:$0xff]  ;;  %15664 = vst [vmem:[#allocation30_spill] sm:$0xff] %v10981_v5  ;;  %v10984_v25 = vld [vmem:[%s8350_s22 + $0x310] sm:$0xff] }
 0x1f2   : > { %2731 = vst.msk [vmem:[#allocation3 + $0xe1] sm:$0xff] %vm15655_vm14, %v10926_v3  ;;  %15659 = vst [vmem:[#allocation22_spill] sm:$0xff] %v10961_v32  ;;  %v10972_v2 = vsel %vm15662_vm0, %v3232_v28, %v3234_v40  ;;  %v3167_v33 = vrot.slane %v2860_v34, 1  ;;  %v10975_v6 = vmul.f32 100.0, %v15569_v35  ;;  %v4132_v41 = vmul.f32 0.125, %v4004_v4  ;;  %v15672_v4 = vld [vmem:[#allocation18_spill] sm:$0xff] }
 0x1f3   : > { %15660 = vst [vmem:[#allocation21_spill] sm:$0xff] %v10965_v44  ;;  %vm15661_vm2 = vmmov %vm15649_vm13  ;;  %v3971_v30 = vsub.f32 %v3715_v53, %v15528_v56  ;;  %v3749_v22 = vadd.f32 %v3557_v16, %v10972_v2  ;;  %v812_v28 = vadd.s32 240, %v8308_v8  ;;  %v10996_v53 = vld [vmem:[%s8350_s22 + $0x320] sm:$0xff]  ;;  %5111 = vperm.xlu0 %7972, %v15672_v4   ;;  %v11012_v47 = vadd.s32 232, %v8308_v8 }
 0x1f4   : > { %v2117_v43 = vsel %vm15661_vm2, %v2114_v42, %v15003_v63  ;;  %15663 = vst [vmem:[#allocation60_spill] sm:$0xff] %v10978_v61  ;;  %15665 = vst [vmem:[#allocation52_spill] sm:$0xff] %v10984_v25  ;;  %v10993_v42 = vld [vmem:[%s8350_s22 + $0x318] sm:$0xff]  ;;  %v15671_v16 = vld [vmem:[#allocation43_spill] sm:$0xff] }
 0x1f5   : > { %2765 = vst.msk [vmem:[#allocation3 + $0x219] sm:$0xff] %vm15655_vm14, %v10965_v44  ;;  %v2476_v56 = vsel %vm10902_vm9, %v2117_v43, 0.0  ;;  %15666 = vst [vmem:[#allocation57_spill] sm:$0xff] %v10993_v42  ;;  %4376 = vperm.xlu1 %7973, %v15671_v16   ;;  %v4099_v24 = vmul.f32 0.125, %v3971_v30  ;;  %v4005_v63 = vsub.f32 %v3749_v22, %v15539_v10  ;;  %v3525_v30 = vadd.f32 %v10705_v60, %v10675_v18  ;;  %v11154_v44 = vld [vmem:[#allocation3 + $0x230] sm:$0xff] }
 0x1f6   : > { %15667 = vst [vmem:[#allocation33_spill] sm:$0xff] %v10996_v53  ;;  %vm15668_vm13 = vmmov %vm15655_vm14  ;;  %vm15673_vm14 = vcmask 1046528   ;;  %v11009_v43 = vadd.f32 %v2476_v56, %v1795_v52  ;;  %v1028_v52 = vand.u32 15, %v812_v28  ;;  %v11036_v10 = vadd.f32 %v10796_v50, %v10827_v15  ;;  %v15680_v28 = vld [vmem:[#allocation75_spill] sm:$0xff] }
 0x1f7   : > { %1444 = vst.msk [vmem:[#allocation3 + $0x389] sm:$0xff] %vm15668_vm13, %v10978_v61  ;;  %vm15669_vm2 = vmmov %vm15668_vm13  ;;  %v11007_v34 = vsel %vm15673_vm14, %v3165_v1, %v3167_v33  ;;  %v11022_v1 = vmul.f32 100.0, %v15578_v12  ;;  %v2899_v16 = vld [vmem:[#allocation3 + $0x210] sm:$0xff]  ;;  %v11039_v18 = vadd.f32 %v4132_v41, %v10837_v27  ;;  %v11043_v22 = vmul.f32 100.0, %v15593_v29  ;;  %v11091_v61 = vld [vmem:[#allocation3 + $0x338] sm:$0xff] }
 0x1f8   : > { %1445 = vst.msk [vmem:[#allocation3 + $0x391] sm:$0xff] %vm15669_vm2, %v10981_v5  ;;  %vm15670_vm0 = vmmov %vm15669_vm2  ;;  %v3716_v56 = vadd.f32 %v3524_v59, %v11007_v34  ;;  %v3236_v60 = vrot.slane %v2899_v16, 1  ;;  %v15681_v5 = vld [vmem:[#allocation76_spill] sm:$0xff]  ;;  %v11053_v15 = vadd.f32 %v4099_v24, %v10850_v55  ;;  %v1021_v50 = vand.u32 15, %v11012_v47  ;;  %v11072_v47 = vld [vmem:[#allocation3 + $0x468] sm:$0xff] }
 0x1f9   : > { %1446 = vst.msk [vmem:[#allocation3 + $0x399] sm:$0xff] %vm15670_vm0, %v10984_v25  ;;  %15674 = vst [vmem:[#allocation64_spill] sm:$0xff] %v11009_v43  ;;  %v11025_v4 = vld [vmem:[#allocation3 + $0xe0] sm:$0xff]  ;;  %v15677_v25 = vld [vmem:[#allocation39_spill] sm:$0xff]  ;;  %4381 = vperm.xlu1 %7973, %v15680_v28   ;;  %5116 = vperm.xlu0 %7972, %v15681_v5   ;;  %v1668_v27 = vsel %vm10912_vm3, %v10919_v62, 0.0  ;;  %v4133_v16 = vmul.f32 0.125, %v4005_v63 }
 0x1fa   : > { %vm15675_vm13 = vmmov %vm15670_vm0  ;;  %2732 = vst.msk [vmem:[#allocation3 + $0xe9] sm:$0xff] %vm15670_vm0, %v11009_v43  ;;  %v15014_v59 = vrot.slane %v11025_v4, 1  ;;  %v3972_v24 = vsub.f32 %v3716_v56, %v15559_v31  ;;  %v15694_v56 = vld [vmem:[#allocation68_spill] sm:$0xff]  ;;  %v15780_v5 = vld [vmem:[#allocation74_spill] sm:$0xff] }
 0x1fb   : > { %1447 = vst.msk [vmem:[#allocation3 + $0x3a1] sm:$0xff] %vm15675_vm13, %v10993_v42  ;;  %vm15676_vm2 = vmmov %vm15670_vm0  ;;  %v3559_v42 = vadd.f32 %v10739_v20, %v10780_v48  ;;  %v11045_v20 = vld [vmem:[#allocation3 + $0x340] sm:$0xff]  ;;  %vm15684_vm13 = vcmask 1046528   ;;  %v11102_v14 = vadd.f32 %v10906_v23, %v15694_v56 }
 0x1fc   : > { %1448 = vst.msk [vmem:[#allocation3 + $0x3a9] sm:$0xff] %vm15676_vm2, %v10996_v53  ;;  %v11030_v53 = vmul.f32 100.0, %v15677_v25  ;;  %15678 = vst [vmem:[#allocation66_spill] sm:$0xff] %v11039_v18  ;;  %v11048_v48 = vld [vmem:[%s8350_s22 + $0x328] sm:$0xff]  ;;  %v1732_v41 = vsel %vm10912_vm3, %v11045_v20, 0.0  ;;  %v11065_v28 = vsel %vm15684_vm13, %v3234_v40, %v3236_v60  ;;  %v2246_v11 = vrot.slane %v11045_v20, 2 }
 0x1fd   : > { %15679 = vst [vmem:[#allocation43_spill] sm:$0xff] %v11048_v48  ;;  %15682 = vst [vmem:[#allocation18_spill] sm:$0xff] %v11053_v15  ;;  %v11081_v40 = vld [vmem:[#allocation3 + $0x218] sm:$0xff]  ;;  %4386 = vperm.xlu1 %7973, %v15696_v46   ;;  %v11123_v46 = vadd.f32 %v4133_v16, %v10890_v51  ;;  %v11142_v51 = vmul.f32 0.125, %v3972_v24 }
 0x1fe   : > { %vm15683_vm14 = vmmov %vm15670_vm0  ;;  %15685 = vst [vmem:[#allocation39_spill] sm:$0xff] %v11065_v28  ;;  %vm11074_vm0 = vcmp.gt.s32.totalorder %v1028_v52, 0  ;;  %v11083_v15 = vld [vmem:[#allocation3 + $0xf8] sm:$0xff]  ;;  %v11089_v52 = vld [vmem:[#allocation3 + $0x228] sm:$0xff] }
 0x1ff   : > { %1449 = vst.msk [vmem:[#allocation3 + $0x3b1] sm:$0xff] %vm15683_vm14, %v11048_v48  ;;  %vm15686_vm2 = vmmov %vm15684_vm13  ;;  %v3750_v48 = vadd.f32 %v3558_v45, %v11065_v28  ;;  %v15692_v18 = vld [vmem:[#allocation19_spill] sm:$0xff]  ;;  %v15693_v45 = vld [vmem:[#allocation73_spill] sm:$0xff]  ;;  %vm11162_vm13 = vcmp.lt.s32.totalorder %v1021_v50, 15 }
 0x200   : > { %v11070_v55 = vsel %vm15686_vm2, %v3167_v33, %v15014_v59  ;;  %15690 = vst [vmem:[#allocation76_spill] sm:$0xff] %v11081_v40  ;;  %v1764_v33 = vsel %vm10912_vm3, %v11072_v47, 0.0  ;;  %15691 = vst [vmem:[#allocation100_spill] sm:$0xff] %v11091_v61  ;;  %v11094_v31 = vadd.f32 %v1668_v27, %v15692_v18  ;;  %v15697_v59 = vld [vmem:[#allocation11_spill] sm:$0xff]  ;;  %v11111_v27 = vld [vmem:[#allocation3 + $0x350] sm:$0xff] }
 0x201   : > { %15687 = vst [vmem:[#allocation75_spill] sm:$0xff] %v11070_v55  ;;  %v3717_v63 = vadd.f32 %v3525_v30, %v11070_v55  ;;  %v11098_v30 = vadd.f32 %v11083_v15, %v15693_v45  ;;  %15695 = vst [vmem:[#allocation101_spill] sm:$0xff] %v11105_v58  ;;  %5121 = vperm.xlu0 %7972, %v15697_v59   ;;  %v4006_v55 = vsub.f32 %v3750_v48, %v15569_v35  ;;  %v15698_v18 = vld [vmem:[#allocation86_spill] sm:$0xff]  ;;  %v11130_v59 = vld [vmem:[#allocation3 + $0xe8] sm:$0xff] }
 0x202   : > { %v1702_v45 = vsel %vm11074_vm0, %v11089_v52, 0.0  ;;  %v11118_v56 = vadd.f32 %v11091_v61, %v15698_v18  ;;  %vm15699_vm3 = vmmov %vm15683_vm14  ;;  %15700 = vst [vmem:[#allocation78_spill] sm:$0xff] %v11123_v46  ;;  %v15701_v35 = vrot.slane %v11081_v40, 1  ;;  %v11132_v48 = vld [vmem:[#allocation3 + $0x100] sm:$0xff]  ;;  %v1734_v18 = vsel %vm11074_vm0, %v11111_v27, 0.0  ;;  %v15707_v24 = vld [vmem:[#allocation87_spill] sm:$0xff]  ;;  %4391 = vperm.xlu1 %7973, %v15711_v17  }
 0x203   : > { %v3973_v43 = vsub.f32 %v3717_v63, %v15578_v12  ;;  %1450 = vst.msk [vmem:[#allocation3 + $0x3b9] sm:$0xff] %vm15699_vm3, %v11105_v58  ;;  %vm15702_vm14 = vmmov %vm15686_vm2  ;;  %v11134_v63 = vld [vmem:[#allocation3 + $0x478] sm:$0xff]  ;;  %v15715_v17 = vrot.slane %v11130_v59, 1  ;;  %v15734_v20 = vrot.slane %v11132_v48, 2 }
 0x204   : > { %v11128_v12 = vsel %vm15702_vm14, %v3236_v60, %v15701_v35  ;;  %15704 = vst [vmem:[#allocation102_spill] sm:$0xff] %v11130_v59  ;;  %v15705_v58 = vld [vmem:[#allocation51_spill] sm:$0xff]  ;;  %v1571_v60 = vld [vmem:[#allocation3 + $0x348] sm:$0xff]  ;;  %v1766_v46 = vsel %vm11074_vm0, %v11134_v63, 0.0  ;;  %vm15714_vm2 = vmmov %vm15699_vm3 }
 0x205   : > { %15703 = vst [vmem:[#allocation11_spill] sm:$0xff] %v11128_v12  ;;  %v11140_v26 = vadd.f32 %v1732_v41, %v15705_v58  ;;  %v11152_v28 = vadd.f32 %v3559_v42, %v11128_v12  ;;  %v15706_v41 = vld [vmem:[#allocation70_spill] sm:$0xff]  ;;  %v11160_v37 = vadd.f32 %v1571_v60, %v15707_v24  ;;  %689 = vrot.lane.b32.xlu0 %v10961_v32, %s8247_s16  ;;  %v11172_v42 = vmul.f32 0.125, %v4006_v55  ;;  %v15713_v24 = vld [vmem:[#allocation88_spill] sm:$0xff]  ;;  %vm15717_vm3 = vmmov %vm15702_vm14 }
 0x206   : > { %v11157_v58 = vadd.f32 %v1702_v45, %v15706_v41  ;;  %v11167_v35 = vld [vmem:[%s8350_s22 + $0x338] sm:$0xff]  ;;  %v11174_v12 = vmul.f32 0.125, %v3973_v43  ;;  %v11176_v45 = vld [vmem:[#allocation3 + $0x460] sm:$0xff]  ;;  %v11179_v50 = vadd.f32 %v1734_v18, %v15713_v24  ;;  %v2118_v41 = vrot.slane %v11083_v15, 2  ;;  %v11191_v43 = vld [vmem:[#allocation3 + $0x358] sm:$0xff] }
 0x207   : > { %15710 = vst [vmem:[#allocation103_spill] sm:$0xff] %v11167_v35  ;;  %15712 = vst [vmem:[#allocation20_spill] sm:$0xff] %v11176_v45  ;;  %v15716_v55 = vrot.slane %v11025_v4, 1  ;;  %v11195_v18 = vadd.f32 %v11176_v45, %v15719_v13  ;;  %v2185_v24 = vrot.slane %v11089_v52, 2  ;;  %v15721_v4 = vld [vmem:[#allocation94_spill] sm:$0xff]  ;;  %v11216_v59 = vld [vmem:[%s8350_s22 + $0x208] sm:$0xff]  ;;  %v4007_v52 = vsub.f32 %v11152_v28, %v15677_v25 }
 0x208   : > { %1451 = vst.msk [vmem:[#allocation3 + $0x3c1] sm:$0xff] %vm15714_vm2, %v11167_v35  ;;  %v15720_v35 = vld [vmem:[#allocation93_spill] sm:$0xff]  ;;  %v11203_v49 = vadd.f32 %v1604_v9, %v15721_v4  ;;  %v11210_v40 = vld [vmem:[%s8350_s22 + $0x340] sm:$0xff]  ;;  %15725 = vst [vmem:[#allocation107_spill] sm:$0xff] %v11216_v59  ;;  %v15726_v15 = vrot.slane %v10919_v62, 2  ;;  %vm15727_vm14 = vcmask 1045504  }
 0x209   : > { %v11189_v32 = vsel %vm15717_vm3, %v15716_v55, %v15715_v17  ;;  %v11200_v57 = vadd.f32 %v1764_v33, %v15720_v35  ;;  %v15722_v17 = vld [vmem:[#allocation95_spill] sm:$0xff]  ;;  %15723 = vst [vmem:[#allocation105_spill] sm:$0xff] %v11210_v40  ;;  %1452 = vst.msk [vmem:[#allocation3 + $0x3c9] sm:$0xff] %vm15714_vm2, %v11210_v40  ;;  %v11234_v4 = vld [vmem:[%s8350_s22 + $0x218] sm:$0xff]  ;;  %v2121_v28 = vsel %vm15727_vm14, %v2118_v41, %v15734_v20  ;;  %v2248_v35 = vrot.slane %v1571_v60, 2 }
 0x20a   : > { %15718 = vst [vmem:[#allocation104_spill] sm:$0xff] %v11189_v32  ;;  %v11206_v55 = vadd.f32 %v1766_v46, %v15722_v17  ;;  %v11213_v13 = vld [vmem:[%s8350_s22 + $0x200] sm:$0xff]  ;;  %v11222_v33 = vadd.f32 %v11036_v10, %v11189_v32  ;;  %v2119_v46 = vsel %vm15727_vm14, %v15726_v15, %v2118_v41  ;;  %v11231_v17 = vld [vmem:[%s8350_s22 + $0x210] sm:$0xff]  ;;  %15729 = vst [vmem:[#allocation109_spill] sm:$0xff] %v11234_v4  ;;  %v2250_v40 = vrot.slane %v11111_v27, 2 }
 0x20b   : > { %15724 = vst [vmem:[#allocation106_spill] sm:$0xff] %v11213_v13  ;;  %15728 = vst [vmem:[#allocation108_spill] sm:$0xff] %v11231_v17  ;;  %v15732_v25 = vld [vmem:[#allocation48_spill] sm:$0xff]  ;;  %v15733_v62 = vld [vmem:[#allocation82_spill] sm:$0xff]  ;;  %v15049_v60 = vrot.slane %v11176_v45, 2  ;;  %v2311_v27 = vrot.slane %v11072_v47, 2 }
 0x20c   : > { %vm15730_vm3 = vmmov %vm15714_vm2  ;;  %4396 = vperm.xlu1 %7973, %v15732_v25   ;;  %5126 = vperm.xlu0 %7972, %v15733_v62   ;;  %v11242_v10 = vld [vmem:[#allocation3 + $0x480] sm:$0xff]  ;;  %v11250_v32 = vld [vmem:[%s8350_s22 + $0x220] sm:$0xff]  ;;  %1414 = vst.msk [vmem:[#allocation3 + $0x271] sm:$0xff] %vm15714_vm2, %v11231_v17  ;;  %v15737_v25 = vrot.slane %v10906_v23, 2  ;;  %v15740_v20 = vrot.slane %v11154_v44, 2  ;;  %v15742_v17 = vrot.slane %v11091_v61, 2 }
 0x20d   : > { %1412 = vst.msk [vmem:[#allocation3 + $0x261] sm:$0xff] %vm15730_vm3, %v11213_v13  ;;  %vm15731_vm5 = vmmov %vm15714_vm2  ;;  %v11278_v13 = vld [vmem:[%s8350_s22 + $0x228] sm:$0xff] }
 0x20e   : > { %1413 = vst.msk [vmem:[#allocation3 + $0x269] sm:$0xff] %vm15731_vm5, %v11216_v59  ;;  %15735 = vst [vmem:[#allocation48_spill] sm:$0xff] %v11250_v32  ;;  %v2315_v59 = vrot.slane %v11134_v63, 2  ;;  %v2478_v63 = vsel %vm11162_vm13, %v2121_v28, 0.0 }
 0x20f   : > { %vm15736_vm5 = vmmov %vm15714_vm2 }
 0x210   : > { %1415 = vst.msk [vmem:[#allocation3 + $0x279] sm:$0xff] %vm15736_vm5, %v11234_v4  ;;  %vm15738_vm3 = vmmov %vm15727_vm14  ;;  %687 = vrot.lane.b32.xlu1 %v10841_v7, %s8247_s16  ;;  %v11317_v7 = vld [vmem:[%s8350_s22 + $0x350] sm:$0xff] }
 0x211   : > { %v2186_v62 = vsel %vm15738_vm3, %v15737_v25, %v2185_v24  ;;  %vm15739_vm14 = vmmov %vm15714_vm2  ;;  %v2313_v25 = vrot.slane %v1604_v9, 2 }
 0x212   : > { %1416 = vst.msk [vmem:[#allocation3 + $0x281] sm:$0xff] %vm15739_vm14, %v11250_v32  ;;  %vm15741_vm2 = vmmov %vm15738_vm3  ;;  %v2317_v32 = vrot.slane %v11242_v10, 2 }
 0x213   : > { %v2188_v15 = vsel %vm15741_vm2, %v2185_v24, %v15740_v20  ;;  %vm15743_vm5 = vmmov %vm15741_vm2  ;;  %v11281_v24 = vld [vmem:[%s8350_s22 + $0x348] sm:$0xff]  ;;  %v2510_v20 = vsel %vm11162_vm13, %v2186_v62, 0.0 }
 0x214   : > { %v2247_v4 = vsel %vm15743_vm5, %v15742_v17, %v2246_v11  ;;  %vm15744_vm15 = vmmov %vm15741_vm2  ;;  %v15747_v17 = vld [vmem:[#allocation83_spill] sm:$0xff] }
 0x215   : > { %v2251_v23 = vsel %vm15744_vm15, %v2248_v35, %v2250_v40  ;;  %vm15745_vm3 = vmmov %vm15741_vm2  ;;  %5131 = vperm.xlu0 %7972, %v15747_v17  }
 0x216   : > { %v2249_v41 = vsel %vm15745_vm3, %v2246_v11, %v2248_v35  ;;  %vm15746_vm1 = vmmov %vm15741_vm2  ;;  %v15748_v11 = vrot.slane %v11191_v43, 2  ;;  %v2542_v28 = vsel %vm11162_vm13, %v2251_v23, 0.0 }
 0x217   : > { %v2312_v47 = vsel %vm15746_vm1, %v15049_v60, %v2311_v27  ;;  %vm15749_vm15 = vmmov %vm15746_vm1  ;;  %v11311_v60 = vadd.f32 %v2119_v46, %v11094_v31  ;;  %v11329_v16 = vadd.f32 %v2249_v41, %v11140_v26  ;;  %v11334_v31 = vld [vmem:[%s8350_s22 + $0x230] sm:$0xff]  ;;  %v11339_v23 = vadd.f32 %v2542_v28, %v11160_v37  ;;  %v1541_v26 = vld [vmem:[#allocation3 + $0x238] sm:$0xff] }
 0x218   : > { %v2253_v9 = vsel %vm15749_vm15, %v2250_v40, %v15748_v11  ;;  %vm15750_vm14 = vmmov %vm15746_vm1  ;;  %vm15751_vm1 = vcmask 7168   ;;  %v2318_v40 = vsel %vm15745_vm3, %v2315_v59, %v2317_v32  ;;  %v2572_v62 = vsel %vm10902_vm9, %v2312_v47, 0.0  ;;  %15757 = vst [vmem:[#allocation110_spill] sm:$0xff] %v11334_v31  ;;  %v15759_v46 = vld [vmem:[#allocation92_spill] sm:$0xff] }
 0x219   : > { %v2314_v35 = vsel %vm15750_vm14, %v2311_v27, %v2313_v25  ;;  %1417 = vst.msk [vmem:[#allocation3 + $0x289] sm:$0xff] %vm15751_vm1, %v11278_v13  ;;  %vm15752_vm2 = vmmov %vm15751_vm1  ;;  %v2540_v27 = vsel %vm10902_vm9, %v2247_v4, 0.0  ;;  %v11323_v4 = vadd.f32 %v2188_v15, %v11157_v58  ;;  %5136 = vperm.xlu0 %7972, %v15759_v46   ;;  %v11342_v58 = vadd.f32 %v2253_v9, %v11179_v50  ;;  %v1574_v15 = vld [vmem:[#allocation3 + $0x360] sm:$0xff] }
 0x21a   : > { %1453 = vst.msk [vmem:[#allocation3 + $0x3d1] sm:$0xff] %vm15752_vm2, %v11281_v24  ;;  %vm15753_vm5 = vmmov %vm15745_vm3  ;;  %v11326_v38 = vadd.f32 %v2540_v27, %v11118_v56  ;;  %v11345_v56 = vadd.f32 %v2572_v62, %v11195_v18  ;;  %v3974_v37 = vsub.f32 %v11222_v33, %v15593_v29  ;;  %v11356_v50 = vadd.f32 %v2314_v35, %v11200_v57  ;;  %v1607_v29 = vld [vmem:[#allocation3 + $0x488] sm:$0xff]  ;;  %v15782_v9 = vld [vmem:[#allocation96_spill] sm:$0xff] }
 0x21b   : > { %v2316_v17 = vsel %vm15753_vm5, %v2313_v25, %v2315_v59  ;;  %v11314_v25 = vadd.f32 %v2478_v63, %v11098_v30  ;;  %v11320_v59 = vadd.f32 %v2510_v20, %v11102_v14  ;;  %15755 = vst [vmem:[#allocation83_spill] sm:$0xff] %v11329_v16  ;;  %vm15756_vm9 = vmmov %vm15751_vm1  ;;  %v15758_v30 = vld [vmem:[#allocation50_spill] sm:$0xff]  ;;  %v4135_v14 = vmul.f32 0.125, %v4007_v52  ;;  %v15784_v35 = vld [vmem:[#allocation89_spill] sm:$0xff] }
 0x21c   : > { %v2574_v11 = vsel %vm11162_vm13, %v2316_v17, 0.0  ;;  %15754 = vst [vmem:[#allocation82_spill] sm:$0xff] %v11326_v38  ;;  %1454 = vst.msk [vmem:[#allocation3 + $0x3d9] sm:$0xff] %vm15756_vm9, %v11317_v7  ;;  %4401 = vperm.xlu1 %7973, %v15758_v30   ;;  %v11362_v52 = vadd.f32 %v2318_v40, %v11206_v55  ;;  %v11374_v57 = vadd.f32 %v11142_v51, %v10931_v54  ;;  %v15772_v55 = vld [vmem:[#allocation77_spill] sm:$0xff]  ;;  %v15773_v33 = vsel %vm11074_vm0, %v11132_v48, 0.0  ;;  %v15785_v20 = vld [vmem:[#allocation55_spill] sm:$0xff] }
 0x21d   : > { %15760 = vst [vmem:[#allocation50_spill] sm:$0xff] %v11339_v23  ;;  %15761 = vst [vmem:[#allocation92_spill] sm:$0xff] %v11342_v58  ;;  %v11359_v18 = vadd.f32 %v2574_v11, %v11203_v49  ;;  %v11378_v49 = vadd.f32 %v11172_v42, %v10975_v6  ;;  %v11385_v41 = vadd.f32 %v15773_v33, %v15772_v55  ;;  %v813_v54 = vadd.s32 248, %v8308_v8  ;;  %v11407_v8 = vld [vmem:[%s8350_s22 + $0x358] sm:$0xff] }
 0x21e   : > { %15762 = vst [vmem:[#allocation111_spill] sm:$0xff] %v11345_v56  ;;  %vm15763_vm13 = vmmov %vm15751_vm1  ;;  %v11396_v6 = vadd.f32 %v11174_v12, %v11022_v1  ;;  %v1831_v51 = vadd.f32 %v11154_v44, %v15780_v5  ;;  %v2189_v42 = vrot.slane %v1541_v26, 2  ;;  %v2254_v47 = vrot.slane %v1574_v15, 2  ;;  %v15783_v1 = vld [vmem:[#allocation97_spill] sm:$0xff] }
 0x21f   : > { %2733 = vst.msk [vmem:[#allocation3 + $0xf1] sm:$0xff] %vm15763_vm13, %v11311_v60  ;;  %vm15764_vm15 = vmmov %vm15751_vm1  ;;  %5141 = vperm.xlu0 %7972, %v15783_v1   ;;  %v1035_v12 = vand.u32 15, %v813_v54  ;;  %v1863_v63 = vadd.f32 %v11191_v43, %v15784_v35  ;;  %v1895_v17 = vadd.f32 %v11242_v10, %v15785_v20  ;;  %v2319_v40 = vrot.slane %v1607_v29, 2  ;;  %v11418_v27 = vld [vmem:[%s8350_s22 + $0x238] sm:$0xff] }
 0x220   : > { %2734 = vst.msk [vmem:[#allocation3 + $0xf9] sm:$0xff] %vm15764_vm15, %v11314_v25  ;;  %vm15765_vm14 = vmmov %vm15751_vm1  ;;  %4406 = vperm.xlu1 %7973, %v15782_v9   ;;  %v11421_v28 = vadd.f32 %v4135_v14, %v11030_v53  ;;  %v4102_v62 = vmul.f32 0.125, %v3974_v37  ;;  %v15788_v11 = vrot.slane %v11154_v44, 2  ;;  %v15790_v46 = vrot.slane %v11191_v43, 2  ;;  %v1507_v43 = vld [vmem:[#allocation3 + $0x108] sm:$0xff]  ;;  %v11443_v14 = vld [vmem:[%s8350_s22 + $0x360] sm:$0xff] }
 0x221   : > { %1418 = vst.msk [vmem:[#allocation3 + $0x291] sm:$0xff] %vm15765_vm14, %v11334_v31  ;;  %15766 = vst [vmem:[#allocation112_spill] sm:$0xff] %v11356_v50  ;;  %v3560_v15 = vadd.f32 %v10900_v19, %v10861_v39  ;;  %v3527_v29 = vadd.f32 %v10942_v0, %v10880_v21  ;;  %v11446_v37 = vld [vmem:[%s8350_s22 + $0x240] sm:$0xff]  ;;  %v3561_v0 = vadd.f32 %v10972_v2, %v10924_v36  ;;  %v15829_v20 = vld [vmem:[#allocation65_spill] sm:$0xff] }
 0x222   : > { %15767 = vst [vmem:[#allocation113_spill] sm:$0xff] %v11359_v18  ;;  %15768 = vst [vmem:[#allocation114_spill] sm:$0xff] %v11362_v52  ;;  %v15799_v54 = vld [vmem:[#allocation58_spill] sm:$0xff] }
 0x223   : > { %2766 = vst.msk [vmem:[#allocation3 + $0x221] sm:$0xff] %vm15751_vm1, %v11320_v59  ;;  %vm15769_vm2 = vmmov %vm15751_vm1 }
 0x224   : > { %2767 = vst.msk [vmem:[#allocation3 + $0x229] sm:$0xff] %vm15769_vm2, %v11323_v4  ;;  %vm15770_vm5 = vmmov %vm15751_vm1  ;;  %4411 = vperm.xlu1 %7973, %v15799_v54   ;;  %v11503_v54 = vld [vmem:[%s8350_s22 + $0x248] sm:$0xff] }
 0x225   : > { %2797 = vst.msk [vmem:[#allocation3 + $0x341] sm:$0xff] %vm15770_vm5, %v11329_v16  ;;  %vm15771_vm3 = vmmov %vm15751_vm1  ;;  %vm15789_vm5 = vcmask 1045504   ;;  %v15843_v16 = vld [vmem:[#allocation75_spill] sm:$0xff] }
 0x226   : > { %2796 = vst.msk [vmem:[#allocation3 + $0x339] sm:$0xff] %vm15771_vm3, %v11326_v38  ;;  %vm15774_vm9 = vmmov %vm15751_vm1  ;;  %v2190_v30 = vsel %vm15789_vm5, %v15788_v11, %v2189_v42  ;;  %v2863_v33 = vld [vmem:[#allocation3 + $0xf0] sm:$0xff]  ;;  %v15800_v42 = vld [vmem:[#allocation99_spill] sm:$0xff] }
 0x227   : > { %2798 = vst.msk [vmem:[#allocation3 + $0x349] sm:$0xff] %vm15774_vm9, %v11339_v23  ;;  %vm15775_vm13 = vmmov %vm15751_vm1  ;;  %v11456_v10 = vld [vmem:[#allocation3 + $0xf8] sm:$0xff]  ;;  %5146 = vperm.xlu0 %7972, %v15800_v42   ;;  %v3173_v9 = vrot.slane %v2863_v33, 1  ;;  %v11557_v23 = vld [vmem:[#allocation3 + $0x240] sm:$0xff] }
 0x228   : > { %2799 = vst.msk [vmem:[#allocation3 + $0x351] sm:$0xff] %vm15775_vm13, %v11342_v58  ;;  %vm15776_vm15 = vmmov %vm15751_vm1  ;;  %vm11435_vm13 = vcmp.lt.s32.totalorder %v1035_v12, 15  ;;  %v15844_v38 = vld [vmem:[#allocation69_spill] sm:$0xff]  ;;  %v15865_v61 = vrot.slane %v11456_v10, 1 }
 0x229   : > { %2828 = vst.msk [vmem:[#allocation3 + $0x461] sm:$0xff] %vm15776_vm15, %v11345_v56  ;;  %vm15777_vm0 = vmmov %vm15751_vm1  ;;  %v2512_v39 = vsel %vm11435_vm13, %v2190_v30, 0.0  ;;  %v15051_v30 = vrot.slane %v11456_v10, 1  ;;  %v15870_v10 = vld [vmem:[#allocation9_spill] sm:$0xff] }
 0x22a   : > { %2829 = vst.msk [vmem:[#allocation3 + $0x469] sm:$0xff] %vm15777_vm0, %v11356_v50  ;;  %vm15778_vm14 = vmmov %vm15777_vm0  ;;  %v2640_v1 = vadd.f32 %v2512_v39, %v1831_v51  ;;  %v15803_v51 = vld [vmem:[#allocation102_spill] sm:$0xff]  ;;  %v15809_v39 = vld [vmem:[#allocation76_spill] sm:$0xff] }
 0x22b   : > { %2830 = vst.msk [vmem:[#allocation3 + $0x471] sm:$0xff] %vm15778_vm14, %v11359_v18  ;;  %vm15779_vm1 = vmmov %vm15777_vm0  ;;  %v11468_v36 = vld [vmem:[#allocation3 + $0x228] sm:$0xff]  ;;  %v11601_v50 = vld [vmem:[%s8350_s22 + $0x380] sm:$0xff] }
 0x22c   : > { %2831 = vst.msk [vmem:[#allocation3 + $0x479] sm:$0xff] %vm15779_vm1, %v11362_v52  ;;  %15781 = vst [vmem:[#allocation77_spill] sm:$0xff] %v11407_v8  ;;  %v15052_v11 = vrot.slane %v11468_v36, 1  ;;  %vm15805_vm1 = vcmask 1046528   ;;  %v11565_v52 = vmul.f32 100.0, %v15844_v38 }
 0x22d   : > { %vm15786_vm2 = vmmov %vm15777_vm0  ;;  %15787 = vst [vmem:[#allocation74_spill] sm:$0xff] %v11418_v27 }
 0x22e   : > { %1455 = vst.msk [vmem:[#allocation3 + $0x3e1] sm:$0xff] %vm15786_vm2, %v11407_v8  ;;  %vm15791_vm3 = vmmov %vm15789_vm5 }
 0x22f   : > { %v2255_v26 = vsel %vm15791_vm3, %v15790_v46, %v2254_v47  ;;  %vm15792_vm9 = vmmov %vm15777_vm0  ;;  %15796 = vst [vmem:[#allocation96_spill] sm:$0xff] %v11443_v14  ;;  %v2901_v47 = vld [vmem:[#allocation3 + $0x220] sm:$0xff]  ;;  %v3528_v46 = vadd.f32 %v11007_v34, %v10926_v3  ;;  %v15810_v3 = vrot.slane %v15809_v39, 1 }
 0x230   : > { %1419 = vst.msk [vmem:[#allocation3 + $0x299] sm:$0xff] %vm15792_vm9, %v11418_v27  ;;  %vm15795_vm15 = vmmov %vm15791_vm3  ;;  %v2544_v21 = vsel %vm11435_vm13, %v2255_v26, 0.0  ;;  %v3240_v2 = vrot.slane %v2901_v47, 1  ;;  %v11475_v26 = vadd.f32 %v4102_v62, %v11043_v22  ;;  %v15818_v47 = vld [vmem:[#allocation59_spill] sm:$0xff] }
 0x231   : > { %v2320_v44 = vsel %vm15795_vm15, %v2317_v32, %v2319_v40  ;;  %15797 = vst [vmem:[#allocation97_spill] sm:$0xff] %v11446_v37  ;;  %v1508_v32 = vld [vmem:[#allocation3 + $0x110] sm:$0xff]  ;;  %1456 = vst.msk [vmem:[#allocation3 + $0x3e9] sm:$0xff] %vm15777_vm0, %v11443_v14  ;;  %v11464_v12 = vadd.f32 %v2544_v21, %v1863_v63  ;;  %v15804_v63 = vrot.slane %v15803_v51, 1  ;;  %4416 = vperm.xlu1 %7973, %v15818_v47   ;;  %v15824_v47 = vrot.slane %v11132_v48, 2 }
 0x232   : > { %v2576_v19 = vsel %vm11435_vm13, %v2320_v44, 0.0  ;;  %vm15798_vm14 = vmmov %vm15777_vm0  ;;  %v2122_v44 = vrot.slane %v1507_v43, 2  ;;  %v2124_v33 = vrot.slane %v1508_v32, 2  ;;  %15815 = vst [vmem:[#allocation76_spill] sm:$0xff] %v11503_v54  ;;  %v15816_v32 = vld [vmem:[#allocation28_spill] sm:$0xff]  ;;  %v15883_v14 = vld [vmem:[#allocation78_spill] sm:$0xff] }
 0x233   : > { %1420 = vst.msk [vmem:[#allocation3 + $0x2a1] sm:$0xff] %vm15798_vm14, %v11446_v37  ;;  %15801 = vst [vmem:[#allocation58_spill] sm:$0xff] %v11464_v12  ;;  %v11466_v40 = vadd.f32 %v2576_v19, %v1895_v17  ;;  %v11480_v17 = vsel %vm15805_vm1, %v15804_v63, %v3173_v9  ;;  %v11500_v19 = vld [vmem:[%s8350_s22 + $0x368] sm:$0xff]  ;;  %v11506_v42 = vmul.f32 100.0, %v15816_v32  ;;  %v15882_v37 = vld [vmem:[#allocation18_spill] sm:$0xff] }
 0x234   : > { %vm15806_vm2 = vmmov %vm15777_vm0  ;;  %v3719_v22 = vadd.f32 %v3527_v29, %v11480_v17  ;;  %15814 = vst [vmem:[#allocation102_spill] sm:$0xff] %v11500_v19  ;;  %v15819_v29 = vld [vmem:[#allocation23_spill] sm:$0xff] }
 0x235   : > { %15802 = vst [vmem:[#allocation99_spill] sm:$0xff] %v11466_v40  ;;  %2768 = vst.msk [vmem:[#allocation3 + $0x231] sm:$0xff] %vm15806_vm2, %v2640_v1  ;;  %5151 = vperm.xlu0 %7972, %v15819_v29  }
 0x236   : > { %vm15807_vm5 = vmmov %vm15777_vm0  ;;  %15817 = vst [vmem:[#allocation28_spill] sm:$0xff] %v11506_v42 }
 0x237   : > { %2800 = vst.msk [vmem:[#allocation3 + $0x359] sm:$0xff] %vm15807_vm5, %v11464_v12  ;;  %vm15808_vm3 = vmmov %vm15777_vm0  ;;  %v11527_v12 = vld [vmem:[%s8350_s22 + $0x370] sm:$0xff] }
 0x238   : > { %2832 = vst.msk [vmem:[#allocation3 + $0x481] sm:$0xff] %vm15808_vm3, %v11466_v40  ;;  %vm15811_vm9 = vmmov %vm15805_vm1 }
 0x239   : > { %v3241_v34 = vsel %vm15811_vm9, %v15810_v3, %v3240_v2  ;;  %vm15812_vm15 = vmmov %vm15805_vm1  ;;  %15828 = vst [vmem:[#allocation59_spill] sm:$0xff] %v11527_v12 }
 0x23a   : > { %v3243_v62 = vsel %vm15812_vm15, %v3240_v2, %v15052_v11  ;;  %vm15813_vm0 = vmmov %vm15805_vm1  ;;  %v3752_v51 = vadd.f32 %v3560_v15, %v3241_v34  ;;  %v15820_v2 = vld [vmem:[#allocation79_spill] sm:$0xff]  ;;  %v3564_v42 = vadd.f32 %v3241_v34, %v11323_v4 }
 0x23b   : > { %v11497_v21 = vsel %vm15813_vm0, %v3173_v9, %v15051_v30  ;;  %v11510_v63 = vadd.f32 %v3243_v62, %v2640_v1  ;;  %v1799_v39 = vadd.f32 %v1507_v43, %v15820_v2  ;;  %vm15821_vm14 = vmmov %vm15806_vm2  ;;  %v15823_v9 = vld [vmem:[#allocation42_spill] sm:$0xff]  ;;  %v3753_v32 = vadd.f32 %v3561_v0, %v3243_v62  ;;  %v15826_v1 = vld [vmem:[#allocation61_spill] sm:$0xff] }
 0x23c   : > { %1457 = vst.msk [vmem:[#allocation3 + $0x3f1] sm:$0xff] %vm15821_vm14, %v11500_v19  ;;  %vm15822_vm1 = vmmov %vm15806_vm2  ;;  %v3975_v3 = vsub.f32 %v3719_v22, %v15823_v9  ;;  %v3720_v30 = vadd.f32 %v3528_v46, %v11497_v21  ;;  %vm15825_vm2 = vcmask 1045504   ;;  %v4008_v29 = vsub.f32 %v3752_v51, %v15826_v1  ;;  %v15830_v0 = vld [vmem:[#allocation47_spill] sm:$0xff]  ;;  %v11536_v46 = vld [vmem:[%s8350_s22 + $0x250] sm:$0xff] }
 0x23d   : > { %1421 = vst.msk [vmem:[#allocation3 + $0x2a9] sm:$0xff] %vm15822_vm1, %v11503_v54  ;;  %v2123_v15 = vsel %vm15825_vm2, %v15824_v47, %v2122_v44  ;;  %v3847_v43 = vmul.f32 100.0, %v15823_v9  ;;  %vm15827_vm5 = vmmov %vm15825_vm2  ;;  %v4009_v22 = vsub.f32 %v3753_v32, %v15829_v20  ;;  %v15833_v51 = vld [vmem:[#allocation24_spill] sm:$0xff]  ;;  %v3848_v9 = vmul.f32 100.0, %v15830_v0  ;;  %v15838_v32 = vld [vmem:[#allocation39_spill] sm:$0xff] }
 0x23e   : > { %v2125_v11 = vsel %vm15827_vm5, %v2122_v44, %v2124_v33  ;;  %v2607_v35 = vadd.f32 %v2123_v15, %v11385_v41  ;;  %v4103_v58 = vmul.f32 0.125, %v3975_v3  ;;  %v3976_v62 = vsub.f32 %v3720_v30, %v15830_v0  ;;  %vm15831_vm3 = vmmov %vm15822_vm1  ;;  %15832 = vst [vmem:[#allocation23_spill] sm:$0xff] %v11536_v46  ;;  %4421 = vperm.xlu1 %7973, %v15833_v51   ;;  %v15834_v44 = vld [vmem:[#allocation31_spill] sm:$0xff]  ;;  %v15837_v30 = vld [vmem:[#allocation21_spill] sm:$0xff] }
 0x23f   : > { %v2480_v48 = vsel %vm11435_vm13, %v2125_v11, 0.0  ;;  %1458 = vst.msk [vmem:[#allocation3 + $0x3f9] sm:$0xff] %vm15831_vm3, %v11527_v12  ;;  %5156 = vperm.xlu0 %7972, %v15834_v44   ;;  %v3880_v41 = vmul.f32 100.0, %v15826_v1  ;;  %v3881_v33 = vmul.f32 100.0, %v15829_v20  ;;  %vm15835_vm9 = vmmov %vm15822_vm1  ;;  %v4136_v53 = vmul.f32 0.125, %v4008_v29  ;;  %v2903_v11 = vld [vmem:[#allocation3 + $0x230] sm:$0xff] }
 0x240   : > { %v11543_v3 = vadd.f32 %v2480_v48, %v1799_v39  ;;  %2735 = vst.msk [vmem:[#allocation3 + $0x101] sm:$0xff] %vm15835_vm9, %v2607_v35  ;;  %vm15836_vm13 = vmmov %vm15822_vm1  ;;  %v3562_v47 = vadd.f32 %v15838_v32, %v15837_v30  ;;  %v15839_v15 = vld [vmem:[#allocation67_spill] sm:$0xff]  ;;  %v4137_v39 = vmul.f32 0.125, %v4009_v22  ;;  %v4104_v48 = vmul.f32 0.125, %v3976_v62  ;;  %v15842_v32 = vld [vmem:[#allocation64_spill] sm:$0xff] }
 0x241   : > { %1422 = vst.msk [vmem:[#allocation3 + $0x2b1] sm:$0xff] %vm15836_vm13, %v11536_v46  ;;  %v11551_v51 = vmul.f32 100.0, %v15839_v15  ;;  %v2904_v1 = vld [vmem:[#allocation3 + $0x238] sm:$0xff]  ;;  %v3654_v44 = vrot.slane %v2903_v11, 1  ;;  %vm15841_vm15 = vmmov %vm15822_vm1  ;;  %v11560_v30 = vadd.f32 %v4103_v58, %v3847_v43  ;;  %v3529_v40 = vadd.f32 %v15843_v16, %v15842_v32  ;;  %v15846_v22 = vld [vmem:[#allocation40_spill] sm:$0xff] }
 0x242   : > { %v15840_v20 = vld [vmem:[#allocation11_spill] sm:$0xff]  ;;  %2736 = vst.msk [vmem:[#allocation3 + $0x109] sm:$0xff] %vm15841_vm15, %v11543_v3  ;;  %v3656_v29 = vrot.slane %v2904_v1, 1  ;;  %4426 = vperm.xlu1 %7973, %v15846_v22   ;;  %v15847_v62 = vld [vmem:[#allocation44_spill] sm:$0xff]  ;;  %v15848_v11 = vrot.slane %v11468_v36, 1  ;;  %vm15849_vm14 = vmmov %vm15813_vm0  ;;  %v11588_v22 = vadd.f32 %v4136_v53, %v3880_v41  ;;  %vm1235_vm5 = vcmask 1024  }
 0x243   : > { %v3563_v0 = vadd.f32 %v15840_v20, %v11320_v59  ;;  %v11568_v59 = vld [vmem:[%s8350_s22 + $0x378] sm:$0xff]  ;;  %5161 = vperm.xlu0 %7972, %v15847_v62   ;;  %v15850_v58 = vld [vmem:[#allocation68_spill] sm:$0xff]  ;;  %v11581_v20 = vld [vmem:[#allocation3 + $0x118] sm:$0xff]  ;;  %15855 = vst [vmem:[#allocation61_spill] sm:$0xff] %v11601_v50 }
 0x244   : > { %15845 = vst [vmem:[#allocation79_spill] sm:$0xff] %v11568_v59  ;;  %v3655_v1 = vsel %vm15813_vm0, %v15848_v11, %v3654_v44  ;;  %v3657_v4 = vsel %vm15849_vm14, %v3654_v44, %v3656_v29  ;;  %v11577_v34 = vmul.f32 100.0, %v15850_v58  ;;  %v15851_v16 = vld [vmem:[#allocation104_spill] sm:$0xff]  ;;  %1459 = vst.msk [vmem:[#allocation3 + $0x401] sm:$0xff] %vm15822_vm1, %v11568_v59  ;;  %v11586_v32 = vld [vmem:[%s8350_s22 + $0x258] sm:$0xff]  ;;  %v15062_v11 = vrot.slane %v11557_v23, 1 }
 0x245   : > { %v3530_v43 = vadd.f32 %v15851_v16, %v11311_v60  ;;  %15852 = vst [vmem:[#allocation42_spill] sm:$0xff] %v11586_v32  ;;  %v3754_v36 = vadd.f32 %v3655_v1, %v3562_v47  ;;  %v3755_v62 = vadd.f32 %v3657_v4, %v3563_v0  ;;  %vm15853_vm2 = vmmov %vm15822_vm1  ;;  %v11593_v44 = vadd.f32 %v4137_v39, %v3881_v33  ;;  %v15854_v16 = vld [vmem:[#allocation19_spill] sm:$0xff]  ;;  %v15879_v19 = vld [vmem:[#allocation30_spill] sm:$0xff] }
 0x246   : > { %1423 = vst.msk [vmem:[#allocation3 + $0x2b9] sm:$0xff] %vm15853_vm2, %v11586_v32  ;;  %v11595_v60 = vadd.f32 %v4104_v48, %v3848_v9  ;;  %v11598_v18 = vmul.f32 100.0, %v15854_v16  ;;  %v3532_v47 = vadd.f32 %v11497_v21, %v2607_v35  ;;  %vm15856_vm3 = vmmov %vm15813_vm0  ;;  %v15857_v39 = vmov 0.0   ;;  %v11613_v9 = vld [vmem:[#allocation3 + $0x388] sm:$0xff]  ;;  %v11618_v35 = vld [vmem:[%s8350_s22 + $0x260] sm:$0xff] }
 0x247   : > { %v4010_v41 = vsub.f32 %v3754_v36, %v15839_v15  ;;  %v2865_v53 = vld [vmem:[#allocation3 + $0x100] sm:$0xff]  ;;  %v3659_v33 = vsel %vm15856_vm3, %v3656_v29, %v15062_v11  ;;  %1273 = vst.msk [vmem:[#allocation3 + $0x248] sm:$0x3] %vm1235_vm5, %v15857_v39  ;;  %1236 = vst.msk [vmem:[#allocation3 + $0x120] sm:$0x3] %vm1235_vm5, %v15857_v39  ;;  %v15860_v21 = vld [vmem:[#allocation29_spill] sm:$0xff]  ;;  %v3531_v1 = vadd.f32 %v11480_v17, %v11314_v25 }
 0x248   : > { %1310 = vst.msk [vmem:[#allocation3 + $0x370] sm:$0x3] %vm1235_vm5, %v15857_v39  ;;  %1347 = vst.msk [vmem:[#allocation3 + $0x498] sm:$0x3] %vm1235_vm5, %v15857_v39  ;;  %4431 = vperm.xlu1 %7973, %v15860_v21   ;;  %v15861_v15 = vld [vmem:[#allocation7_spill] sm:$0xff]  ;;  %v3177_v48 = vrot.slane %v2865_v53, 1  ;;  %v3756_v4 = vadd.f32 %v3659_v33, %v3564_v42  ;;  %v4011_v36 = vsub.f32 %v3755_v62, %v15850_v58 }
 0x249   : > { %vm15858_vm9 = vmmov %vm15822_vm1  ;;  %15859 = vst [vmem:[#allocation65_spill] sm:$0xff] %v11618_v35  ;;  %5166 = vperm.xlu0 %7972, %v15861_v15   ;;  %v11623_v29 = vmul.f32 100.0, %v15772_v55  ;;  %v2866_v39 = vld [vmem:[#allocation3 + $0x108] sm:$0xff]  ;;  %v2867_v11 = vld [vmem:[#allocation3 + $0x110] sm:$0xff]  ;;  %v1736_v45 = vsel %vm8724_vm7, %v11613_v9, 0.0  ;;  %v4138_v58 = vmul.f32 0.125, %v4010_v41 }
 0x24a   : > { %1460 = vst.msk [vmem:[#allocation3 + $0x409] sm:$0xff] %vm15858_vm9, %v11601_v50  ;;  %vm15862_vm13 = vmmov %vm15822_vm1  ;;  %v15863_v21 = vld [vmem:[#allocation73_spill] sm:$0xff]  ;;  %v15864_v53 = vld [vmem:[#allocation70_spill] sm:$0xff]  ;;  %v3646_v17 = vrot.slane %v2866_v39, 1  ;;  %v3648_v42 = vrot.slane %v2867_v11, 1  ;;  %v15872_v39 = vrot.slane %v11581_v20, 1 }
 0x24b   : > { %1424 = vst.msk [vmem:[#allocation3 + $0x2c1] sm:$0xff] %vm15862_vm13, %v11618_v35  ;;  %v11631_v0 = vmul.f32 100.0, %v15863_v21  ;;  %v11634_v15 = vmul.f32 100.0, %v15864_v53  ;;  %vm15866_vm15 = vmmov %vm15813_vm0  ;;  %v1577_v33 = vld [vmem:[#allocation3 + $0x398] sm:$0xff]  ;;  %v4012_v50 = vsub.f32 %v3756_v4, %v15864_v53  ;;  %v2256_v27 = vrot.slane %v11613_v9, 2 }
 0x24c   : > { %v3178_v25 = vsel %vm15866_vm15, %v15865_v61, %v3177_v48  ;;  %v11647_v32 = vld [vmem:[%s8350_s22 + $0x388] sm:$0xff]  ;;  %4436 = vperm.xlu1 %7973, %v15870_v10   ;;  %v15871_v61 = vld [vmem:[#allocation66_spill] sm:$0xff]  ;;  %v3647_v11 = vsel %vm15813_vm0, %v3177_v48, %v3646_v17  ;;  %vm15873_vm14 = vmmov %vm15813_vm0  ;;  %v15888_v9 = vrot.slane %v11557_v23, 1  ;;  %vm15890_vm15 = vcmask 1045504  }
 0x24d   : > { %v11643_v62 = vadd.f32 %v3178_v25, %v11543_v3  ;;  %v3721_v35 = vadd.f32 %v3529_v40, %v3178_v25  ;;  %15868 = vst [vmem:[#allocation47_spill] sm:$0xff] %v11647_v32  ;;  %v11650_v59 = vld [vmem:[%s8350_s22 + $0x268] sm:$0xff]  ;;  %5171 = vperm.xlu0 %7972, %v15871_v61   ;;  %v3651_v41 = vsel %vm15873_vm14, %v3648_v42, %v15872_v39  ;;  %vm15874_vm1 = vmmov %vm15813_vm0  ;;  %v11660_v40 = vmul.f32 100.0, %v15780_v5  ;;  %v1576_v25 = vld [vmem:[#allocation3 + $0x390] sm:$0xff] }
 0x24e   : > { %15869 = vst [vmem:[#allocation24_spill] sm:$0xff] %v11650_v59  ;;  %v3649_v3 = vsel %vm15874_vm1, %v3646_v17, %v3648_v42  ;;  %1461 = vst.msk [vmem:[#allocation3 + $0x411] sm:$0xff] %vm15853_vm2, %v11647_v32  ;;  %v3722_v4 = vadd.f32 %v3647_v11, %v3530_v43  ;;  %v3724_v53 = vadd.f32 %v3651_v41, %v3532_v47  ;;  %v1579_v10 = vld [vmem:[#allocation3 + $0x3a8] sm:$0xff]  ;;  %v1738_v39 = vsel %vm8720_vm6, %v1577_v33, 0.0  ;;  %v15878_v32 = vld [vmem:[#allocation60_spill] sm:$0xff] }
 0x24f   : > { %vm15875_vm5 = vmmov %vm15853_vm2  ;;  %v3723_v48 = vadd.f32 %v3649_v3, %v3531_v1  ;;  %v11668_v17 = vmul.f32 0.125, %v4011_v36  ;;  %v2906_v42 = vld [vmem:[#allocation3 + $0x248] sm:$0x3]  ;;  %v1740_v12 = vsel %vm8741_vm11, %v1579_v10, 0.0  ;;  %v1864_v54 = vadd.f32 %v1736_v45, %v15878_v32  ;;  %v1578_v41 = vld [vmem:[#allocation3 + $0x3a0] sm:$0xff] }
 0x250   : > { %1425 = vst.msk [vmem:[#allocation3 + $0x2c9] sm:$0xff] %vm15875_vm5, %v11650_v59  ;;  %v1865_v59 = vadd.f32 %v1576_v25, %v15879_v19  ;;  %v11675_v43 = vadd.f32 %v4138_v58, %v11551_v51  ;;  %v3977_v47 = vsub.f32 %v3721_v35, %v15844_v38  ;;  %v3978_v1 = vsub.f32 %v3722_v4, %v15854_v16  ;;  %v11680_v3 = vld [vmem:[%s8350_s22 + $0x390] sm:$0xff]  ;;  %vm15884_vm3 = vmmov %vm15853_vm2  ;;  %v11694_v16 = vld [vmem:[#allocation3 + $0x3b0] sm:$0xff] }
 0x251   : > { %v4140_v11 = vmul.f32 0.125, %v4012_v50  ;;  %15880 = vst [vmem:[#allocation31_spill] sm:$0xff] %v11680_v3  ;;  %v11683_v36 = vld [vmem:[%s8350_s22 + $0x270] sm:$0xff]  ;;  %4441 = vperm.xlu1 %7973, %v15882_v37   ;;  %5176 = vperm.xlu0 %7972, %v15883_v14   ;;  %v3660_v45 = vrot.slane %v2906_v42, 1  ;;  %v2257_v8 = vrot.slane %v1576_v25, 2  ;;  %v2259_v51 = vrot.slane %v1577_v33, 2  ;;  %vm15885_vm9 = vmmov %vm15853_vm2 }
 0x252   : > { %15881 = vst [vmem:[#allocation21_spill] sm:$0xff] %v11683_v36  ;;  %1462 = vst.msk [vmem:[#allocation3 + $0x419] sm:$0xff] %vm15884_vm3, %v11680_v3  ;;  %v3980_v38 = vsub.f32 %v3724_v53, %v15772_v55  ;;  %v3979_v50 = vsub.f32 %v3723_v48, %v15863_v21  ;;  %v15886_v37 = vld [vmem:[#allocation52_spill] sm:$0xff]  ;;  %v15887_v35 = vld [vmem:[#allocation57_spill] sm:$0xff]  ;;  %v2261_v42 = vrot.slane %v1578_v41, 2  ;;  %v4106_v55 = vmul.f32 0.125, %v3978_v1 }
 0x253   : > { %1426 = vst.msk [vmem:[#allocation3 + $0x2d1] sm:$0xff] %vm15885_vm9, %v11683_v36  ;;  %v1866_v14 = vadd.f32 %v1738_v39, %v15886_v37  ;;  %v1867_v58 = vadd.f32 %v1578_v41, %v15887_v35  ;;  %vm15889_vm13 = vmmov %vm15813_vm0  ;;  %v2258_v4 = vsel %vm15890_vm15, %v2256_v27, %v2257_v8  ;;  %v4105_v36 = vmul.f32 0.125, %v3977_v47  ;;  %v15892_v53 = vld [vmem:[#allocation33_spill] sm:$0xff]  ;;  %v2944_v1 = vld [vmem:[#allocation3 + $0x378] sm:$0xff] }
 0x254   : > { %v3661_v33 = vsel %vm15889_vm13, %v15888_v9, %v3660_v45  ;;  %vm15891_vm0 = vmmov %vm15890_vm15  ;;  %v1868_v48 = vadd.f32 %v1740_v12, %v15892_v53  ;;  %v11706_v3 = vld [vmem:[%s8350_s22 + $0x398] sm:$0xff]  ;;  %v2263_v39 = vrot.slane %v1579_v10, 2  ;;  %v2265_v27 = vrot.slane %v11694_v16, 2  ;;  %v11729_v45 = vpop.permute.xlu0 %4336  ;;  %v15950_v46 = vld [vmem:[#allocation107_spill] sm:$0xff] }
 0x255   : > { %v2260_v25 = vsel %vm15891_vm0, %v2257_v8, %v2259_v51  ;;  %v3757_v21 = vadd.f32 %v3661_v33, %v11510_v63  ;;  %15893 = vst [vmem:[#allocation39_spill] sm:$0xff] %v11706_v3  ;;  %4446 = vperm.xlu1 %7973, %v11374_v57   ;;  %5181 = vperm.xlu0 %7972, %v11378_v49   ;;  %vm15894_vm14 = vmmov %vm15891_vm0  ;;  %v11714_v63 = vld [vmem:[#allocation3 + $0x380] sm:$0xff]  ;;  %v11719_v12 = vld [vmem:[%s8350_s22 + $0x278] sm:$0xff]  ;;  %v4108_v57 = vmul.f32 0.125, %v3980_v38 }
 0x256   : > { %v2262_v23 = vsel %vm15894_vm14, %v2259_v51, %v2261_v42  ;;  %v2546_v47 = vsel %vm8728_vm8, %v2260_v25, 0.0  ;;  %vm15896_vm1 = vmmov %vm15853_vm2  ;;  %15897 = vst [vmem:[#allocation67_spill] sm:$0xff] %v11719_v12  ;;  %v11721_v49 = vadd.f32 %v2258_v4, %v1864_v54  ;;  %v4107_v51 = vmul.f32 0.125, %v3979_v50  ;;  %v11738_v54 = vld [vmem:[%s8350_s22 + $0x280] sm:$0xff] }
 0x257   : > { %1463 = vst.msk [vmem:[#allocation3 + $0x421] sm:$0xff] %vm15896_vm1, %v11706_v3  ;;  %v11723_v41 = vadd.f32 %v2546_v47, %v1865_v59  ;;  %v11725_v10 = vadd.f32 %v2262_v23, %v1866_v14  ;;  %vm15898_vm2 = vmmov %vm15896_vm1  ;;  %v4013_v9 = vsub.f32 %v3757_v21, %v15780_v5  ;;  %v11735_v3 = vld [vmem:[%s8350_s22 + $0x3a0] sm:$0xff]  ;;  %v3309_v5 = vrot.slane %v2944_v1, 1  ;;  %v2869_v1 = vld [vmem:[#allocation3 + $0x120] sm:$0x3] }
 0x258   : > { %1427 = vst.msk [vmem:[#allocation3 + $0x2d9] sm:$0xff] %vm15898_vm2, %v11719_v12  ;;  %vm15899_vm5 = vmmov %vm15891_vm0  ;;  %v15903_v59 = vld [vmem:[#allocation15_spill] sm:$0xff]  ;;  %v15100_v50 = vrot.slane %v11714_v63, 1  ;;  %v11759_v21 = vadd.f32 %v11668_v17, %v11577_v34  ;;  %v15913_v34 = vld [vmem:[#allocation101_spill] sm:$0xff] }
 0x259   : > { %v2264_v33 = vsel %vm15899_vm5, %v2261_v42, %v2263_v39  ;;  %vm15900_vm3 = vmmov %vm15891_vm0  ;;  %15901 = vst [vmem:[#allocation11_spill] sm:$0xff] %v11735_v3  ;;  %vm15904_vm9 = vnez %v15903_v59  ;;  %v1581_v4 = vld [vmem:[#allocation3 + $0x3b8] sm:$0xff]  ;;  %v1582_v42 = vld [vmem:[#allocation3 + $0x3c0] sm:$0xff]  ;;  %4451 = vperm.xlu1 %7973, %v11396_v6   ;;  %5186 = vperm.xlu0 %7972, %v11421_v28   ;;  %v11772_v6 = vadd.f32 %v4106_v55, %v11598_v18 }
 0x25a   : > { %v2266_v25 = vsel %vm15900_vm3, %v2263_v39, %v2265_v27  ;;  %15902 = vst [vmem:[#allocation64_spill] sm:$0xff] %v11738_v54  ;;  %v2548_v38 = vsel %vm15904_vm9, %v2264_v33, 0.0  ;;  %vm15905_vm13 = vmmov %vm15896_vm1  ;;  %v15910_v39 = vld [vmem:[#allocation27_spill] sm:$0xff]  ;;  %v11769_v33 = vadd.f32 %v4105_v36, %v11565_v52  ;;  %v11775_v28 = vadd.f32 %v4108_v57, %v11623_v29  ;;  %v11780_v17 = vld [vmem:[#allocation3 + $0x3c8] sm:$0xff] }
 0x25b   : > { %v11742_v14 = vadd.f32 %v2266_v25, %v1868_v48  ;;  %2801 = vst.msk [vmem:[#allocation3 + $0x389] sm:$0xff] %vm15905_vm13, %v11721_v49  ;;  %vm15906_vm15 = vmmov %vm15896_vm1  ;;  %v11762_v48 = vadd.f32 %v4140_v11, %v11634_v15  ;;  %v11764_v23 = vadd.f32 %v2548_v38, %v1867_v58  ;;  %vm15911_vm2 = vnez %v15910_v39  ;;  %v15915_v52 = vld [vmem:[#allocation43_spill] sm:$0xff] }
 0x25c   : > { %2802 = vst.msk [vmem:[#allocation3 + $0x391] sm:$0xff] %vm15906_vm15, %v11723_v41  ;;  %vm15907_vm0 = vmmov %vm15896_vm1  ;;  %v1742_v47 = vsel %vm15911_vm2, %v1581_v4, 0.0  ;;  %v4141_v11 = vmul.f32 0.125, %v4013_v9  ;;  %v1869_v36 = vadd.f32 %v11694_v16, %v15915_v52  ;;  %v2267_v18 = vrot.slane %v1581_v4, 2  ;;  %v11796_v25 = vld [vmem:[%s8350_s22 + $0x3a8] sm:$0xff]  ;;  %v11800_v16 = vpop.permute.xlu0 %5066 }
 0x25d   : > { %2803 = vst.msk [vmem:[#allocation3 + $0x399] sm:$0xff] %vm15907_vm0, %v11725_v10  ;;  %vm15908_vm14 = vmmov %vm15907_vm0  ;;  %v1870_v15 = vadd.f32 %v1742_v47, %v15913_v34  ;;  %v2269_v58 = vrot.slane %v1582_v42, 2  ;;  %v11787_v29 = vadd.f32 %v4107_v51, %v11631_v0  ;;  %vm15916_vm15 = vcmask 1046528   ;;  %4456 = vperm.xlu1 %7973, %v11475_v26   ;;  %5191 = vperm.xlu0 %7972, %v11588_v22   ;;  %v15920_v0 = vld [vmem:[#allocation103_spill] sm:$0xff]  ;;  %v15923_v26 = vld [vmem:[#allocation17_spill] sm:$0xff] }
 0x25e   : > { %1464 = vst.msk [vmem:[#allocation3 + $0x429] sm:$0xff] %vm15908_vm14, %v11735_v3  ;;  %vm15909_vm1 = vmmov %vm15907_vm0  ;;  %v3311_v55 = vsel %vm15916_vm15, %v3309_v5, %v15100_v50  ;;  %v11793_v57 = vmul.f32 100.0, %v15878_v32  ;;  %v3652_v9 = vrot.slane %v2869_v1, 1  ;;  %v1871_v51 = vadd.f32 %v1582_v42, %v15920_v0  ;;  %v11809_v47 = vld [vmem:[%s8350_s22 + $0x288] sm:$0xff]  ;;  %v11825_v5 = vpop.permute.xlu1 %5061 }
 0x25f   : > { %1428 = vst.msk [vmem:[#allocation3 + $0x2e1] sm:$0xff] %vm15909_vm1, %v11738_v54  ;;  %vm15912_vm5 = vmmov %vm15907_vm0  ;;  %v11812_v1 = vmul.f32 100.0, %v15879_v19 }
 0x260   : > { %2805 = vst.msk [vmem:[#allocation3 + $0x3a9] sm:$0xff] %vm15912_vm5, %v11742_v14  ;;  %vm15914_vm13 = vmmov %vm15907_vm0  ;;  %vm15924_vm5 = vnez %v15923_v26 }
 0x261   : > { %2804 = vst.msk [vmem:[#allocation3 + $0x3a1] sm:$0xff] %vm15914_vm13, %v11764_v23  ;;  %15917 = vst [vmem:[#allocation75_spill] sm:$0xff] %v11796_v25  ;;  %4461 = vperm.xlu1 %7973, %v11560_v30   ;;  %5196 = vperm.xlu0 %7972, %v11593_v44  }
 0x262   : > { %15918 = vst [vmem:[#allocation69_spill] sm:$0xff] %v11800_v16  ;;  %vm15919_vm0 = vmmov %vm15900_vm3  ;;  %v2946_v3 = vld [vmem:[#allocation3 + $0x388] sm:$0xff] }
 0x263   : > { %v2268_v38 = vsel %vm15919_vm0, %v2265_v27, %v2267_v18  ;;  %vm15921_vm14 = vmmov %vm15919_vm0  ;;  %1465 = vst.msk [vmem:[#allocation3 + $0x431] sm:$0xff] %vm15909_vm1, %v11796_v25  ;;  %v15925_v27 = vrot.slane %v11581_v20, 1  ;;  %v11828_v25 = vadd.f32 %v4141_v11, %v11660_v40  ;;  %v15931_v40 = vld [vmem:[#allocation32_spill] sm:$0xff]  ;;  %v15955_v16 = vld [vmem:[#allocation109_spill] sm:$0xff] }
 0x264   : > { %v2270_v4 = vsel %vm15921_vm14, %v2267_v18, %v2269_v58  ;;  %15922 = vst [vmem:[#allocation40_spill] sm:$0xff] %v11809_v47  ;;  %v2550_v22 = vsel %vm15924_vm5, %v2268_v38, 0.0  ;;  %vm15926_vm13 = vmmov %vm15916_vm15  ;;  %v11821_v18 = vld [vmem:[#allocation3 + $0x260] sm:$0xff]  ;;  %v2948_v54 = vld [vmem:[#allocation3 + $0x398] sm:$0xff] }
 0x265   : > { %v11816_v50 = vadd.f32 %v2270_v4, %v1870_v15  ;;  %v3653_v42 = vsel %vm15926_vm13, %v15925_v27, %v3652_v9  ;;  %vm15927_vm15 = vmmov %vm15909_vm1  ;;  %15928 = vst [vmem:[#allocation44_spill] sm:$0xff] %v11828_v25  ;;  %v11830_v38 = vadd.f32 %v2550_v22, %v1869_v36  ;;  %v2947_v15 = vld [vmem:[#allocation3 + $0x390] sm:$0xff]  ;;  %v15929_v9 = vrot.slane %v11780_v17, 2  ;;  %v11859_v22 = vld [vmem:[%s8350_s22 + $0x290] sm:$0xff]  ;;  %4466 = vperm.xlu1 %7973, %v11595_v60  }
 0x266   : > { %1429 = vst.msk [vmem:[#allocation3 + $0x2e9] sm:$0xff] %vm15927_vm15, %v11809_v47  ;;  %v3725_v20 = vadd.f32 %v3653_v42, %v11643_v62  ;;  %vm15930_vm14 = vmmov %vm15919_vm0  ;;  %v3598_v27 = vadd.f32 %v3311_v55, %v11721_v49  ;;  %v3312_v47 = vrot.slane %v2946_v3, 1  ;;  %v3314_v12 = vrot.slane %v2947_v15, 1  ;;  %v11856_v55 = vld [vmem:[%s8350_s22 + $0x3b0] sm:$0xff]  ;;  %5201 = vperm.xlu0 %7972, %v11675_v43  }
 0x267   : > { %v2272_v4 = vsel %vm15930_vm14, %v2269_v58, %v15929_v9  ;;  %2807 = vst.msk [vmem:[#allocation3 + $0x3b9] sm:$0xff] %vm15909_vm1, %v11816_v50  ;;  %vm15932_vm13 = vnez %v15931_v40  ;;  %v3316_v62 = vrot.slane %v2948_v54, 1  ;;  %vm15933_vm15 = vmmov %vm15909_vm1  ;;  %v11846_v36 = vmul.f32 100.0, %v15886_v37  ;;  %v11853_v58 = vld [vmem:[#allocation3 + $0x270] sm:$0xff]  ;;  %v15939_v9 = vld [vmem:[#allocation35_spill] sm:$0xff] }
 0x268   : > { %v2552_v11 = vsel %vm15932_vm13, %v2272_v4, 0.0  ;;  %2806 = vst.msk [vmem:[#allocation3 + $0x3b1] sm:$0xff] %vm15933_vm15, %v11830_v38  ;;  %v11849_v3 = vmul.f32 100.0, %v15887_v35  ;;  %15935 = vst [vmem:[#allocation104_spill] sm:$0xff] %v11856_v55  ;;  %v2949_v30 = vld [vmem:[#allocation3 + $0x3a0] sm:$0xff]  ;;  %v2950_v44 = vld [vmem:[#allocation3 + $0x3a8] sm:$0xff]  ;;  %vm15940_vm1 = vnez %v15939_v9  ;;  %v3981_v40 = vsub.f32 %v3725_v20, %v15820_v2 }
 0x269   : > { %v11851_v49 = vadd.f32 %v2552_v11, %v1871_v51  ;;  %15936 = vst [vmem:[#allocation19_spill] sm:$0xff] %v11859_v22  ;;  %v15937_v54 = vrot.slane %v11714_v63, 1  ;;  %vm15938_vm14 = vcmask 1046528   ;;  %v11865_v15 = vmul.f32 100.0, %v15820_v2  ;;  %1466 = vst.msk [vmem:[#allocation3 + $0x439] sm:$0xff] %vm15933_vm15, %v11856_v55  ;;  %v716_v63 = vpop.permute.xlu0 %715  ;;  %v11883_v55 = vld [vmem:[#allocation3 + $0x280] sm:$0xff]  ;;  %v11890_v2 = vpop.permute.xlu1 %4341  ;;  %4471 = vperm.xlu1 %7973, %v11769_v33  }
 0x26a   : > { %v1704_v4 = vsel %vm8724_vm7, %v11821_v18, 0.0  ;;  %vm15941_vm0 = vmmov %vm15933_vm15  ;;  %v3318_v11 = vrot.slane %v2949_v30, 1  ;;  %v3315_v25 = vsel %vm15938_vm14, %v3312_v47, %v3314_v12  ;;  %v723_v51 = vrot.slane %v716_v63, 1  ;;  %v1543_v43 = vld [vmem:[#allocation3 + $0x268] sm:$0xff]  ;;  %5206 = vperm.xlu0 %7972, %v11759_v21  }
 0x26b   : > { %15934 = vst [vmem:[#allocation68_spill] sm:$0xff] %v11851_v49  ;;  %v3313_v42 = vsel %vm15938_vm14, %v15937_v54, %v3312_v47  ;;  %1430 = vst.msk [vmem:[#allocation3 + $0x2f1] sm:$0xff] %vm15941_vm0, %v11859_v22  ;;  %v3320_v54 = vrot.slane %v2950_v44, 1  ;;  %v1706_v30 = vsel %vm8720_vm6, %v11853_v58, 0.0  ;;  %v1708_v20 = vsel %vm8741_vm11, %v11883_v55, 0.0 }
 0x26c   : > { %vm15942_vm3 = vmmov %vm15941_vm0  ;;  %v3599_v56 = vadd.f32 %v3313_v42, %v11723_v41  ;;  %vm15946_vm15 = vcmask 1039360   ;;  %v3600_v60 = vadd.f32 %v3315_v25, %v11725_v10  ;;  %v15947_v42 = vld [vmem:[#allocation106_spill] sm:$0xff]  ;;  %v11914_v31 = vmul.f32 0.125, %v3981_v40  ;;  %v1545_v40 = vld [vmem:[#allocation3 + $0x278] sm:$0xff] }
 0x26d   : > { %2808 = vst.msk [vmem:[#allocation3 + $0x3c1] sm:$0xff] %vm15942_vm3, %v11851_v49  ;;  %vm15943_vm7 = vmmov %vm15938_vm14  ;;  %v728_v61 = vsel %vm15946_vm15, %v716_v63, %v723_v51  ;;  %v11905_v22 = vadd.f32 %v1704_v4, %v15947_v42  ;;  %v741_v49 = vpop.permute.xlu0 %740  ;;  %v11917_v26 = vadd.f32 %v1543_v43, %v15950_v46  ;;  %v15951_v51 = vld [vmem:[#allocation108_spill] sm:$0xff]  ;;  %vm15952_vm6 = vcmask 7168   ;;  %v15954_v10 = vld [vmem:[#allocation34_spill] sm:$0xff]  ;;  %4476 = vperm.xlu1 %7973, %v11772_v6  }
 0x26e   : > { %v3317_v0 = vsel %vm15943_vm7, %v3314_v12, %v3316_v62  ;;  %vm15944_vm3 = vmmov %vm15943_vm7  ;;  %v11897_v12 = vmul.f32 100.0, %v15892_v53  ;;  %v736_v25 = vadd.f32 %v728_v61, %v15954_v10  ;;  %v748_v4 = vrot.slane %v741_v49, 1  ;;  %4486 = vperm.xlu0 %7972, %v11775_v28  }
 0x26f   : > { %v3319_v47 = vsel %vm15944_vm3, %v3316_v62, %v3318_v11  ;;  %vm15945_vm0 = vmmov %vm15944_vm3  ;;  %v11908_v62 = vld [vmem:[%s8350_s22 + $0x3b8] sm:$0xff]  ;;  %v3601_v34 = vadd.f32 %v3317_v0, %v11764_v23  ;;  %v2952_v0 = vld [vmem:[#allocation3 + $0x3b8] sm:$0xff]  ;;  %v2191_v46 = vrot.slane %v11821_v18, 2  ;;  %vm15956_vm14 = vcmask 777216  }
 0x270   : > { %v11894_v41 = vsel %vm15945_vm0, %v3318_v11, %v3320_v54  ;;  %v3790_v44 = vadd.f32 %v3598_v27, %v3319_v47  ;;  %15948 = vst [vmem:[#allocation29_spill] sm:$0xff] %v11908_v62  ;;  %v11911_v11 = vld [vmem:[%s8350_s22 + $0x298] sm:$0xff]  ;;  %v11920_v27 = vadd.f32 %v1706_v30, %v15951_v51  ;;  %1467 = vst.msk [vmem:[#allocation3 + $0x441] sm:$0xff] %vm15952_vm6, %v11908_v62  ;;  %v3324_v51 = vrot.slane %v2952_v0, 1 }
 0x271   : > { %15949 = vst [vmem:[#allocation7_spill] sm:$0xff] %v11911_v11  ;;  %vm15953_vm11 = vmmov %vm15952_vm6  ;;  %v3791_v63 = vadd.f32 %v3599_v56, %v11894_v41  ;;  %v2951_v23 = vld [vmem:[#allocation3 + $0x3b0] sm:$0xff]  ;;  %v3602_v62 = vadd.f32 %v3319_v47, %v11742_v14  ;;  %v753_v56 = vsel %vm15956_vm14, %v741_v49, %v748_v4  ;;  %v2192_v18 = vrot.slane %v1543_v43, 2  ;;  %4481 = vperm.xlu1 %7973, %v11787_v29  }
 0x272   : > { %1431 = vst.msk [vmem:[#allocation3 + $0x2f9] sm:$0xff] %vm15953_vm11, %v11911_v11  ;;  %v3322_v30 = vrot.slane %v2951_v23, 1  ;;  %v11933_v11 = vadd.f32 %v1545_v40, %v15955_v16  ;;  %v4046_v61 = vsub.f32 %v3790_v44, %v15878_v32  ;;  %v2194_v33 = vrot.slane %v11853_v58, 2  ;;  %v718_v23 = vpop.permute.xlu1 %717  ;;  %vm15957_vm7 = vmmov %vm15945_vm0  ;;  %v11950_v4 = vld [vmem:[%s8350_s22 + $0x3c0] sm:$0xff]  ;;  %5211 = vperm.xlu0 %7972, %v11762_v48  }
 0x273   : > { %v761_v21 = vadd.f32 %v753_v56, %v736_v25  ;;  %vm15958_vm3 = vmmov %vm15945_vm0  ;;  %v724_v16 = vrot.slane %v718_v23, 1  ;;  %v4047_v49 = vsub.f32 %v3791_v63, %v15879_v19  ;;  %v2196_v44 = vrot.slane %v1545_v40, 2  ;;  %15959 = vst [vmem:[#allocation73_spill] sm:$0xff] %v11950_v4  ;;  %v11953_v43 = vld [vmem:[%s8350_s22 + $0x2a0] sm:$0xff] }
 0x274   : > { %v11937_v10 = vld [vmem:[#allocation3 + $0x3c0] sm:$0xff]  ;;  %v11941_v0 = vsel %vm15957_vm7, %v3320_v54, %v3322_v30  ;;  %v11944_v14 = vsel %vm15958_vm3, %v3322_v30, %v3324_v51  ;;  %15960 = vst [vmem:[#allocation70_spill] sm:$0xff] %v11953_v43  ;;  %v8234_v58 = vld [vmem:[%s8291_s15] sm:$0x3]  ;;  %v2198_v19 = vrot.slane %v11883_v55, 2  ;;  %vm15961_vm15 = vmmov %vm15952_vm6  ;;  %vm15962_vm11 = vcmask 1039360  }
 0x275   : > { %v15123_v47 = vrot.slane %v11937_v10, 1  ;;  %v3792_v32 = vadd.f32 %v3600_v60, %v11941_v0  ;;  %v769_v25 = vsub.f32 %v761_v21, %v8234_v58  ;;  %v3793_v54 = vadd.f32 %v3601_v34, %v11944_v14  ;;  %1468 = vst.msk [vmem:[#allocation3 + $0x449] sm:$0xff] %vm15961_vm15, %v11950_v4  ;;  %v11972_v34 = vld [vmem:[#allocation3 + $0x288] sm:$0xff]  ;;  %v15964_v55 = vld [vmem:[#allocation48_spill] sm:$0xff]  ;;  %v15973_v29 = vld [vmem:[#allocation6_spill] sm:$0xff] }
 0x276   : > { %1432 = vst.msk [vmem:[#allocation3 + $0x301] sm:$0xff] %vm15952_vm6, %v11953_v43  ;;  %v729_v60 = vsel %vm15962_vm11, %v718_v23, %v724_v16  ;;  %vm15963_vm14 = vcmask 1045504   ;;  %v743_v40 = vpop.permute.xlu1 %742  ;;  %v4174_v56 = vmul.f32 0.125, %v4046_v61  ;;  %v1836_v21 = vadd.f32 %v1708_v20, %v15964_v55  ;;  %v15968_v23 = vld [vmem:[#allocation36_spill] sm:$0xff] }
 0x277   : > { %v11962_v30 = vsel %vm15945_vm0, %v3324_v51, %v15123_v47  ;;  %v4048_v6 = vsub.f32 %v3792_v32, %v15886_v37  ;;  %v2195_v63 = vsel %vm15963_vm14, %v2192_v18, %v2194_v33  ;;  %v773_v51 = vmul.f32 0.125, %v769_v25  ;;  %vm15965_vm7 = vmmov %vm15963_vm14  ;;  %v15966_v47 = vld [vmem:[#allocation38_spill] sm:$0xff]  ;;  %v15971_v25 = vld [vmem:[#allocation5_spill] sm:$0xff] }
 0x278   : > { %v3794_v28 = vadd.f32 %v3602_v62, %v11962_v30  ;;  %v2193_v58 = vsel %vm15965_vm7, %v2191_v46, %v2192_v18  ;;  %v737_v4 = vadd.f32 %v729_v60, %v15966_v47  ;;  %v749_v43 = vrot.slane %v743_v40, 1  ;;  %vm15967_vm3 = vmmov %vm15965_vm7 }
 0x279   : > { %v4049_v16 = vsub.f32 %v3793_v54, %v15887_v35  ;;  %v2199_v37 = vsel %vm15967_vm3, %v2196_v44, %v2198_v19  ;;  %v777_v62 = vadd.f32 %v773_v51, %v15968_v23  ;;  %v15129_v61 = vrot.slane %v11972_v34, 2  ;;  %vm15970_vm15 = vmmov %vm15967_vm3  ;;  %v15979_v51 = vld [vmem:[#allocation105_spill] sm:$0xff] }
 0x27a   : > { %v4050_v32 = vsub.f32 %v3794_v28, %v15892_v53  ;;  %v2514_v20 = vsel %vm8728_vm8, %v2195_v63, 0.0  ;;  %vm15969_vm0 = vcmask 777216   ;;  %v4175_v35 = vmul.f32 0.125, %v4047_v49  ;;  %vm15975_vm8 = vmmov %vm15967_vm3  ;;  %v12009_v28 = vld [vmem:[%s8350_s22 + $0x3c8] sm:$0xff]  ;;  %v1584_v63 = vld [vmem:[#allocation3 + $0x3d0] sm:$0xff] }
 0x27b   : > { %v754_v46 = vsel %vm15969_vm0, %v743_v40, %v749_v43  ;;  %v4176_v18 = vmul.f32 0.125, %v4048_v6  ;;  %v2197_v47 = vsel %vm15970_vm15, %v2194_v33, %v2196_v44  ;;  %v11990_v54 = vrot.slane %v777_v62, %v15971_v25  ;;  %v2907_v44 = vld [vmem:[#allocation3 + $0x250] sm:$0xff]  ;;  %v12006_v6 = vld [vmem:[#allocation3 + $0x258] sm:$0xff]  ;;  %15976 = vst [vmem:[#allocation66_spill] sm:$0xff] %v12009_v28 }
 0x27c   : > { %v11993_v48 = vrot.slane %v777_v62, %v15973_v29  ;;  %v762_v53 = vadd.f32 %v754_v46, %v737_v4  ;;  %v2516_v8 = vsel %vm15904_vm9, %v2199_v37, 0.0  ;;  %v4177_v60 = vmul.f32 0.125, %v4049_v16  ;;  %v8235_v4 = vld [vmem:[%s8291_s15 + $0x2] sm:$0x3]  ;;  %v12047_v62 = vpop.permute.xlu0 %5071 }
 0x27d   : > { %15972 = vst [vmem:[#allocation13_spill] sm:$0xff] %v11990_v54  ;;  %v2201_v43 = vsel %vm15975_vm8, %v2198_v19, %v15129_v61  ;;  %v12001_v49 = vadd.f32 %v2193_v58, %v11905_v22  ;;  %v12004_v33 = vadd.f32 %v2514_v20, %v11917_v26  ;;  %vm4505_vm6 = vcmp.eq.f32.partialorder %v11729_v45, %v11990_v54  ;;  %v12019_v26 = vld [vmem:[%s8350_s22 + $0x2a8] sm:$0xff] }
 0x27e   : > { %15974 = vst [vmem:[#allocation9_spill] sm:$0xff] %v11993_v48  ;;  %v770_v59 = vsub.f32 %v762_v53, %v8235_v4  ;;  %vm4506_vm9 = vcmp.eq.f32.partialorder %v11729_v45, %v11993_v48  ;;  %v4178_v19 = vmul.f32 0.125, %v4050_v32  ;;  %vm15977_vm11 = vcmask 7168   ;;  %15978 = vst [vmem:[#allocation12_spill] sm:$0xff] %v12019_v26 }
 0x27f   : > { %1469 = vst.msk [vmem:[#allocation3 + $0x451] sm:$0xff] %vm15977_vm11, %v12009_v28  ;;  %v15133_v22 = vmov 1.0   ;;  %v15980_v40 = vsel %vm15940_vm1, %v11780_v17, 0.0  ;;  %v12028_v16 = vadd.f32 %v2197_v47, %v11920_v27  ;;  %v12031_v45 = vadd.f32 %v2516_v8, %v11933_v11  ;;  %vm15981_vm14 = vmmov %vm15977_vm11 }
 0x280   : > { %7371 = vmatprep.mubr.msk.f32.mxu0 %vm4506_vm9, %v15133_v22  ;;  %v1872_v58 = vadd.f32 %v15980_v40, %v15979_v51  ;;  %v12033_v37 = vadd.f32 %v2201_v43, %v1836_v21  ;;  %2769 = vst.msk [vmem:[#allocation3 + $0x261] sm:$0xff] %vm15981_vm14, %v12001_v49  ;;  %vm15982_vm7 = vmmov %vm15977_vm11  ;;  %v774_v23 = vmul.f32 0.125, %v770_v59  ;;  %vm4508_vm0 = vcmp.eq.f32.partialorder %v11890_v2, %v11993_v48  ;;  %v12045_v21 = vld [vmem:[#allocation3 + $0x3d8] sm:$0xff]  ;;  %v12104_v59 = vpop.permute.xlu0 %5076 }
 0x281   : > { %2770 = vst.msk [vmem:[#allocation3 + $0x269] sm:$0xff] %vm15982_vm7, %v12004_v33  ;;  %vm15983_vm3 = vmmov %vm15982_vm7  ;;  %7372 = vmatmul.mubr.msk.f32.vlgmr.msra.gmra.mrb[0].mxu0 %vm4505_vm6, %v15133_v22  ;;  %v3244_v11 = vrot.slane %v2907_v44, 1  ;;  %v15130_v27 = vrot.slane %v12006_v6, 1  ;;  %v12051_v32 = vadd.f32 %v4174_v56, %v11793_v57  ;;  %v12054_v20 = vadd.f32 %v4175_v35, %v11812_v1  ;;  %v12068_v56 = vld [vmem:[%s8350_s22 + $0x2b0] sm:$0xff] }
 0x282   : > { %1433 = vst.msk [vmem:[#allocation3 + $0x309] sm:$0xff] %vm15983_vm3, %v12019_v26  ;;  %7373 = vmatprep.mubr.msk.f32.mxu0 %vm4508_vm0, %v15133_v22  ;;  %v12058_v46 = vadd.f32 %v11914_v31, %v11865_v15  ;;  %vm15987_vm15 = vmmov %vm15983_vm3  ;;  %v15990_v47 = vmov 1.0|1.0   ;;  %v2273_v57 = vrot.slane %v1584_v63, 2  ;;  %v15992_v1 = vld [vmem:[#allocation37_spill] sm:$0xff]  ;;  %v12072_v53 = vadd.f32 %v4176_v18, %v11846_v36 }
 0x283   : > { %15984 = vst [vmem:[#allocation16_spill] sm:$0xff] %v12051_v32  ;;  %15985 = vst [vmem:[#allocation60_spill] sm:$0xff] %v12054_v20  ;;  %7890 = vmatpush1.bf16.msra.mxu0 %v15990_v47  ;;  %v778_v35 = vadd.f32 %v774_v23, %v15992_v1  ;;  %v12075_v31 = vadd.f32 %v4177_v60, %v11849_v3  ;;  %v12078_v15 = vadd.f32 %v4178_v19, %v11897_v12  ;;  %v15996_v8 = vmov 0.0|0.0   ;;  %v12117_v23 = vld [vmem:[#allocation3 + $0x290] sm:$0xff]  ;;  %v16005_v1 = vld [vmem:[#allocation69_spill] sm:$0xff] }
 0x284   : > { %15986 = vst [vmem:[#allocation30_spill] sm:$0xff] %v12058_v46  ;;  %2771 = vst.msk [vmem:[#allocation3 + $0x271] sm:$0xff] %vm15987_vm15, %v12028_v16  ;;  %7891 = vmatprep.subr.bf16.mxu0 %v15996_v8  ;;  %vm4507_vm11 = vcmp.eq.f32.partialorder %v11890_v2, %v11990_v54  ;;  %vm15998_vm14 = vcmask 1046528   ;;  %v15999_v36 = vrot.slane %v11780_v17, 2  ;;  %vm16000_vm7 = vcmask 1045504   ;;  %v16001_v2 = vld [vmem:[#allocation45_spill] sm:$0xff] }
 0x285   : > { %vm15988_vm8 = vmmov %vm15983_vm3  ;;  %15991 = vst [vmem:[#allocation18_spill] sm:$0xff] %v12068_v56  ;;  %v3246_v43 = vsel %vm15998_vm14, %v3244_v11, %v15130_v27  ;;  %v15128_v18 = vrot.slane %v12045_v21, 2  ;;  %v12093_v12 = vrot.slane %v778_v35, %v15971_v25  ;;  %v12096_v60 = vrot.slane %v778_v35, %v15973_v29  ;;  %7374 = vmatmul.mubr.msk.f32.gmra.mrb[2].mxu0 %vm4507_vm11, %v15133_v22 }
 0x286   : > { %2772 = vst.msk [vmem:[#allocation3 + $0x279] sm:$0xff] %vm15988_vm8, %v12031_v45  ;;  %vm15989_vm9 = vmmov %vm15983_vm3  ;;  %v2274_v3 = vsel %vm16000_vm7, %v15999_v36, %v2273_v57  ;;  %v12107_v17 = vmul.f32 100.0, %v15947_v42  ;;  %v1873_v19 = vadd.f32 %v1584_v63, %v11281_v24  ;;  %v12112_v40 = vadd.f32 %v11894_v41, %v11830_v38 }
 0x287   : > { %2773 = vst.msk [vmem:[#allocation3 + $0x281] sm:$0xff] %vm15989_vm9, %v12033_v37  ;;  %15993 = vst [vmem:[#allocation78_spill] sm:$0xff] %v12072_v53  ;;  %v12099_v44 = vadd.f32 %v2274_v3, %v1872_v58  ;;  %7892 = vmatpush1.bf16.msra.mxu0 %v15990_v47  ;;  %vm5231_vm15 = vcmp.eq.f32.partialorder %v11825_v5, %v12096_v60  ;;  %vm5230_vm8 = vcmp.eq.f32.partialorder %v11825_v5, %v12093_v12  ;;  %v12130_v41 = vld [vmem:[#allocation3 + $0x260] sm:$0xff] }
 0x288   : > { %15994 = vst [vmem:[#allocation52_spill] sm:$0xff] %v12075_v31  ;;  %15995 = vst [vmem:[#allocation57_spill] sm:$0xff] %v12078_v15  ;;  %v3566_v63 = vadd.f32 %v3246_v43, %v12001_v49  ;;  %v12128_v38 = vmul.f32 100.0, %v15915_v52  ;;  %7893 = vmatprep.subr.bf16.mxu0 %v15996_v8  ;;  %7499 = vmatprep.mubr.msk.f32.mxu1 %vm5231_vm15, %v15133_v22  ;;  %v12139_v5 = vadd.f32 %v11941_v0, %v11816_v50  ;;  %v16006_v0 = vld [vmem:[#allocation46_spill] sm:$0xff]  ;;  %vm16009_vm15 = vcmask 1046528   ;;  %v16034_v31 = vld [vmem:[#allocation68_spill] sm:$0xff] }
 0x289   : > { %vm15997_vm6 = vmmov %vm15983_vm3  ;;  %vm16002_vm3 = vnez %v16001_v2  ;;  %v1710_v49 = vsel %vm15911_vm2, %v12117_v23, 0.0  ;;  %7500 = vmatmul.mubr.msk.f32.vlgmr.msra.gmra.mrb[0].mxu1 %vm5230_vm8, %v15133_v22  ;;  %v3247_v50 = vrot.slane %v12130_v41, 1  ;;  %vm16007_vm11 = vnez %v16006_v0  ;;  %v12165_v41 = vld [vmem:[#allocation3 + $0x268] sm:$0xff] }
 0x28a   : > { %1434 = vst.msk [vmem:[#allocation3 + $0x311] sm:$0xff] %vm15997_vm6, %v12068_v56  ;;  %v1746_v4 = vsel %vm16002_vm3, %v12045_v21, 0.0  ;;  %vm16003_vm0 = vmmov %vm16000_vm7  ;;  %v15141_v39 = vrot.slane %v12117_v23, 2  ;;  %7922 = vmatpush1.bf16.msra.mxu1 %v15990_v47  ;;  %vm5232_vm7 = vcmp.eq.f32.partialorder %v16005_v1, %v12093_v12  ;;  %v15148_v26 = vrot.slane %v12165_v41, 1 }
 0x28b   : > { %v2276_v58 = vsel %vm16003_vm0, %v2273_v57, %v15128_v18  ;;  %vm16004_vm9 = vmmov %vm15997_vm6  ;;  %v12135_v11 = vadd.f32 %v1746_v4, %v11317_v7  ;;  %v1837_v57 = vadd.f32 %v11972_v34, %v11278_v13  ;;  %vm5233_vm6 = vcmp.eq.f32.partialorder %v16005_v1, %v12096_v60  ;;  %v12149_v35 = vld [vmem:[#allocation3 + $0x270] sm:$0xff]  ;;  %v4347_v4 = vpop.permute.xlu1 %4346  ;;  %v12158_v18 = vpop.permute.xlu0 %5081  ;;  %7923 = vmatprep.subr.bf16.mxu1 %v15996_v8 }
 0x28c   : > { %2809 = vst.msk [vmem:[#allocation3 + $0x3c9] sm:$0xff] %vm16004_vm9, %v12099_v44  ;;  %v2554_v3 = vsel %vm16007_vm11, %v2276_v58, 0.0  ;;  %7501 = vmatprep.mubr.msk.f32.mxu1 %vm5233_vm6, %v15133_v22  ;;  %v15138_v61 = vrot.slane %v12149_v35, 1  ;;  %vm4510_vm2 = vcmp.eq.f32.partialorder %v4347_v4, %v11993_v48  ;;  %vm4509_vm14 = vcmp.eq.f32.partialorder %v4347_v4, %v11990_v54  ;;  %v12174_v58 = vld [vmem:[#allocation3 + $0x3e0] sm:$0xff]  ;;  %vm16011_vm8 = vmmov %vm16009_vm15  ;;  %7894 = vmatpush1.bf16.msra.mxu0 %v15990_v47 }
 0x28d   : > { %v2912_v43 = vld [vmem:[#allocation3 + $0x278] sm:$0xff]  ;;  %v12163_v25 = vadd.f32 %v2554_v3, %v1873_v19  ;;  %vm5235_vm0 = vcmp.eq.f32.partialorder %v12047_v62, %v12096_v60  ;;  %7375 = vmatprep.mubr.msk.f32.mxu0 %vm4510_vm2, %v15133_v22  ;;  %v16010_v3 = vrot.slane %v12006_v6, 1  ;;  %vm16012_vm9 = vmmov %vm16011_vm8  ;;  %vm16013_vm6 = vcmask 7168   ;;  %7895 = vmatprep.subr.bf16.mxu0 %v15996_v8 }
 0x28e   : > { %v12151_v36 = vld [vmem:[#allocation3 + $0x280] sm:$0xff]  ;;  %v3253_v27 = vrot.slane %v2912_v43, 1  ;;  %v12177_v43 = vld [vmem:[%s8350_s22 + $0x2b8] sm:$0xff]  ;;  %v16014_v22 = vrot.slane %v11972_v34, 2  ;;  %vm16015_vm2 = vcmask 1045504   ;;  %v16017_v6 = vmov 1.0   ;;  %7924 = vmatpush1.bf16.msra.mxu1 %v15990_v47 }
 0x28f   : > { %v15137_v29 = vrot.slane %v12151_v36, 1  ;;  %16008 = vst [vmem:[#allocation33_spill] sm:$0xff] %v12177_v43  ;;  %v3248_v1 = vsel %vm16011_vm8, %v16010_v3, %v3247_v50  ;;  %2810 = vst.msk [vmem:[#allocation3 + $0x3d1] sm:$0xff] %vm16013_vm6, %v12163_v25  ;;  %7376 = vmatmul.mubr.msk.f32.gmra.mrb[4].mxu0 %vm4509_vm14, %v16017_v6  ;;  %7502 = vmatmul.mubr.msk.f32.gmra.mrb[2].mxu1 %vm5232_vm7, %v16017_v6  ;;  %v4352_v34 = vpop.permute.xlu1 %4351  ;;  %vm5234_vm14 = vcmp.eq.f32.partialorder %v12047_v62, %v12093_v12 }
 0x290   : > { %v12183_v19 = vsel %vm16009_vm15, %v15138_v61, %v3253_v27  ;;  %v2203_v56 = vsel %vm16015_vm2, %v16014_v22, %v15141_v39  ;;  %vm16016_vm15 = vmmov %vm16013_vm6  ;;  %v3567_v3 = vadd.f32 %v3248_v1, %v12004_v33  ;;  %7503 = vmatprep.mubr.msk.f32.mxu1 %vm5235_vm0, %v16017_v6  ;;  %v12213_v22 = vpop.permute.xlu0 %5086  ;;  %vm5237_vm7 = vcmp.eq.f32.partialorder %v12104_v59, %v12096_v60  ;;  %v16020_v1 = vld [vmem:[#allocation110_spill] sm:$0xff] }
 0x291   : > { %v12191_v4 = vsel %vm16012_vm9, %v3253_v27, %v15137_v29  ;;  %1435 = vst.msk [vmem:[#allocation3 + $0x319] sm:$0xff] %vm16016_vm15, %v12177_v43  ;;  %v3758_v27 = vadd.f32 %v3566_v63, %v12183_v19  ;;  %v2518_v61 = vsel %vm15924_vm5, %v2203_v56, 0.0  ;;  %v12224_v56 = vld [vmem:[%s8350_s22 + $0x2c0] sm:$0xff]  ;;  %vm4512_vm5 = vcmp.eq.f32.partialorder %v4352_v34, %v11993_v48  ;;  %vm16021_vm9 = vmmov %vm16013_vm6  ;;  %7925 = vmatprep.subr.bf16.mxu1 %v15996_v8 }
 0x292   : > { %v12219_v63 = vadd.f32 %v2518_v61, %v1837_v57  ;;  %16019 = vst [vmem:[#allocation14_spill] sm:$0xff] %v12224_v56  ;;  %vm4511_vm0 = vcmp.eq.f32.partialorder %v4352_v34, %v11990_v54  ;;  %vm5236_vm8 = vcmp.eq.f32.partialorder %v12104_v59, %v12093_v12  ;;  %v12231_v39 = vadd.f32 %v1710_v49, %v16020_v1  ;;  %vm16022_vm15 = vmmov %vm16021_vm9  ;;  %v16023_v34 = vld [vmem:[#allocation107_spill] sm:$0xff] }
 0x293   : > { %v2954_v33 = vld [vmem:[#allocation3 + $0x3c8] sm:$0xff]  ;;  %1436 = vst.msk [vmem:[#allocation3 + $0x321] sm:$0xff] %vm16021_vm9, %v12224_v56  ;;  %7377 = vmatprep.mubr.msk.f32.mxu0 %vm4512_vm5, %v16017_v6  ;;  %vm5239_vm6 = vcmp.eq.f32.partialorder %v12158_v18, %v12096_v60  ;;  %vm5238_vm2 = vcmp.eq.f32.partialorder %v12158_v18, %v12093_v12  ;;  %v3759_v57 = vadd.f32 %v3567_v3, %v12191_v4  ;;  %v12252_v29 = vmul.f32 100.0, %v16023_v34  ;;  %v4357_v28 = vpop.permute.xlu1 %4356 }
 0x294   : > { %v3328_v61 = vrot.slane %v2954_v33, 1  ;;  %2774 = vst.msk [vmem:[#allocation3 + $0x289] sm:$0xff] %vm16022_vm15, %v12219_v63  ;;  %7378 = vmatmul.mubr.msk.f32.gmra.mrb[6].mxu0 %vm4511_vm0, %v16017_v6  ;;  %7504 = vmatmul.mubr.msk.f32.gmra.mrb[4].mxu1 %vm5234_vm14, %v16017_v6  ;;  %v4014_v49 = vsub.f32 %v3758_v27, %v15947_v42  ;;  %vm16024_vm5 = vcmask 1046528   ;;  %v16025_v33 = vrot.slane %v12174_v58, 2  ;;  %v12266_v42 = vpop.permute.xlu0 %5091 }
 0x295   : > { %v3250_v3 = vsel %vm16024_vm5, %v3247_v50, %v15148_v26  ;;  %v16026_v56 = vrot.slane %v12045_v21, 2  ;;  %vm16027_vm9 = vcmask 1045504   ;;  %7505 = vmatprep.mubr.msk.f32.mxu1 %vm5237_vm7, %v16017_v6  ;;  %v16028_v62 = vrot.slane %v11937_v10, 1  ;;  %vm16029_vm14 = vmmov %vm16024_vm5  ;;  %v16030_v26 = vld [vmem:[#allocation101_spill] sm:$0xff]  ;;  %7926 = vmatpush1.bf16.msra.mxu1 %v15990_v47 }
 0x296   : > { %v4015_v50 = vsub.f32 %v3759_v57, %v16023_v34  ;;  %v12275_v15 = vmul.f32 100.0, %v16030_v26  ;;  %vm4514_vm7 = vcmp.eq.f32.partialorder %v4357_v28, %v11993_v48  ;;  %vm4513_vm0 = vcmp.eq.f32.partialorder %v4357_v28, %v11990_v54  ;;  %v12285_v10 = vld [vmem:[#allocation3 + $0x3d0] sm:$0xff]  ;;  %v16032_v57 = vld [vmem:[#allocation77_spill] sm:$0xff]  ;;  %7896 = vmatpush1.bf16.msra.mxu0 %v15990_v47  ;;  %7927 = vmatprep.subr.bf16.mxu1 %v15996_v8 }
 0x297   : > { %v2278_v43 = vsel %vm16027_vm9, %v16026_v56, %v16025_v33  ;;  %v12271_v27 = vsel %vm16029_vm14, %v16028_v62, %v3328_v61  ;;  %v12280_v56 = vld [vmem:[#allocation3 + $0x298] sm:$0xff]  ;;  %v16031_v33 = vld [vmem:[#allocation108_spill] sm:$0xff]  ;;  %v12292_v34 = vadd.f32 %v12174_v58, %v16032_v57  ;;  %7379 = vmatprep.mubr.msk.f32.mxu0 %vm4514_vm7, %v16017_v6  ;;  %vm5241_vm15 = vcmp.eq.f32.partialorder %v12213_v22, %v12096_v60  ;;  %v4362_v53 = vpop.permute.xlu1 %4361 }
 0x298   : > { %v12278_v21 = vadd.f32 %v2278_v43, %v12135_v11  ;;  %v12288_v62 = vmul.f32 100.0, %v16031_v33  ;;  %vm5240_vm5 = vcmp.eq.f32.partialorder %v12213_v22, %v12093_v12  ;;  %v3795_v28 = vadd.f32 %v12112_v40, %v12271_v27  ;;  %7380 = vmatmul.mubr.msk.f32.gmra.mrb[8].mxu0 %vm4513_vm0, %v16017_v6  ;;  %7506 = vmatmul.mubr.msk.f32.gmra.mrb[6].mxu1 %vm5236_vm8, %v16017_v6  ;;  %v12321_v20 = vpop.permute.xlu0 %5096  ;;  %vm16036_vm8 = vmmov %vm16029_vm14  ;;  %v12335_v11 = vld [vmem:[%s8350_s22 + $0x2c8] sm:$0xff] }
 0x299   : > { %vm16033_vm9 = vcmask 7168   ;;  %v4142_v43 = vmul.f32 0.125, %v4014_v49  ;;  %v3568_v46 = vadd.f32 %v3250_v3, %v12028_v16  ;;  %v12314_v40 = vadd.f32 %v11944_v14, %v16034_v31  ;;  %7507 = vmatprep.mubr.msk.f32.mxu1 %vm5239_vm6, %v16017_v6  ;;  %v16037_v14 = vld [vmem:[#allocation103_spill] sm:$0xff]  ;;  %v12332_v3 = vld [vmem:[#allocation3 + $0x3e8] sm:$0xff]  ;;  %16038 = vst [vmem:[#allocation15_spill] sm:$0xff] %v12335_v11  ;;  %vm16041_vm0 = vmmov %vm16036_vm8  ;;  %7928 = vmatpush1.bf16.msra.mxu1 %v15990_v47 }
 0x29a   : > { %2811 = vst.msk [vmem:[#allocation3 + $0x3d9] sm:$0xff] %vm16033_vm9, %v12278_v21  ;;  %v4051_v59 = vsub.f32 %v3795_v28, %v15915_v52  ;;  %v4143_v32 = vmul.f32 0.125, %v4015_v50  ;;  %v16035_v49 = vrot.slane %v12285_v10, 1  ;;  %v12330_v31 = vmul.f32 100.0, %v16037_v14  ;;  %1437 = vst.msk [vmem:[#allocation3 + $0x329] sm:$0xff] %vm16033_vm9, %v12335_v11  ;;  %7897 = vmatprep.subr.bf16.mxu0 %v15996_v8  ;;  %7929 = vmatprep.subr.bf16.mxu1 %v15996_v8 }
 0x29b   : > { %vm4516_vm14 = vcmp.eq.f32.partialorder %v4362_v53, %v11993_v48  ;;  %vm4515_vm6 = vcmp.eq.f32.partialorder %v4362_v53, %v11990_v54  ;;  %vm5243_vm7 = vcmp.eq.f32.partialorder %v12266_v42, %v12096_v60  ;;  %v12341_v52 = vld [vmem:[#allocation3 + $0x288] sm:$0xff]  ;;  %v16039_v50 = vrot.slane %v12149_v35, 1  ;;  %7898 = vmatpush1.bf16.msra.mxu0 %v15990_v47 }
 0x29c   : > { %v12327_v16 = vsel %vm16036_vm8, %v3328_v61, %v16035_v49  ;;  %v16040_v61 = vrot.slane %v12165_v41, 1  ;;  %7381 = vmatprep.mubr.msk.f32.mxu0 %vm4516_vm14, %v16017_v6  ;;  %vm5242_vm8 = vcmp.eq.f32.partialorder %v12266_v42, %v12093_v12  ;;  %v16042_v35 = vrot.slane %v12280_v56, 2  ;;  %7508 = vmatmul.mubr.msk.f32.gmra.mrb[8].mxu1 %vm5238_vm2, %v16017_v6 }
 0x29d   : > { %v3796_v53 = vadd.f32 %v12139_v5, %v12327_v16  ;;  %v16043_v41 = vrot.slane %v12117_v23, 2  ;;  %7382 = vmatmul.mubr.msk.f32.gmra.mrb[10].mxu0 %vm4515_vm6, %v16017_v6  ;;  %v16046_v5 = vld [vmem:[#allocation74_spill] sm:$0xff]  ;;  %7509 = vmatprep.mubr.msk.f32.mxu1 %vm5241_vm15, %v16017_v6  ;;  %v4179_v18 = vmul.f32 0.125, %v4051_v59  ;;  %vm16050_vm2 = vcmask 1046528   ;;  %v12396_v23 = vld [vmem:[#allocation3 + $0x2a0] sm:$0xff] }
 0x29e   : > { %v3252_v28 = vsel %vm16041_vm0, %v16040_v61, %v16039_v50  ;;  %vm16044_vm0 = vcmask 1045504   ;;  %v12369_v61 = vadd.f32 %v4142_v43, %v12107_v17  ;;  %v1839_v49 = vadd.f32 %v12280_v56, %v16046_v5  ;;  %v16051_v59 = vld [vmem:[#allocation8_spill] sm:$0xff]  ;;  %7930 = vmatpush1.bf16.msra.mxu1 %v15990_v47  ;;  %7899 = vmatprep.subr.bf16.mxu0 %v15996_v8 }
 0x29f   : > { %v2205_v50 = vsel %vm16044_vm0, %v16043_v41, %v16042_v35  ;;  %v4367_v35 = vpop.permute.xlu1 %4366  ;;  %v12381_v41 = vpop.permute.xlu0 %5101  ;;  %v12384_v17 = vadd.f32 %v4143_v32, %v12252_v29  ;;  %v16048_v43 = vrot.slane %v12341_v52, 1  ;;  %vm5245_vm6 = vcmp.eq.f32.partialorder %v12321_v20, %v12096_v60  ;;  %7900 = vmatpush1.bf16.msra.mxu0 %v15990_v47  ;;  %7931 = vmatprep.subr.bf16.mxu1 %v15996_v8 }
 0x2a0   : > { %16045 = vst [vmem:[#allocation27_spill] sm:$0xff] %v12369_v61  ;;  %v12374_v11 = vadd.f32 %v2205_v50, %v12231_v39  ;;  %v16049_v61 = vrot.slane %v12151_v36, 1  ;;  %v12394_v50 = vadd.f32 %v3252_v28, %v12031_v45  ;;  %vm4518_vm15 = vcmp.eq.f32.partialorder %v4367_v35, %v11993_v48  ;;  %7510 = vmatmul.mubr.msk.f32.gmra.mrb[10].mxu1 %vm5240_vm5, %v16017_v6 }
 0x2a1   : > { %16047 = vst [vmem:[#allocation43_spill] sm:$0xff] %v12384_v17  ;;  %vm4517_vm14 = vcmp.eq.f32.partialorder %v4367_v35, %v11990_v54  ;;  %v4052_v32 = vsub.f32 %v3796_v53, %v16030_v26  ;;  %v12403_v29 = vld [vmem:[#allocation3 + $0x3d8] sm:$0xff]  ;;  %7383 = vmatprep.mubr.msk.f32.mxu0 %vm4518_vm15, %v16017_v6  ;;  %vm16052_vm0 = vnez %v16051_v59  ;;  %v16054_v26 = vrot.slane %v12174_v58, 2  ;;  %7511 = vmatprep.mubr.msk.f32.mxu1 %vm5243_vm7, %v16017_v6 }
 0x2a2   : > { %v12391_v39 = vsel %vm16050_vm2, %v16049_v61, %v16048_v43  ;;  %2775 = vst.msk [vmem:[#allocation3 + $0x291] sm:$0xff] %vm16033_vm9, %v12374_v11  ;;  %v1748_v28 = vsel %vm16052_vm0, %v12332_v3, 0.0  ;;  %v16053_v61 = vrot.slane %v12332_v3, 2  ;;  %vm16055_vm2 = vcmask 1045504   ;;  %7384 = vmatmul.mubr.msk.f32.gmra.mrb[12].mxu0 %vm4517_vm14, %v16017_v6  ;;  %7932 = vmatpush1.bf16.msra.mxu1 %v15990_v47 }
 0x2a3   : > { %v3760_v45 = vadd.f32 %v3568_v46, %v12391_v39  ;;  %v16056_v46 = vld [vmem:[#allocation10_spill] sm:$0xff]  ;;  %v12431_v58 = vadd.f32 %v11962_v30, %v12099_v44  ;;  %v12438_v22 = vpop.permute.xlu0 %5106  ;;  %v16060_v30 = vrot.slane %v12285_v10, 1  ;;  %vm16061_vm5 = vcmask 1046528   ;;  %7901 = vmatprep.subr.bf16.mxu0 %v15996_v8  ;;  %7933 = vmatprep.subr.bf16.mxu1 %v15996_v8 }
 0x2a4   : > { %v2280_v53 = vsel %vm16055_vm2, %v16054_v26, %v16053_v61  ;;  %vm16057_vm9 = vnez %v16056_v46  ;;  %v4372_v61 = vpop.permute.xlu1 %4371  ;;  %v12441_v26 = vadd.f32 %v4179_v18, %v12128_v38  ;;  %v4180_v17 = vmul.f32 0.125, %v4052_v32  ;;  %v16062_v46 = vld [vmem:[#allocation96_spill] sm:$0xff]  ;;  %v12457_v18 = vld [vmem:[#allocation3 + $0x3f0] sm:$0xff]  ;;  %7512 = vmatmul.mubr.msk.f32.gmra.mrb[12].mxu1 %vm5242_vm8, %v16017_v6  ;;  %7902 = vmatpush1.bf16.msra.mxu0 %v15990_v47 }
 0x2a5   : > { %v2556_v35 = vsel %vm16057_vm9, %v2280_v53, 0.0  ;;  %v4016_v36 = vsub.f32 %v3760_v45, %v16031_v33  ;;  %v16059_v53 = vrot.slane %v12403_v29, 1  ;;  %vm4520_vm14 = vcmp.eq.f32.partialorder %v4372_v61, %v11993_v48  ;;  %v16063_v33 = vld [vmem:[#allocation109_spill] sm:$0xff]  ;;  %7513 = vmatprep.mubr.msk.f32.mxu1 %vm5245_vm6, %v16017_v6  ;;  %7903 = vmatprep.subr.bf16.mxu0 %v15996_v8 }
 0x2a6   : > { %16058 = vst [vmem:[#allocation35_spill] sm:$0xff] %v12441_v26  ;;  %v12452_v43 = vadd.f32 %v2556_v35, %v12292_v34  ;;  %vm4519_vm7 = vcmp.eq.f32.partialorder %v4372_v61, %v11990_v54  ;;  %v1876_v38 = vadd.f32 %v1748_v28, %v16062_v46  ;;  %7385 = vmatprep.mubr.msk.f32.mxu0 %vm4520_vm14, %v16017_v6  ;;  %v12466_v34 = vmul.f32 100.0, %v16063_v33  ;;  %v12503_v46 = vld [vmem:[#allocation3 + $0x2a8] sm:$0xff]  ;;  %v16075_v35 = vld [vmem:[#allocation102_spill] sm:$0xff] }
 0x2a7   : > { %v12449_v44 = vsel %vm16061_vm5, %v16060_v30, %v16059_v53  ;;  %vm5247_vm2 = vcmp.eq.f32.partialorder %v12381_v41, %v12096_v60  ;;  %vm16064_vm5 = vcmask 7168   ;;  %v16065_v32 = vrot.slane %v12396_v23, 2  ;;  %7386 = vmatmul.mubr.msk.f32.gmra.mrb[14].mxu0 %vm4519_vm7, %v16017_v6  ;;  %v12495_v42 = vpop.permute.xlu0 %5111  ;;  %7934 = vmatpush1.bf16.msra.mxu1 %v15990_v47 }
 0x2a8   : > { %v3797_v10 = vadd.f32 %v12314_v40, %v12449_v44  ;;  %2812 = vst.msk [vmem:[#allocation3 + $0x3e1] sm:$0xff] %vm16064_vm5, %v12452_v43  ;;  %v16066_v45 = vrot.slane %v12280_v56, 2  ;;  %vm16067_vm15 = vcmask 1045504   ;;  %vm5246_vm14 = vcmp.eq.f32.partialorder %v12381_v41, %v12093_v12  ;;  %v4377_v53 = vpop.permute.xlu1 %4376  ;;  %7904 = vmatpush1.bf16.msra.mxu0 %v15990_v47  ;;  %7935 = vmatprep.subr.bf16.mxu1 %v15996_v8 }
 0x2a9   : > { %v12484_v40 = vmul.f32 100.0, %v15979_v51  ;;  %v1712_v56 = vsel %vm15940_vm1, %v12396_v23, 0.0  ;;  %v4144_v30 = vmul.f32 0.125, %v4016_v36  ;;  %v15152_v9 = vrot.slane %v12457_v18, 2  ;;  %7905 = vmatprep.subr.bf16.mxu0 %v15996_v8 }
 0x2aa   : > { %v2207_v28 = vsel %vm16067_vm15, %v16066_v45, %v16065_v32  ;;  %v4053_v32 = vsub.f32 %v3797_v10, %v16037_v14  ;;  %v12498_v45 = vld [vmem:[#allocation3 + $0x290] sm:$0xff]  ;;  %vm4521_vm1 = vcmp.eq.f32.partialorder %v4377_v53, %v11990_v54  ;;  %vm5249_vm8 = vcmp.eq.f32.partialorder %v12438_v22, %v12096_v60  ;;  %vm16071_vm15 = vmmov %vm16064_vm5 }
 0x2ab   : > { %v2520_v61 = vsel %vm15932_vm13, %v2207_v28, 0.0  ;;  %vm4522_vm13 = vcmp.eq.f32.partialorder %v4377_v53, %v11993_v48  ;;  %v12511_v36 = vadd.f32 %v4180_v17, %v12275_v15  ;;  %vm5248_vm6 = vcmp.eq.f32.partialorder %v12438_v22, %v12093_v12  ;;  %v12547_v53 = vpop.permute.xlu0 %5116  ;;  %7936 = vmatpush1.bf16.msra.mxu1 %v15990_v47 }
 0x2ac   : > { %v12500_v26 = vadd.f32 %v2520_v61, %v1839_v49  ;;  %7387 = vmatprep.mubr.msk.f32.mxu0 %vm4522_vm13, %v16017_v6  ;;  %v15151_v14 = vrot.slane %v12498_v45, 1  ;;  %v16070_v49 = vld [vmem:[#allocation97_spill] sm:$0xff]  ;;  %v12523_v28 = vadd.f32 %v12183_v19, %v12033_v37  ;;  %v16072_v15 = vrot.slane %v12332_v3, 2  ;;  %v4382_v61 = vpop.permute.xlu1 %4381  ;;  %7906 = vmatpush1.bf16.msra.mxu0 %v15990_v47 }
 0x2ad   : > { %16069 = vst [vmem:[#allocation106_spill] sm:$0xff] %v12511_v36  ;;  %v1840_v10 = vadd.f32 %v1712_v56, %v16070_v49  ;;  %vm16073_vm7 = vcmask 1045504   ;;  %7388 = vmatmul.mubr.msk.f32.gmra.mrb[16].mxu0 %vm4521_vm1, %v16017_v6  ;;  %vm16074_vm5 = vcmp.eq.f32.partialorder %v12321_v20, %v12093_v12  ;;  %v4181_v56 = vmul.f32 0.125, %v4053_v32  ;;  %7937 = vmatprep.subr.bf16.mxu1 %v15996_v8 }
 0x2ae   : > { %2776 = vst.msk [vmem:[#allocation3 + $0x299] sm:$0xff] %vm16071_vm15, %v12500_v26  ;;  %v2282_v17 = vsel %vm16073_vm7, %v16072_v15, %v15152_v9  ;;  %7514 = vmatmul.mubr.msk.f32.gmra.mrb[14].mxu1 %vm16074_vm5, %v16017_v6  ;;  %v12538_v37 = vadd.f32 %v12457_v18, %v16075_v35  ;;  %v15153_v3 = vrot.slane %v12503_v46, 2  ;;  %vm5251_vm13 = vcmp.eq.f32.partialorder %v12495_v42, %v12096_v60 }
 0x2af   : > { %v12540_v19 = vadd.f32 %v2282_v17, %v1876_v38  ;;  %7515 = vmatprep.mubr.msk.f32.mxu1 %vm5247_vm2, %v16017_v6  ;;  %v12552_v20 = vadd.f32 %v4144_v30, %v12288_v62  ;;  %v16077_v38 = vrot.slane %v12341_v52, 1  ;;  %vm16078_vm1 = vcmask 1046528   ;;  %v12564_v17 = vld [vmem:[#allocation3 + $0x3f8] sm:$0xff]  ;;  %v12569_v62 = vld [vmem:[#allocation3 + $0x3e0] sm:$0xff]  ;;  %v12615_v36 = vpop.permute.xlu0 %5121  ;;  %7938 = vmatpush1.bf16.msra.mxu1 %v15990_v47 }
 0x2b0   : > { %v12562_v15 = vmul.f32 100.0, %v15964_v55  ;;  %vm4524_vm2 = vcmp.eq.f32.partialorder %v4382_v61, %v11993_v48  ;;  %vm4523_vm15 = vcmp.eq.f32.partialorder %v4382_v61, %v11990_v54  ;;  %vm16079_vm7 = vcmask 7168   ;;  %7907 = vmatprep.subr.bf16.mxu0 %v15996_v8  ;;  %7939 = vmatprep.subr.bf16.mxu1 %v15996_v8 }
 0x2b1   : > { %16076 = vst [vmem:[#allocation34_spill] sm:$0xff] %v12552_v20  ;;  %v12559_v32 = vsel %vm16078_vm1, %v16077_v38, %v15151_v14  ;;  %2813 = vst.msk [vmem:[#allocation3 + $0x3e9] sm:$0xff] %vm16079_vm7, %v12540_v19  ;;  %v12575_v52 = vadd.f32 %v12271_v27, %v12163_v25  ;;  %v12578_v30 = vmul.f32 100.0, %v11281_v24  ;;  %7389 = vmatprep.mubr.msk.f32.mxu0 %vm4524_vm2, %v16017_v6  ;;  %v16080_v25 = vrot.slane %v12396_v23, 2  ;;  %v16084_v38 = vld [vmem:[#allocation76_spill] sm:$0xff]  ;;  %v4387_v20 = vpop.permute.xlu1 %4386 }
 0x2b2   : > { %vm5250_vm5 = vcmp.eq.f32.partialorder %v12495_v42, %v12093_v12  ;;  %v3761_v61 = vadd.f32 %v12394_v50, %v12559_v32  ;;  %vm16081_vm1 = vcmask 1045504   ;;  %v1750_v9 = vsel %vm9645_vm12, %v12564_v17, 0.0  ;;  %7390 = vmatmul.mubr.msk.f32.gmra.mrb[18].mxu0 %vm4523_vm15, %v16017_v6  ;;  %7516 = vmatmul.mubr.msk.f32.gmra.mrb[16].mxu1 %vm5246_vm14, %v16017_v6 }
 0x2b3   : > { %v2209_v27 = vsel %vm16081_vm1, %v16080_v25, %v15153_v3  ;;  %v12602_v50 = vadd.f32 %v4181_v56, %v12330_v31  ;;  %v12606_v23 = vadd.f32 %v12503_v46, %v16084_v38  ;;  %7517 = vmatprep.mubr.msk.f32.mxu1 %vm5249_vm8, %v16017_v6  ;;  %v16085_v31 = vrot.slane %v12569_v62, 1  ;;  %v12632_v3 = vld [vmem:[#allocation3 + $0x2b0] sm:$0xff]  ;;  %v690_v22 = vpop.permute.xlu0 %689  ;;  %7908 = vmatpush1.bf16.msra.mxu0 %v15990_v47 }
 0x2b4   : > { %v12608_v25 = vadd.f32 %v2209_v27, %v1840_v10  ;;  %v4017_v41 = vsub.f32 %v3761_v61, %v16063_v33  ;;  %v16086_v56 = vrot.slane %v12403_v29, 1  ;;  %vm16087_vm14 = vcmask 1046528   ;;  %7909 = vmatprep.subr.bf16.mxu0 %v15996_v8  ;;  %7940 = vmatpush1.bf16.msra.mxu1 %v15990_v47 }
 0x2b5   : > { %16083 = vst [vmem:[#allocation48_spill] sm:$0xff] %v12602_v50  ;;  %v12627_v10 = vadd.f32 %v12191_v4, %v12219_v63  ;;  %v12630_v27 = vmul.f32 100.0, %v11278_v13  ;;  %vm4526_vm8 = vcmp.eq.f32.partialorder %v4387_v20, %v11993_v48  ;;  %vm4525_vm2 = vcmp.eq.f32.partialorder %v4387_v20, %v11990_v54  ;;  %v12639_v29 = vld [vmem:[#allocation3 + $0x298] sm:$0xff]  ;;  %7941 = vmatprep.subr.bf16.mxu1 %v15996_v8 }
 0x2b6   : > { %v12623_v50 = vsel %vm16087_vm14, %v16086_v56, %v16085_v31  ;;  %vm5253_vm15 = vcmp.eq.f32.partialorder %v12547_v53, %v12096_v60  ;;  %2777 = vst.msk [vmem:[#allocation3 + $0x2a1] sm:$0xff] %vm16079_vm7, %v12608_v25  ;;  %v16088_v4 = vld [vmem:[#allocation59_spill] sm:$0xff]  ;;  %7391 = vmatprep.mubr.msk.f32.mxu0 %vm4526_vm8, %v16017_v6  ;;  %vm5252_vm1 = vcmp.eq.f32.partialorder %v12547_v53, %v12093_v12  ;;  %v16089_v61 = vrot.slane %v12564_v17, 2 }
 0x2b7   : > { %v12644_v63 = vadd.f32 %v1750_v9, %v16088_v4  ;;  %v3798_v33 = vadd.f32 %v12431_v58, %v12623_v50  ;;  %v16090_v31 = vrot.slane %v12457_v18, 2  ;;  %vm16091_vm14 = vcmask 1045504   ;;  %7392 = vmatmul.mubr.msk.f32.gmra.mrb[20].mxu0 %vm4525_vm2, %v16017_v6  ;;  %7518 = vmatmul.mubr.msk.f32.gmra.mrb[18].mxu1 %vm5248_vm6, %v16017_v6  ;;  %v16092_v58 = vld [vmem:[#allocation54_spill] sm:$0xff] }
 0x2b8   : > { %v12660_v9 = vadd.f32 %v12327_v16, %v12278_v21  ;;  %vm16093_vm8 = vnez %v16092_v58  ;;  %v12671_v18 = vmul.f32 100.0, %v11317_v7  ;;  %v1714_v21 = vsel %vm16002_vm3, %v12632_v3, 0.0  ;;  %7519 = vmatprep.mubr.msk.f32.mxu1 %vm5251_vm13, %v16017_v6  ;;  %v12689_v2 = vld [vmem:[#allocation3 + $0x3e8] sm:$0xff]  ;;  %7910 = vmatpush1.bf16.msra.mxu0 %v15990_v47 }
 0x2b9   : > { %v2284_v56 = vsel %vm16091_vm14, %v16090_v31, %v16089_v61  ;;  %v4392_v61 = vpop.permute.xlu1 %4391  ;;  %v4145_v31 = vmul.f32 0.125, %v4017_v41  ;;  %v4054_v58 = vsub.f32 %v3798_v33, %v15979_v51  ;;  %v16095_v14 = vrot.slane %v12498_v45, 1  ;;  %v12698_v41 = vld [vmem:[#allocation3 + $0x400] sm:$0xff]  ;;  %7942 = vmatpush1.bf16.msra.mxu1 %v15990_v47  ;;  %7911 = vmatprep.subr.bf16.mxu0 %v15996_v8 }
 0x2ba   : > { %v2558_v20 = vsel %vm16093_vm8, %v2284_v56, 0.0  ;;  %v16094_v56 = vrot.slane %v12639_v29, 1  ;;  %vm16096_vm6 = vcmask 1046528   ;;  %v694_v38 = vrot.slane %v690_v22, 7  ;;  %7943 = vmatprep.subr.bf16.mxu1 %v15996_v8 }
 0x2bb   : > { %v12692_v16 = vadd.f32 %v2558_v20, %v12538_v37  ;;  %vm4528_vm3 = vcmp.eq.f32.partialorder %v4392_v61, %v11993_v48  ;;  %vm4527_vm13 = vcmp.eq.f32.partialorder %v4392_v61, %v11990_v54  ;;  %vm5255_vm2 = vcmp.eq.f32.partialorder %v12615_v36, %v12096_v60  ;;  %7520 = vmatmul.mubr.msk.f32.gmra.mrb[20].mxu1 %vm5250_vm5, %v16017_v6  ;;  %v16102_v61 = vld [vmem:[#allocation23_spill] sm:$0xff] }
 0x2bc   : > { %v12687_v4 = vsel %vm16096_vm6, %v16095_v14, %v16094_v56  ;;  %7393 = vmatprep.mubr.msk.f32.mxu0 %vm4528_vm3, %v16017_v6  ;;  %vm5254_vm7 = vcmp.eq.f32.partialorder %v12615_v36, %v12093_v12  ;;  %vm16097_vm14 = vcmask 7168   ;;  %v16098_v14 = vrot.slane %v12632_v3, 2  ;;  %7521 = vmatprep.mubr.msk.f32.mxu1 %vm5253_vm15, %v16017_v6 }
 0x2bd   : > { %v3762_v51 = vadd.f32 %v12523_v28, %v12687_v4  ;;  %2814 = vst.msk [vmem:[#allocation3 + $0x3f1] sm:$0xff] %vm16097_vm14, %v12692_v16  ;;  %v16099_v28 = vrot.slane %v12503_v46, 2  ;;  %vm16100_vm6 = vcmask 1045504   ;;  %vm16101_vm3 = vcmask 138240   ;;  %7394 = vmatmul.mubr.msk.f32.gmra.mrb[22].mxu0 %vm4527_vm13, %v16017_v6  ;;  %vm16108_vm13 = vmmov %vm16097_vm14  ;;  %7944 = vmatpush1.bf16.msra.mxu1 %v15990_v47 }
 0x2be   : > { %v698_v33 = vsel %vm16101_vm3, %v694_v38, %v690_v22  ;;  %v4182_v20 = vmul.f32 0.125, %v4054_v58  ;;  %v1842_v56 = vadd.f32 %v1714_v21, %v16102_v61  ;;  %v12731_v38 = vpop.permute.xlu0 %5126  ;;  %v16104_v58 = vrot.slane %v12689_v2, 1  ;;  %v12741_v22 = vld [vmem:[#allocation3 + $0x2a0] sm:$0xff]  ;;  %vm16111_vm14 = vmmov %vm16100_vm6  ;;  %7912 = vmatpush1.bf16.msra.mxu0 %v15990_v47  ;;  %7945 = vmatprep.subr.bf16.mxu1 %v15996_v8 }
 0x2bf   : > { %v2211_v37 = vsel %vm16100_vm6, %v16099_v28, %v16098_v14  ;;  %706 = vst.msk [vmem:[#allocation2 + $0x9] sm:$0x7] %vm8302_vm4, %v698_v33  ;;  %v4397_v14 = vpop.permute.xlu1 %4396  ;;  %v4018_v42 = vsub.f32 %v3762_v51, %v15964_v55  ;;  %v16105_v21 = vrot.slane %v12569_v62, 1  ;;  %vm16106_vm5 = vcmask 1046528   ;;  %v12757_v51 = vld [vmem:[#allocation3 + $0x2b8] sm:$0xff]  ;;  %7522 = vmatmul.mubr.msk.f32.gmra.mrb[22].mxu1 %vm5252_vm1, %v16017_v6  ;;  %vm16115_vm3 = vmmov %vm16108_vm13  ;;  %7913 = vmatprep.subr.bf16.mxu0 %v15996_v8 }
 0x2c0   : > { %v2522_v45 = vsel %vm16007_vm11, %v2211_v37, 0.0  ;;  %v15155_v37 = vrot.slane %v12698_v41, 2  ;;  %vm4530_vm11 = vcmp.eq.f32.partialorder %v4397_v14, %v11993_v48  ;;  %vm4529_vm15 = vcmp.eq.f32.partialorder %v4397_v14, %v11990_v54  ;;  %7523 = vmatprep.mubr.msk.f32.mxu1 %vm5255_vm2, %v16017_v6  ;;  %vm16114_vm1 = vmmov %vm16106_vm5 }
 0x2c1   : > { %v12739_v0 = vsel %vm16106_vm5, %v16105_v21, %v16104_v58  ;;  %v12744_v28 = vadd.f32 %v2522_v45, %v12606_v23  ;;  %v12751_v55 = vadd.f32 %v4145_v31, %v12466_v34  ;;  %v12755_v62 = vadd.f32 %v12391_v39, %v12374_v11  ;;  %7395 = vmatprep.mubr.msk.f32.mxu0 %vm4530_vm11, %v16017_v6  ;;  %v16109_v34 = vld [vmem:[#allocation79_spill] sm:$0xff]  ;;  %vm16118_vm5 = vmmov %vm16111_vm14 }
 0x2c2   : > { %v3799_v23 = vadd.f32 %v12575_v52, %v12739_v0  ;;  %v15154_v45 = vrot.slane %v12741_v22, 1  ;;  %v12768_v31 = vadd.f32 %v12698_v41, %v16109_v34  ;;  %v16110_v11 = vrot.slane %v12564_v17, 2  ;;  %7396 = vmatmul.mubr.msk.f32.gmra.mrb[24].mxu0 %vm4529_vm15, %v16017_v6  ;;  %v12796_v53 = vpop.permute.xlu0 %5131  ;;  %7946 = vmatpush1.bf16.msra.mxu1 %v15990_v47 }
 0x2c3   : > { %16107 = vst [vmem:[#allocation38_spill] sm:$0xff] %v12751_v55  ;;  %2778 = vst.msk [vmem:[#allocation3 + $0x2a9] sm:$0xff] %vm16108_vm13, %v12744_v28  ;;  %vm5257_vm6 = vcmp.eq.f32.partialorder %v12731_v38, %v12096_v60  ;;  %v12784_v52 = vadd.f32 %v4182_v20, %v12484_v40  ;;  %v12787_v33 = vmul.f32 100.0, %v16020_v1  ;;  %v688_v14 = vpop.permute.xlu1 %687  ;;  %v4146_v58 = vmul.f32 0.125, %v4018_v42  ;;  %7524 = vmatmul.mubr.msk.f32.gmra.mrb[24].mxu1 %vm5254_vm7, %v16017_v6 }
 0x2c4   : > { %v2286_v39 = vsel %vm16111_vm14, %v16110_v11, %v15155_v37  ;;  %v4055_v21 = vsub.f32 %v3799_v23, %v11281_v24  ;;  %v16113_v40 = vrot.slane %v12639_v29, 1  ;;  %v693_v11 = vrot.slane %v688_v14, 7  ;;  %v12820_v29 = vld [vmem:[#allocation3 + $0x408] sm:$0xff]  ;;  %7525 = vmatprep.mubr.msk.f32.mxu1 %vm5257_vm6, %v16017_v6  ;;  %vm16123_vm6 = vmmov %vm16115_vm3  ;;  %7914 = vmatpush1.bf16.msra.mxu0 %v15990_v47 }
 0x2c5   : > { %16112 = vst [vmem:[#allocation36_spill] sm:$0xff] %v12784_v52  ;;  %v12790_v17 = vadd.f32 %v2286_v39, %v12644_v63  ;;  %v15158_v63 = vrot.slane %v12757_v51, 2  ;;  %vm5256_vm2 = vcmp.eq.f32.partialorder %v12731_v38, %v12093_v12  ;;  %v12812_v39 = vld [vmem:[#allocation3 + $0x3f0] sm:$0xff]  ;;  %v12818_v24 = vadd.f32 %v12449_v44, %v12452_v43  ;;  %7915 = vmatprep.subr.bf16.mxu0 %v15996_v8 }
 0x2c6   : > { %v12804_v20 = vsel %vm16114_vm1, %v16113_v40, %v15154_v45  ;;  %v12826_v40 = vmul.f32 100.0, %v16032_v57  ;;  %v16117_v43 = vrot.slane %v12632_v3, 2  ;;  %vm16119_vm11 = vcmask 138240   ;;  %v12843_v23 = vld [vmem:[#allocation2 + $0x9] sm:$0x7]  ;;  %v12857_v36 = vpop.permute.xlu0 %5136  ;;  %7947 = vmatprep.subr.bf16.mxu1 %v15996_v8 }
 0x2c7   : > { %v3763_v42 = vadd.f32 %v12627_v10, %v12804_v20  ;;  %2815 = vst.msk [vmem:[#allocation3 + $0x3f9] sm:$0xff] %vm16115_vm3, %v12790_v17  ;;  %v16116_v10 = vld [vmem:[#allocation42_spill] sm:$0xff]  ;;  %v697_v37 = vsel %vm16119_vm11, %v693_v11, %v688_v14  ;;  %v4183_v52 = vmul.f32 0.125, %v4055_v21  ;;  %v4402_v3 = vpop.permute.xlu1 %4401  ;;  %746 = vrot.lane.b32.xlu0 %v12843_v23, %s8255_s24  ;;  %vm5259_vm7 = vcmp.eq.f32.partialorder %v12796_v53, %v12096_v60 }
 0x2c8   : > { %v12830_v45 = vadd.f32 %v12757_v51, %v16116_v10  ;;  %v2213_v44 = vsel %vm16118_vm5, %v16117_v43, %v15158_v63  ;;  %705 = vst.msk [vmem:[#allocation2 + $0x6] sm:$0x7] %vm8302_vm4, %v697_v37  ;;  %v16121_v46 = vrot.slane %v12689_v2, 1  ;;  %vm16122_vm4 = vmmov %vm16114_vm1  ;;  %v15156_v14 = vrot.slane %v12820_v29, 2  ;;  %7526 = vmatmul.mubr.msk.f32.gmra.mrb[26].mxu1 %vm5256_vm2, %v16017_v6  ;;  %7916 = vmatpush1.bf16.msra.mxu0 %v15990_v47 }
 0x2c9   : > { %v4019_v10 = vsub.f32 %v3763_v42, %v11278_v13  ;;  %v12846_v55 = vadd.f32 %v2213_v44, %v1842_v56  ;;  %v12862_v13 = vadd.f32 %v4146_v58, %v12562_v15  ;;  %v16120_v56 = vrot.slane %v12812_v39, 1  ;;  %v16124_v42 = vld [vmem:[#allocation63_spill] sm:$0xff]  ;;  %7527 = vmatprep.mubr.msk.f32.mxu1 %vm5259_vm7, %v16017_v6  ;;  %vm16129_vm11 = vmmov %vm16122_vm4  ;;  %7948 = vmatpush1.bf16.msra.mxu1 %v15990_v47 }
 0x2ca   : > { %vm4532_vm15 = vcmp.eq.f32.partialorder %v4402_v3, %v11993_v48  ;;  %vm4531_vm13 = vcmp.eq.f32.partialorder %v4402_v3, %v11990_v54  ;;  %vm5258_vm14 = vcmp.eq.f32.partialorder %v12796_v53, %v12093_v12  ;;  %v12876_v21 = vld [vmem:[#allocation3 + $0x2a8] sm:$0xff]  ;;  %v12882_v15 = vadd.f32 %v12559_v32, %v12500_v26  ;;  %v12916_v38 = vpop.permute.xlu0 %5141  ;;  %7949 = vmatprep.subr.bf16.mxu1 %v15996_v8 }
 0x2cb   : > { %v12869_v37 = vsel %vm16122_vm4, %v16121_v46, %v16120_v56  ;;  %2779 = vst.msk [vmem:[#allocation3 + $0x2b1] sm:$0xff] %vm16123_vm6, %v12846_v55  ;;  %7397 = vmatprep.mubr.msk.f32.mxu0 %vm4532_vm15, %v16017_v6  ;;  %v15157_v58 = vrot.slane %v12876_v21, 1  ;;  %v12890_v11 = vmul.f32 100.0, %v16046_v5  ;;  %vm16125_vm1 = vnez %v16124_v42  ;;  %v4407_v3 = vpop.permute.xlu1 %4406  ;;  %v16127_v56 = vld [vmem:[#allocation44_spill] sm:$0xff]  ;;  %v16130_v46 = vld [vmem:[#allocation62_spill] sm:$0xff]  ;;  %7917 = vmatprep.subr.bf16.mxu0 %v15996_v8 }
 0x2cc   : > { %v3800_v2 = vadd.f32 %v12660_v9, %v12869_v37  ;;  %v1752_v43 = vsel %vm16125_vm1, %v12820_v29, 0.0  ;;  %7398 = vmatmul.mubr.msk.f32.gmra.mrb[26].mxu0 %vm4531_vm13, %v16017_v6  ;;  %vm5261_vm3 = vcmp.eq.f32.partialorder %v12857_v36, %v12096_v60  ;;  %v12904_v26 = vadd.f32 %v4183_v52, %v12578_v30  ;;  %5216 = vperm.xlu0 %7972, %v16127_v56   ;;  %v12932_v56 = vld [vmem:[#allocation3 + $0x2c0] sm:$0xff] }
 0x2cd   : > { %v4147_v32 = vmul.f32 0.125, %v4019_v10  ;;  %v16126_v9 = vrot.slane %v12698_v41, 2  ;;  %vm5260_vm2 = vcmp.eq.f32.partialorder %v12857_v36, %v12093_v12  ;;  %v16128_v41 = vrot.slane %v12741_v22, 1  ;;  %7528 = vmatmul.mubr.msk.f32.gmra.mrb[28].mxu1 %vm5258_vm14, %v16017_v6  ;;  %vm16135_vm14 = vmmov %vm16129_vm11  ;;  %7918 = vmatpush1.bf16.msra.mxu0 %v15990_v47 }
 0x2ce   : > { %v4056_v30 = vsub.f32 %v3800_v2, %v11317_v7  ;;  %v12928_v10 = vld [vmem:[#allocation3 + $0x3f8] sm:$0xff]  ;;  %vm16131_vm4 = vnez %v16130_v46  ;;  %vm4534_vm7 = vcmp.eq.f32.partialorder %v4407_v3, %v11993_v48  ;;  %vm4533_vm15 = vcmp.eq.f32.partialorder %v4407_v3, %v11990_v54  ;;  %v12940_v2 = vld [vmem:[#allocation3 + $0x410] sm:$0xff]  ;;  %v12968_v53 = vpop.permute.xlu0 %5146  ;;  %7529 = vmatprep.mubr.msk.f32.mxu1 %vm5261_vm3, %v16017_v6  ;;  %7950 = vmatpush1.bf16.msra.mxu1 %v15990_v47 }
 0x2cf   : > { %v2288_v44 = vsel %vm16118_vm5, %v16126_v9, %v15156_v14  ;;  %v12926_v52 = vsel %vm16129_vm11, %v16128_v41, %v15157_v58  ;;  %v16132_v14 = vld [vmem:[#allocation61_spill] sm:$0xff]  ;;  %v1716_v22 = vsel %vm16052_vm0, %v12932_v56, 0.0  ;;  %7399 = vmatprep.mubr.msk.f32.mxu0 %vm4534_vm7, %v16017_v6  ;;  %v15159_v58 = vrot.slane %v12928_v10, 1  ;;  %v709_v59 = vld [vmem:[#allocation2 + $0x6] sm:$0x7]  ;;  %7951 = vmatprep.subr.bf16.mxu1 %v15996_v8 }
 0x2d0   : > { %v2560_v9 = vsel %vm16131_vm4, %v2288_v44, 0.0  ;;  %v1880_v7 = vadd.f32 %v1752_v43, %v16132_v14  ;;  %v4184_v41 = vmul.f32 0.125, %v4056_v30  ;;  %v3764_v44 = vadd.f32 %v12755_v62, %v12926_v52  ;;  %7400 = vmatmul.mubr.msk.f32.gmra.mrb[28].mxu0 %vm4533_vm15, %v16017_v6  ;;  %719 = vrot.lane.b32.xlu1 %v709_v59, %s8254_s23  ;;  %v4412_v30 = vpop.permute.xlu1 %4411 }
 0x2d1   : > { %v12948_v3 = vadd.f32 %v2560_v9, %v12768_v31  ;;  %vm5263_vm0 = vcmp.eq.f32.partialorder %v12916_v38, %v12096_v60  ;;  %v12959_v62 = vadd.f32 %v4147_v32, %v12630_v27  ;;  %v12963_v31 = vadd.f32 %v12623_v50, %v12540_v19  ;;  %v16133_v9 = vld [vmem:[#allocation16_spill] sm:$0xff]  ;;  %7530 = vmatmul.mubr.msk.f32.gmra.mrb[30].mxu1 %vm5260_vm2, %v16017_v6 }
 0x2d2   : > { %v15162_v43 = vrot.slane %v12932_v56, 2  ;;  %6511 = vperm.xlu0 %7972, %v16133_v9   ;;  %vm5262_vm13 = vcmp.eq.f32.partialorder %v12916_v38, %v12093_v12  ;;  %v4020_v63 = vsub.f32 %v3764_v44, %v16020_v1  ;;  %v16134_v27 = vrot.slane %v12812_v39, 1  ;;  %v12980_v50 = vld [vmem:[#allocation3 + $0x2b0] sm:$0xff]  ;;  %v16136_v1 = vld [vmem:[#allocation65_spill] sm:$0xff]  ;;  %v13030_v36 = vpop.permute.xlu0 %5151  ;;  %7531 = vmatprep.mubr.msk.f32.mxu1 %vm5263_vm0, %v16017_v6 }
 0x2d3   : > { %2816 = vst.msk [vmem:[#allocation3 + $0x401] sm:$0xff] %vm16123_vm6, %v12948_v3  ;;  %v15160_v32 = vrot.slane %v12940_v2, 2  ;;  %vm4536_vm5 = vcmp.eq.f32.partialorder %v4412_v30, %v11993_v48  ;;  %vm4535_vm11 = vcmp.eq.f32.partialorder %v4412_v30, %v11990_v54  ;;  %v12992_v39 = vadd.f32 %v1716_v22, %v16136_v1  ;;  %7919 = vmatprep.subr.bf16.mxu0 %v15996_v8 }
 0x2d4   : > { %v12978_v19 = vsel %vm16135_vm14, %v16134_v27, %v15159_v58  ;;  %v12996_v44 = vadd.f32 %v12687_v4, %v12608_v25  ;;  %7401 = vmatprep.mubr.msk.f32.mxu0 %vm4536_vm5, %v16017_v6  ;;  %v13000_v9 = vadd.f32 %v4184_v41, %v12671_v18  ;;  %v15161_v58 = vrot.slane %v12980_v50, 1  ;;  %v4417_v41 = vpop.permute.xlu1 %4416  ;;  %721 = vrot.lane.b32.xlu1 %v12843_v23, %s8254_s23  ;;  %v16145_v4 = vld [vmem:[#allocation96_spill] sm:$0xff] }
 0x2d5   : > { %v3801_v27 = vadd.f32 %v12818_v24, %v12978_v19  ;;  %v16137_v30 = vrot.slane %v12757_v51, 2  ;;  %vm16138_vm3 = vcmask 1045504   ;;  %vm5264_vm7 = vcmp.eq.f32.partialorder %v12968_v53, %v12093_v12  ;;  %7402 = vmatmul.mubr.msk.f32.gmra.mrb[30].mxu0 %vm4535_vm11, %v16017_v6  ;;  %7532 = vmatmul.mubr.msk.f32.gmra.mrb[32].mxu1 %vm5262_vm13, %v16017_v6 }
 0x2d6   : > { %v4148_v25 = vmul.f32 0.125, %v4020_v63  ;;  %v16140_v51 = vrot.slane %v12820_v29, 2  ;;  %vm16141_vm15 = vmmov %vm16138_vm3  ;;  %vm5265_vm14 = vcmp.eq.f32.partialorder %v12968_v53, %v12096_v60  ;;  %vm4538_vm2 = vcmp.eq.f32.partialorder %v4417_v41, %v11993_v48  ;;  %v13091_v38 = vpop.permute.xlu0 %5156  ;;  %v16158_v53 = vld [vmem:[#allocation52_spill] sm:$0xff]  ;;  %7952 = vmatpush1.bf16.msra.mxu1 %v15990_v47  ;;  %7920 = vmatpush1.bf16.msra.mxu0 %v15990_v47 }
 0x2d7   : > { %v2215_v22 = vsel %vm16138_vm3, %v16137_v30, %v15162_v43  ;;  %v16142_v30 = vld [vmem:[#allocation60_spill] sm:$0xff]  ;;  %v4057_v63 = vsub.f32 %v3801_v27, %v16032_v57  ;;  %vm4537_vm6 = vcmp.eq.f32.partialorder %v4417_v41, %v11990_v54  ;;  %v16146_v57 = vld [vmem:[#allocation47_spill] sm:$0xff]  ;;  %7403 = vmatprep.mubr.msk.f32.mxu0 %vm4538_vm2, %v16017_v6  ;;  %vm5266_vm0 = vcmp.eq.f32.partialorder %v13030_v36, %v12093_v12 }
 0x2d8   : > { %v2524_v18 = vsel %vm16057_vm9, %v2215_v22, 0.0  ;;  %v2290_v24 = vsel %vm16141_vm15, %v16140_v51, %v15160_v32  ;;  %6516 = vperm.xlu0 %7972, %v16142_v30   ;;  %v16143_v22 = vrot.slane %v12876_v21, 1  ;;  %vm16144_vm9 = vcmask 1046528   ;;  %v13043_v32 = vld [vmem:[#allocation3 + $0x2c8] sm:$0xff]  ;;  %744 = vrot.lane.b32.xlu1 %v709_v59, %s8255_s24 }
 0x2d9   : > { %v13041_v51 = vmul.f32 100.0, %v16145_v4  ;;  %v13053_v23 = vadd.f32 %v12940_v2, %v16146_v57  ;;  %v13057_v21 = vadd.f32 %v12739_v0, %v12692_v16  ;;  %v13063_v30 = vadd.f32 %v2524_v18, %v12830_v45  ;;  %7404 = vmatmul.mubr.msk.f32.gmra.mrb[32].mxu0 %vm4537_vm6, %v16017_v6  ;;  %v16148_v18 = vld [vmem:[#allocation78_spill] sm:$0xff]  ;;  %7533 = vmatprep.mubr.msk.f32.mxu1 %vm5265_vm14, %v16017_v6 }
 0x2da   : > { %v13038_v29 = vsel %vm16144_vm9, %v16143_v22, %v15161_v58  ;;  %v13066_v22 = vmul.f32 100.0, %v16070_v49  ;;  %v13068_v41 = vadd.f32 %v2290_v24, %v1880_v7  ;;  %v13079_v16 = vadd.f32 %v4148_v25, %v12787_v33  ;;  %v13081_v0 = vld [vmem:[#allocation3 + $0x400] sm:$0xff]  ;;  %v4422_v7 = vpop.permute.xlu1 %4421  ;;  %v13099_v58 = vld [vmem:[#allocation3 + $0x418] sm:$0xff]  ;;  %7534 = vmatmul.mubr.msk.f32.gmra.mrb[34].mxu1 %vm5264_vm7, %v16017_v6 }
 0x2db   : > { %v3765_v27 = vadd.f32 %v12882_v15, %v13038_v29  ;;  %v13084_v45 = vmul.f32 100.0, %v16075_v35  ;;  %v2216_v15 = vrot.slane %v13043_v32, 2  ;;  %vm5267_vm5 = vcmp.eq.f32.partialorder %v13030_v36, %v12096_v60 }
 0x2dc   : > { %16147 = vst [vmem:[#allocation105_spill] sm:$0xff] %v13079_v16  ;;  %6521 = vperm.xlu0 %7972, %v16148_v18   ;;  %v4185_v24 = vmul.f32 0.125, %v4057_v63  ;;  %v15163_v25 = vrot.slane %v13081_v0, 1  ;;  %vm16149_vm13 = vcmask 7168   ;;  %vm4539_vm3 = vcmp.eq.f32.partialorder %v4422_v7, %v11990_v54  ;;  %7535 = vmatprep.mubr.msk.f32.mxu1 %vm5267_vm5, %v16017_v6  ;;  %v13214_v16 = vld [vmem:[#allocation3 + $0x420] sm:$0xff] }
 0x2dd   : > { %v4021_v33 = vsub.f32 %v3765_v27, %v16046_v5  ;;  %2780 = vst.msk [vmem:[#allocation3 + $0x2b9] sm:$0xff] %vm16149_vm13, %v13063_v30  ;;  %vm16150_vm11 = vmmov %vm16149_vm13  ;;  %vm4540_vm15 = vcmp.eq.f32.partialorder %v4422_v7, %v11993_v48  ;;  %v16151_v5 = vld [vmem:[#allocation24_spill] sm:$0xff]  ;;  %v13111_v63 = vadd.f32 %v12804_v20, %v12744_v28  ;;  %v13113_v27 = vld [vmem:[#allocation3 + $0x2d0] sm:$0xff]  ;;  %v16152_v7 = vrot.slane %v12928_v10, 1 }
 0x2de   : > { %2817 = vst.msk [vmem:[#allocation3 + $0x409] sm:$0xff] %vm16150_vm11, %v13068_v41  ;;  %v1845_v59 = vadd.f32 %v13043_v32, %v16151_v5  ;;  %7405 = vmatprep.mubr.msk.f32.mxu0 %vm4540_vm15, %v16017_v6  ;;  %v16153_v57 = vrot.slane %v12932_v56, 2  ;;  %vm16154_vm14 = vcmask 1045504   ;;  %v16155_v5 = vld [vmem:[#allocation71_spill] sm:$0xff]  ;;  %v16157_v56 = vld [vmem:[#allocation76_spill] sm:$0xff]  ;;  %vm5268_vm6 = vcmp.eq.f32.partialorder %v13091_v38, %v12093_v12  ;;  %7536 = vmatmul.mubr.msk.f32.gmra.mrb[36].mxu1 %vm5266_vm0, %v16017_v6 }
 0x2df   : > { %v4149_v18 = vmul.f32 0.125, %v4021_v33  ;;  %v13121_v43 = vsel %vm16144_vm9, %v16152_v7, %v15163_v25  ;;  %vm16156_vm2 = vnez %v16155_v5  ;;  %7406 = vmatmul.mubr.msk.f32.gmra.mrb[34].mxu0 %vm4539_vm3, %v16017_v6  ;;  %v15164_v33 = vrot.slane %v13099_v58, 2  ;;  %v4427_v7 = vpop.permute.xlu1 %4426  ;;  %v16159_v25 = vld [vmem:[#allocation30_spill] sm:$0xff]  ;;  %vm16165_vm5 = vmmov %vm16154_vm14 }
 0x2e0   : > { %v2217_v32 = vsel %vm16154_vm14, %v16153_v57, %v2216_v15  ;;  %v1754_v28 = vsel %vm16156_vm2, %v13099_v58, 0.0  ;;  %v3802_v20 = vadd.f32 %v12963_v31, %v13121_v43  ;;  %v13141_v57 = vmul.f32 100.0, %v16157_v56  ;;  %6526 = vperm.xlu0 %7972, %v16158_v53   ;;  %4491 = vperm.xlu1 %7973, %v16159_v25   ;;  %v13150_v31 = vpop.permute.xlu0 %5161  ;;  %v16162_v25 = vld [vmem:[#allocation31_spill] sm:$0xff]  ;;  %vm16167_vm15 = vmmov %vm16165_vm5 }
 0x2e1   : > { %v13138_v10 = vadd.f32 %v2217_v32, %v12992_v39  ;;  %vm5269_vm13 = vcmp.eq.f32.partialorder %v13091_v38, %v12096_v60  ;;  %v13153_v39 = vadd.f32 %v4185_v24, %v12826_v40  ;;  %vm4541_vm7 = vcmp.eq.f32.partialorder %v4427_v7, %v11990_v54 }
 0x2e2   : > { %vm4542_vm11 = vcmp.eq.f32.partialorder %v4427_v7, %v11993_v48  ;;  %vm16161_vm3 = vcmask 7168   ;;  %v13165_v53 = vadd.f32 %v1754_v28, %v16162_v25  ;;  %v13169_v40 = vadd.f32 %v12869_v37, %v12790_v17  ;;  %7537 = vmatprep.mubr.msk.f32.mxu1 %vm5269_vm13, %v16017_v6 }
 0x2e3   : > { %16160 = vst [vmem:[#allocation37_spill] sm:$0xff] %v13153_v39  ;;  %2781 = vst.msk [vmem:[#allocation3 + $0x2c1] sm:$0xff] %vm16161_vm3, %v13138_v10  ;;  %7407 = vmatprep.mubr.msk.f32.mxu0 %vm4542_vm11, %v16017_v6  ;;  %v13173_v24 = vadd.f32 %v4149_v18, %v12890_v11  ;;  %v4058_v7 = vsub.f32 %v3802_v20, %v16145_v4  ;;  %v16164_v32 = vrot.slane %v12940_v2, 2  ;;  %v16166_v28 = vrot.slane %v13113_v27, 2  ;;  %v16168_v11 = vld [vmem:[#allocation72_spill] sm:$0xff]  ;;  %v16170_v4 = vld [vmem:[#allocation59_spill] sm:$0xff]  ;;  %v4432_v36 = vpop.permute.xlu1 %4431 }
 0x2e4   : > { %7408 = vmatmul.mubr.msk.f32.gmra.mrb[36].mxu0 %vm4541_vm7, %v16017_v6  ;;  %v13189_v17 = vld [vmem:[#allocation3 + $0x2b8] sm:$0xff]  ;;  %vm16169_vm9 = vnez %v16168_v11  ;;  %v13196_v18 = vmul.f32 100.0, %v16170_v4  ;;  %vm5270_vm0 = vcmp.eq.f32.partialorder %v13150_v31, %v12093_v12  ;;  %v13207_v11 = vpop.permute.xlu0 %5166  ;;  %vm4544_vm14 = vcmp.eq.f32.partialorder %v4432_v36, %v11993_v48  ;;  %7538 = vmatmul.mubr.msk.f32.gmra.mrb[38].mxu1 %vm5268_vm6, %v16017_v6  ;;  %vm16183_vm6 = vmmov %vm16161_vm3 }
 0x2e5   : > { %16163 = vst [vmem:[#allocation45_spill] sm:$0xff] %v13173_v24  ;;  %v2292_v5 = vsel %vm16165_vm5, %v16164_v32, %v15164_v33  ;;  %v2219_v25 = vsel %vm16167_vm15, %v2216_v15, %v16166_v28  ;;  %v13191_v37 = vld [vmem:[#allocation3 + $0x408] sm:$0xff]  ;;  %v1718_v15 = vsel %vm9645_vm12, %v13113_v27, 0.0  ;;  %v16174_v24 = vld [vmem:[#allocation27_spill] sm:$0xff]  ;;  %vm5271_vm12 = vcmp.eq.f32.partialorder %v13150_v31, %v12096_v60  ;;  %7409 = vmatprep.mubr.msk.f32.mxu0 %vm4544_vm14, %v16017_v6  ;;  %v16191_v31 = vld [vmem:[#allocation34_spill] sm:$0xff] }
 0x2e6   : > { %v2562_v2 = vsel %vm16169_vm9, %v2292_v5, 0.0  ;;  %v2526_v28 = vsel %vm16093_vm8, %v2219_v25, 0.0  ;;  %v16173_v33 = vld [vmem:[#allocation57_spill] sm:$0xff]  ;;  %5786 = vperm.xlu1 %7973, %v16174_v24   ;;  %v3269_v5 = vrot.slane %v13189_v17, 1  ;;  %v15165_v39 = vrot.slane %v13191_v37, 1  ;;  %v13224_v25 = vld [vmem:[#allocation3 + $0x2d8] sm:$0xff]  ;;  %7539 = vmatprep.mubr.msk.f32.mxu1 %vm5271_vm12, %v16017_v6 }
 0x2e7   : > { %6531 = vperm.xlu0 %7972, %v16173_v33   ;;  %v13212_v20 = vadd.f32 %v2562_v2, %v13053_v23  ;;  %vm4543_vm8 = vcmp.eq.f32.partialorder %v4432_v36, %v11990_v54  ;;  %v4186_v33 = vmul.f32 0.125, %v4058_v7  ;;  %v16175_v23 = vrot.slane %v12980_v50, 1  ;;  %v16179_v7 = vld [vmem:[#allocation21_spill] sm:$0xff]  ;;  %v4437_v38 = vpop.permute.xlu1 %4436 }
 0x2e8   : > { %vm16176_vm7 = vcmask 1046528   ;;  %v16177_v17 = vrot.slane %v13081_v0, 1  ;;  %v1846_v32 = vadd.f32 %v1718_v15, %v16179_v7  ;;  %v13242_v36 = vadd.f32 %v2526_v28, %v1845_v59  ;;  %7410 = vmatmul.mubr.msk.f32.gmra.mrb[38].mxu0 %vm4543_vm8, %v16017_v6  ;;  %v16181_v15 = vld [vmem:[#allocation35_spill] sm:$0xff]  ;;  %7540 = vmatmul.mubr.msk.f32.gmra.mrb[40].mxu1 %vm5270_vm0, %v16017_v6 }
 0x2e9   : > { %v13230_v24 = vsel %vm16176_vm7, %v16175_v23, %v3269_v5  ;;  %vm16178_vm11 = vmmov %vm16176_vm7  ;;  %2818 = vst.msk [vmem:[#allocation3 + $0x411] sm:$0xff] %vm16161_vm3, %v13212_v20  ;;  %v13255_v23 = vadd.f32 %v12926_v52, %v12846_v55  ;;  %v15167_v59 = vrot.slane %v13214_v16, 2  ;;  %vm5272_vm13 = vcmp.eq.f32.partialorder %v13207_v11, %v12093_v12  ;;  %v16182_v28 = vld [vmem:[#allocation43_spill] sm:$0xff] }
 0x2ea   : > { %v13237_v2 = vsel %vm16178_vm11, %v16177_v17, %v15165_v39  ;;  %16180 = vst [vmem:[#allocation69_spill] sm:$0xff] %v13242_v36  ;;  %v3766_v50 = vadd.f32 %v12996_v44, %v13230_v24  ;;  %vm5273_vm5 = vcmp.eq.f32.partialorder %v13207_v11, %v12096_v60  ;;  %5791 = vperm.xlu1 %7973, %v16182_v28   ;;  %v13264_v44 = vpop.permute.xlu0 %5171  ;;  %2782 = vst.msk [vmem:[#allocation3 + $0x2c9] sm:$0xff] %vm16183_vm6, %v13242_v36  ;;  %vm16186_vm12 = vcmask 1045504  }
 0x2eb   : > { %v3803_v0 = vadd.f32 %v13057_v21, %v13237_v2  ;;  %6536 = vperm.xlu0 %7972, %v16181_v15   ;;  %v13266_v21 = vld [vmem:[#allocation3 + $0x2c0] sm:$0xff]  ;;  %v13271_v55 = vmul.f32 100.0, %v16102_v61  ;;  %vm4545_vm15 = vcmp.eq.f32.partialorder %v4437_v38, %v11990_v54  ;;  %vm4546_vm8 = vcmp.eq.f32.partialorder %v4437_v38, %v11993_v48  ;;  %v16184_v15 = vld [vmem:[#allocation39_spill] sm:$0xff]  ;;  %vm16189_vm14 = vmmov %vm16186_vm12  ;;  %7541 = vmatprep.mubr.msk.f32.mxu1 %vm5273_vm5, %v16017_v6 }
 0x2ec   : > { %v13281_v17 = vadd.f32 %v4186_v33, %v13041_v51  ;;  %v13285_v28 = vadd.f32 %v13214_v16, %v16184_v15  ;;  %7411 = vmatprep.mubr.msk.f32.mxu0 %vm4546_vm8, %v16017_v6  ;;  %v4022_v39 = vsub.f32 %v3766_v50, %v16070_v49  ;;  %v3271_v38 = vrot.slane %v13266_v21, 1  ;;  %v4442_v50 = vpop.permute.xlu1 %4441  ;;  %vm16192_vm0 = vmmov %vm16176_vm7  ;;  %7542 = vmatmul.mubr.msk.f32.gmra.mrb[42].mxu1 %vm5272_vm13, %v16017_v6 }
 0x2ed   : > { %v4059_v52 = vsub.f32 %v3803_v0, %v16075_v35  ;;  %v16185_v7 = vrot.slane %v13099_v58, 2  ;;  %7412 = vmatmul.mubr.msk.f32.gmra.mrb[40].mxu0 %vm4545_vm15, %v16017_v6  ;;  %v13307_v35 = vadd.f32 %v12978_v19, %v12948_v3  ;;  %v13310_v58 = vmul.f32 100.0, %v16109_v34  ;;  %v16190_v0 = vld [vmem:[#allocation106_spill] sm:$0xff]  ;;  %v16193_v19 = vld [vmem:[#allocation67_spill] sm:$0xff]  ;;  %vm16194_vm8 = vmmov %vm16183_vm6 }
 0x2ee   : > { %v16187_v51 = vrot.slane %v13224_v25, 2  ;;  %v16188_v33 = vrot.slane %v13113_v27, 2  ;;  %5796 = vperm.xlu1 %7973, %v16191_v31   ;;  %v13322_v3 = vsel %vm16192_vm0, %v3269_v5, %v3271_v38  ;;  %v13326_v21 = vadd.f32 %v13224_v25, %v16193_v19  ;;  %v13330_v27 = vld [vmem:[#allocation3 + $0x428] sm:$0xff]  ;;  %vm16198_vm13 = vmmov %vm16192_vm0 }
 0x2ef   : > { %v2294_v36 = vsel %vm16186_vm12, %v16185_v7, %v15167_v59  ;;  %6541 = vperm.xlu0 %7972, %v16190_v0   ;;  %vm5274_vm7 = vcmp.eq.f32.partialorder %v13264_v44, %v12093_v12  ;;  %vm4547_vm11 = vcmp.eq.f32.partialorder %v4442_v50, %v11990_v54  ;;  %vm4548_vm3 = vcmp.eq.f32.partialorder %v4442_v50, %v11993_v48  ;;  %v16196_v50 = vld [vmem:[#allocation38_spill] sm:$0xff] }
 0x2f0   : > { %v13303_v49 = vadd.f32 %v2294_v36, %v13165_v53  ;;  %v2221_v7 = vsel %vm16189_vm14, %v16188_v33, %v16187_v51  ;;  %v13319_v53 = vpop.permute.xlu0 %5176  ;;  %v4150_v36 = vmul.f32 0.125, %v4022_v39  ;;  %v4187_v39 = vmul.f32 0.125, %v4059_v52  ;;  %v13340_v5 = vld [vmem:[#allocation3 + $0x410] sm:$0xff]  ;;  %7413 = vmatprep.mubr.msk.f32.mxu0 %vm4548_vm3, %v16017_v6  ;;  %v4447_v33 = vpop.permute.xlu1 %4446  ;;  %vm16201_vm3 = vmmov %vm16198_vm13 }
 0x2f1   : > { %v13328_v59 = vadd.f32 %v2221_v7, %v1846_v32  ;;  %vm5275_vm15 = vcmp.eq.f32.partialorder %v13264_v44, %v12096_v60  ;;  %v3767_v32 = vadd.f32 %v13111_v63, %v13322_v3  ;;  %v15168_v51 = vrot.slane %v13340_v5, 1  ;;  %7414 = vmatmul.mubr.msk.f32.gmra.mrb[42].mxu0 %vm4547_vm11, %v16017_v6  ;;  %v16195_v7 = vld [vmem:[#allocation48_spill] sm:$0xff] }
 0x2f2   : > { %2819 = vst.msk [vmem:[#allocation3 + $0x419] sm:$0xff] %vm16183_vm6, %v13303_v49  ;;  %v13354_v52 = vadd.f32 %v13038_v29, %v13063_v30  ;;  %vm5276_vm5 = vcmp.eq.f32.partialorder %v13319_v53, %v12093_v12  ;;  %vm5277_vm12 = vcmp.eq.f32.partialorder %v13319_v53, %v12096_v60  ;;  %v13367_v63 = vadd.f32 %v4150_v36, %v13066_v22  ;;  %v13369_v29 = vld [vmem:[#allocation3 + $0x2c8] sm:$0xff] }
 0x2f3   : > { %2783 = vst.msk [vmem:[#allocation3 + $0x2d1] sm:$0xff] %vm16194_vm8, %v13328_v59  ;;  %6546 = vperm.xlu0 %7972, %v16195_v7   ;;  %5801 = vperm.xlu1 %7973, %v16196_v50   ;;  %v4023_v31 = vsub.f32 %v3767_v32, %v16157_v56  ;;  %v16197_v11 = vrot.slane %v13191_v37, 1  ;;  %v3273_v36 = vrot.slane %v13369_v29, 1  ;;  %v16199_v30 = vld [vmem:[#allocation81_spill] sm:$0xff]  ;;  %v13388_v7 = vld [vmem:[#allocation3 + $0x2e0] sm:$0xff]  ;;  %vm4549_vm0 = vcmp.eq.f32.partialorder %v4447_v33, %v11990_v54 }
 0x2f4   : > { %v13374_v0 = vpop.permute.xlu0 %5181  ;;  %vm16200_vm14 = vnez %v16199_v30  ;;  %vm4550_vm11 = vcmp.eq.f32.partialorder %v4447_v33, %v11993_v48  ;;  %7543 = vmatprep.mubr.msk.f32.mxu1 %vm5275_vm15, %v16017_v6  ;;  %v13397_v56 = vadd.f32 %v4187_v39, %v13084_v45  ;;  %v13401_v37 = vadd.f32 %v13121_v43, %v13068_v41  ;;  %v16205_v41 = vld [vmem:[#allocation11_spill] sm:$0xff]  ;;  %v13443_v39 = vld [vmem:[#allocation3 + $0x430] sm:$0xff] }
 0x2f5   : > { %v13382_v22 = vsel %vm16198_vm13, %v16197_v11, %v15168_v51  ;;  %v1756_v19 = vsel %vm16200_vm14, %v13330_v27, 0.0  ;;  %7415 = vmatprep.mubr.msk.f32.mxu0 %vm4550_vm11, %v16017_v6  ;;  %v4151_v32 = vmul.f32 0.125, %v4023_v31  ;;  %v13407_v33 = vsel %vm16201_vm3, %v3271_v38, %v3273_v36  ;;  %7544 = vmatmul.mubr.msk.f32.gmra.mrb[44].mxu1 %vm5274_vm7, %v16017_v6  ;;  %v16206_v38 = vld [vmem:[#allocation80_spill] sm:$0xff]  ;;  %v4452_v31 = vpop.permute.xlu1 %4451 }
 0x2f6   : > { %v3804_v29 = vadd.f32 %v13169_v40, %v13382_v22  ;;  %v16202_v50 = vrot.slane %v13330_v27, 2  ;;  %v16203_v11 = vrot.slane %v13214_v16, 2  ;;  %vm16204_vm6 = vcmask 1045504   ;;  %7416 = vmatmul.mubr.msk.f32.gmra.mrb[44].mxu0 %vm4549_vm0, %v16017_v6  ;;  %7545 = vmatprep.mubr.msk.f32.mxu1 %vm5277_vm12, %v16017_v6 }
 0x2f7   : > { %v3768_v43 = vadd.f32 %v13255_v23, %v13407_v33  ;;  %v13423_v40 = vadd.f32 %v1756_v19, %v16205_v41  ;;  %vm16207_vm15 = vnez %v16206_v38  ;;  %vm5278_vm8 = vcmp.eq.f32.partialorder %v13374_v0, %v12093_v12  ;;  %5806 = vperm.xlu1 %7973, %v12862_v13   ;;  %v16209_v19 = vld [vmem:[#allocation42_spill] sm:$0xff] }
 0x2f8   : > { %v2296_v45 = vsel %vm16204_vm6, %v16203_v11, %v16202_v50  ;;  %v16208_v50 = vld [vmem:[#allocation36_spill] sm:$0xff]  ;;  %v13432_v44 = vpop.permute.xlu0 %5186  ;;  %v4060_v23 = vsub.f32 %v3804_v29, %v16170_v4  ;;  %v13438_v51 = vmul.f32 100.0, %v16209_v19  ;;  %vm5279_vm7 = vcmp.eq.f32.partialorder %v13374_v0, %v12096_v60  ;;  %v16221_v0 = vld [vmem:[#allocation105_spill] sm:$0xff] }
 0x2f9   : > { %v2564_v16 = vsel %vm16207_vm15, %v2296_v45, 0.0  ;;  %6551 = vperm.xlu0 %7972, %v16208_v50   ;;  %v13435_v11 = vld [vmem:[#allocation3 + $0x418] sm:$0xff]  ;;  %vm4551_vm13 = vcmp.eq.f32.partialorder %v4452_v31, %v11990_v54  ;;  %vm4552_vm0 = vcmp.eq.f32.partialorder %v4452_v31, %v11993_v48  ;;  %v1720_v4 = vsel %vm16125_vm1, %v13388_v7, 0.0  ;;  %7546 = vmatmul.mubr.msk.f32.gmra.mrb[46].mxu1 %vm5276_vm5, %v16017_v6  ;;  %vm16213_vm1 = vmmov %vm16204_vm6  ;;  %v4457_v50 = vpop.permute.xlu1 %4456 }
 0x2fa   : > { %v13441_v45 = vadd.f32 %v2564_v16, %v13285_v28  ;;  %v13453_v13 = vld [vmem:[#allocation3 + $0x2d0] sm:$0xff]  ;;  %7417 = vmatprep.mubr.msk.f32.mxu0 %vm4552_vm0, %v16017_v6  ;;  %v13460_v28 = vadd.f32 %v4151_v32, %v13141_v57  ;;  %v4024_v29 = vsub.f32 %v3768_v43, %v16102_v61  ;;  %v15169_v16 = vrot.slane %v13435_v11, 1  ;;  %7547 = vmatprep.mubr.msk.f32.mxu1 %vm5279_vm7, %v16017_v6 }
 0x2fb   : > { %vm16210_vm11 = vcmask 7168   ;;  %vm5280_vm12 = vcmp.eq.f32.partialorder %v13432_v44, %v12093_v12  ;;  %7418 = vmatmul.mubr.msk.f32.gmra.mrb[46].mxu0 %vm4551_vm13, %v16017_v6  ;;  %v4188_v61 = vmul.f32 0.125, %v4060_v23  ;;  %v16211_v42 = vrot.slane %v13388_v7, 2  ;;  %5811 = vperm.xlu1 %7973, %v12959_v62  }
 0x2fc   : > { %2820 = vst.msk [vmem:[#allocation3 + $0x421] sm:$0xff] %vm16210_vm11, %v13441_v45  ;;  %v16212_v57 = vrot.slane %v13224_v25, 2  ;;  %v15172_v43 = vrot.slane %v13443_v39, 2  ;;  %vm5281_vm3 = vcmp.eq.f32.partialorder %v13432_v44, %v12096_v60  ;;  %v13485_v31 = vpop.permute.xlu0 %5191  ;;  %v16214_v53 = vrot.slane %v13340_v5, 1 }
 0x2fd   : > { %6556 = vperm.xlu0 %7972, %v12904_v26   ;;  %vm16215_vm5 = vcmask 1046528   ;;  %v16216_v23 = vrot.slane %v13453_v13, 1  ;;  %vm4553_vm13 = vcmp.eq.f32.partialorder %v4457_v50, %v11990_v54  ;;  %vm4554_vm0 = vcmp.eq.f32.partialorder %v4457_v50, %v11993_v48  ;;  %v16218_v26 = vld [vmem:[#allocation64_spill] sm:$0xff]  ;;  %7548 = vmatmul.mubr.msk.f32.gmra.mrb[48].mxu1 %vm5278_vm8, %v16017_v6 }
 0x2fe   : > { %v2223_v32 = vsel %vm16213_vm1, %v16212_v57, %v16211_v42  ;;  %v13492_v25 = vsel %vm16215_vm5, %v16214_v53, %v15169_v16  ;;  %vm16217_vm6 = vmmov %vm16215_vm5  ;;  %v13500_v57 = vmul.f32 100.0, %v16132_v14  ;;  %v1848_v62 = vadd.f32 %v1720_v4, %v16218_v26  ;;  %7419 = vmatprep.mubr.msk.f32.mxu0 %vm4554_vm0, %v16017_v6  ;;  %v4462_v4 = vpop.permute.xlu1 %4461  ;;  %7549 = vmatprep.mubr.msk.f32.mxu1 %vm5281_vm3, %v16017_v6 }
 0x2ff   : > { %v13497_v42 = vsel %vm16217_vm6, %v3273_v36, %v16216_v23  ;;  %v13511_v5 = vadd.f32 %v13230_v24, %v13138_v10  ;;  %v13513_v36 = vld [vmem:[#allocation3 + $0x2e8] sm:$0xff]  ;;  %v4152_v53 = vmul.f32 0.125, %v4024_v29  ;;  %v3805_v23 = vadd.f32 %v13307_v35, %v13492_v25  ;;  %7420 = vmatmul.mubr.msk.f32.gmra.mrb[48].mxu0 %vm4553_vm13, %v16017_v6  ;;  %5816 = vperm.xlu1 %7973, %v16221_v0  }
 0x300   : > { %v3769_v50 = vadd.f32 %v13354_v52, %v13497_v42  ;;  %v2528_v16 = vsel %vm16131_vm4, %v2223_v32, 0.0  ;;  %v13529_v10 = vadd.f32 %v4188_v61, %v13196_v18  ;;  %v13535_v35 = vmul.f32 100.0, %v16136_v1  ;;  %vm16220_vm4 = vmmov %vm16213_vm1  ;;  %v13544_v29 = vpop.permute.xlu0 %5196 }
 0x301   : > { %v13532_v24 = vadd.f32 %v2528_v16, %v13326_v21  ;;  %v16219_v46 = vrot.slane %v13330_v27, 2  ;;  %6561 = vperm.xlu0 %7972, %v13000_v9   ;;  %v4061_v18 = vsub.f32 %v3805_v23, %v16109_v34  ;;  %v15170_v61 = vrot.slane %v13513_v36, 2  ;;  %7550 = vmatmul.mubr.msk.f32.gmra.mrb[50].mxu1 %vm5280_vm12, %v16017_v6  ;;  %vm16226_vm0 = vmmov %vm16220_vm4 }
 0x302   : > { %v4025_v21 = vsub.f32 %v3769_v50, %v16209_v19  ;;  %vm5282_vm8 = vcmp.eq.f32.partialorder %v13485_v31, %v12093_v12  ;;  %vm5283_vm7 = vcmp.eq.f32.partialorder %v13485_v31, %v12096_v60  ;;  %vm4555_vm11 = vcmp.eq.f32.partialorder %v4462_v4, %v11990_v54  ;;  %v16223_v19 = vld [vmem:[#allocation75_spill] sm:$0xff]  ;;  %v16236_v31 = vld [vmem:[#allocation24_spill] sm:$0xff] }
 0x303   : > { %v2298_v52 = vsel %vm16220_vm4, %v16219_v46, %v15172_v43  ;;  %vm4556_vm1 = vcmp.eq.f32.partialorder %v4462_v4, %v11993_v48  ;;  %v13562_v34 = vld [vmem:[#allocation3 + $0x420] sm:$0xff]  ;;  %vm16222_vm5 = vcmask 7168   ;;  %v13568_v9 = vadd.f32 %v4152_v53, %v13271_v55  ;;  %v13590_v50 = vld [vmem:[#allocation3 + $0x438] sm:$0xff]  ;;  %v4467_v46 = vpop.permute.xlu1 %4466  ;;  %v16228_v4 = vld [vmem:[#allocation45_spill] sm:$0xff]  ;;  %7551 = vmatprep.mubr.msk.f32.mxu1 %vm5283_vm7, %v16017_v6 }
 0x304   : > { %v13549_v16 = vadd.f32 %v2298_v52, %v13423_v40  ;;  %2784 = vst.msk [vmem:[#allocation3 + $0x2d9] sm:$0xff] %vm16222_vm5, %v13532_v24  ;;  %7421 = vmatprep.mubr.msk.f32.mxu0 %vm4556_vm1, %v16017_v6  ;;  %v4189_v27 = vmul.f32 0.125, %v4061_v18  ;;  %v15171_v40 = vrot.slane %v13562_v34, 1  ;;  %v1885_v32 = vadd.f32 %v13443_v39, %v16223_v19  ;;  %vm16224_vm6 = vmmov %vm16222_vm5  ;;  %v16227_v52 = vld [vmem:[#allocation37_spill] sm:$0xff]  ;;  %5821 = vperm.xlu1 %7973, %v16228_v4   ;;  %v13594_v0 = vpop.permute.xlu0 %5201  ;;  %v13614_v4 = vld [vmem:[#allocation3 + $0x2f0] sm:$0xff] }
 0x305   : > { %vm5284_vm3 = vcmp.eq.f32.partialorder %v13544_v29, %v12093_v12  ;;  %vm5285_vm13 = vcmp.eq.f32.partialorder %v13544_v29, %v12096_v60  ;;  %7422 = vmatmul.mubr.msk.f32.gmra.mrb[50].mxu0 %vm4555_vm11, %v16017_v6  ;;  %v4153_v55 = vmul.f32 0.125, %v4025_v21  ;;  %v16225_v53 = vrot.slane %v13388_v7, 2  ;;  %6566 = vperm.xlu0 %7972, %v16227_v52   ;;  %v16231_v21 = vld [vmem:[#allocation47_spill] sm:$0xff] }
 0x306   : > { %2821 = vst.msk [vmem:[#allocation3 + $0x429] sm:$0xff] %vm16224_vm6, %v13549_v16  ;;  %v16229_v44 = vrot.slane %v13435_v11, 1  ;;  %vm16230_vm12 = vcmask 1046528   ;;  %v13605_v7 = vadd.f32 %v13237_v2, %v13212_v20  ;;  %vm4557_vm4 = vcmp.eq.f32.partialorder %v4467_v46, %v11990_v54  ;;  %v16233_v20 = vld [vmem:[#allocation69_spill] sm:$0xff]  ;;  %v16234_v11 = vld [vmem:[#allocation84_spill] sm:$0xff]  ;;  %7552 = vmatmul.mubr.msk.f32.gmra.mrb[52].mxu1 %vm5282_vm8, %v16017_v6  ;;  %vm16239_vm8 = vmmov %vm16226_vm0 }
 0x307   : > { %v2225_v23 = vsel %vm16226_vm0, %v16225_v53, %v15170_v61  ;;  %v13608_v53 = vmul.f32 100.0, %v16231_v21  ;;  %v16232_v61 = vld [vmem:[#allocation40_spill] sm:$0xff]  ;;  %vm4558_vm11 = vcmp.eq.f32.partialorder %v4467_v46, %v11993_v48  ;;  %v13624_v2 = vadd.f32 %v13322_v3, %v16233_v20  ;;  %7553 = vmatprep.mubr.msk.f32.mxu1 %vm5285_vm13, %v16017_v6 }
 0x308   : > { %v13601_v18 = vsel %vm16230_vm12, %v16229_v44, %v15171_v40  ;;  %v13612_v52 = vadd.f32 %v13513_v36, %v16232_v61  ;;  %vm16235_vm1 = vnez %v16234_v11  ;;  %7423 = vmatprep.mubr.msk.f32.mxu0 %vm4558_vm11, %v16017_v6  ;;  %v13631_v40 = vadd.f32 %v4189_v27, %v13310_v58  ;;  %5826 = vperm.xlu1 %7973, %v13367_v63   ;;  %v13670_v3 = vld [vmem:[#allocation3 + $0x440] sm:$0xff]  ;;  %v16243_v11 = vld [vmem:[#allocation31_spill] sm:$0xff] }
 0x309   : > { %v1758_v44 = vsel %vm16235_vm1, %v13590_v50, 0.0  ;;  %v3806_v46 = vadd.f32 %v13401_v37, %v13601_v18  ;;  %v13635_v43 = vadd.f32 %v2225_v23, %v1848_v62  ;;  %v15173_v61 = vrot.slane %v13590_v50, 2  ;;  %7424 = vmatmul.mubr.msk.f32.gmra.mrb[52].mxu0 %vm4557_vm4, %v16017_v6  ;;  %v4472_v37 = vpop.permute.xlu1 %4471  ;;  %6571 = vperm.xlu0 %7972, %v13281_v17   ;;  %v13654_v62 = vpop.permute.xlu0 %5206 }
 0x30a   : > { %vm5286_vm7 = vcmp.eq.f32.partialorder %v13594_v0, %v12093_v12  ;;  %vm5287_vm5 = vcmp.eq.f32.partialorder %v13594_v0, %v12096_v60  ;;  %v13649_v58 = vadd.f32 %v4153_v55, %v13438_v51  ;;  %v13662_v20 = vmul.f32 100.0, %v16236_v31  ;;  %v16237_v51 = vld [vmem:[#allocation104_spill] sm:$0xff]  ;;  %7554 = vmatmul.mubr.msk.f32.gmra.mrb[54].mxu1 %vm5284_vm3, %v16017_v6 }
 0x30b   : > { %v4062_v27 = vsub.f32 %v3806_v46, %v16132_v14  ;;  %v13657_v23 = vld [vmem:[#allocation3 + $0x2d8] sm:$0xff]  ;;  %2785 = vst.msk [vmem:[#allocation3 + $0x2e1] sm:$0xff] %vm16224_vm6, %v13635_v43  ;;  %v1886_v55 = vadd.f32 %v1758_v44, %v16237_v51  ;;  %v16238_v17 = vrot.slane %v13443_v39, 2  ;;  %vm4559_vm0 = vcmp.eq.f32.partialorder %v4472_v37, %v11990_v54  ;;  %7555 = vmatprep.mubr.msk.f32.mxu1 %vm5287_vm5, %v16017_v6 }
 0x30c   : > { %vm4560_vm12 = vcmp.eq.f32.partialorder %v4472_v37, %v11993_v48  ;;  %v13682_v44 = vadd.f32 %v13382_v22, %v13303_v49  ;;  %v1722_v46 = vsel %vm16156_vm2, %v13614_v4, 0.0  ;;  %v13693_v19 = vmul.f32 100.0, %v16243_v11  ;;  %vm16246_vm2 = vmmov %vm16239_vm8  ;;  %5831 = vperm.xlu1 %7973, %v13460_v28  }
 0x30d   : > { %v2300_v63 = vsel %vm16239_vm8, %v16238_v17, %v15173_v61  ;;  %v13678_v14 = vld [vmem:[#allocation3 + $0x428] sm:$0xff]  ;;  %7425 = vmatprep.mubr.msk.f32.mxu0 %vm4560_vm12, %v16017_v6  ;;  %v3277_v17 = vrot.slane %v13657_v23, 1  ;;  %v4190_v49 = vmul.f32 0.125, %v4062_v27  ;;  %v16244_v23 = vrot.slane %v13614_v4, 2  ;;  %6576 = vperm.xlu0 %7972, %v13397_v56   ;;  %v13711_v26 = vpop.permute.xlu0 %4486  ;;  %vm16258_vm5 = vmmov %vm16246_vm2 }
 0x30e   : > { %v16241_v61 = vld [vmem:[#allocation49_spill] sm:$0xff]  ;;  %7426 = vmatmul.mubr.msk.f32.gmra.mrb[54].mxu0 %vm4559_vm0, %v16017_v6  ;;  %v16245_v39 = vrot.slane %v13513_v36, 2  ;;  %v16247_v29 = vrot.slane %v13453_v13, 1  ;;  %vm16248_vm3 = vcmask 1046528   ;;  %v16249_v27 = vrot.slane %v13678_v14, 1  ;;  %7556 = vmatmul.mubr.msk.f32.gmra.mrb[56].mxu1 %vm5286_vm7, %v16017_v6 }
 0x30f   : > { %vm16242_vm4 = vnez %v16241_v61  ;;  %v4477_v61 = vpop.permute.xlu1 %4476  ;;  %v16250_v36 = vrot.slane %v13562_v34, 1  ;;  %vm16251_vm13 = vmmov %vm16248_vm3  ;;  %vm5288_vm11 = vcmp.eq.f32.partialorder %v13654_v62, %v12093_v12  ;;  %vm5289_vm6 = vcmp.eq.f32.partialorder %v13654_v62, %v12096_v60 }
 0x310   : > { %v2566_v51 = vsel %vm16242_vm4, %v2300_v63, 0.0  ;;  %v2227_v63 = vsel %vm16246_vm2, %v16245_v39, %v16244_v23  ;;  %v16252_v23 = vld [vmem:[#allocation19_spill] sm:$0xff]  ;;  %vm4561_vm8 = vcmp.eq.f32.partialorder %v4477_v61, %v11990_v54  ;;  %vm4562_vm0 = vcmp.eq.f32.partialorder %v4477_v61, %v11993_v48  ;;  %5836 = vperm.xlu1 %7973, %v13568_v9   ;;  %7557 = vmatprep.mubr.msk.f32.mxu1 %vm5289_vm6, %v16017_v6 }
 0x311   : > { %v13701_v22 = vadd.f32 %v2566_v51, %v1885_v32  ;;  %v13716_v32 = vsel %vm16248_vm3, %v16247_v29, %v3277_v17  ;;  %v13723_v51 = vsel %vm16251_vm13, %v16250_v36, %v16249_v27  ;;  %v1850_v39 = vadd.f32 %v1722_v46, %v16252_v23  ;;  %7427 = vmatprep.mubr.msk.f32.mxu0 %vm4562_vm0, %v16017_v6 }
 0x312   : > { %v2530_v56 = vsel %vm16169_vm9, %v2227_v63, 0.0  ;;  %vm16254_vm12 = vcmask 7168   ;;  %v3770_v13 = vadd.f32 %v13511_v5, %v13716_v32  ;;  %v3807_v28 = vadd.f32 %v13605_v7, %v13723_v51  ;;  %7428 = vmatmul.mubr.msk.f32.gmra.mrb[56].mxu0 %vm4561_vm8, %v16017_v6  ;;  %v13760_v7 = vld [vmem:[#allocation3 + $0x2e0] sm:$0xff]  ;;  %v13770_v63 = vld [vmem:[#allocation3 + $0x2f8] sm:$0xff]  ;;  %6581 = vperm.xlu0 %7972, %v13529_v10   ;;  %v16260_v10 = vld [vmem:[#allocation29_spill] sm:$0xff] }
 0x313   : > { %2822 = vst.msk [vmem:[#allocation3 + $0x431] sm:$0xff] %vm16254_vm12, %v13701_v22  ;;  %v13746_v34 = vadd.f32 %v2530_v56, %v13612_v52  ;;  %v13750_v61 = vadd.f32 %v13407_v33, %v13328_v59  ;;  %vm4565_vm9 = vcmp.eq.f32.partialorder %v13711_v26, %v11990_v54  ;;  %v4318_v5 = vadd.f32 %v4190_v49, %v13500_v57  ;;  %v16255_v52 = vld [vmem:[#allocation21_spill] sm:$0xff]  ;;  %v4482_v29 = vpop.permute.xlu1 %4481  ;;  %vm16259_vm7 = vmmov %vm16254_vm12 }
 0x314   : > { %v13763_v46 = vmul.f32 100.0, %v16255_v52  ;;  %v16256_v59 = vrot.slane %v13670_v3, 2  ;;  %v16257_v33 = vrot.slane %v13590_v50, 2  ;;  %v4026_v57 = vsub.f32 %v3770_v13, %v16136_v1  ;;  %v5212_v1 = vpop.permute.xlu0 %5211  ;;  %v13791_v50 = vld [vmem:[#allocation3 + $0x448] sm:$0xff]  ;;  %vm16262_vm0 = vmmov %vm16259_vm7  ;;  %7558 = vmatmul.mubr.msk.f32.gmra.mrb[58].mxu1 %vm5288_vm11, %v16017_v6  ;;  %5841 = vperm.xlu1 %7973, %v13649_v58  }
 0x315   : > { %v4063_v0 = vsub.f32 %v3807_v28, %v16231_v21  ;;  %v3279_v49 = vrot.slane %v13760_v7, 1  ;;  %2786 = vst.msk [vmem:[#allocation3 + $0x2e9] sm:$0xff] %vm16259_vm7, %v13746_v34  ;;  %vm4566_vm2 = vcmp.eq.f32.partialorder %v13711_v26, %v11993_v48  ;;  %vm4563_vm3 = vcmp.eq.f32.partialorder %v4482_v29, %v11990_v54  ;;  %vm16265_vm11 = vmmov %vm16258_vm5 }
 0x316   : > { %v2302_v37 = vsel %vm16258_vm5, %v16257_v33, %v16256_v59  ;;  %vm4564_vm13 = vcmp.eq.f32.partialorder %v4482_v29, %v11993_v48  ;;  %v1887_v9 = vadd.f32 %v13670_v3, %v16260_v10  ;;  %v4154_v21 = vmul.f32 0.125, %v4026_v57  ;;  %6586 = vperm.xlu0 %7972, %v13631_v40   ;;  %v16266_v29 = vld [vmem:[#allocation67_spill] sm:$0xff] }
 0x317   : > { %v13779_v27 = vadd.f32 %v2302_v37, %v1886_v55  ;;  %7429 = vmatprep.mubr.msk.f32.mxu0 %vm4564_vm13, %v16017_v6  ;;  %vm16261_vm8 = vcmask 1046528   ;;  %v13803_v36 = vadd.f32 %v13492_v25, %v13441_v45  ;;  %v2228_v56 = vrot.slane %v13770_v63, 2  ;;  %v16263_v45 = vld [vmem:[#allocation7_spill] sm:$0xff]  ;;  %vm16276_vm13 = vmmov %vm16262_vm0 }
 0x318   : > { %v13797_v55 = vsel %vm16261_vm8, %v3277_v17, %v3279_v49  ;;  %7430 = vmatmul.mubr.msk.f32.gmra.mrb[58].mxu0 %vm4563_vm3, %v16017_v6  ;;  %v4191_v17 = vmul.f32 0.125, %v4063_v0  ;;  %v13815_v28 = vmul.f32 100.0, %v16184_v15  ;;  %v1851_v25 = vadd.f32 %v13770_v63, %v16263_v45  ;;  %v13836_v63 = vld [vmem:[#allocation3 + $0x300] sm:$0xff]  ;;  %vm16270_vm7 = vmmov %vm16261_vm8 }
 0x319   : > { %2823 = vst.msk [vmem:[#allocation3 + $0x439] sm:$0xff] %vm16262_vm0, %v13779_v27  ;;  %v3771_v13 = vadd.f32 %v13624_v2, %v13797_v55  ;;  %vm5291_vm6 = vcmp.eq.f32.partialorder %v5212_v1, %v12096_v60  ;;  %v4282_v59 = vadd.f32 %v4154_v21, %v13535_v35  ;;  %v16264_v33 = vrot.slane %v13614_v4, 2  ;;  %7431 = vmatprep.mubr.msk.f32.mxu0 %vm4566_vm2, %v16017_v6  ;;  %vm16271_vm2 = vmmov %vm16262_vm0 }
 0x31a   : > { %v2967_v62 = vld [vmem:[#allocation3 + $0x430] sm:$0xff]  ;;  %v2303_v2 = vrot.slane %v13791_v50, 2  ;;  %vm5290_vm12 = vcmp.eq.f32.partialorder %v5212_v1, %v12093_v12  ;;  %7559 = vmatprep.mubr.msk.f32.mxu1 %vm5291_vm6, %v16017_v6  ;;  %v13840_v4 = vadd.f32 %v13497_v42, %v13532_v24  ;;  %v13843_v57 = vmul.f32 100.0, %v16266_v29  ;;  %6591 = vperm.xlu0 %7972, %v4318_v5   ;;  %vm16277_vm8 = vmmov %vm16258_vm5 }
 0x31b   : > { %v2229_v37 = vsel %vm16265_vm11, %v16264_v33, %v2228_v56  ;;  %v4027_v40 = vsub.f32 %v3771_v13, %v16236_v31  ;;  %v3354_v58 = vrot.slane %v2967_v62, 1  ;;  %v1760_v1 = vsel %vm10497_vm10, %v13791_v50, 0.0  ;;  %7560 = vmatmul.mubr.msk.f32.gmra.mrb[60].mxu1 %vm5290_vm12, %v16017_v6  ;;  %v16272_v13 = vld [vmem:[#allocation56_spill] sm:$0xff]  ;;  %5846 = vperm.xlu1 %7973, %v4282_v59   ;;  %vm16283_vm6 = vmmov %vm16262_vm0 }
 0x31c   : > { %v13834_v35 = vadd.f32 %v2229_v37, %v1850_v39  ;;  %v16268_v21 = vrot.slane %v13670_v3, 2  ;;  %7432 = vmatmul.mubr.msk.f32.gmra.mrb[60].mxu0 %vm4565_vm9, %v16017_v6  ;;  %v4319_v42 = vadd.f32 %v4191_v17, %v13608_v53  ;;  %v16269_v39 = vrot.slane %v13678_v14, 1  ;;  %v2926_v50 = vld [vmem:[#allocation3 + $0x2e8] sm:$0xff]  ;;  %v1600_v17 = vld [vmem:[#allocation3 + $0x450] sm:$0xff]  ;;  %vm16275_vm9 = vmmov %vm16270_vm7 }
 0x31d   : > { %v4155_v24 = vmul.f32 0.125, %v4027_v40  ;;  %vm16273_vm3 = vnez %v16272_v13  ;;  %v3281_v33 = vrot.slane %v2926_v50, 1  ;;  %v2230_v14 = vrot.slane %v13836_v63, 2  ;;  %v1601_v50 = vld [vmem:[#allocation3 + $0x458] sm:$0xff]  ;;  %vm16284_vm11 = vmmov %vm16258_vm5  ;;  %v1567_v13 = vld [vmem:[#allocation3 + $0x328] sm:$0xff] }
 0x31e   : > { %v2304_v31 = vsel %vm16258_vm5, %v16268_v21, %v2303_v2  ;;  %v13862_v3 = vsel %vm16270_vm7, %v16269_v39, %v3354_v58  ;;  %2787 = vst.msk [vmem:[#allocation3 + $0x2f1] sm:$0xff] %vm16271_vm2, %v13834_v35  ;;  %v16274_v21 = vld [vmem:[#allocation73_spill] sm:$0xff]  ;;  %v2305_v7 = vrot.slane %v1600_v17, 2  ;;  %6596 = vperm.xlu0 %7972, %v4319_v42   ;;  %v13918_v38 = vadd.f32 %v13716_v32, %v13635_v43  ;;  %vm16291_vm2 = vmmov %vm16262_vm0 }
 0x31f   : > { %v2568_v62 = vsel %vm16273_vm3, %v2304_v31, 0.0  ;;  %v3808_v26 = vadd.f32 %v13682_v44, %v13862_v3  ;;  %v4283_v37 = vadd.f32 %v4155_v24, %v13662_v20  ;;  %v1888_v39 = vadd.f32 %v1760_v1, %v16274_v21 }
 0x320   : > { %v13870_v53 = vadd.f32 %v2568_v62, %v1887_v9  ;;  %v13874_v40 = vld [vmem:[#allocation3 + $0x438] sm:$0xff]  ;;  %v13879_v31 = vadd.f32 %v13601_v18, %v13549_v16  ;;  %v1724_v44 = vsel %vm16200_vm14, %v13836_v63, 0.0  ;;  %v13890_v20 = vsel %vm16275_vm9, %v3279_v49, %v3281_v33  ;;  %v13905_v49 = vld [vmem:[#allocation3 + $0x308] sm:$0xff]  ;;  %vm16278_vm14 = vmmov %vm16270_vm7 }
 0x321   : > { %v4064_v5 = vsub.f32 %v3808_v26, %v16243_v11  ;;  %v3356_v9 = vrot.slane %v13874_v40, 1  ;;  %v2231_v16 = vsel %vm16277_vm8, %v2228_v56, %v2230_v14  ;;  %v3772_v30 = vadd.f32 %v13750_v61, %v13890_v20  ;;  %5851 = vperm.xlu1 %7973, %v4283_v37   ;;  %v16279_v63 = vld [vmem:[#allocation70_spill] sm:$0xff] }
 0x322   : > { %2824 = vst.msk [vmem:[#allocation3 + $0x441] sm:$0xff] %vm16276_vm13, %v13870_v53  ;;  %v13901_v18 = vmul.f32 100.0, %v16205_v41  ;;  %v2532_v11 = vsel %vm16207_vm15, %v2231_v16, 0.0  ;;  %v1852_v8 = vadd.f32 %v1724_v44, %v16279_v63  ;;  %vm16280_vm15 = vmmov %vm16258_vm5  ;;  %v16282_v37 = vld [vmem:[#allocation66_spill] sm:$0xff]  ;;  %v16285_v44 = vld [vmem:[#allocation41_spill] sm:$0xff]  ;;  %v2307_v16 = vrot.slane %v1601_v50, 2 }
 0x323   : > { %v4192_v59 = vmul.f32 0.125, %v4064_v5  ;;  %v13908_v56 = vsel %vm16278_vm14, %v3354_v58, %v3356_v9  ;;  %v13911_v1 = vadd.f32 %v2532_v11, %v1851_v25  ;;  %v4028_v61 = vsub.f32 %v3772_v30, %v16255_v52  ;;  %v16281_v25 = vld [vmem:[#allocation64_spill] sm:$0xff]  ;;  %vm16287_vm5 = vmmov %vm16270_vm7 }
 0x324   : > { %v3809_v24 = vadd.f32 %v13803_v36, %v13908_v56  ;;  %v2306_v42 = vsel %vm16280_vm15, %v2303_v2, %v2305_v7  ;;  %v13926_v52 = vmul.f32 100.0, %v16281_v25  ;;  %v2232_v36 = vrot.slane %v13905_v49, 2  ;;  %vm16289_vm7 = vmmov %vm16277_vm8 }
 0x325   : > { %v4320_v58 = vadd.f32 %v4192_v59, %v13693_v19  ;;  %v2927_v62 = vld [vmem:[#allocation3 + $0x2f0] sm:$0xff]  ;;  %2788 = vst.msk [vmem:[#allocation3 + $0x2f9] sm:$0xff] %vm16262_vm0, %v13911_v1  ;;  %v13928_v26 = vadd.f32 %v2306_v42, %v1888_v39  ;;  %v4156_v43 = vmul.f32 0.125, %v4028_v61  ;;  %v1889_v40 = vadd.f32 %v1600_v17, %v16282_v37  ;;  %v16290_v42 = vld [vmem:[#allocation12_spill] sm:$0xff]  ;;  %vm16295_vm13 = vmmov %vm16287_vm5 }
 0x326   : > { %v4065_v32 = vsub.f32 %v3809_v24, %v16184_v15  ;;  %v3283_v2 = vrot.slane %v2927_v62, 1  ;;  %v3619_v19 = vadd.f32 %v13723_v51, %v13701_v22  ;;  %v2233_v39 = vsel %vm16284_vm11, %v2230_v14, %v2232_v36  ;;  %v16288_v22 = vld [vmem:[#allocation75_spill] sm:$0xff]  ;;  %v1564_v24 = vld [vmem:[#allocation3 + $0x310] sm:$0xff]  ;;  %vm16297_vm8 = vmmov %vm16262_vm0 }
 0x327   : > { %6601 = vperm.xlu0 %7972, %v4320_v58   ;;  %2825 = vst.msk [vmem:[#allocation3 + $0x449] sm:$0xff] %vm16283_vm6, %v13928_v26  ;;  %vm16286_vm12 = vnez %v16285_v44  ;;  %v4284_v47 = vadd.f32 %v4156_v43, %v13763_v46  ;;  %v13945_v11 = vadd.f32 %v2233_v39, %v1852_v8  ;;  %v13950_v51 = vmul.f32 100.0, %v16288_v22  ;;  %v16292_v8 = vld [vmem:[#allocation90_spill] sm:$0xff]  ;;  %v16293_v58 = vld [vmem:[#allocation25_spill] sm:$0xff]  ;;  %v16296_v39 = vld [vmem:[#allocation40_spill] sm:$0xff] }
 0x328   : > { %v1762_v5 = vsel %vm16286_vm12, %v1601_v50, 0.0  ;;  %v4193_v30 = vmul.f32 0.125, %v4065_v32  ;;  %v13943_v15 = vsel %vm16287_vm5, %v3281_v33, %v3283_v2  ;;  %v2308_v14 = vsel %vm16289_vm7, %v2305_v7, %v2307_v16  ;;  %vm16301_vm14 = vmmov %vm16289_vm7 }
 0x329   : > { %v2969_v17 = vld [vmem:[#allocation3 + $0x440] sm:$0xff]  ;;  %v3773_v59 = vadd.f32 %v13840_v4, %v13943_v15  ;;  %5856 = vperm.xlu1 %7973, %v4284_v47   ;;  %v1853_v33 = vadd.f32 %v13905_v49, %v16290_v42  ;;  %2789 = vst.msk [vmem:[#allocation3 + $0x301] sm:$0xff] %vm16291_vm2, %v13945_v11  ;;  %v1890_v50 = vadd.f32 %v1762_v5, %v16292_v8  ;;  %v13969_v47 = vmul.f32 100.0, %v16296_v39  ;;  %vm16303_vm15 = vmmov %vm16289_vm7 }
 0x32a   : > { %v3358_v61 = vrot.slane %v2969_v17, 1  ;;  %v4321_v46 = vadd.f32 %v4193_v30, %v13815_v28  ;;  %vm16294_vm9 = vnez %v16293_v58  ;;  %v3583_v7 = vadd.f32 %v13797_v55, %v13746_v34  ;;  %v16299_v55 = vld [vmem:[#allocation20_spill] sm:$0xff]  ;;  %vm16304_vm0 = vmmov %vm16287_vm5 }
 0x32b   : > { %v2570_v4 = vsel %vm16294_vm9, %v2308_v14, 0.0  ;;  %v4029_v62 = vsub.f32 %v3773_v59, %v16266_v29  ;;  %v3620_v5 = vadd.f32 %v13862_v3, %v13779_v27  ;;  %v2234_v30 = vrot.slane %v1564_v24, 2  ;;  %vm16308_vm6 = vmmov %vm16304_vm0 }
 0x32c   : > { %v3359_v43 = vsel %vm16295_vm13, %v3356_v9, %v3358_v61  ;;  %v13965_v32 = vadd.f32 %v2570_v4, %v1889_v40  ;;  %6606 = vperm.xlu0 %7972, %v4321_v46   ;;  %v2928_v49 = vld [vmem:[#allocation3 + $0x2f8] sm:$0xff]  ;;  %v1726_v34 = vsel %vm16235_vm1, %v1564_v24, 0.0  ;;  %v16300_v40 = vrot.slane %v16299_v55, 2  ;;  %v16302_v46 = vld [vmem:[#allocation104_spill] sm:$0xff]  ;;  %vm16307_vm1 = vmmov %vm16291_vm2 }
 0x32d   : > { %v3810_v28 = vadd.f32 %v13879_v31, %v3359_v43  ;;  %v4157_v17 = vmul.f32 0.125, %v4029_v62  ;;  %v3285_v29 = vrot.slane %v2928_v49, 1  ;;  %v13982_v4 = vmul.f32 100.0, %v16302_v46  ;;  %v1565_v62 = vld [vmem:[#allocation3 + $0x318] sm:$0xff]  ;;  %vm16311_vm11 = vmmov %vm16289_vm7 }
 0x32e   : > { %2826 = vst.msk [vmem:[#allocation3 + $0x451] sm:$0xff] %vm16297_vm8, %v13965_v32  ;;  %v2310_v31 = vsel %vm16301_vm14, %v2307_v16, %v16300_v40  ;;  %v2970_v14 = vld [vmem:[#allocation3 + $0x448] sm:$0xff]  ;;  %v2235_v27 = vsel %vm16303_vm15, %v2232_v36, %v2234_v30  ;;  %vm16312_vm5 = vmmov %vm16304_vm0 }
 0x32f   : > { %v4066_v59 = vsub.f32 %v3810_v28, %v16205_v41  ;;  %v13985_v3 = vadd.f32 %v2310_v31, %v1890_v50  ;;  %v4285_v49 = vadd.f32 %v4157_v17, %v13843_v57  ;;  %v13989_v9 = vsel %vm16304_vm0, %v3283_v2, %v3285_v29  ;;  %v16306_v28 = vld [vmem:[#allocation18_spill] sm:$0xff]  ;;  %vm16313_vm7 = vmmov %vm16307_vm1 }
 0x330   : > { %v3360_v24 = vrot.slane %v2970_v14, 1  ;;  %v2534_v16 = vsel %vm16242_vm4, %v2235_v27, 0.0  ;;  %v3774_v41 = vadd.f32 %v13918_v38, %v13989_v9  ;;  %v1854_v48 = vadd.f32 %v1726_v34, %v16306_v28  ;;  %v2929_v36 = vld [vmem:[#allocation3 + $0x300] sm:$0xff]  ;;  %vm16309_vm4 = vmmov %vm16307_vm1 }
 0x331   : > { %v4194_v40 = vmul.f32 0.125, %v4066_v59  ;;  %v13996_v54 = vadd.f32 %v2534_v16, %v1853_v33  ;;  %2827 = vst.msk [vmem:[#allocation3 + $0x459] sm:$0xff] %vm16307_vm1, %v13985_v3  ;;  %5861 = vperm.xlu1 %7973, %v4285_v49   ;;  %v3584_v2 = vadd.f32 %v13890_v20, %v13834_v35  ;;  %v14004_v50 = vmul.f32 100.0, %v16252_v23  ;;  %v14010_v59 = vld [vmem:[#allocation3 + $0x320] sm:$0xff]  ;;  %v16310_v20 = vld [vmem:[#allocation33_spill] sm:$0xff]  ;;  %vm16314_vm2 = vmmov %vm16304_vm0 }
 0x332   : > { %v3361_v57 = vsel %vm16308_vm6, %v3358_v61, %v3360_v24  ;;  %v2236_v17 = vrot.slane %v1565_v62, 2  ;;  %v4030_v34 = vsub.f32 %v3774_v41, %v16281_v25  ;;  %v3287_v31 = vrot.slane %v2929_v36, 1  ;;  %v14025_v16 = vld [vmem:[#allocation3 + $0x468] sm:$0xff]  ;;  %vm16315_vm13 = vmmov %vm16311_vm11 }
 0x333   : > { %v4322_v38 = vadd.f32 %v4194_v40, %v13901_v18  ;;  %v3811_v33 = vadd.f32 %v3619_v19, %v3361_v57  ;;  %2790 = vst.msk [vmem:[#allocation3 + $0x309] sm:$0xff] %vm16309_vm4, %v13996_v54  ;;  %v3621_v61 = vadd.f32 %v13908_v56, %v13870_v53  ;;  %v14015_v35 = vmul.f32 100.0, %v16260_v10  ;;  %vm16316_vm8 = vmmov %vm16304_vm0 }
 0x334   : > { %v1855_v14 = vadd.f32 %v1565_v62, %v16310_v20  ;;  %v2237_v27 = vsel %vm16311_vm11, %v2234_v30, %v2236_v17  ;;  %v4158_v18 = vmul.f32 0.125, %v4030_v34  ;;  %v14021_v19 = vsel %vm16312_vm5, %v3285_v29, %v3287_v31  ;;  %vm16317_vm14 = vmmov %vm16304_vm0 }
 0x335   : > { %6611 = vperm.xlu0 %7972, %v4322_v38   ;;  %v4067_v25 = vsub.f32 %v3811_v33, %v16288_v22  ;;  %v2971_v49 = vld [vmem:[#allocation3 + $0x450] sm:$0xff]  ;;  %v14023_v55 = vadd.f32 %v2237_v27, %v1854_v48  ;;  %v3775_v53 = vadd.f32 %v3583_v7, %v14021_v19  ;;  %v3585_v62 = vadd.f32 %v13943_v15, %v13911_v1  ;;  %vm16320_vm15 = vmmov %vm16307_vm1 }
 0x336   : > { %v3362_v56 = vrot.slane %v2971_v49, 1  ;;  %v2238_v30 = vrot.slane %v14010_v59, 2  ;;  %v4286_v40 = vadd.f32 %v4158_v18, %v13926_v52  ;;  %v14035_v22 = vmul.f32 100.0, %v16263_v45  ;;  %vm16322_vm1 = vmmov %vm16311_vm11 }
 0x337   : > { %v4195_v41 = vmul.f32 0.125, %v4067_v25  ;;  %2791 = vst.msk [vmem:[#allocation3 + $0x311] sm:$0xff] %vm16313_vm7, %v14023_v55  ;;  %v3622_v48 = vadd.f32 %v3359_v43, %v13928_v26  ;;  %v4031_v29 = vsub.f32 %v3775_v53, %v16296_v39  ;;  %v3368_v15 = vrot.slane %v14025_v16, 1  ;;  %vm16323_vm6 = vmmov %vm16304_vm0 }
 0x338   : > { %v3363_v7 = vsel %vm16314_vm2, %v3360_v24, %v3362_v56  ;;  %v2972_v36 = vld [vmem:[#allocation3 + $0x458] sm:$0xff]  ;;  %v2973_v38 = vld [vmem:[#allocation3 + $0x460] sm:$0xff]  ;;  %v2239_v1 = vsel %vm16315_vm13, %v2236_v17, %v2238_v30  ;;  %5866 = vperm.xlu1 %7973, %v4286_v40   ;;  %v1728_v26 = vsel %vm10497_vm10, %v14010_v59, 0.0  ;;  %v3623_v39 = vadd.f32 %v3361_v57, %v13965_v32  ;;  %vm16318_vm10 = vmmov %vm16304_vm0 }
 0x339   : > { %v4323_v52 = vadd.f32 %v4195_v41, %v13950_v51  ;;  %v3812_v34 = vadd.f32 %v3620_v5, %v3363_v7  ;;  %v3364_v33 = vrot.slane %v2972_v36, 1  ;;  %v3366_v27 = vrot.slane %v2973_v38, 1  ;;  %vm16328_vm11 = vmmov %vm16304_vm0 }
 0x33a   : > { %v4159_v18 = vmul.f32 0.125, %v4031_v29  ;;  %v2930_v25 = vld [vmem:[#allocation3 + $0x308] sm:$0xff]  ;;  %v2536_v43 = vsel %vm16273_vm3, %v2239_v1, 0.0  ;;  %vm16319_vm3 = vmmov %vm16304_vm0  ;;  %v16321_v29 = vld [vmem:[#allocation14_spill] sm:$0xff]  ;;  %v2240_v38 = vrot.slane %v1567_v13, 2 }
 0x33b   : > { %6616 = vperm.xlu0 %7972, %v4323_v52   ;;  %v4068_v24 = vsub.f32 %v3812_v34, %v16302_v46  ;;  %v3289_v17 = vrot.slane %v2930_v25, 1  ;;  %v3365_v51 = vsel %vm16316_vm8, %v3362_v56, %v3364_v33  ;;  %v14052_v5 = vsel %vm16317_vm14, %v3364_v33, %v3366_v27  ;;  %vm16329_vm5 = vmmov %vm16304_vm0 }
 0x33c   : > { %v4287_v49 = vadd.f32 %v4159_v18, %v13969_v47  ;;  %v3813_v16 = vadd.f32 %v3621_v61, %v3365_v51  ;;  %v3814_v0 = vadd.f32 %v3622_v48, %v14052_v5  ;;  %v14056_v59 = vadd.f32 %v2536_v43, %v1855_v14  ;;  %vm16332_vm7 = vmmov %vm16322_vm1 }
 0x33d   : > { %v4196_v53 = vmul.f32 0.125, %v4068_v24  ;;  %v14059_v32 = vsel %vm16318_vm10, %v3287_v31, %v3289_v17  ;;  %v3942_v46 = vmul.f32 100.0, %v16274_v21  ;;  %v14063_v57 = vsel %vm16319_vm3, %v3366_v27, %v3368_v15  ;;  %v2975_v31 = vld [vmem:[#allocation3 + $0x470] sm:$0xff]  ;;  %vm16336_vm2 = vmmov %vm16309_vm4 }
 0x33e   : > { %5871 = vperm.xlu1 %7973, %v4287_v49   ;;  %v3776_v56 = vadd.f32 %v3584_v2, %v14059_v32  ;;  %v4069_v47 = vsub.f32 %v3813_v16, %v16260_v10  ;;  %v2931_v61 = vld [vmem:[#allocation3 + $0x310] sm:$0xff]  ;;  %v4070_v40 = vsub.f32 %v3814_v0, %v16274_v21  ;;  %2792 = vst.msk [vmem:[#allocation3 + $0x319] sm:$0xff] %vm16320_vm15, %v14056_v59  ;;  %v3370_v27 = vrot.slane %v2975_v31, 1  ;;  %v16324_v0 = vld [vmem:[#allocation15_spill] sm:$0xff]  ;;  %vm16337_vm13 = vmmov %vm16304_vm0 }
 0x33f   : > { %v3815_v14 = vadd.f32 %v3623_v39, %v14063_v57  ;;  %v4324_v41 = vadd.f32 %v4196_v53, %v13982_v4  ;;  %v3291_v48 = vrot.slane %v2931_v61, 1  ;;  %v1856_v36 = vadd.f32 %v1728_v26, %v16321_v29  ;;  %v16327_v61 = vld [vmem:[#allocation111_spill] sm:$0xff]  ;;  %vm16338_vm8 = vmmov %vm16304_vm0 }
 0x340   : > { %v4032_v1 = vsub.f32 %v3776_v56, %v16252_v23  ;;  %v4197_v2 = vmul.f32 0.125, %v4069_v47  ;;  %v3586_v10 = vadd.f32 %v13989_v9, %v13945_v11  ;;  %v4198_v34 = vmul.f32 0.125, %v4070_v40  ;;  %v1568_v23 = vld [vmem:[#allocation3 + $0x330] sm:$0xff]  ;;  %vm16341_vm14 = vmmov %vm16304_vm0 }
 0x341   : > { %v4071_v21 = vsub.f32 %v3815_v14, %v16282_v37  ;;  %6621 = vperm.xlu0 %7972, %v4324_v41   ;;  %v3292_v52 = vsel %vm16304_vm0, %v3289_v17, %v3291_v48  ;;  %v2241_v33 = vsel %vm16322_vm1, %v2238_v30, %v2240_v38  ;;  %v14081_v26 = vmul.f32 100.0, %v16279_v63  ;;  %vm16344_vm10 = vmmov %vm16304_vm0 }
 0x342   : > { %v4160_v4 = vmul.f32 0.125, %v4032_v1  ;;  %v4325_v18 = vadd.f32 %v4197_v2, %v14015_v35  ;;  %v3777_v25 = vadd.f32 %v3585_v62, %v3292_v52  ;;  %v3943_v43 = vmul.f32 100.0, %v16282_v37  ;;  %v2976_v62 = vld [vmem:[#allocation3 + $0x478] sm:$0xff]  ;;  %vm16345_vm3 = vmmov %vm16304_vm0 }
 0x343   : > { %v2665_v11 = vadd.f32 %v2241_v33, %v1856_v36  ;;  %v14085_v9 = vsel %vm16323_vm6, %v3368_v15, %v3370_v27  ;;  %v3624_v39 = vadd.f32 %v3363_v7, %v13985_v3  ;;  %v4199_v17 = vmul.f32 0.125, %v4071_v21  ;;  %v16325_v7 = vld [vmem:[#allocation85_spill] sm:$0xff]  ;;  %vm16346_vm15 = vmmov %vm16304_vm0 }
 0x344   : > { %v4288_v24 = vadd.f32 %v4160_v4, %v14004_v50  ;;  %v4033_v30 = vsub.f32 %v3777_v25, %v16263_v45  ;;  %v1730_v35 = vsel %vm16286_vm12, %v1568_v23, 0.0  ;;  %v4326_v49 = vadd.f32 %v4198_v34, %v3942_v46  ;;  %vm16326_vm12 = vmmov %vm16322_vm1  ;;  %v2977_v34 = vld [vmem:[#allocation3 + $0x480] sm:$0xff] }
 0x345   : > { %6626 = vperm.xlu0 %7972, %v4325_v18   ;;  %v2932_v16 = vld [vmem:[#allocation3 + $0x318] sm:$0xff]  ;;  %v1857_v37 = vadd.f32 %v1567_v13, %v16324_v0  ;;  %2793 = vst.msk [vmem:[#allocation3 + $0x321] sm:$0xff] %vm16309_vm4, %v2665_v11  ;;  %v3816_v15 = vadd.f32 %v3624_v39, %v14085_v9  ;;  %v2242_v53 = vrot.slane %v1568_v23, 2  ;;  %v3944_v45 = vmul.f32 100.0, %v16292_v8  ;;  %vm16347_vm1 = vmmov %vm16304_vm0 }
 0x346   : > { %5876 = vperm.xlu1 %7973, %v4288_v24   ;;  %v4161_v3 = vmul.f32 0.125, %v4033_v30  ;;  %v3293_v50 = vrot.slane %v2932_v16, 1  ;;  %v1858_v56 = vadd.f32 %v1730_v35, %v16325_v7  ;;  %v3372_v46 = vrot.slane %v2976_v62, 1  ;;  %v16334_v18 = vld [vmem:[#allocation91_spill] sm:$0xff]  ;;  %v2937_v16 = vld [vmem:[#allocation3 + $0x340] sm:$0xff]  ;;  %vm16348_vm6 = vmmov %vm16304_vm0 }
 0x347   : > { %v4072_v44 = vsub.f32 %v3816_v15, %v16292_v8  ;;  %v2243_v47 = vsel %vm16326_vm12, %v2240_v38, %v2242_v53  ;;  %v3625_v40 = vadd.f32 %v3365_v51, %v16327_v61  ;;  %v4327_v31 = vadd.f32 %v4199_v17, %v3943_v43 }
 0x348   : > { %v4289_v13 = vadd.f32 %v4161_v3, %v14035_v22  ;;  %v3294_v14 = vsel %vm16328_vm11, %v3291_v48, %v3293_v50  ;;  %v2538_v41 = vsel %vm16294_vm9, %v2243_v47, 0.0  ;;  %v14105_v21 = vsel %vm16329_vm5, %v3370_v27, %v3372_v46  ;;  %v16330_v48 = vld [vmem:[#allocation100_spill] sm:$0xff]  ;;  %vm16333_vm9 = vmmov %vm16309_vm4  ;;  %v14146_v3 = vld [vmem:[#allocation3 + $0x490] sm:$0xff] }
 0x349   : > { %6631 = vperm.xlu0 %7972, %v4326_v49   ;;  %v3778_v36 = vadd.f32 %v3586_v10, %v3294_v14  ;;  %v4200_v1 = vmul.f32 0.125, %v4072_v44  ;;  %v2666_v2 = vadd.f32 %v2538_v41, %v1857_v37  ;;  %v3587_v8 = vadd.f32 %v14021_v19, %v13996_v54  ;;  %v14123_v54 = vpop.permute.xlu0 %746  ;;  %v16339_v44 = vld [vmem:[#allocation93_spill] sm:$0xff]  ;;  %v720_v41 = vpop.permute.xlu1 %719 }
 0x34a   : > { %5881 = vperm.xlu1 %7973, %v4289_v13   ;;  %v14110_v51 = vmul.f32 100.0, %v16290_v42  ;;  %v3817_v22 = vadd.f32 %v3625_v40, %v14105_v21  ;;  %v16331_v38 = vrot.slane %v16330_v48, 2  ;;  %v3588_v33 = vadd.f32 %v14059_v32, %v14023_v55 }
 0x34b   : > { %v4034_v10 = vsub.f32 %v3778_v36, %v16279_v63  ;;  %2794 = vst.msk [vmem:[#allocation3 + $0x329] sm:$0xff] %vm16333_vm9, %v2666_v2  ;;  %v14121_v27 = vmul.f32 100.0, %v16306_v28  ;;  %v3945_v25 = vmul.f32 100.0, %v16334_v18  ;;  %v3589_v43 = vadd.f32 %v3292_v52, %v14056_v59  ;;  %v16335_v63 = vld [vmem:[#allocation112_spill] sm:$0xff]  ;;  %v2978_v59 = vld [vmem:[#allocation3 + $0x488] sm:$0xff] }
 0x34c   : > { %v2245_v58 = vsel %vm16332_vm7, %v2242_v53, %v16331_v38  ;;  %v2933_v4 = vld [vmem:[#allocation3 + $0x320] sm:$0xff]  ;;  %v4073_v23 = vsub.f32 %v3817_v22, %v16334_v18  ;;  %v3626_v39 = vadd.f32 %v14052_v5, %v16335_v63  ;;  %v4328_v32 = vadd.f32 %v4200_v1, %v3944_v45  ;;  %v14138_v52 = vld [vmem:[#allocation3 + $0x348] sm:$0xff]  ;;  %v16343_v38 = vld [vmem:[#allocation114_spill] sm:$0xff] }
 0x34d   : > { %v14125_v19 = vadd.f32 %v2245_v58, %v1858_v56  ;;  %v4162_v24 = vmul.f32 0.125, %v4034_v10  ;;  %6636 = vperm.xlu0 %7972, %v4327_v31   ;;  %v3295_v55 = vrot.slane %v2933_v4, 1  ;;  %v3670_v30 = vrot.slane %v2977_v34, 1 }
 0x34e   : > { %v751_v17 = vrot.slane %v14123_v54, 1  ;;  %v4201_v35 = vmul.f32 0.125, %v4073_v23  ;;  %v14136_v62 = vmul.f32 100.0, %v16310_v20  ;;  %v3590_v49 = vadd.f32 %v3294_v14, %v2665_v11  ;;  %v16340_v11 = vld [vmem:[#allocation113_spill] sm:$0xff] }
 0x34f   : > { %2795 = vst.msk [vmem:[#allocation3 + $0x331] sm:$0xff] %vm16336_vm2, %v14125_v19  ;;  %v4290_v5 = vadd.f32 %v4162_v24, %v14081_v26  ;;  %v3296_v37 = vsel %vm16337_vm13, %v3293_v50, %v3295_v55  ;;  %v14143_v15 = vmul.f32 100.0, %v16321_v29  ;;  %v3671_v53 = vsel %vm16338_vm8, %v3372_v46, %v3670_v30  ;;  %vm16357_vm2 = vmmov %vm16304_vm0 }
 0x350   : > { %v3779_v45 = vadd.f32 %v3587_v8, %v3296_v37  ;;  %v3818_v56 = vadd.f32 %v3671_v53, %v3626_v39  ;;  %v3946_v47 = vmul.f32 100.0, %v16339_v44  ;;  %v3627_v61 = vadd.f32 %v14063_v57, %v16340_v11  ;;  %v16342_v57 = vld [vmem:[#allocation94_spill] sm:$0xff]  ;;  %vm16359_vm13 = vmmov %vm16304_vm0 }
 0x351   : > { %5886 = vperm.xlu1 %7973, %v4290_v5   ;;  %6641 = vperm.xlu0 %7972, %v4328_v32   ;;  %v4329_v40 = vadd.f32 %v4201_v35, %v3945_v25  ;;  %v3303_v26 = vrot.slane %v2937_v16, 1  ;;  %v3672_v13 = vrot.slane %v2978_v59, 1  ;;  %v3305_v50 = vrot.slane %v14138_v52, 1  ;;  %v2941_v52 = vld [vmem:[#allocation3 + $0x360] sm:$0xff]  ;;  %vm16363_vm8 = vmmov %vm16304_vm0 }
 0x352   : > { %v4035_v14 = vsub.f32 %v3779_v45, %v16290_v42  ;;  %v2934_v31 = vld [vmem:[#allocation3 + $0x328] sm:$0xff]  ;;  %v4074_v46 = vsub.f32 %v3818_v56, %v16339_v44  ;;  %v3591_v36 = vadd.f32 %v3296_v37, %v2666_v2  ;;  %v3674_v1 = vrot.slane %v14146_v3, 1 }
 0x353   : > { %v3297_v8 = vrot.slane %v2934_v31, 1  ;;  %v3673_v22 = vsel %vm16341_vm14, %v3670_v30, %v3672_v13  ;;  %v3947_v48 = vmul.f32 100.0, %v16342_v57  ;;  %v3628_v58 = vadd.f32 %v14085_v9, %v16343_v38  ;;  %v722_v30 = vpop.permute.xlu1 %721  ;;  %vm16368_vm14 = vmmov %vm16304_vm0 }
 0x354   : > { %v4163_v34 = vmul.f32 0.125, %v4035_v14  ;;  %v4202_v18 = vmul.f32 0.125, %v4074_v46  ;;  %v725_v42 = vrot.slane %v720_v41, 1  ;;  %v3819_v25 = vadd.f32 %v3673_v22, %v3627_v61  ;;  %v16353_v22 = vld [vmem:[#allocation22_spill] sm:$0xff] }
 0x355   : > { %v3298_v23 = vsel %vm16344_vm10, %v3295_v55, %v3297_v8  ;;  %6646 = vperm.xlu0 %7972, %v4329_v40   ;;  %v14163_v39 = vsel %vm16345_vm3, %v3303_v26, %v3305_v50  ;;  %v3675_v35 = vsel %vm16346_vm15, %v3672_v13, %v3674_v1  ;;  %v726_v56 = vrot.slane %v722_v30, 1 }
 0x356   : > { %v2935_v10 = vld [vmem:[#allocation3 + $0x330] sm:$0xff]  ;;  %v2936_v4 = vld [vmem:[#allocation3 + $0x338] sm:$0xff]  ;;  %v4291_v24 = vadd.f32 %v4163_v34, %v14110_v51  ;;  %v3780_v32 = vadd.f32 %v3588_v33, %v3298_v23  ;;  %v4330_v9 = vadd.f32 %v4202_v18, %v3946_v47  ;;  %v4075_v5 = vsub.f32 %v3819_v25, %v16342_v57 }
 0x357   : > { %v3299_v2 = vrot.slane %v2935_v10, 1  ;;  %v3301_v63 = vrot.slane %v2936_v4, 1  ;;  %v3592_v44 = vadd.f32 %v3298_v23, %v14125_v19  ;;  %v3820_v47 = vadd.f32 %v3675_v35, %v3628_v58  ;;  %v745_v13 = vpop.permute.xlu1 %744  ;;  %v5217_v19 = vpop.permute.xlu0 %5216  ;;  %v2940_v35 = vld [vmem:[#allocation3 + $0x358] sm:$0xff] }
 0x358   : > { %5891 = vperm.xlu1 %7973, %v4291_v24   ;;  %v4036_v51 = vsub.f32 %v3780_v32, %v16306_v28  ;;  %v4203_v45 = vmul.f32 0.125, %v4075_v5  ;;  %vm16349_vm4 = vcmask 777216   ;;  %vm16350_vm12 = vcmask 1039360   ;;  %v8237_v5 = vld [vmem:[%s8291_s15 + $0x4] sm:$0x3] }
 0x359   : > { %v3300_v16 = vsel %vm16304_vm0, %v3297_v8, %v3299_v2  ;;  %v14171_v55 = vsel %vm16347_vm1, %v3299_v2, %v3301_v63  ;;  %v14174_v59 = vsel %vm16348_vm6, %v3301_v63, %v3303_v26  ;;  %6651 = vperm.xlu0 %7972, %v4330_v9   ;;  %v756_v28 = vsel %vm16349_vm4, %v14123_v54, %v751_v17  ;;  %vm16351_vm11 = vmmov %vm16350_vm12  ;;  %v2939_v17 = vld [vmem:[#allocation3 + $0x350] sm:$0xff] }
 0x35a   : > { %v3781_v33 = vadd.f32 %v3589_v43, %v3300_v16  ;;  %v3782_v37 = vadd.f32 %v3590_v49, %v14171_v55  ;;  %v3783_v53 = vadd.f32 %v3591_v36, %v14174_v59  ;;  %v4164_v11 = vmul.f32 0.125, %v4036_v51  ;;  %vm16355_vm5 = vmmov %vm16349_vm4 }
 0x35b   : > { %v730_v43 = vsel %vm16350_vm12, %v720_v41, %v725_v42  ;;  %v4331_v49 = vadd.f32 %v4203_v45, %v3947_v48  ;;  %v731_v14 = vsel %vm16351_vm11, %v722_v30, %v726_v56  ;;  %v750_v54 = vrot.slane %v745_v13, 1  ;;  %v16354_v48 = vld [vmem:[#allocation26_spill] sm:$0xff]  ;;  %v2980_v42 = vld [vmem:[#allocation3 + $0x498] sm:$0x3]  ;;  %v14200_v25 = vpop.permute.xlu0 %6511  ;;  %vm16374_vm6 = vmmov %vm16357_vm2 }
 0x35c   : > { %v4037_v61 = vsub.f32 %v3781_v33, %v16310_v20  ;;  %v4038_v40 = vsub.f32 %v3782_v37, %v16321_v29  ;;  %v4039_v26 = vsub.f32 %v3783_v53, %v16324_v0  ;;  %v4292_v31 = vadd.f32 %v4164_v11, %v14121_v27  ;;  %v16352_v29 = vld [vmem:[#allocation95_spill] sm:$0xff]  ;;  %vm16376_vm12 = vmmov %vm16357_vm2 }
 0x35d   : > { %v3784_v20 = vadd.f32 %v3592_v44, %v14163_v39  ;;  %v3948_v36 = vmul.f32 100.0, %v16352_v29  ;;  %6656 = vperm.xlu0 %7972, %v4331_v49   ;;  %v739_v57 = vadd.f32 %v731_v14, %v16353_v22  ;;  %v4076_v38 = vsub.f32 %v3820_v47, %v16352_v29  ;;  %v16358_v33 = vld [vmem:[#allocation99_spill] sm:$0xff]  ;;  %v16364_v14 = vld [vmem:[#allocation50_spill] sm:$0xff] }
 0x35e   : > { %v4165_v46 = vmul.f32 0.125, %v4037_v61  ;;  %v4166_v8 = vmul.f32 0.125, %v4038_v40  ;;  %5896 = vperm.xlu1 %7973, %v4292_v31   ;;  %v738_v58 = vadd.f32 %v730_v43, %v16354_v48  ;;  %v3911_v27 = vmul.f32 100.0, %v16324_v0  ;;  %v8236_v0 = vld [vmem:[%s8291_s15 + $0x6] sm:$0x3]  ;;  %v16361_v40 = vld [vmem:[#allocation28_spill] sm:$0xff] }
 0x35f   : > { %v4167_v34 = vmul.f32 0.125, %v4039_v26  ;;  %v764_v10 = vadd.f32 %v756_v28, %v739_v57  ;;  %v4204_v4 = vmul.f32 0.125, %v4076_v38  ;;  %v755_v18 = vsel %vm16355_vm5, %v745_v13, %v750_v54  ;;  %v14221_v44 = vpop.permute.xlu0 %6516  ;;  %v16360_v47 = vld [vmem:[#allocation83_spill] sm:$0xff]  ;;  %v16362_v28 = vld [vmem:[#allocation86_spill] sm:$0xff]  ;;  %v16365_v31 = vld [vmem:[#allocation5_spill] sm:$0xff] }
 0x360   : > { %v4293_v41 = vadd.f32 %v4165_v46, %v14136_v62  ;;  %vm5292_vm7 = vcmp.eq.f32.partialorder %v5217_v19, %v12093_v12  ;;  %v763_v23 = vadd.f32 %v755_v18, %v738_v58  ;;  %vm5293_vm9 = vcmp.eq.f32.partialorder %v5217_v19, %v12096_v60  ;;  %v16356_v62 = vld [vmem:[#allocation82_spill] sm:$0xff]  ;;  %v16369_v58 = vld [vmem:[#allocation51_spill] sm:$0xff]  ;;  %v16370_v18 = vld [vmem:[#allocation92_spill] sm:$0xff] }
 0x361   : > { %v3307_v2 = vrot.slane %v2939_v17, 1  ;;  %v3593_v63 = vadd.f32 %v3300_v16, %v16356_v62  ;;  %v4294_v24 = vadd.f32 %v4166_v8, %v14143_v15  ;;  %v772_v32 = vsub.f32 %v764_v10, %v8236_v0  ;;  %7561 = vmatprep.mubr.msk.f32.mxu1 %vm5293_vm9, %v16017_v6  ;;  %v16366_v46 = vld [vmem:[#allocation6_spill] sm:$0xff] }
 0x362   : > { %v4040_v9 = vsub.f32 %v3784_v20, %v16325_v7  ;;  %v4332_v30 = vadd.f32 %v4204_v4, %v3948_v36  ;;  %5901 = vperm.xlu1 %7973, %v4293_v41   ;;  %v771_v51 = vsub.f32 %v763_v23, %v8237_v5  ;;  %v3629_v16 = vadd.f32 %v14105_v21, %v16358_v33  ;;  %v16367_v20 = vld [vmem:[#allocation55_spill] sm:$0xff]  ;;  %v2943_v10 = vld [vmem:[#allocation3 + $0x370] sm:$0x3]  ;;  %v4492_v23 = vpop.permute.xlu1 %4491 }
 0x363   : > { %v14212_v60 = vsel %vm16357_vm2, %v3305_v50, %v3307_v2  ;;  %v3676_v15 = vrot.slane %v2980_v42, 1  ;;  %7562 = vmatmul.mubr.msk.f32.gmra.mrb[62].mxu1 %vm5292_vm7, %v16017_v6  ;;  %v767_v37 = vmul.f32 100.0, %v8237_v5  ;;  %v776_v53 = vmul.f32 0.125, %v772_v32  ;;  %v14241_v8 = vpop.permute.xlu0 %6521  ;;  %v16372_v32 = vld [vmem:[#allocation9_spill] sm:$0xff]  ;;  %v16373_v5 = vld [vmem:[#allocation87_spill] sm:$0xff] }
 0x364   : > { %v3912_v45 = vmul.f32 100.0, %v16325_v7  ;;  %6661 = vperm.xlu0 %7972, %v4332_v30   ;;  %v3785_v56 = vadd.f32 %v3593_v63, %v14212_v60  ;;  %v775_v50 = vmul.f32 0.125, %v771_v51  ;;  %v3594_v11 = vadd.f32 %v14171_v55, %v16360_v47  ;;  %v4763_v47 = vpop.f32.mrb[0].mxu0 }
 0x365   : > { %v3677_v21 = vsel %vm16359_vm13, %v3674_v1, %v3676_v15  ;;  %v3662_v12 = vrot.slane %v2940_v35, 1  ;;  %v4295_v61 = vadd.f32 %v4167_v34, %v3911_v27  ;;  %v780_v26 = vadd.f32 %v776_v53, %v16361_v40 }
 0x366   : > { %v4168_v13 = vmul.f32 0.125, %v4040_v9  ;;  %v3821_v7 = vadd.f32 %v3677_v21, %v3629_v16  ;;  %5906 = vperm.xlu1 %7973, %v4294_v24   ;;  %v4041_v43 = vsub.f32 %v3785_v56, %v16362_v28  ;;  %v3595_v19 = vadd.f32 %v14174_v59, %v16364_v14  ;;  %v2942_v59 = vld [vmem:[#allocation3 + $0x368] sm:$0xff]  ;;  %v16375_v16 = vld [vmem:[#allocation58_spill] sm:$0xff]  ;;  %v5787_v53 = vpop.permute.xlu1 %5786 }
 0x367   : > { %v3663_v49 = vsel %vm16363_vm8, %v3307_v2, %v3662_v12  ;;  %v3664_v3 = vrot.slane %v2941_v52, 1  ;;  %v14234_v1 = vrot.slane %v780_v26, %v16365_v31  ;;  %v14237_v55 = vrot.slane %v780_v26, %v16366_v46  ;;  %v14253_v2 = vpop.permute.xlu0 %6526  ;;  %v16377_v52 = vld [vmem:[#allocation88_spill] sm:$0xff] }
 0x368   : > { %v3949_v29 = vmul.f32 100.0, %v16367_v20  ;;  %v4077_v36 = vsub.f32 %v3821_v7, %v16367_v20  ;;  %v779_v22 = vadd.f32 %v775_v50, %v767_v37  ;;  %v3786_v57 = vadd.f32 %v3663_v49, %v3594_v11  ;;  %v16378_v7 = vld [vmem:[#allocation89_spill] sm:$0xff]  ;;  %v5488_v20 = vpop.f32.mrb[0].mxu1 }
 0x369   : > { %v3665_v38 = vsel %vm16368_vm14, %v3662_v12, %v3664_v3  ;;  %v4296_v54 = vadd.f32 %v4168_v13, %v3912_v45  ;;  %vm6680_vm10 = vcmp.eq.f32.partialorder %v14200_v25, %v14234_v1  ;;  %vm6681_vm3 = vcmp.eq.f32.partialorder %v14200_v25, %v14237_v55 }
 0x36a   : > { %v4205_v17 = vmul.f32 0.125, %v4077_v36  ;;  %5911 = vperm.xlu1 %7973, %v4295_v61   ;;  %v3913_v41 = vmul.f32 100.0, %v16362_v28  ;;  %v4169_v48 = vmul.f32 0.125, %v4041_v43  ;;  %v4042_v27 = vsub.f32 %v3786_v57, %v16369_v58  ;;  %7757 = vmatprep.mubr.msk.f32.mxu1 %vm6681_vm3, %v16017_v6  ;;  %v5792_v11 = vpop.permute.xlu1 %5791  ;;  %v4765_v61 = vpop.f32.mrb[1].mxu0 }
 0x36b   : > { %v3787_v34 = vadd.f32 %v3665_v38, %v3595_v19  ;;  %v3596_v42 = vadd.f32 %v14163_v39, %v16370_v18  ;;  %v14256_v62 = vrot.slane %v779_v22, %v16365_v31  ;;  %v3914_v63 = vmul.f32 100.0, %v16369_v58  ;;  %7758 = vmatmul.mubr.msk.f32.vlgmr.msra.gmra.mrb[64].mxu1 %vm6680_vm10, %v16017_v6  ;;  %v16371_v39 = vld [vmem:[#allocation13_spill] sm:$0xff]  ;;  %v6532_v45 = vpop.permute.xlu0 %6531  ;;  %v4768_v43 = vpop.f32.mrb[2].mxu0 }
 0x36c   : > { %v4333_v4 = vadd.f32 %v4205_v17, %v3949_v29  ;;  %vm6683_vm15 = vcmp.eq.f32.partialorder %v14221_v44, %v14237_v55  ;;  %v3666_v24 = vrot.slane %v2942_v59, 1  ;;  %v14266_v0 = vrot.slane %v779_v22, %v16366_v46  ;;  %v4770_v19 = vpop.f32.mrb[3].mxu0  ;;  %v5490_v29 = vpop.f32.mrb[1].mxu1 }
 0x36d   : > { %7759 = vmatprep.mubr.msk.f32.mxu1 %vm6683_vm15, %v16017_v6  ;;  %vm4567_vm0 = vcmp.eq.f32.partialorder %v4492_v23, %v16371_v39  ;;  %vm4568_vm1 = vcmp.eq.f32.partialorder %v4492_v23, %v16372_v32  ;;  %v3668_v9 = vrot.slane %v2943_v10, 1  ;;  %v4297_v30 = vadd.f32 %v4169_v48, %v3913_v41  ;;  %v4773_v38 = vpop.f32.mrb[4].mxu0 }
 0x36e   : > { %6666 = vperm.xlu0 %7972, %v4333_v4   ;;  %5916 = vperm.xlu1 %7973, %v4296_v54   ;;  %v4170_v35 = vmul.f32 0.125, %v4042_v27  ;;  %v4043_v51 = vsub.f32 %v3787_v34, %v16373_v5  ;;  %v3667_v33 = vsel %vm16374_vm6, %v3664_v3, %v3666_v24  ;;  %vm6682_vm4 = vcmp.eq.f32.partialorder %v14221_v44, %v14234_v1  ;;  %v5797_v49 = vpop.permute.xlu1 %5796  ;;  %v5493_v54 = vpop.f32.mrb[2].mxu1 }
 0x36f   : > { %7433 = vmatprep.mubr.msk.f32.mxu0 %vm4568_vm1, %v16017_v6  ;;  %v3788_v25 = vadd.f32 %v3667_v33, %v3596_v42  ;;  %v3597_v15 = vadd.f32 %v14212_v60, %v16375_v16  ;;  %v3669_v37 = vsel %vm16376_vm12, %v3666_v24, %v3668_v9  ;;  %vm6685_vm11 = vcmp.eq.f32.partialorder %v14241_v8, %v14237_v55  ;;  %v6537_v12 = vpop.permute.xlu0 %6536  ;;  %v5495_v59 = vpop.f32.mrb[3].mxu1 }
 0x370   : > { %7434 = vmatmul.mubr.msk.f32.gmra.mrb[62].mxu0 %vm4567_vm0, %v16017_v6  ;;  %7760 = vmatmul.mubr.msk.f32.gmra.mrb[66].mxu1 %vm6682_vm4, %v16017_v6  ;;  %vm5955_vm5 = vcmp.eq.f32.partialorder %v5787_v53, %v14256_v62  ;;  %vm5956_vm7 = vcmp.eq.f32.partialorder %v5787_v53, %v14266_v0  ;;  %v3915_v56 = vmul.f32 100.0, %v16373_v5  ;;  %v4298_v60 = vadd.f32 %v4170_v35, %v3914_v63  ;;  %v4775_v58 = vpop.f32.mrb[5].mxu0  ;;  %v5498_v4 = vpop.f32.mrb[4].mxu1 }
 0x371   : > { %7761 = vmatprep.mubr.msk.f32.mxu1 %vm6685_vm11, %v16017_v6  ;;  %7628 = vmatprep.mubr.msk.f32.mxu0 %vm5956_vm7, %v16017_v6  ;;  %v4171_v44 = vmul.f32 0.125, %v4043_v51  ;;  %v4044_v50 = vsub.f32 %v3788_v25, %v16377_v52  ;;  %v3789_v21 = vadd.f32 %v3669_v37, %v3597_v15  ;;  %vm6684_vm9 = vcmp.eq.f32.partialorder %v14241_v8, %v14234_v1  ;;  %v4778_v10 = vpop.f32.mrb[6].mxu0  ;;  %v5500_v42 = vpop.f32.mrb[5].mxu1 }
 0x372   : > { %5921 = vperm.xlu1 %7973, %v4297_v30   ;;  %7974 = vlog2.f32 %v4763_v47  ;;  %vm6687_vm2 = vcmp.eq.f32.partialorder %v14253_v2, %v14237_v55  ;;  %vm5957_vm13 = vcmp.eq.f32.partialorder %v5792_v11, %v14256_v62  ;;  %vm5958_vm8 = vcmp.eq.f32.partialorder %v5792_v11, %v14266_v0  ;;  %v5802_v36 = vpop.permute.xlu1 %5801  ;;  %v4780_v24 = vpop.f32.mrb[7].mxu0 }
 0x373   : > { %v4299_v40 = vadd.f32 %v4171_v44, %v3915_v56  ;;  %v3916_v26 = vmul.f32 100.0, %v16377_v52  ;;  %v4172_v13 = vmul.f32 0.125, %v4044_v50  ;;  %v4045_v28 = vsub.f32 %v3789_v21, %v16378_v7  ;;  %v6542_v14 = vpop.permute.xlu0 %6541  ;;  %v4783_v9 = vpop.f32.mrb[8].mxu0 }
 0x374   : > { %7629 = vmatmul.mubr.msk.f32.vlgmr.msra.gmra.mrb[64].mxu0 %vm5955_vm5, %v16017_v6  ;;  %7762 = vmatmul.mubr.msk.f32.gmra.mrb[68].mxu1 %vm6684_vm9, %v16017_v6  ;;  %vm6686_vm14 = vcmp.eq.f32.partialorder %v14253_v2, %v14234_v1  ;;  %7976 = vlog2.f32 %v4768_v43  ;;  %vm6689_vm10 = vcmp.eq.f32.partialorder %v6532_v45, %v14237_v55  ;;  %vm5959_vm3 = vcmp.eq.f32.partialorder %v5797_v49, %v14256_v62  ;;  %v5503_v30 = vpop.f32.mrb[6].mxu1  ;;  %v4785_v33 = vpop.f32.mrb[9].mxu0 }
 0x375   : > { %7763 = vmatprep.mubr.msk.f32.mxu1 %vm6687_vm2, %v16017_v6  ;;  %7630 = vmatprep.mubr.msk.f32.mxu0 %vm5958_vm8, %v16017_v6  ;;  %vm5960_vm15 = vcmp.eq.f32.partialorder %v5797_v49, %v14266_v0  ;;  %v4300_v3 = vadd.f32 %v4172_v13, %v3916_v26  ;;  %v3917_v31 = vmul.f32 100.0, %v16378_v7  ;;  %v4173_v46 = vmul.f32 0.125, %v4045_v28  ;;  %v5505_v35 = vpop.f32.mrb[7].mxu1  ;;  %v4788_v53 = vpop.f32.mrb[10].mxu0 }
 0x376   : > { %5926 = vperm.xlu1 %7973, %v4298_v60   ;;  %vm6688_vm0 = vcmp.eq.f32.partialorder %v6532_v45, %v14234_v1  ;;  %vm6691_vm1 = vcmp.eq.f32.partialorder %v6537_v12, %v14237_v55  ;;  %7978 = vlog2.f32 %v5488_v20  ;;  %vm5961_vm6 = vcmp.eq.f32.partialorder %v5802_v36, %v14256_v62  ;;  %v5807_v41 = vpop.permute.xlu1 %5806  ;;  %v5508_v45 = vpop.f32.mrb[8].mxu1 }
 0x377   : > { %vm5962_vm4 = vcmp.eq.f32.partialorder %v5802_v36, %v14266_v0  ;;  %v6547_v8 = vpop.permute.xlu0 %6546  ;;  %v4301_v57 = vadd.f32 %v4173_v46, %v3917_v31  ;;  %vm6690_vm12 = vcmp.eq.f32.partialorder %v6537_v12, %v14234_v1  ;;  %7980 = vlog2.f32 %v4773_v38  ;;  %v5510_v60 = vpop.f32.mrb[9].mxu1 }
 0x378   : > { %7631 = vmatmul.mubr.msk.f32.gmra.mrb[66].mxu0 %vm5957_vm13, %v16017_v6  ;;  %7764 = vmatmul.mubr.msk.f32.gmra.mrb[70].mxu1 %vm6686_vm14, %v16017_v6  ;;  %vm6693_vm11 = vcmp.eq.f32.partialorder %v6542_v14, %v14237_v55  ;;  %7982 = vlog2.f32 %v5493_v54  ;;  %vm5963_vm5 = vcmp.eq.f32.partialorder %v5807_v41, %v14256_v62  ;;  %vm5964_vm7 = vcmp.eq.f32.partialorder %v5807_v41, %v14266_v0  ;;  %v4790_v21 = vpop.f32.mrb[11].mxu0  ;;  %v5513_v28 = vpop.f32.mrb[10].mxu1 }
 0x379   : > { %7765 = vmatprep.mubr.msk.f32.mxu1 %vm6689_vm10, %v16017_v6  ;;  %7632 = vmatprep.mubr.msk.f32.mxu0 %vm5960_vm15, %v16017_v6  ;;  %vm16379_vm9 = vcmask 7168   ;;  %vm6692_vm2 = vcmp.eq.f32.partialorder %v6542_v14, %v14234_v1  ;;  %vm6695_vm13 = vcmp.eq.f32.partialorder %v6547_v8, %v14237_v55  ;;  %7984 = vlog2.f32 %v4778_v10  ;;  %v4793_v7 = vpop.f32.mrb[12].mxu0  ;;  %v5515_v49 = vpop.f32.mrb[11].mxu1 }
 0x37a   : > { %5931 = vperm.xlu1 %7973, %v4299_v40   ;;  %v5812_v23 = vpop.permute.xlu1 %5811  ;;  %vm16380_vm8 = vmmov %vm16379_vm9  ;;  %7986 = vlog2.f32 %v5498_v4  ;;  %v4795_v31 = vpop.f32.mrb[13].mxu0 }
 0x37b   : > { %v6552_v48 = vpop.permute.xlu0 %6551  ;;  %vm5965_vm14 = vcmp.eq.f32.partialorder %v5812_v23, %v14256_v62  ;;  %vm5966_vm10 = vcmp.eq.f32.partialorder %v5812_v23, %v14266_v0  ;;  %7988 = vlog2.f32 %v4783_v9  ;;  %v5518_v38 = vpop.f32.mrb[12].mxu1 }
 0x37c   : > { %7633 = vmatmul.mubr.msk.f32.gmra.mrb[68].mxu0 %vm5959_vm3, %v16017_v6  ;;  %7766 = vmatmul.mubr.msk.f32.gmra.mrb[72].mxu1 %vm6688_vm0, %v16017_v6  ;;  %v7975_v22 = vpop.eup %7974  ;;  %vm6694_vm3 = vcmp.eq.f32.partialorder %v6547_v8, %v14234_v1  ;;  %vm6697_vm15 = vcmp.eq.f32.partialorder %v6552_v48, %v14237_v55  ;;  %7990 = vlog2.f32 %v5503_v30 }
 0x37d   : > { %7767 = vmatprep.mubr.msk.f32.mxu1 %vm6691_vm1, %v16017_v6  ;;  %7634 = vmatprep.mubr.msk.f32.mxu0 %vm5962_vm4, %v16017_v6  ;;  %v4923_v17 = vmul.f32 0.6931472, %v7975_v22  ;;  %7992 = vlog2.f32 %v4788_v53 }
 0x37e   : > { %5936 = vperm.xlu1 %7973, %v4300_v3   ;;  %v7977_v27 = vpop.eup %7976  ;;  %v5817_v5 = vpop.permute.xlu1 %5816  ;;  %7994 = vlog2.f32 %v5508_v45 }
 0x37f   : > { %v4925_v34 = vmul.f32 0.6931472, %v7977_v27  ;;  %v4986_v18 = vsel %vm16379_vm9, %v4923_v17, 0.0  ;;  %v6557_v63 = vpop.permute.xlu0 %6556  ;;  %vm5967_vm0 = vcmp.eq.f32.partialorder %v5817_v5, %v14256_v62  ;;  %vm5968_vm1 = vcmp.eq.f32.partialorder %v5817_v5, %v14266_v0  ;;  %v5520_v17 = vpop.f32.mrb[13].mxu1 }
 0x380   : > { %7635 = vmatmul.mubr.msk.f32.gmra.mrb[70].mxu0 %vm5961_vm6, %v16017_v6  ;;  %7768 = vmatmul.mubr.msk.f32.gmra.mrb[74].mxu1 %vm6690_vm12, %v16017_v6  ;;  %v7979_v32 = vpop.eup %7978  ;;  %vm6696_vm6 = vcmp.eq.f32.partialorder %v6552_v48, %v14234_v1  ;;  %vm6699_vm4 = vcmp.eq.f32.partialorder %v6557_v63, %v14237_v55  ;;  %vm16381_vm12 = vmmov %vm16380_vm8  ;;  %7996 = vlog2.f32 %v4793_v7 }
 0x381   : > { %7769 = vmatprep.mubr.msk.f32.mxu1 %vm6693_vm11, %v16017_v6  ;;  %7636 = vmatprep.mubr.msk.f32.mxu0 %vm5964_vm7, %v16017_v6  ;;  %v4987_v2 = vsel %vm16380_vm8, %v4925_v34, 0.0  ;;  %v7981_v25 = vpop.eup %7980  ;;  %v5648_v16 = vmul.f32 0.6931472, %v7979_v32  ;;  %vm16382_vm7 = vmmov %vm16380_vm8  ;;  %7998 = vlog2.f32 %v5513_v28 }
 0x382   : > { %5941 = vperm.xlu1 %7973, %v4301_v57   ;;  %v4988_v39 = vadd.f32 %v4987_v2, %v4986_v18  ;;  %v7983_v15 = vpop.eup %7982  ;;  %v4927_v37 = vmul.f32 0.6931472, %v7981_v25  ;;  %vm16383_vm9 = vmmov %vm16382_vm7  ;;  %v4798_v57 = vpop.f32.mrb[14].mxu0 }
 0x383   : > { %v14343_v51 = vpop.permute.xlu0 %6561  ;;  %v5650_v56 = vmul.f32 0.6931472, %v7983_v15  ;;  %v5822_v44 = vpop.permute.xlu1 %5821  ;;  %v5711_v11 = vsel %vm16382_vm7, %v5648_v16, 0.0  ;;  %vm16384_vm8 = vmmov %vm16382_vm7  ;;  %8000 = vlog2.f32 %v4798_v57 }
 0x384   : > { %7637 = vmatmul.mubr.msk.f32.gmra.mrb[72].mxu0 %vm5963_vm5, %v16017_v6  ;;  %7770 = vmatmul.mubr.msk.f32.gmra.mrb[76].mxu1 %vm6692_vm2, %v16017_v6  ;;  %v4989_v52 = vsel %vm16381_vm12, %v4927_v37, 0.0  ;;  %vm5969_vm11 = vcmp.eq.f32.partialorder %v5822_v44, %v14256_v62  ;;  %vm5970_vm5 = vcmp.eq.f32.partialorder %v5822_v44, %v14266_v0  ;;  %v7985_v47 = vpop.eup %7984  ;;  %vm6698_vm2 = vcmp.eq.f32.partialorder %v6557_v63, %v14234_v1  ;;  %v4800_v58 = vpop.f32.mrb[15].mxu0 }
 0x385   : > { %7771 = vmatprep.mubr.msk.f32.mxu1 %vm6695_vm13, %v16017_v6  ;;  %7638 = vmatprep.mubr.msk.f32.mxu0 %vm5966_vm10, %v16017_v6  ;;  %v4990_v12 = vadd.f32 %v4989_v52, %v4988_v39  ;;  %v5712_v61 = vsel %vm16383_vm9, %v5650_v56, 0.0  ;;  %v7987_v40 = vpop.eup %7986  ;;  %v4929_v13 = vmul.f32 0.6931472, %v7985_v47  ;;  %vm6701_vm13 = vcmp.eq.f32.partialorder %v14343_v51, %v14237_v55  ;;  %v4803_v23 = vpop.f32.mrb[16].mxu0 }
 0x386   : > { %v5713_v26 = vadd.f32 %v5712_v61, %v5711_v11  ;;  %v5652_v43 = vmul.f32 0.6931472, %v7987_v40  ;;  %v7989_v46 = vpop.eup %7988  ;;  %8002 = vlog2.f32 %v5518_v38  ;;  %v5523_v2 = vpop.f32.mrb[14].mxu1 }
 0x387   : > { %v14356_v50 = vpop.permute.xlu0 %6566  ;;  %v5827_v14 = vpop.permute.xlu1 %5826  ;;  %v4991_v19 = vsel %vm16384_vm8, %v4929_v13, 0.0  ;;  %v4931_v22 = vmul.f32 0.6931472, %v7989_v46  ;;  %8004 = vlog2.f32 %v4803_v23 }
 0x388   : > { %7639 = vmatmul.mubr.msk.f32.gmra.mrb[74].mxu0 %vm5965_vm14, %v16017_v6  ;;  %7772 = vmatmul.mubr.msk.f32.gmra.mrb[78].mxu1 %vm6694_vm3, %v16017_v6  ;;  %vm5971_vm14 = vcmp.eq.f32.partialorder %v5827_v14, %v14256_v62  ;;  %vm5972_vm10 = vcmp.eq.f32.partialorder %v5827_v14, %v14266_v0  ;;  %v4992_v20 = vadd.f32 %v4991_v19, %v4990_v12  ;;  %vm16385_vm3 = vmmov %vm16382_vm7  ;;  %v7991_v36 = vpop.eup %7990  ;;  %v5525_v24 = vpop.f32.mrb[15].mxu1  ;;  %8006 = vlog2.f32 %v5523_v2 }
 0x389   : > { %7773 = vmatprep.mubr.msk.f32.mxu1 %vm6697_vm15, %v16017_v6  ;;  %7640 = vmatprep.mubr.msk.f32.mxu0 %vm5968_vm1, %v16017_v6  ;;  %v5714_v29 = vsel %vm16385_vm3, %v5652_v43, 0.0  ;;  %v5654_v54 = vmul.f32 0.6931472, %v7991_v36  ;;  %vm6700_vm15 = vcmp.eq.f32.partialorder %v14343_v51, %v14234_v1  ;;  %vm16386_vm1 = vmmov %vm16385_vm3  ;;  %v7993_v27 = vpop.eup %7992  ;;  %v4805_v30 = vpop.f32.mrb[17].mxu0 }
 0x38a   : > { %v5715_v8 = vadd.f32 %v5714_v29, %v5713_v26  ;;  %v4993_v41 = vsel %vm16386_vm1, %v4931_v22, 0.0  ;;  %vm16387_vm12 = vmmov %vm16386_vm1  ;;  %v7995_v4 = vpop.eup %7994  ;;  %v4933_v42 = vmul.f32 0.6931472, %v7993_v27  ;;  %v4808_v15 = vpop.f32.mrb[18].mxu0 }
 0x38b   : > { %v14374_v3 = vpop.permute.xlu0 %6571  ;;  %v5832_v59 = vpop.permute.xlu1 %5831  ;;  %v4994_v34 = vadd.f32 %v4993_v41, %v4992_v20  ;;  %v5716_v10 = vsel %vm16387_vm12, %v5654_v54, 0.0  ;;  %v5656_v63 = vmul.f32 0.6931472, %v7995_v4  ;;  %vm16388_vm7 = vmmov %vm16386_vm1  ;;  %8008 = vlog2.f32 %v4808_v15 }
 0x38c   : > { %7641 = vmatmul.mubr.msk.f32.gmra.mrb[76].mxu0 %vm5967_vm0, %v16017_v6  ;;  %7774 = vmatmul.mubr.msk.f32.gmra.mrb[80].mxu1 %vm6696_vm6, %v16017_v6  ;;  %vm6703_vm0 = vcmp.eq.f32.partialorder %v14356_v50, %v14237_v55  ;;  %vm5973_vm6 = vcmp.eq.f32.partialorder %v5832_v59, %v14256_v62  ;;  %v5717_v18 = vadd.f32 %v5716_v10, %v5715_v8  ;;  %v4995_v32 = vsel %vm16388_vm7, %v4933_v42, 0.0  ;;  %v7997_v35 = vpop.eup %7996  ;;  %v5528_v37 = vpop.f32.mrb[16].mxu1 }
 0x38d   : > { %7775 = vmatprep.mubr.msk.f32.mxu1 %vm6699_vm4, %v16017_v6  ;;  %7642 = vmatprep.mubr.msk.f32.mxu0 %vm5970_vm5, %v16017_v6  ;;  %vm5974_vm4 = vcmp.eq.f32.partialorder %v5832_v59, %v14266_v0  ;;  %vm6705_vm5 = vcmp.eq.f32.partialorder %v14374_v3, %v14237_v55  ;;  %v4996_v5 = vadd.f32 %v4995_v32, %v4994_v34  ;;  %v7999_v33 = vpop.eup %7998  ;;  %v4935_v16 = vmul.f32 0.6931472, %v7997_v35  ;;  %v5530_v45 = vpop.f32.mrb[17].mxu1 }
 0x38e   : > { %v5658_v53 = vmul.f32 0.6931472, %v7999_v33  ;;  %vm6704_vm8 = vcmp.eq.f32.partialorder %v14374_v3, %v14234_v1  ;;  %8010 = vlog2.f32 %v5528_v37  ;;  %v4810_v52 = vpop.f32.mrb[19].mxu0  ;;  %v5533_v26 = vpop.f32.mrb[18].mxu1 }
 0x38f   : > { %v14390_v48 = vpop.permute.xlu0 %6576  ;;  %v5837_v39 = vpop.permute.xlu1 %5836 }
 0x390   : > { %7643 = vmatmul.mubr.msk.f32.gmra.mrb[78].mxu0 %vm5969_vm11, %v16017_v6  ;;  %7776 = vmatmul.mubr.msk.f32.gmra.mrb[82].mxu1 %vm6698_vm2, %v16017_v6  ;;  %vm6702_vm11 = vcmp.eq.f32.partialorder %v14356_v50, %v14234_v1  ;;  %vm5975_vm9 = vcmp.eq.f32.partialorder %v5837_v39, %v14256_v62  ;;  %vm5976_vm2 = vcmp.eq.f32.partialorder %v5837_v39, %v14266_v0  ;;  %v8001_v50 = vpop.eup %8000  ;;  %v4813_v40 = vpop.f32.mrb[20].mxu0 }
 0x391   : > { %7777 = vmatprep.mubr.msk.f32.mxu1 %vm6701_vm13, %v16017_v6  ;;  %7644 = vmatprep.mubr.msk.f32.mxu0 %vm5972_vm10, %v16017_v6  ;;  %vm16389_vm13 = vmmov %vm16386_vm1  ;;  %v8003_v11 = vpop.eup %8002  ;;  %v4937_v61 = vmul.f32 0.6931472, %v8001_v50  ;;  %8012 = vlog2.f32 %v4813_v40  ;;  %v5535_v7 = vpop.f32.mrb[19].mxu1 }
 0x392   : > { %v5718_v51 = vsel %vm16389_vm13, %v5656_v63, 0.0  ;;  %vm16390_vm10 = vmmov %vm16386_vm1  ;;  %v5660_v13 = vmul.f32 0.6931472, %v8003_v11  ;;  %8014 = vlog2.f32 %v5533_v26  ;;  %v4815_v14 = vpop.f32.mrb[21].mxu0  ;;  %v8005_v19 = vpop.eup %8004 }
 0x393   : > { %v14406_v9 = vpop.permute.xlu0 %6581  ;;  %v5719_v25 = vadd.f32 %v5718_v51, %v5717_v18  ;;  %v5842_v56 = vpop.permute.xlu1 %5841  ;;  %v4997_v60 = vsel %vm16390_vm10, %v4935_v16, 0.0  ;;  %v4939_v29 = vmul.f32 0.6931472, %v8005_v19 }
 0x394   : > { %7645 = vmatmul.mubr.msk.f32.gmra.mrb[80].mxu0 %vm5971_vm14, %v16017_v6  ;;  %7778 = vmatmul.mubr.msk.f32.gmra.mrb[84].mxu1 %vm6700_vm15, %v16017_v6  ;;  %vm6707_vm14 = vcmp.eq.f32.partialorder %v14390_v48, %v14237_v55  ;;  %vm5977_vm3 = vcmp.eq.f32.partialorder %v5842_v56, %v14256_v62  ;;  %vm5978_vm15 = vcmp.eq.f32.partialorder %v5842_v56, %v14266_v0  ;;  %v8007_v46 = vpop.eup %8006  ;;  %v4818_v36 = vpop.f32.mrb[22].mxu0 }
 0x395   : > { %7779 = vmatprep.mubr.msk.f32.mxu1 %vm6703_vm0, %v16017_v6  ;;  %7646 = vmatprep.mubr.msk.f32.mxu0 %vm5974_vm4, %v16017_v6  ;;  %v4998_v21 = vadd.f32 %v4997_v60, %v4996_v5  ;;  %vm16391_vm0 = vmmov %vm16386_vm1  ;;  %vm6706_vm1 = vcmp.eq.f32.partialorder %v14390_v48, %v14234_v1  ;;  %v5538_v8 = vpop.f32.mrb[20].mxu1  ;;  %v5662_v22 = vmul.f32 0.6931472, %v8007_v46  ;;  %vm6708_vm7 = vcmp.eq.f32.partialorder %v14406_v9, %v14234_v1  ;;  %v4820_v59 = vpop.f32.mrb[23].mxu0 }
 0x396   : > { %v5720_v47 = vsel %vm16391_vm0, %v5658_v53, 0.0  ;;  %vm16392_vm4 = vmmov %vm16391_vm0  ;;  %8016 = vlog2.f32 %v4818_v36  ;;  %v5540_v57 = vpop.f32.mrb[21].mxu1  ;;  %v8009_v41 = vpop.eup %8008 }
 0x397   : > { %v14422_v44 = vpop.permute.xlu0 %6586  ;;  %v5721_v12 = vadd.f32 %v5720_v47, %v5719_v25  ;;  %v4999_v43 = vsel %vm16392_vm4, %v4937_v61, 0.0  ;;  %8018 = vlog2.f32 %v5538_v8  ;;  %v4941_v10 = vmul.f32 0.6931472, %v8009_v41  ;;  %v4823_v4 = vpop.f32.mrb[24].mxu0 }
 0x398   : > { %7647 = vmatmul.mubr.msk.f32.gmra.mrb[82].mxu0 %vm5973_vm6, %v16017_v6  ;;  %7780 = vmatmul.mubr.msk.f32.gmra.mrb[86].mxu1 %vm6702_vm11, %v16017_v6  ;;  %vm6709_vm6 = vcmp.eq.f32.partialorder %v14406_v9, %v14237_v55  ;;  %v5000_v3 = vadd.f32 %v4999_v43, %v4998_v21  ;;  %v8011_v27 = vpop.eup %8010  ;;  %v5543_v18 = vpop.f32.mrb[22].mxu1  ;;  %vm6710_vm10 = vcmp.eq.f32.partialorder %v14422_v44, %v14234_v1  ;;  %8020 = vlog2.f32 %v4823_v4 }
 0x399   : > { %7781 = vmatprep.mubr.msk.f32.mxu1 %vm6705_vm5, %v16017_v6  ;;  %7648 = vmatprep.mubr.msk.f32.mxu0 %vm5976_vm2, %v16017_v6  ;;  %vm16393_vm5 = vmmov %vm16391_vm0  ;;  %v5664_v42 = vmul.f32 0.6931472, %v8011_v27  ;;  %v5545_v23 = vpop.f32.mrb[23].mxu1  ;;  %v4825_v2 = vpop.f32.mrb[25].mxu0  ;;  %8022 = vlog2.f32 %v5543_v18 }
 0x39a   : > { %v5847_v28 = vpop.permute.xlu1 %5846  ;;  %v5722_v31 = vsel %vm16393_vm5, %v5660_v13, 0.0  ;;  %vm16394_vm2 = vmmov %vm16391_vm0  ;;  %v5548_v33 = vpop.f32.mrb[24].mxu1 }
 0x39b   : > { %vm5979_vm12 = vcmp.eq.f32.partialorder %v5847_v28, %v14256_v62  ;;  %vm5980_vm11 = vcmp.eq.f32.partialorder %v5847_v28, %v14266_v0  ;;  %v14438_v49 = vpop.permute.xlu0 %6591  ;;  %v5723_v20 = vadd.f32 %v5722_v31, %v5721_v12  ;;  %v5001_v54 = vsel %vm16394_vm2, %v4939_v29, 0.0  ;;  %v8013_v39 = vpop.eup %8012  ;;  %vm16398_vm5 = vmmov %vm16391_vm0 }
 0x39c   : > { %7649 = vmatmul.mubr.msk.f32.gmra.mrb[84].mxu0 %vm5975_vm9, %v16017_v6  ;;  %7782 = vmatmul.mubr.msk.f32.gmra.mrb[88].mxu1 %vm6704_vm8, %v16017_v6  ;;  %vm6711_vm9 = vcmp.eq.f32.partialorder %v14422_v44, %v14237_v55  ;;  %v5002_v48 = vadd.f32 %v5001_v54, %v5000_v3  ;;  %v5726_v9 = vsel %vm16391_vm0, %v5664_v42, 0.0  ;;  %v8015_v30 = vpop.eup %8014  ;;  %v4943_v5 = vmul.f32 0.6931472, %v8013_v39  ;;  %v5550_v16 = vpop.f32.mrb[25].mxu1 }
 0x39d   : > { %7783 = vmatprep.mubr.msk.f32.mxu1 %vm6707_vm14, %v16017_v6  ;;  %7650 = vmatprep.mubr.msk.f32.mxu0 %vm5978_vm15, %v16017_v6  ;;  %vm16395_vm14 = vmmov %vm16391_vm0  ;;  %vm6713_vm15 = vcmp.eq.f32.partialorder %v14438_v49, %v14237_v55  ;;  %v5666_v25 = vmul.f32 0.6931472, %v8015_v30  ;;  %8024 = vlog2.f32 %v5548_v33  ;;  %v5553_v21 = vpop.f32.mrb[26].mxu1 }
 0x39e   : > { %v5724_v58 = vsel %vm16395_vm14, %v5662_v22, 0.0  ;;  %v5555_v11 = vpop.f32.mrb[27].mxu1 }
 0x39f   : > { %v6597_v17 = vpop.permute.xlu0 %6596  ;;  %v5725_v34 = vadd.f32 %v5724_v58, %v5723_v20  ;;  %v5728_v45 = vsel %vm16398_vm5, %v5666_v25, 0.0  ;;  %v4828_v50 = vpop.f32.mrb[26].mxu0 }
 0x3a0   : > { %7651 = vmatmul.mubr.msk.f32.gmra.mrb[86].mxu0 %vm5977_vm3, %v16017_v6  ;;  %7784 = vmatmul.mubr.msk.f32.gmra.mrb[90].mxu1 %vm6706_vm1, %v16017_v6  ;;  %v5852_v38 = vpop.permute.xlu1 %5851  ;;  %vm16396_vm3 = vmmov %vm16391_vm0  ;;  %vm6712_vm1 = vcmp.eq.f32.partialorder %v14438_v49, %v14234_v1  ;;  %v8017_v37 = vpop.eup %8016  ;;  %8026 = vlog2.f32 %v4828_v50 }
 0x3a1   : > { %7785 = vmatprep.mubr.msk.f32.mxu1 %vm6709_vm6, %v16017_v6  ;;  %7652 = vmatprep.mubr.msk.f32.mxu0 %vm5980_vm11, %v16017_v6  ;;  %vm5981_vm13 = vcmp.eq.f32.partialorder %v5852_v38, %v14256_v62  ;;  %vm5982_vm8 = vcmp.eq.f32.partialorder %v5852_v38, %v14266_v0  ;;  %v5003_v63 = vsel %vm16396_vm3, %v4941_v10, 0.0  ;;  %v5727_v35 = vadd.f32 %v5726_v9, %v5725_v34  ;;  %v8019_v60 = vpop.eup %8018  ;;  %v4830_v12 = vpop.f32.mrb[27].mxu0  ;;  %vm16401_vm3 = vmmov %vm16391_vm0 }
 0x3a2   : > { %v5004_v32 = vadd.f32 %v5003_v63, %v5002_v48  ;;  %vm6715_vm11 = vcmp.eq.f32.partialorder %v6597_v17, %v14237_v55  ;;  %v4945_v52 = vmul.f32 0.6931472, %v8017_v37  ;;  %v5668_v47 = vmul.f32 0.6931472, %v8019_v60  ;;  %v8021_v40 = vpop.eup %8020  ;;  %v5558_v19 = vpop.f32.mrb[28].mxu1 }
 0x3a3   : > { %v5729_v44 = vadd.f32 %v5728_v45, %v5727_v35  ;;  %8028 = vlog2.f32 %v5553_v21  ;;  %v8023_v28 = vpop.eup %8022  ;;  %v4947_v49 = vmul.f32 0.6931472, %v8021_v40  ;;  %v4833_v14 = vpop.f32.mrb[28].mxu0 }
 0x3a4   : > { %7653 = vmatmul.mubr.msk.f32.gmra.mrb[88].mxu0 %vm5979_vm12, %v16017_v6  ;;  %7786 = vmatmul.mubr.msk.f32.gmra.mrb[92].mxu1 %vm6708_vm7, %v16017_v6  ;;  %vm16397_vm12 = vmmov %vm16391_vm0  ;;  %vm6714_vm7 = vcmp.eq.f32.partialorder %v6597_v17, %v14234_v1  ;;  %v5670_v3 = vmul.f32 0.6931472, %v8023_v28  ;;  %8030 = vlog2.f32 %v4833_v14  ;;  %v5560_v31 = vpop.f32.mrb[29].mxu1  ;;  %v4835_v46 = vpop.f32.mrb[29].mxu0 }
 0x3a5   : > { %7787 = vmatprep.mubr.msk.f32.mxu1 %vm6711_vm9, %v16017_v6  ;;  %7654 = vmatprep.mubr.msk.f32.mxu0 %vm5982_vm8, %v16017_v6  ;;  %v5005_v15 = vsel %vm16397_vm12, %v4943_v5, 0.0  ;;  %vm16399_vm9 = vmmov %vm16391_vm0  ;;  %v5009_v20 = vsel %vm16401_vm3, %v4947_v49, 0.0  ;;  %8032 = vlog2.f32 %v5558_v19  ;;  %v5563_v17 = vpop.f32.mrb[30].mxu1 }
 0x3a6   : > { %v14466_v24 = vpop.permute.xlu0 %6601  ;;  %v5006_v53 = vadd.f32 %v5005_v15, %v5004_v32  ;;  %v5007_v61 = vsel %vm16399_vm9, %v4945_v52, 0.0  ;;  %v5732_v22 = vsel %vm16391_vm0, %v5670_v3, 0.0  ;;  %v5565_v59 = vpop.f32.mrb[31].mxu1  ;;  %vm16406_vm3 = vmmov %vm16391_vm0 }
 0x3a7   : > { %vm6717_vm2 = vcmp.eq.f32.partialorder %v14466_v24, %v14237_v55  ;;  %v8025_v36 = vpop.eup %8024 }
 0x3a8   : > { %7655 = vmatmul.mubr.msk.f32.gmra.mrb[90].mxu0 %vm5981_vm13, %v16017_v6  ;;  %7788 = vmatmul.mubr.msk.f32.gmra.mrb[94].mxu1 %vm6710_vm10, %v16017_v6  ;;  %v5857_v51 = vpop.permute.xlu1 %5856  ;;  %v5008_v26 = vadd.f32 %v5007_v61, %v5006_v53  ;;  %vm16400_vm13 = vmmov %vm16391_vm0  ;;  %vm6716_vm10 = vcmp.eq.f32.partialorder %v14466_v24, %v14234_v1  ;;  %v5672_v38 = vmul.f32 0.6931472, %v8025_v36  ;;  %v4838_v54 = vpop.f32.mrb[30].mxu0 }
 0x3a9   : > { %7789 = vmatprep.mubr.msk.f32.mxu1 %vm6713_vm15, %v16017_v6  ;;  %vm5983_vm6 = vcmp.eq.f32.partialorder %v5857_v51, %v14256_v62  ;;  %vm5984_vm4 = vcmp.eq.f32.partialorder %v5857_v51, %v14266_v0  ;;  %v5730_v13 = vsel %vm16400_vm13, %v5668_v47, 0.0  ;;  %8034 = vlog2.f32 %v4838_v54  ;;  %v4840_v41 = vpop.f32.mrb[31].mxu0  ;;  %v5568_v2 = vpop.f32.mrb[32].mxu1 }
 0x3aa   : > { %7656 = vmatprep.mubr.msk.f32.mxu0 %vm5984_vm4, %v16017_v6  ;;  %v5731_v43 = vadd.f32 %v5730_v13, %v5729_v44  ;;  %v5010_v8 = vadd.f32 %v5009_v20, %v5008_v26  ;;  %8036 = vlog2.f32 %v5563_v17  ;;  %v8027_v27 = vpop.eup %8026  ;;  %v5570_v39 = vpop.f32.mrb[33].mxu1 }
 0x3ab   : > { %v6607_v56 = vpop.permute.xlu0 %6606  ;;  %v4949_v4 = vmul.f32 0.6931472, %v8027_v27 }
 0x3ac   : > { %7790 = vmatmul.mubr.msk.f32.gmra.mrb[96].mxu1 %vm6712_vm1, %v16017_v6  ;;  %7657 = vmatmul.mubr.msk.f32.gmra.mrb[92].mxu0 %vm5983_vm6, %v16017_v6  ;;  %vm6719_vm15 = vcmp.eq.f32.partialorder %v6607_v56, %v14237_v55  ;;  %v5733_v57 = vadd.f32 %v5732_v22, %v5731_v43  ;;  %vm6718_vm1 = vcmp.eq.f32.partialorder %v6607_v56, %v14234_v1  ;;  %vm16402_vm6 = vmmov %vm16391_vm0  ;;  %v4843_v42 = vpop.f32.mrb[32].mxu0 }
 0x3ad   : > { %7791 = vmatprep.mubr.msk.f32.mxu1 %vm6715_vm11, %v16017_v6  ;;  %v5734_v48 = vsel %vm16402_vm6, %v5672_v38, 0.0  ;;  %v8029_v10 = vpop.eup %8028  ;;  %8038 = vlog2.f32 %v4843_v42  ;;  %v4845_v63 = vpop.f32.mrb[33].mxu0 }
 0x3ae   : > { %v5735_v34 = vadd.f32 %v5734_v48, %v5733_v57  ;;  %v5674_v23 = vmul.f32 0.6931472, %v8029_v10  ;;  %8040 = vlog2.f32 %v5568_v2  ;;  %v8031_v32 = vpop.eup %8030  ;;  %v5573_v16 = vpop.f32.mrb[34].mxu1 }
 0x3af   : > { %v8033_v5 = vpop.eup %8032  ;;  %v4951_v33 = vmul.f32 0.6931472, %v8031_v32  ;;  %v5575_v37 = vpop.f32.mrb[35].mxu1 }
 0x3b0   : > { %7792 = vmatmul.mubr.msk.f32.gmra.mrb[98].mxu1 %vm6714_vm7, %v16017_v6  ;;  %v5862_v7 = vpop.permute.xlu1 %5861  ;;  %vm16403_vm7 = vmmov %vm16391_vm0  ;;  %v5676_v15 = vmul.f32 0.6931472, %v8033_v5 }
 0x3b1   : > { %7793 = vmatprep.mubr.msk.f32.mxu1 %vm6717_vm2, %v16017_v6  ;;  %vm5985_vm8 = vcmp.eq.f32.partialorder %v5862_v7, %v14256_v62  ;;  %vm5986_vm14 = vcmp.eq.f32.partialorder %v5862_v7, %v14266_v0  ;;  %v5011_v24 = vsel %vm16403_vm7, %v4949_v4, 0.0  ;;  %vm16404_vm2 = vmmov %vm16391_vm0  ;;  %v5578_v12 = vpop.f32.mrb[36].mxu1 }
 0x3b2   : > { %7658 = vmatprep.mubr.msk.f32.mxu0 %vm5986_vm14, %v16017_v6  ;;  %v5012_v9 = vadd.f32 %v5011_v24, %v5010_v8  ;;  %v5736_v30 = vsel %vm16404_vm2, %v5674_v23, 0.0  ;;  %v4848_v25 = vpop.f32.mrb[34].mxu0  ;;  %v5738_v52 = vsel %vm16406_vm3, %v5676_v15, 0.0  ;;  %v5580_v40 = vpop.f32.mrb[37].mxu1 }
 0x3b3   : > { %7659 = vmatmul.mubr.msk.f32.gmra.mrb[94].mxu0 %vm5985_vm8, %v16017_v6  ;;  %v5737_v51 = vadd.f32 %v5736_v30, %v5735_v34  ;;  %8042 = vlog2.f32 %v4848_v25  ;;  %v4850_v53 = vpop.f32.mrb[35].mxu0  ;;  %v8035_v60 = vpop.eup %8034 }
 0x3b4   : > { %v6612_v29 = vpop.permute.xlu0 %6611  ;;  %7794 = vmatmul.mubr.msk.f32.gmra.mrb[100].mxu1 %vm6716_vm10, %v16017_v6  ;;  %vm16405_vm10 = vmmov %vm16391_vm0  ;;  %8044 = vlog2.f32 %v5573_v16  ;;  %v8037_v50 = vpop.eup %8036  ;;  %v4953_v47 = vmul.f32 0.6931472, %v8035_v60 }
 0x3b5   : > { %7795 = vmatprep.mubr.msk.f32.mxu1 %vm6719_vm15, %v16017_v6  ;;  %vm6721_vm4 = vcmp.eq.f32.partialorder %v6612_v29, %v14237_v55  ;;  %vm6720_vm5 = vcmp.eq.f32.partialorder %v6612_v29, %v14234_v1  ;;  %v5013_v45 = vsel %vm16405_vm10, %v4951_v33, 0.0  ;;  %v5739_v21 = vadd.f32 %v5738_v52, %v5737_v51 }
 0x3b6   : > { %v5014_v44 = vadd.f32 %v5013_v45, %v5012_v9  ;;  %v5678_v61 = vmul.f32 0.6931472, %v8037_v50 }
 0x3b7   : > { %v5867_v58 = vpop.permute.xlu1 %5866  ;;  %v4853_v11 = vpop.f32.mrb[36].mxu0 }
 0x3b8   : > { %7796 = vmatmul.mubr.msk.f32.gmra.mrb[102].mxu1 %vm6718_vm1, %v16017_v6  ;;  %vm5987_vm12 = vcmp.eq.f32.partialorder %v5867_v58, %v14256_v62  ;;  %vm5988_vm11 = vcmp.eq.f32.partialorder %v5867_v58, %v14266_v0  ;;  %8046 = vlog2.f32 %v4853_v11  ;;  %v4855_v26 = vpop.f32.mrb[37].mxu0  ;;  %vm16407_vm1 = vmmov %vm16404_vm2  ;;  %v8039_v28 = vpop.eup %8038 }
 0x3b9   : > { %7797 = vmatprep.mubr.msk.f32.mxu1 %vm6721_vm4, %v16017_v6  ;;  %7660 = vmatprep.mubr.msk.f32.mxu0 %vm5988_vm11, %v16017_v6  ;;  %v5015_v13 = vsel %vm16407_vm1, %v4953_v47, 0.0  ;;  %8048 = vlog2.f32 %v5578_v12  ;;  %vm16408_vm6 = vmmov %vm16407_vm1  ;;  %v8041_v19 = vpop.eup %8040  ;;  %v4955_v31 = vmul.f32 0.6931472, %v8039_v28  ;;  %v5583_v20 = vpop.f32.mrb[38].mxu1 }
 0x3ba   : > { %v6617_v18 = vpop.permute.xlu0 %6616  ;;  %7661 = vmatmul.mubr.msk.f32.gmra.mrb[96].mxu0 %vm5987_vm12, %v16017_v6  ;;  %v5016_v43 = vadd.f32 %v5015_v13, %v5014_v44  ;;  %v5740_v49 = vsel %vm16408_vm6, %v5678_v61, 0.0  ;;  %v5680_v29 = vmul.f32 0.6931472, %v8041_v19  ;;  %v5585_v36 = vpop.f32.mrb[39].mxu1  ;;  %vm16409_vm7 = vmmov %vm16407_vm1 }
 0x3bb   : > { %vm6723_vm9 = vcmp.eq.f32.partialorder %v6617_v18, %v14237_v55  ;;  %vm6722_vm14 = vcmp.eq.f32.partialorder %v6617_v18, %v14234_v1  ;;  %v5741_v3 = vadd.f32 %v5740_v49, %v5739_v21  ;;  %v4858_v46 = vpop.f32.mrb[38].mxu0  ;;  %v5017_v22 = vsel %vm16409_vm7, %v4955_v31, 0.0  ;;  %v5588_v34 = vpop.f32.mrb[40].mxu1  ;;  %vm16411_vm10 = vmmov %vm16407_vm1 }
 0x3bc   : > { %7798 = vmatmul.mubr.msk.f32.gmra.mrb[104].mxu1 %vm6720_vm5, %v16017_v6  ;;  %8050 = vlog2.f32 %v4858_v46  ;;  %v4860_v8 = vpop.f32.mrb[39].mxu0  ;;  %v5018_v54 = vadd.f32 %v5017_v22, %v5016_v43  ;;  %v5590_v4 = vpop.f32.mrb[41].mxu1  ;;  %vm16412_vm3 = vmmov %vm16407_vm1 }
 0x3bd   : > { %v5872_v35 = vpop.permute.xlu1 %5871  ;;  %7799 = vmatprep.mubr.msk.f32.mxu1 %vm6723_vm9, %v16017_v6  ;;  %8052 = vlog2.f32 %v5583_v20  ;;  %v8043_v38 = vpop.eup %8042  ;;  %vm16410_vm9 = vmmov %vm16407_vm1 }
 0x3be   : > { %vm5989_vm13 = vcmp.eq.f32.partialorder %v5872_v35, %v14256_v62  ;;  %vm5990_vm8 = vcmp.eq.f32.partialorder %v5872_v35, %v14266_v0  ;;  %v5742_v17 = vsel %vm16410_vm9, %v5680_v29, 0.0  ;;  %v8045_v41 = vpop.eup %8044  ;;  %v4957_v58 = vmul.f32 0.6931472, %v8043_v38  ;;  %vm16414_vm7 = vmmov %vm16407_vm1 }
 0x3bf   : > { %7662 = vmatprep.mubr.msk.f32.mxu0 %vm5990_vm8, %v16017_v6  ;;  %v5743_v48 = vadd.f32 %v5742_v17, %v5741_v3  ;;  %v5682_v10 = vmul.f32 0.6931472, %v8045_v41  ;;  %v5593_v35 = vpop.f32.mrb[42].mxu1  ;;  %vm16415_vm9 = vmmov %vm16407_vm1 }
 0x3c0   : > { %7663 = vmatmul.mubr.msk.f32.gmra.mrb[98].mxu0 %vm5989_vm13, %v16017_v6  ;;  %v6622_v56 = vpop.permute.xlu0 %6621  ;;  %7800 = vmatmul.mubr.msk.f32.gmra.mrb[106].mxu1 %vm6722_vm14, %v16017_v6  ;;  %v4863_v27 = vpop.f32.mrb[40].mxu0  ;;  %v5019_v42 = vsel %vm16411_vm10, %v4957_v58, 0.0  ;;  %vm16416_vm10 = vmmov %vm16407_vm1 }
 0x3c1   : > { %vm6725_vm15 = vcmp.eq.f32.partialorder %v6622_v56, %v14237_v55  ;;  %vm6724_vm0 = vcmp.eq.f32.partialorder %v6622_v56, %v14234_v1  ;;  %8054 = vlog2.f32 %v4863_v27  ;;  %v4865_v18 = vpop.f32.mrb[41].mxu0  ;;  %v5020_v63 = vadd.f32 %v5019_v42, %v5018_v54  ;;  %v5595_v51 = vpop.f32.mrb[43].mxu1 }
 0x3c2   : > { %7801 = vmatprep.mubr.msk.f32.mxu1 %vm6725_vm15, %v16017_v6  ;;  %8056 = vlog2.f32 %v5588_v34  ;;  %v8047_v2 = vpop.eup %8046  ;;  %v5744_v24 = vsel %vm16412_vm3, %v5682_v10, 0.0  ;;  %vm16417_vm3 = vmmov %vm16407_vm1 }
 0x3c3   : > { %v8049_v39 = vpop.eup %8048  ;;  %v5745_v32 = vadd.f32 %v5744_v24, %v5743_v48  ;;  %v4959_v9 = vmul.f32 0.6931472, %v8047_v2 }
 0x3c4   : > { %v6627_v7 = vpop.permute.xlu0 %6626  ;;  %7802 = vmatmul.mubr.msk.f32.gmra.mrb[108].mxu1 %vm6724_vm0, %v16017_v6  ;;  %v4868_v30 = vpop.f32.mrb[42].mxu0  ;;  %v5684_v5 = vmul.f32 0.6931472, %v8049_v39 }
 0x3c5   : > { %v5877_v14 = vpop.permute.xlu1 %5876  ;;  %vm6727_vm4 = vcmp.eq.f32.partialorder %v6627_v7, %v14237_v55  ;;  %vm6726_vm5 = vcmp.eq.f32.partialorder %v6627_v7, %v14234_v1  ;;  %8058 = vlog2.f32 %v4868_v30  ;;  %v4870_v33 = vpop.f32.mrb[43].mxu0  ;;  %v5021_v16 = vsel %vm16407_vm1, %v4959_v9, 0.0 }
 0x3c6   : > { %vm5991_vm12 = vcmp.eq.f32.partialorder %v5877_v14, %v14256_v62  ;;  %vm5992_vm11 = vcmp.eq.f32.partialorder %v5877_v14, %v14266_v0  ;;  %7803 = vmatprep.mubr.msk.f32.mxu1 %vm6727_vm4, %v16017_v6  ;;  %8060 = vlog2.f32 %v5593_v35  ;;  %v8051_v37 = vpop.eup %8050  ;;  %v5022_v53 = vadd.f32 %v5021_v16, %v5020_v63 }
 0x3c7   : > { %7664 = vmatprep.mubr.msk.f32.mxu0 %vm5992_vm11, %v16017_v6  ;;  %v8053_v56 = vpop.eup %8052  ;;  %v4961_v44 = vmul.f32 0.6931472, %v8051_v37 }
 0x3c8   : > { %7665 = vmatmul.mubr.msk.f32.gmra.mrb[100].mxu0 %vm5991_vm12, %v16017_v6  ;;  %v6632_v57 = vpop.permute.xlu0 %6631  ;;  %7804 = vmatmul.mubr.msk.f32.gmra.mrb[110].mxu1 %vm6726_vm5, %v16017_v6  ;;  %vm16413_vm12 = vmmov %vm16407_vm1  ;;  %v5598_v50 = vpop.f32.mrb[44].mxu1  ;;  %v5686_v21 = vmul.f32 0.6931472, %v8053_v56 }
 0x3c9   : > { %v5882_v59 = vpop.permute.xlu1 %5881  ;;  %vm6729_vm2 = vcmp.eq.f32.partialorder %v6632_v57, %v14237_v55  ;;  %vm6728_vm14 = vcmp.eq.f32.partialorder %v6632_v57, %v14234_v1  ;;  %v5746_v45 = vsel %vm16413_vm12, %v5684_v5, 0.0  ;;  %v4873_v52 = vpop.f32.mrb[44].mxu0  ;;  %v5023_v12 = vsel %vm16414_vm7, %v4961_v44, 0.0  ;;  %vm16419_vm7 = vmmov %vm16407_vm1 }
 0x3ca   : > { %vm5993_vm13 = vcmp.eq.f32.partialorder %v5882_v59, %v14256_v62  ;;  %vm5994_vm8 = vcmp.eq.f32.partialorder %v5882_v59, %v14266_v0  ;;  %7805 = vmatprep.mubr.msk.f32.mxu1 %vm6729_vm2, %v16017_v6  ;;  %v5747_v60 = vadd.f32 %v5746_v45, %v5745_v32  ;;  %8062 = vlog2.f32 %v4873_v52  ;;  %v5600_v47 = vpop.f32.mrb[45].mxu1  ;;  %v4875_v11 = vpop.f32.mrb[45].mxu0 }
 0x3cb   : > { %7666 = vmatprep.mubr.msk.f32.mxu0 %vm5994_vm8, %v16017_v6  ;;  %8064 = vlog2.f32 %v5598_v50  ;;  %v8055_v40 = vpop.eup %8054  ;;  %v5024_v26 = vadd.f32 %v5023_v12, %v5022_v53  ;;  %v5748_v13 = vsel %vm16415_vm9, %v5686_v21, 0.0  ;;  %vm16420_vm9 = vmmov %vm16407_vm1 }
 0x3cc   : > { %7667 = vmatmul.mubr.msk.f32.gmra.mrb[102].mxu0 %vm5993_vm13, %v16017_v6  ;;  %v6637_v23 = vpop.permute.xlu0 %6636  ;;  %7806 = vmatmul.mubr.msk.f32.gmra.mrb[112].mxu1 %vm6728_vm14, %v16017_v6  ;;  %v8057_v7 = vpop.eup %8056  ;;  %v5749_v28 = vadd.f32 %v5748_v13, %v5747_v60  ;;  %v4963_v43 = vmul.f32 0.6931472, %v8055_v40 }
 0x3cd   : > { %vm6731_vm15 = vcmp.eq.f32.partialorder %v6637_v23, %v14237_v55  ;;  %vm6730_vm0 = vcmp.eq.f32.partialorder %v6637_v23, %v14234_v1  ;;  %v5603_v14 = vpop.f32.mrb[46].mxu1  ;;  %v5688_v3 = vmul.f32 0.6931472, %v8057_v7 }
 0x3ce   : > { %7807 = vmatprep.mubr.msk.f32.mxu1 %vm6731_vm15, %v16017_v6  ;;  %v4878_v49 = vpop.f32.mrb[46].mxu0  ;;  %v5605_v31 = vpop.f32.mrb[47].mxu1  ;;  %v5025_v46 = vsel %vm16416_vm10, %v4963_v43, 0.0 }
 0x3cf   : > { %8066 = vlog2.f32 %v4878_v49  ;;  %v4880_v29 = vpop.f32.mrb[47].mxu0  ;;  %v8059_v36 = vpop.eup %8058  ;;  %v5026_v8 = vadd.f32 %v5025_v46, %v5024_v26  ;;  %v5750_v22 = vsel %vm16417_vm3, %v5688_v3, 0.0  ;;  %vm16422_vm3 = vmmov %vm16407_vm1 }
 0x3d0   : > { %v5887_v25 = vpop.permute.xlu1 %5886  ;;  %v6642_v15 = vpop.permute.xlu0 %6641  ;;  %7808 = vmatmul.mubr.msk.f32.gmra.mrb[114].mxu1 %vm6730_vm0, %v16017_v6  ;;  %8068 = vlog2.f32 %v5603_v14  ;;  %v5751_v38 = vadd.f32 %v5750_v22, %v5749_v28  ;;  %v4965_v54 = vmul.f32 0.6931472, %v8059_v36 }
 0x3d1   : > { %vm5995_vm6 = vcmp.eq.f32.partialorder %v5887_v25, %v14256_v62  ;;  %vm5996_vm4 = vcmp.eq.f32.partialorder %v5887_v25, %v14266_v0  ;;  %vm6733_vm11 = vcmp.eq.f32.partialorder %v6642_v15, %v14237_v55  ;;  %vm6732_vm5 = vcmp.eq.f32.partialorder %v6642_v15, %v14234_v1  ;;  %v8061_v57 = vpop.eup %8060  ;;  %v5608_v59 = vpop.f32.mrb[48].mxu1 }
 0x3d2   : > { %7668 = vmatprep.mubr.msk.f32.mxu0 %vm5996_vm4, %v16017_v6  ;;  %7809 = vmatprep.mubr.msk.f32.mxu1 %vm6733_vm11, %v16017_v6  ;;  %v4883_v17 = vpop.f32.mrb[48].mxu0  ;;  %v5690_v41 = vmul.f32 0.6931472, %v8061_v57  ;;  %v5610_v48 = vpop.f32.mrb[49].mxu1  ;;  %v5027_v27 = vsel %vm16407_vm1, %v4965_v54, 0.0 }
 0x3d3   : > { %7669 = vmatmul.mubr.msk.f32.gmra.mrb[104].mxu0 %vm5995_vm6, %v16017_v6  ;;  %8070 = vlog2.f32 %v4883_v17  ;;  %v4885_v58 = vpop.f32.mrb[49].mxu0  ;;  %v5028_v18 = vadd.f32 %v5027_v27, %v5026_v8  ;;  %vm16418_vm6 = vmmov %vm16407_vm1 }
 0x3d4   : > { %v6647_v61 = vpop.permute.xlu0 %6646  ;;  %7810 = vmatmul.mubr.msk.f32.gmra.mrb[116].mxu1 %vm6732_vm5, %v16017_v6  ;;  %8072 = vlog2.f32 %v5608_v59  ;;  %v8063_v10 = vpop.eup %8062  ;;  %v5752_v42 = vsel %vm16418_vm6, %v5690_v41, 0.0  ;;  %vm16423_vm6 = vmmov %vm16407_vm1 }
 0x3d5   : > { %vm6735_vm2 = vcmp.eq.f32.partialorder %v6647_v61, %v14237_v55  ;;  %vm6734_vm13 = vcmp.eq.f32.partialorder %v6647_v61, %v14234_v1  ;;  %v8065_v23 = vpop.eup %8064  ;;  %v5753_v2 = vadd.f32 %v5752_v42, %v5751_v38  ;;  %v4967_v63 = vmul.f32 0.6931472, %v8063_v10  ;;  %v5613_v39 = vpop.f32.mrb[50].mxu1 }
 0x3d6   : > { %7811 = vmatprep.mubr.msk.f32.mxu1 %vm6735_vm2, %v16017_v6  ;;  %v5692_v32 = vmul.f32 0.6931472, %v8065_v23  ;;  %v5615_v30 = vpop.f32.mrb[51].mxu1 }
 0x3d7   : > { %v5892_v19 = vpop.permute.xlu1 %5891  ;;  %v5029_v35 = vsel %vm16419_vm7, %v4967_v63, 0.0 }
 0x3d8   : > { %vm5997_vm8 = vcmp.eq.f32.partialorder %v5892_v19, %v14256_v62  ;;  %vm5998_vm14 = vcmp.eq.f32.partialorder %v5892_v19, %v14266_v0  ;;  %v6652_v20 = vpop.permute.xlu0 %6651  ;;  %7812 = vmatmul.mubr.msk.f32.gmra.mrb[118].mxu1 %vm6734_vm13, %v16017_v6  ;;  %v4888_v24 = vpop.f32.mrb[50].mxu0  ;;  %v5030_v33 = vadd.f32 %v5029_v35, %v5028_v18  ;;  %v5754_v25 = vsel %vm16420_vm9, %v5692_v32, 0.0  ;;  %vm16425_vm9 = vmmov %vm16407_vm1 }
 0x3d9   : > { %7670 = vmatprep.mubr.msk.f32.mxu0 %vm5998_vm14, %v16017_v6  ;;  %vm6737_vm15 = vcmp.eq.f32.partialorder %v6652_v20, %v14237_v55  ;;  %vm6736_vm0 = vcmp.eq.f32.partialorder %v6652_v20, %v14234_v1  ;;  %8074 = vlog2.f32 %v4888_v24  ;;  %v4890_v9 = vpop.f32.mrb[51].mxu0  ;;  %v8067_v5 = vpop.eup %8066  ;;  %v5755_v15 = vadd.f32 %v5754_v25, %v5753_v2  ;;  %vm16421_vm14 = vmmov %vm16407_vm1 }
 0x3da   : > { %7671 = vmatmul.mubr.msk.f32.gmra.mrb[106].mxu0 %vm5997_vm8, %v16017_v6  ;;  %7813 = vmatprep.mubr.msk.f32.mxu1 %vm6737_vm15, %v16017_v6  ;;  %8076 = vlog2.f32 %v5613_v39  ;;  %v8069_v16 = vpop.eup %8068  ;;  %v4969_v37 = vmul.f32 0.6931472, %v8067_v5  ;;  %v5618_v60 = vpop.f32.mrb[52].mxu1 }
 0x3db   : > { %v5694_v56 = vmul.f32 0.6931472, %v8069_v16  ;;  %v5620_v50 = vpop.f32.mrb[53].mxu1 }
 0x3dc   : > { %v6657_v34 = vpop.permute.xlu0 %6656  ;;  %7814 = vmatmul.mubr.msk.f32.gmra.mrb[120].mxu1 %vm6736_vm0, %v16017_v6  ;;  %v4893_v45 = vpop.f32.mrb[52].mxu0  ;;  %v5031_v52 = vsel %vm16421_vm14, %v4969_v37, 0.0  ;;  %vm16427_vm14 = vmmov %vm16407_vm1 }
 0x3dd   : > { %v5897_v4 = vpop.permute.xlu1 %5896  ;;  %vm6739_vm4 = vcmp.eq.f32.partialorder %v6657_v34, %v14237_v55  ;;  %vm6738_vm5 = vcmp.eq.f32.partialorder %v6657_v34, %v14234_v1  ;;  %8078 = vlog2.f32 %v4893_v45  ;;  %v4895_v44 = vpop.f32.mrb[53].mxu0  ;;  %v5032_v11 = vadd.f32 %v5031_v52, %v5030_v33 }
 0x3de   : > { %vm5999_vm12 = vcmp.eq.f32.partialorder %v5897_v4, %v14256_v62  ;;  %vm6000_vm11 = vcmp.eq.f32.partialorder %v5897_v4, %v14266_v0  ;;  %7815 = vmatprep.mubr.msk.f32.mxu1 %vm6739_vm4, %v16017_v6  ;;  %8080 = vlog2.f32 %v5618_v60  ;;  %v8071_v21 = vpop.eup %8070  ;;  %v5756_v12 = vsel %vm16422_vm3, %v5694_v56, 0.0  ;;  %v5623_v7 = vpop.f32.mrb[54].mxu1 }
 0x3df   : > { %7672 = vmatprep.mubr.msk.f32.mxu0 %vm6000_vm11, %v16017_v6  ;;  %v8073_v61 = vpop.eup %8072  ;;  %v5757_v40 = vadd.f32 %v5756_v12, %v5755_v15  ;;  %v4971_v26 = vmul.f32 0.6931472, %v8071_v21  ;;  %v5625_v49 = vpop.f32.mrb[55].mxu1  ;;  %vm16424_vm11 = vmmov %vm16407_vm1 }
 0x3e0   : > { %7673 = vmatmul.mubr.msk.f32.gmra.mrb[108].mxu0 %vm5999_vm12, %v16017_v6  ;;  %7816 = vmatmul.mubr.msk.f32.gmra.mrb[122].mxu1 %vm6738_vm5, %v16017_v6  ;;  %v5696_v28 = vmul.f32 0.6931472, %v8073_v61 }
 0x3e1   : > { %v5902_v51 = vpop.permute.xlu1 %5901  ;;  %v4898_v13 = vpop.f32.mrb[54].mxu0  ;;  %v5033_v14 = vsel %vm16407_vm1, %v4971_v26, 0.0 }
 0x3e2   : > { %vm6001_vm2 = vcmp.eq.f32.partialorder %v5902_v51, %v14256_v62  ;;  %vm6002_vm13 = vcmp.eq.f32.partialorder %v5902_v51, %v14266_v0  ;;  %8082 = vlog2.f32 %v4898_v13  ;;  %v4900_v43 = vpop.f32.mrb[55].mxu0  ;;  %v5034_v31 = vadd.f32 %v5033_v14, %v5032_v11  ;;  %v5628_v22 = vpop.f32.mrb[56].mxu1 }
 0x3e3   : > { %v6662_v53 = vpop.permute.xlu0 %6661  ;;  %7674 = vmatprep.mubr.msk.f32.mxu0 %vm6002_vm13, %v16017_v6  ;;  %8084 = vlog2.f32 %v5623_v7  ;;  %v8075_v19 = vpop.eup %8074  ;;  %v5758_v46 = vsel %vm16423_vm6, %v5696_v28, 0.0 }
 0x3e4   : > { %vm6741_vm8 = vcmp.eq.f32.partialorder %v6662_v53, %v14237_v55  ;;  %7675 = vmatmul.mubr.msk.f32.gmra.mrb[110].mxu0 %vm6001_vm2, %v16017_v6  ;;  %vm6740_vm10 = vcmp.eq.f32.partialorder %v6662_v53, %v14234_v1  ;;  %v8077_v20 = vpop.eup %8076  ;;  %v5759_v29 = vadd.f32 %v5758_v46, %v5757_v40  ;;  %v4973_v36 = vmul.f32 0.6931472, %v8075_v19  ;;  %v5630_v54 = vpop.f32.mrb[57].mxu1 }
 0x3e5   : > { %7817 = vmatprep.mubr.msk.f32.mxu1 %vm6741_vm8, %v16017_v6  ;;  %v5907_v47 = vpop.permute.xlu1 %5906  ;;  %v4903_v8 = vpop.f32.mrb[56].mxu0  ;;  %v5698_v57 = vmul.f32 0.6931472, %v8077_v20  ;;  %vm16426_vm8 = vmmov %vm16407_vm1 }
 0x3e6   : > { %7818 = vmatmul.mubr.msk.f32.gmra.mrb[124].mxu1 %vm6740_vm10, %v16017_v6  ;;  %vm6003_vm15 = vcmp.eq.f32.partialorder %v5907_v47, %v14256_v62  ;;  %vm6004_vm0 = vcmp.eq.f32.partialorder %v5907_v47, %v14266_v0  ;;  %8086 = vlog2.f32 %v4903_v8  ;;  %v4905_v38 = vpop.f32.mrb[57].mxu0  ;;  %v5035_v59 = vsel %vm16424_vm11, %v4973_v36, 0.0 }
 0x3e7   : > { %7676 = vmatprep.mubr.msk.f32.mxu0 %vm6004_vm0, %v16017_v6  ;;  %8088 = vlog2.f32 %v5628_v22  ;;  %v8079_v41 = vpop.eup %8078  ;;  %v5036_v58 = vadd.f32 %v5035_v59, %v5034_v31  ;;  %v5760_v27 = vsel %vm16425_vm9, %v5698_v57, 0.0  ;;  %v5633_v42 = vpop.f32.mrb[58].mxu1  ;;  %vm16429_vm0 = vmmov %vm16407_vm1 }
 0x3e8   : > { %7677 = vmatmul.mubr.msk.f32.gmra.mrb[112].mxu0 %vm6003_vm15, %v16017_v6  ;;  %v8081_v34 = vpop.eup %8080  ;;  %v5761_v10 = vadd.f32 %v5760_v27, %v5759_v29  ;;  %v4975_v4 = vmul.f32 0.6931472, %v8079_v41  ;;  %vm16428_vm15 = vmmov %vm16407_vm1 }
 0x3e9   : > { %v5912_v3 = vpop.permute.xlu1 %5911  ;;  %v5700_v23 = vmul.f32 0.6931472, %v8081_v34  ;;  %vm16433_vm9 = vmmov %vm16429_vm0 }
 0x3ea   : > { %vm6005_vm4 = vcmp.eq.f32.partialorder %v5912_v3, %v14256_v62  ;;  %vm6006_vm12 = vcmp.eq.f32.partialorder %v5912_v3, %v14266_v0  ;;  %v5037_v2 = vsel %vm16426_vm8, %v4975_v4, 0.0  ;;  %vm16434_vm8 = vmmov %vm16429_vm0 }
 0x3eb   : > { %7678 = vmatprep.mubr.msk.f32.mxu0 %vm6006_vm12, %v16017_v6  ;;  %v4908_v18 = vpop.f32.mrb[58].mxu0  ;;  %v5038_v39 = vadd.f32 %v5037_v2, %v5036_v58  ;;  %v5762_v32 = vsel %vm16427_vm14, %v5700_v23, 0.0  ;;  %vm16431_vm12 = vmmov %vm16429_vm0 }
 0x3ec   : > { %7679 = vmatmul.mubr.msk.f32.gmra.mrb[114].mxu0 %vm6005_vm4, %v16017_v6  ;;  %8090 = vlog2.f32 %v4908_v18  ;;  %v8083_v63 = vpop.eup %8082  ;;  %v5763_v30 = vadd.f32 %v5762_v32, %v5761_v10  ;;  %vm16430_vm4 = vmmov %vm16429_vm0 }
 0x3ed   : > { %v6667_v17 = vpop.permute.xlu0 %6666  ;;  %v5917_v48 = vpop.permute.xlu1 %5916  ;;  %8092 = vlog2.f32 %v5633_v42  ;;  %v4977_v35 = vmul.f32 0.6931472, %v8083_v63  ;;  %vm16435_vm14 = vmmov %vm16429_vm0 }
 0x3ee   : > { %vm6742_vm5 = vcmp.eq.f32.partialorder %v6667_v17, %v14234_v1  ;;  %vm6743_vm7 = vcmp.eq.f32.partialorder %v6667_v17, %v14237_v55  ;;  %vm6007_vm2 = vcmp.eq.f32.partialorder %v5917_v48, %v14256_v62  ;;  %vm6008_vm13 = vcmp.eq.f32.partialorder %v5917_v48, %v14266_v0  ;;  %v4910_v1 = vpop.f32.mrb[59].mxu0  ;;  %v5635_v55 = vpop.f32.mrb[59].mxu1 }
 0x3ef   : > { %7819 = vmatprep.mubr.msk.f32.mxu1 %vm6743_vm7, %v16017_v6  ;;  %7680 = vmatprep.mubr.msk.f32.mxu0 %vm6008_vm13, %v16017_v6  ;;  %v8085_v9 = vpop.eup %8084  ;;  %v4913_v5 = vpop.f32.mrb[60].mxu0  ;;  %v5039_v15 = vsel %vm16428_vm15, %v4977_v35, 0.0  ;;  %vm16432_vm7 = vmmov %vm16429_vm0 }
 0x3f0   : > { %7820 = vmatmul.mubr.msk.f32.gmra.mrb[126].mxu1 %vm6742_vm5, %v16017_v6  ;;  %7681 = vmatmul.mubr.msk.f32.gmra.mrb[116].mxu0 %vm6007_vm2, %v16017_v6  ;;  %v5638_v51 = vpop.f32.mrb[60].mxu1  ;;  %v5702_v33 = vmul.f32 0.6931472, %v8085_v9  ;;  %8094 = vlog2.f32 %v4913_v5  ;;  %v4915_v25 = vpop.f32.mrb[61].mxu0  ;;  %v5040_v45 = vadd.f32 %v5039_v15, %v5038_v39  ;;  %vm16436_vm15 = vmmov %vm16429_vm0 }
 0x3f1   : > { %v5922_v24 = vpop.permute.xlu1 %5921  ;;  %v5640_v16 = vpop.f32.mrb[61].mxu1  ;;  %8096 = vlog2.f32 %v5638_v51 }
 0x3f2   : > { %vm6009_vm10 = vcmp.eq.f32.partialorder %v5922_v24, %v14256_v62  ;;  %vm6010_vm3 = vcmp.eq.f32.partialorder %v5922_v24, %v14266_v0  ;;  %v8087_v37 = vpop.eup %8086  ;;  %v5764_v56 = vsel %vm16429_vm0, %v5702_v33, 0.0 }
 0x3f3   : > { %7682 = vmatprep.mubr.msk.f32.mxu0 %vm6010_vm3, %v16017_v6  ;;  %v8089_v60 = vpop.eup %8088  ;;  %v5765_v44 = vadd.f32 %v5764_v56, %v5763_v30  ;;  %v4979_v52 = vmul.f32 0.6931472, %v8087_v37 }
 0x3f4   : > { %7683 = vmatmul.mubr.msk.f32.gmra.mrb[118].mxu0 %vm6009_vm10, %v16017_v6  ;;  %v5704_v50 = vmul.f32 0.6931472, %v8089_v60 }
 0x3f5   : > { %v5927_v53 = vpop.permute.xlu1 %5926  ;;  %v5041_v21 = vsel %vm16430_vm4, %v4979_v52, 0.0  ;;  %vm16439_vm4 = vmmov %vm16429_vm0 }
 0x3f6   : > { %vm6011_vm1 = vcmp.eq.f32.partialorder %v5927_v53, %v14256_v62  ;;  %vm6012_vm6 = vcmp.eq.f32.partialorder %v5927_v53, %v14266_v0  ;;  %v8091_v47 = vpop.eup %8090  ;;  %v5042_v12 = vadd.f32 %v5041_v21, %v5040_v45  ;;  %v5766_v61 = vsel %vm16431_vm12, %v5704_v50, 0.0  ;;  %vm16440_vm12 = vmmov %vm16429_vm0 }
 0x3f7   : > { %7684 = vmatprep.mubr.msk.f32.mxu0 %vm6012_vm6, %v16017_v6  ;;  %v8093_v40 = vpop.eup %8092  ;;  %v5767_v26 = vadd.f32 %v5766_v61, %v5765_v44  ;;  %v4981_v13 = vmul.f32 0.6931472, %v8091_v47  ;;  %vm16438_vm6 = vmmov %vm16429_vm0 }
 0x3f8   : > { %7685 = vmatmul.mubr.msk.f32.gmra.mrb[120].mxu0 %vm6011_vm1, %v16017_v6  ;;  %v5706_v7 = vmul.f32 0.6931472, %v8093_v40  ;;  %vm16437_vm1 = vmmov %vm16429_vm0 }
 0x3f9   : > { %v5932_v11 = vpop.permute.xlu1 %5931  ;;  %v5043_v28 = vsel %vm16432_vm7, %v4981_v13, 0.0  ;;  %vm16443_vm7 = vmmov %vm16429_vm0 }
 0x3fa   : > { %vm6013_vm11 = vcmp.eq.f32.partialorder %v5932_v11, %v14256_v62  ;;  %vm6014_vm5 = vcmp.eq.f32.partialorder %v5932_v11, %v14266_v0  ;;  %v8095_v43 = vpop.eup %8094  ;;  %v5044_v14 = vadd.f32 %v5043_v28, %v5042_v12  ;;  %v5768_v19 = vsel %vm16433_vm9, %v5706_v7, 0.0  ;;  %vm16444_vm9 = vmmov %vm16429_vm0 }
 0x3fb   : > { %7686 = vmatprep.mubr.msk.f32.mxu0 %vm6014_vm5, %v16017_v6  ;;  %v8097_v3 = vpop.eup %8096  ;;  %v5769_v31 = vadd.f32 %v5768_v19, %v5767_v26  ;;  %v4983_v46 = vmul.f32 0.6931472, %v8095_v43  ;;  %vm16442_vm5 = vmmov %vm16429_vm0 }
 0x3fc   : > { %7687 = vmatmul.mubr.msk.f32.gmra.mrb[122].mxu0 %vm6013_vm11, %v16017_v6  ;;  %v5708_v20 = vmul.f32 0.6931472, %v8097_v3  ;;  %vm16441_vm11 = vmmov %vm16429_vm0 }
 0x3fd   : > { %v5937_v49 = vpop.permute.xlu1 %5936  ;;  %v5045_v29 = vsel %vm16434_vm8, %v4983_v46, 0.0  ;;  %vm16446_vm8 = vmmov %vm16429_vm0 }
 0x3fe   : > { %vm6015_vm2 = vcmp.eq.f32.partialorder %v5937_v49, %v14256_v62  ;;  %vm6016_vm13 = vcmp.eq.f32.partialorder %v5937_v49, %v14266_v0  ;;  %v5046_v8 = vadd.f32 %v5045_v29, %v5044_v14  ;;  %v5770_v22 = vsel %vm16435_vm14, %v5708_v20, 0.0  ;;  %vm16447_vm14 = vmmov %vm16429_vm0 }
 0x3ff   : > { %7688 = vmatprep.mubr.msk.f32.mxu0 %vm6016_vm13, %v16017_v6  ;;  %v5771_v57 = vadd.f32 %v5770_v22, %v5769_v31  ;;  %vm16445_vm13 = vmmov %vm16429_vm0 }
 0x400   : > { %7689 = vmatmul.mubr.msk.f32.gmra.mrb[124].mxu0 %vm6015_vm2, %v16017_v6  ;;  %vm5057_vm2 = vcmask 0  }
 0x401   : > { %v5942_v36 = vpop.permute.xlu1 %5941 }
 0x402   : > { %vm6017_vm10 = vcmp.eq.f32.partialorder %v5942_v36, %v14256_v62  ;;  %vm6018_vm3 = vcmp.eq.f32.partialorder %v5942_v36, %v14266_v0 }
 0x403   : > { %7690 = vmatprep.mubr.msk.f32.mxu0 %vm6018_vm3, %v16017_v6  ;;  %vm16449_vm3 = vmmov %vm16429_vm0 }
 0x404   : > { %7691 = vmatmul.mubr.msk.f32.gmra.mrb[126].mxu0 %vm6017_vm10, %v16017_v6  ;;  %vm16448_vm10 = vmmov %vm16429_vm0 }
 0x436   : > { %v5643_v38 = vpop.f32.mrb[62].mxu1 }
 0x437   : > { %8098 = vlog2.f32 %v5643_v38  ;;  %v5645_v54 = vpop.f32.mrb[63].mxu1 }
 0x43e   : > { %v6938_v17 = vpop.f32.mrb[64].mxu1 }
 0x43f   : > { %8100 = vlog2.f32 %v6938_v17  ;;  %v6940_v41 = vpop.f32.mrb[65].mxu1 }
 0x441   : > { %v8099_v59 = vpop.eup %8098 }
 0x442   : > { %v5710_v48 = vmul.f32 0.6931472, %v8099_v59 }
 0x443   : > { %v4918_v58 = vpop.f32.mrb[62].mxu0  ;;  %v6943_v34 = vpop.f32.mrb[66].mxu1 }
 0x444   : > { %v5772_v27 = vsel %vm16436_vm15, %v5710_v48, 0.0  ;;  %8102 = vlog2.f32 %v4918_v58  ;;  %v4920_v62 = vpop.f32.mrb[63].mxu0  ;;  %v6945_v10 = vpop.f32.mrb[67].mxu1  ;;  %vm16450_vm15 = vmmov %vm16429_vm0 }
 0x445   : > { %v5773_v0 = vadd.f32 %v5772_v27, %v5771_v57  ;;  %8104 = vlog2.f32 %v6943_v34 }
 0x447   : > { %v5774_v4 = vrot.slane %v5773_v0, 4  ;;  %v6213_v18 = vpop.f32.mrb[64].mxu0  ;;  %v6948_v6 = vpop.f32.mrb[68].mxu1 }
 0x448   : > { %8106 = vlog2.f32 %v6213_v18  ;;  %v6215_v42 = vpop.f32.mrb[65].mxu0  ;;  %v6950_v23 = vpop.f32.mrb[69].mxu1 }
 0x449   : > { %8108 = vlog2.f32 %v6948_v6  ;;  %v8101_v1 = vpop.eup %8100  ;;  %v5775_v55 = vadd.f32 %v5774_v4, %v5773_v0 }
 0x44a   : > { %v7098_v9 = vmul.f32 0.6931472, %v8101_v1 }
 0x44b   : > { %v6218_v2 = vpop.f32.mrb[66].mxu0  ;;  %v6953_v63 = vpop.f32.mrb[70].mxu1  ;;  %v5776_v35 = vrot.slane %v5775_v55, 2 }
 0x44c   : > { %8110 = vlog2.f32 %v6218_v2  ;;  %v6220_v24 = vpop.f32.mrb[67].mxu0  ;;  %v6955_v39 = vpop.f32.mrb[71].mxu1  ;;  %v7161_v45 = vsel %vm16437_vm1, %v7098_v9, 0.0  ;;  %vm16451_vm1 = vmmov %vm16429_vm0 }
 0x44d   : > { %8112 = vlog2.f32 %v6953_v63  ;;  %v5777_v52 = vadd.f32 %v5776_v35, %v5775_v55 }
 0x44e   : > { %v8103_v32 = vpop.eup %8102 }
 0x44f   : > { %v8105_v30 = vpop.eup %8104  ;;  %v4985_v5 = vmul.f32 0.6931472, %v8103_v32  ;;  %v6223_v51 = vpop.f32.mrb[68].mxu0  ;;  %v5778_v49 = vrot.slane %v5777_v52, 1 }
 0x450   : > { %v7100_v33 = vmul.f32 0.6931472, %v8105_v30  ;;  %v6958_v25 = vpop.f32.mrb[72].mxu1  ;;  %8114 = vlog2.f32 %v6223_v51  ;;  %v6225_v16 = vpop.f32.mrb[69].mxu0 }
 0x451   : > { %v5047_v15 = vsel %vm16429_vm0, %v4985_v5, 0.0  ;;  %8116 = vlog2.f32 %v6958_v25  ;;  %v6960_v37 = vpop.f32.mrb[73].mxu1  ;;  %v5779_v41 = vadd.f32 %v5778_v49, %v5777_v52 }
 0x452   : > { %v8107_v53 = vpop.eup %8106  ;;  %v7162_v56 = vsel %vm16438_vm6, %v7100_v33, 0.0  ;;  %v5048_v60 = vadd.f32 %v5047_v15, %v5046_v8  ;;  %vm16452_vm6 = vmmov %vm16429_vm0 }
 0x453   : > { %v8109_v44 = vpop.eup %8108  ;;  %v7163_v50 = vadd.f32 %v7162_v56, %v7161_v45  ;;  %v6228_v21 = vpop.f32.mrb[70].mxu0  ;;  %v6373_v40 = vmul.f32 0.6931472, %v8107_v53  ;;  %v5780_v2 = vmul.f32 -0.0044527627, %v5779_v41 }
 0x454   : > { %v5049_v47 = vrot.slane %v5048_v60, 4  ;;  %v7102_v11 = vmul.f32 0.6931472, %v8109_v44  ;;  %v6963_v12 = vpop.f32.mrb[74].mxu1  ;;  %8118 = vlog2.f32 %v6228_v21  ;;  %v6230_v61 = vpop.f32.mrb[71].mxu0 }
 0x455   : > { %8120 = vlog2.f32 %v6963_v12  ;;  %v6965_v26 = vpop.f32.mrb[75].mxu1  ;;  %v6436_v36 = vsel %vm16440_vm12, %v6373_v40, 0.0  ;;  %v5781_v53 = vadd.f32 6.589511, %v5780_v2  ;;  %vm16454_vm12 = vmmov %vm16429_vm0 }
 0x456   : > { %v8111_v13 = vpop.eup %8110  ;;  %v5050_v7 = vadd.f32 %v5049_v47, %v5048_v60  ;;  %v7164_v28 = vsel %vm16439_vm4, %v7102_v11, 0.0  ;;  %vm16453_vm4 = vmmov %vm16429_vm0 }
 0x457   : > { %v8113_v43 = vpop.eup %8112  ;;  %v7165_v14 = vadd.f32 %v7164_v28, %v7163_v50  ;;  %v6375_v19 = vmul.f32 0.6931472, %v8111_v13  ;;  %v6233_v3 = vpop.f32.mrb[72].mxu0  ;;  %7563 = vst.msk [vmem:[%s14664_s27 + $0x1] sm:$0x1] %vm5057_vm2, %v5781_v53 }
 0x458   : > { %v5051_v31 = vrot.slane %v5050_v7, 2  ;;  %v7104_v46 = vmul.f32 0.6931472, %v8113_v43  ;;  %v6968_v20 = vpop.f32.mrb[76].mxu1  ;;  %8122 = vlog2.f32 %v6233_v3  ;;  %v6235_v29 = vpop.f32.mrb[73].mxu0 }
 0x459   : > { %v6437_v8 = vsel %vm16441_vm11, %v6375_v19, 0.0  ;;  %8124 = vlog2.f32 %v6968_v20  ;;  %v6970_v22 = vpop.f32.mrb[77].mxu1  ;;  %vm16455_vm11 = vmmov %vm16429_vm0 }
 0x45a   : > { %v8115_v57 = vpop.eup %8114  ;;  %v5052_v38 = vadd.f32 %v5051_v31, %v5050_v7  ;;  %v7166_v54 = vsel %vm16442_vm5, %v7104_v46, 0.0  ;;  %v6438_v17 = vadd.f32 %v6437_v8, %v6436_v36  ;;  %vm16456_vm5 = vmmov %vm16429_vm0 }
 0x45b   : > { %v8117_v59 = vpop.eup %8116  ;;  %v7167_v48 = vadd.f32 %v7166_v54, %v7165_v14  ;;  %v6377_v58 = vmul.f32 0.6931472, %v8115_v57  ;;  %v6238_v27 = vpop.f32.mrb[74].mxu0 }
 0x45c   : > { %v5053_v34 = vrot.slane %v5052_v38, 1  ;;  %v7106_v62 = vmul.f32 0.6931472, %v8117_v59  ;;  %v6973_v0 = vpop.f32.mrb[78].mxu1  ;;  %8126 = vlog2.f32 %v6238_v27  ;;  %v6240_v10 = vpop.f32.mrb[75].mxu0 }
 0x45d   : > { %v6439_v4 = vsel %vm16443_vm7, %v6377_v58, 0.0  ;;  %8128 = vlog2.f32 %v6973_v0  ;;  %v6975_v18 = vpop.f32.mrb[79].mxu1  ;;  %vm16457_vm7 = vmmov %vm16429_vm0 }
 0x45e   : > { %v8119_v6 = vpop.eup %8118  ;;  %v5054_v42 = vadd.f32 %v5053_v34, %v5052_v38  ;;  %v7168_v23 = vsel %vm16444_vm9, %v7106_v62, 0.0  ;;  %v6440_v1 = vadd.f32 %v6439_v4, %v6438_v17  ;;  %vm16458_vm9 = vmmov %vm16429_vm0 }
 0x45f   : > { %v8121_v55 = vpop.eup %8120  ;;  %v7169_v63 = vadd.f32 %v7168_v23, %v7167_v48  ;;  %v6379_v24 = vmul.f32 0.6931472, %v8119_v6  ;;  %v6243_v39 = vpop.f32.mrb[76].mxu0 }
 0x460   : > { %v5055_v32 = vmul.f32 -0.0044527627, %v5054_v42  ;;  %v7108_v9 = vmul.f32 0.6931472, %v8121_v55  ;;  %v6978_v30 = vpop.f32.mrb[80].mxu1  ;;  %8130 = vlog2.f32 %v6243_v39  ;;  %v6245_v35 = vpop.f32.mrb[77].mxu0 }
 0x461   : > { %v6441_v5 = vsel %vm16445_vm13, %v6379_v24, 0.0  ;;  %8132 = vlog2.f32 %v6978_v30  ;;  %v6980_v51 = vpop.f32.mrb[81].mxu1  ;;  %vm16459_vm13 = vmmov %vm16429_vm0 }
 0x462   : > { %v8123_v33 = vpop.eup %8122  ;;  %v5056_v25 = vadd.f32 6.589511, %v5055_v32  ;;  %v7170_v16 = vsel %vm16446_vm8, %v7108_v9, 0.0  ;;  %v6442_v15 = vadd.f32 %v6441_v5, %v6440_v1  ;;  %vm16460_vm8 = vmmov %vm16429_vm0 }
 0x463   : > { %v8125_v37 = vpop.eup %8124  ;;  %v7171_v45 = vadd.f32 %v7170_v16, %v7169_v63  ;;  %v6381_v56 = vmul.f32 0.6931472, %v8123_v33  ;;  %v6248_v60 = vpop.f32.mrb[78].mxu0 }
 0x464   : > { %5058 = vst.msk [vmem:[%s14664_s27] sm:$0x1] %vm5057_vm2, %v5056_v25  ;;  %v7110_v44 = vmul.f32 0.6931472, %v8125_v37  ;;  %v6983_v52 = vpop.f32.mrb[82].mxu1  ;;  %8134 = vlog2.f32 %v6248_v60  ;;  %v6250_v50 = vpop.f32.mrb[79].mxu0 }
 0x465   : > { %v6443_v21 = vsel %vm16447_vm14, %v6381_v56, 0.0  ;;  %8136 = vlog2.f32 %v6983_v52  ;;  %v6985_v47 = vpop.f32.mrb[83].mxu1  ;;  %vm16461_vm14 = vmmov %vm16429_vm0 }
 0x466   : > { %v8127_v11 = vpop.eup %8126  ;;  %v7172_v12 = vsel %vm16448_vm10, %v7110_v44, 0.0  ;;  %v6444_v61 = vadd.f32 %v6443_v21, %v6442_v15  ;;  %vm16462_vm10 = vmmov %vm16429_vm0 }
 0x467   : > { %v8129_v40 = vpop.eup %8128  ;;  %v7173_v26 = vadd.f32 %v7172_v12, %v7171_v45  ;;  %v6383_v13 = vmul.f32 0.6931472, %v8127_v11  ;;  %v6253_v7 = vpop.f32.mrb[80].mxu0 }
 0x468   : > { %v7112_v28 = vmul.f32 0.6931472, %v8129_v40  ;;  %v6988_v43 = vpop.f32.mrb[84].mxu1  ;;  %8138 = vlog2.f32 %v6253_v7  ;;  %v6255_v49 = vpop.f32.mrb[81].mxu0 }
 0x469   : > { %v6445_v14 = vsel %vm16449_vm3, %v6383_v13, 0.0  ;;  %8140 = vlog2.f32 %v6988_v43  ;;  %v6990_v19 = vpop.f32.mrb[85].mxu1  ;;  %vm16463_vm3 = vmmov %vm16429_vm0 }
 0x46a   : > { %v8131_v3 = vpop.eup %8130  ;;  %v7174_v31 = vsel %vm16450_vm15, %v7112_v28, 0.0  ;;  %v6446_v46 = vadd.f32 %v6445_v14, %v6444_v61  ;;  %vm16464_vm15 = vmmov %vm16429_vm0 }
 0x46b   : > { %v8133_v20 = vpop.eup %8132  ;;  %v7175_v29 = vadd.f32 %v7174_v31, %v7173_v26  ;;  %v6385_v36 = vmul.f32 0.6931472, %v8131_v3  ;;  %v6258_v8 = vpop.f32.mrb[82].mxu0 }
 0x46c   : > { %v7114_v22 = vmul.f32 0.6931472, %v8133_v20  ;;  %v6993_v57 = vpop.f32.mrb[86].mxu1  ;;  %8142 = vlog2.f32 %v6258_v8  ;;  %v6260_v38 = vpop.f32.mrb[83].mxu0 }
 0x46d   : > { %v6447_v54 = vsel %vm16429_vm0, %v6385_v36, 0.0  ;;  %8144 = vlog2.f32 %v6993_v57  ;;  %v6995_v17 = vpop.f32.mrb[87].mxu1 }
 0x46e   : > { %v8135_v59 = vpop.eup %8134  ;;  %v7176_v41 = vsel %vm16451_vm1, %v7114_v22, 0.0  ;;  %v6448_v48 = vadd.f32 %v6447_v54, %v6446_v46  ;;  %vm16465_vm1 = vmmov %vm16429_vm0 }
 0x46f   : > { %v8137_v58 = vpop.eup %8136  ;;  %v7177_v27 = vadd.f32 %v7176_v41, %v7175_v29  ;;  %v6387_v34 = vmul.f32 0.6931472, %v8135_v59  ;;  %v6263_v62 = vpop.f32.mrb[84].mxu0 }
 0x470   : > { %v7116_v0 = vmul.f32 0.6931472, %v8137_v58  ;;  %v6998_v10 = vpop.f32.mrb[88].mxu1  ;;  %8146 = vlog2.f32 %v6263_v62  ;;  %v6265_v4 = vpop.f32.mrb[85].mxu0 }
 0x471   : > { %v6449_v18 = vsel %vm16452_vm6, %v6387_v34, 0.0  ;;  %8148 = vlog2.f32 %v6998_v10  ;;  %v7000_v6 = vpop.f32.mrb[89].mxu1  ;;  %vm16466_vm6 = vmmov %vm16429_vm0 }
 0x472   : > { %v8139_v42 = vpop.eup %8138  ;;  %v7178_v23 = vsel %vm16453_vm4, %v7116_v0, 0.0  ;;  %v6450_v1 = vadd.f32 %v6449_v18, %v6448_v48  ;;  %vm16467_vm4 = vmmov %vm16429_vm0 }
 0x473   : > { %v8141_v55 = vpop.eup %8140  ;;  %v7179_v2 = vadd.f32 %v7178_v23, %v7177_v27  ;;  %v6389_v63 = vmul.f32 0.6931472, %v8139_v42  ;;  %v6268_v24 = vpop.f32.mrb[86].mxu0 }
 0x474   : > { %v7118_v39 = vmul.f32 0.6931472, %v8141_v55  ;;  %v7003_v32 = vpop.f32.mrb[90].mxu1  ;;  %8150 = vlog2.f32 %v6268_v24  ;;  %v6270_v9 = vpop.f32.mrb[87].mxu0 }
 0x475   : > { %v6451_v30 = vsel %vm16454_vm12, %v6389_v63, 0.0  ;;  %8152 = vlog2.f32 %v7003_v32  ;;  %v7005_v35 = vpop.f32.mrb[91].mxu1  ;;  %vm16468_vm12 = vmmov %vm16429_vm0 }
 0x476   : > { %v8143_v5 = vpop.eup %8142  ;;  %v7180_v51 = vsel %vm16455_vm11, %v7118_v39, 0.0  ;;  %v6452_v33 = vadd.f32 %v6451_v30, %v6450_v1  ;;  %vm16469_vm11 = vmmov %vm16429_vm0 }
 0x477   : > { %v8145_v25 = vpop.eup %8144  ;;  %v7181_v16 = vadd.f32 %v7180_v51, %v7179_v2  ;;  %v6391_v15 = vmul.f32 0.6931472, %v8143_v5  ;;  %v6273_v37 = vpop.f32.mrb[88].mxu0 }
 0x478   : > { %v7120_v53 = vmul.f32 0.6931472, %v8145_v25  ;;  %v7008_v45 = vpop.f32.mrb[92].mxu1  ;;  %8154 = vlog2.f32 %v6273_v37  ;;  %v6275_v56 = vpop.f32.mrb[89].mxu0 }
 0x479   : > { %v6453_v60 = vsel %vm16456_vm5, %v6391_v15, 0.0  ;;  %8156 = vlog2.f32 %v7008_v45  ;;  %v7010_v44 = vpop.f32.mrb[93].mxu1  ;;  %vm16470_vm5 = vmmov %vm16429_vm0 }
 0x47a   : > { %v8147_v52 = vpop.eup %8146  ;;  %v7182_v50 = vsel %vm16457_vm7, %v7120_v53, 0.0  ;;  %v6454_v21 = vadd.f32 %v6453_v60, %v6452_v33  ;;  %vm16471_vm7 = vmmov %vm16429_vm0 }
 0x47b   : > { %v8149_v47 = vpop.eup %8148  ;;  %v7183_v11 = vadd.f32 %v7182_v50, %v7181_v16  ;;  %v6393_v12 = vmul.f32 0.6931472, %v8147_v52  ;;  %v6278_v61 = vpop.f32.mrb[90].mxu0 }
 0x47c   : > { %v7122_v40 = vmul.f32 0.6931472, %v8149_v47  ;;  %v7013_v26 = vpop.f32.mrb[94].mxu1  ;;  %8158 = vlog2.f32 %v6278_v61  ;;  %v6280_v13 = vpop.f32.mrb[91].mxu0 }
 0x47d   : > { %v6455_v7 = vsel %vm16458_vm9, %v6393_v12, 0.0  ;;  %8160 = vlog2.f32 %v7013_v26  ;;  %v7015_v28 = vpop.f32.mrb[95].mxu1  ;;  %vm16472_vm9 = vmmov %vm16429_vm0 }
 0x47e   : > { %v8151_v43 = vpop.eup %8150  ;;  %v7184_v49 = vsel %vm16459_vm13, %v7122_v40, 0.0  ;;  %v6456_v14 = vadd.f32 %v6455_v7, %v6454_v21  ;;  %vm16473_vm13 = vmmov %vm16429_vm0 }
 0x47f   : > { %v8153_v19 = vpop.eup %8152  ;;  %v7185_v3 = vadd.f32 %v7184_v49, %v7183_v11  ;;  %v6395_v31 = vmul.f32 0.6931472, %v8151_v43  ;;  %v7018_v20 = vpop.f32.mrb[96].mxu1 }
 0x480   : > { %v7124_v46 = vmul.f32 0.6931472, %v8153_v19  ;;  %8162 = vlog2.f32 %v7018_v20  ;;  %v7020_v36 = vpop.f32.mrb[97].mxu1  ;;  %v6283_v8 = vpop.f32.mrb[92].mxu0 }
 0x481   : > { %v6457_v29 = vsel %vm16460_vm8, %v6395_v31, 0.0  ;;  %8164 = vlog2.f32 %v6283_v8  ;;  %v6285_v54 = vpop.f32.mrb[93].mxu0  ;;  %vm16474_vm8 = vmmov %vm16429_vm0 }
 0x482   : > { %v8155_v22 = vpop.eup %8154  ;;  %v7186_v57 = vsel %vm16461_vm14, %v7124_v46, 0.0  ;;  %v6458_v38 = vadd.f32 %v6457_v29, %v6456_v14  ;;  %vm16475_vm14 = vmmov %vm16429_vm0 }
 0x483   : > { %v8157_v17 = vpop.eup %8156  ;;  %v7187_v59 = vadd.f32 %v7186_v57, %v7185_v3  ;;  %v6397_v41 = vmul.f32 0.6931472, %v8155_v22  ;;  %v7023_v58 = vpop.f32.mrb[98].mxu1 }
 0x484   : > { %v7126_v48 = vmul.f32 0.6931472, %v8157_v17  ;;  %8166 = vlog2.f32 %v7023_v58  ;;  %v7025_v34 = vpop.f32.mrb[99].mxu1 }
 0x485   : > { %v6459_v27 = vsel %vm16462_vm10, %v6397_v41, 0.0  ;;  %vm16476_vm10 = vmmov %vm16429_vm0 }
 0x486   : > { %v8159_v62 = vpop.eup %8158  ;;  %v7188_v0 = vsel %vm16463_vm3, %v7126_v48, 0.0  ;;  %v6460_v10 = vadd.f32 %v6459_v27, %v6458_v38  ;;  %v6288_v23 = vpop.f32.mrb[94].mxu0  ;;  %vm16477_vm3 = vmmov %vm16429_vm0 }
 0x487   : > { %v8161_v4 = vpop.eup %8160  ;;  %v7189_v18 = vadd.f32 %v7188_v0, %v7187_v59  ;;  %v6399_v6 = vmul.f32 0.6931472, %v8159_v62  ;;  %v7028_v1 = vpop.f32.mrb[100].mxu1  ;;  %8168 = vlog2.f32 %v6288_v23 }
 0x488   : > { %v7128_v42 = vmul.f32 0.6931472, %v8161_v4  ;;  %v6290_v2 = vpop.f32.mrb[95].mxu0  ;;  %v7030_v63 = vpop.f32.mrb[101].mxu1  ;;  %8170 = vlog2.f32 %v7028_v1 }
 0x489   : > { %v6461_v55 = vsel %vm16464_vm15, %v6399_v6, 0.0  ;;  %vm16478_vm15 = vmmov %vm16429_vm0 }
 0x48a   : > { %v7190_v24 = vsel %vm16429_vm0, %v7128_v42, 0.0  ;;  %v6462_v39 = vadd.f32 %v6461_v55, %v6460_v10  ;;  %v8163_v32 = vpop.eup %8162 }
 0x48b   : > { %v7191_v9 = vadd.f32 %v7190_v24, %v7189_v18  ;;  %v8165_v30 = vpop.eup %8164  ;;  %v7130_v35 = vmul.f32 0.6931472, %v8163_v32  ;;  %v7033_v5 = vpop.f32.mrb[102].mxu1 }
 0x48c   : > { %v6401_v51 = vmul.f32 0.6931472, %v8165_v30  ;;  %8172 = vlog2.f32 %v7033_v5  ;;  %v7035_v33 = vpop.f32.mrb[103].mxu1 }
 0x48d   : > { %v7192_v25 = vsel %vm16465_vm1, %v7130_v35, 0.0  ;;  %v6293_v53 = vpop.f32.mrb[96].mxu0  ;;  %vm16479_vm1 = vmmov %vm16429_vm0 }
 0x48e   : > { %v8167_v16 = vpop.eup %8166  ;;  %v7193_v15 = vadd.f32 %v7192_v25, %v7191_v9  ;;  %v6463_v37 = vsel %vm16466_vm6, %v6401_v51, 0.0  ;;  %8174 = vlog2.f32 %v6293_v53  ;;  %v6295_v60 = vpop.f32.mrb[97].mxu0  ;;  %vm16480_vm6 = vmmov %vm16429_vm0 }
 0x48f   : > { %v6464_v45 = vadd.f32 %v6463_v37, %v6462_v39  ;;  %v7132_v56 = vmul.f32 0.6931472, %v8167_v16  ;;  %v7038_v44 = vpop.f32.mrb[104].mxu1 }
 0x490   : > { %8176 = vlog2.f32 %v7038_v44  ;;  %v7040_v52 = vpop.f32.mrb[105].mxu1 }
 0x491   : > { %v7194_v50 = vsel %vm16467_vm4, %v7132_v56, 0.0  ;;  %v8169_v21 = vpop.eup %8168  ;;  %vm16481_vm4 = vmmov %vm16429_vm0 }
 0x492   : > { %v7195_v47 = vadd.f32 %v7194_v50, %v7193_v15  ;;  %v8171_v11 = vpop.eup %8170  ;;  %v6403_v12 = vmul.f32 0.6931472, %v8169_v21 }
 0x493   : > { %v6298_v61 = vpop.f32.mrb[98].mxu0  ;;  %v7043_v40 = vpop.f32.mrb[106].mxu1  ;;  %v7134_v26 = vmul.f32 0.6931472, %v8171_v11 }
 0x494   : > { %8178 = vlog2.f32 %v6298_v61  ;;  %v6300_v13 = vpop.f32.mrb[99].mxu0  ;;  %v7045_v7 = vpop.f32.mrb[107].mxu1  ;;  %v6465_v28 = vsel %vm16468_vm12, %v6403_v12, 0.0  ;;  %vm16482_vm12 = vmmov %vm16429_vm0 }
 0x495   : > { %8180 = vlog2.f32 %v7043_v40  ;;  %v6466_v49 = vadd.f32 %v6465_v28, %v6464_v45  ;;  %v7196_v14 = vsel %vm16469_vm11, %v7134_v26, 0.0  ;;  %vm16483_vm11 = vmmov %vm16429_vm0 }
 0x496   : > { %v8173_v43 = vpop.eup %8172  ;;  %v7197_v19 = vadd.f32 %v7196_v14, %v7195_v47 }
 0x497   : > { %v7136_v3 = vmul.f32 0.6931472, %v8173_v43  ;;  %v7048_v31 = vpop.f32.mrb[108].mxu1 }
 0x498   : > { %8182 = vlog2.f32 %v7048_v31  ;;  %v7050_v46 = vpop.f32.mrb[109].mxu1  ;;  %v8175_v20 = vpop.eup %8174 }
 0x499   : > { %v7198_v29 = vsel %vm16470_vm5, %v7136_v3, 0.0  ;;  %v6405_v8 = vmul.f32 0.6931472, %v8175_v20  ;;  %vm16484_vm5 = vmmov %vm16429_vm0 }
 0x49a   : > { %v8177_v36 = vpop.eup %8176  ;;  %v7199_v22 = vadd.f32 %v7198_v29, %v7197_v19 }
 0x49b   : > { %v7138_v57 = vmul.f32 0.6931472, %v8177_v36  ;;  %v6303_v38 = vpop.f32.mrb[100].mxu0  ;;  %v7053_v54 = vpop.f32.mrb[110].mxu1  ;;  %v6467_v17 = vsel %vm16471_vm7, %v6405_v8, 0.0  ;;  %vm16485_vm7 = vmmov %vm16429_vm0 }
 0x49c   : > { %8184 = vlog2.f32 %v6303_v38  ;;  %v6305_v59 = vpop.f32.mrb[101].mxu0  ;;  %v7055_v41 = vpop.f32.mrb[111].mxu1  ;;  %v6468_v48 = vadd.f32 %v6467_v17, %v6466_v49 }
 0x49d   : > { %v7200_v58 = vsel %vm16472_vm9, %v7138_v57, 0.0  ;;  %8186 = vlog2.f32 %v7053_v54  ;;  %vm16486_vm9 = vmmov %vm16429_vm0 }
 0x49e   : > { %v8179_v27 = vpop.eup %8178  ;;  %v7201_v34 = vadd.f32 %v7200_v58, %v7199_v22 }
 0x49f   : > { %v8181_v62 = vpop.eup %8180  ;;  %v6407_v0 = vmul.f32 0.6931472, %v8179_v27  ;;  %v6308_v10 = vpop.f32.mrb[102].mxu0 }
 0x4a0   : > { %v7058_v4 = vpop.f32.mrb[112].mxu1  ;;  %v7140_v18 = vmul.f32 0.6931472, %v8181_v62  ;;  %8188 = vlog2.f32 %v6308_v10  ;;  %v6310_v6 = vpop.f32.mrb[103].mxu0 }
 0x4a1   : > { %v7060_v42 = vpop.f32.mrb[113].mxu1  ;;  %v6469_v23 = vsel %vm16473_vm13, %v6407_v0, 0.0  ;;  %8190 = vlog2.f32 %v7058_v4  ;;  %vm16487_vm13 = vmmov %vm16429_vm0 }
 0x4a2   : > { %v8183_v1 = vpop.eup %8182  ;;  %v6470_v55 = vadd.f32 %v6469_v23, %v6468_v48  ;;  %v7202_v2 = vsel %vm16474_vm8, %v7140_v18, 0.0  ;;  %vm16488_vm8 = vmmov %vm16429_vm0 }
 0x4a3   : > { %v7203_v63 = vadd.f32 %v7202_v2, %v7201_v34  ;;  %v7142_v24 = vmul.f32 0.6931472, %v8183_v1  ;;  %v7063_v39 = vpop.f32.mrb[114].mxu1 }
 0x4a4   : > { %8192 = vlog2.f32 %v7063_v39  ;;  %v7065_v32 = vpop.f32.mrb[115].mxu1 }
 0x4a5   : > { %v7204_v9 = vsel %vm16475_vm14, %v7142_v24, 0.0  ;;  %vm16489_vm14 = vmmov %vm16429_vm0 }
 0x4a6   : > { %v8185_v30 = vpop.eup %8184  ;;  %v7205_v35 = vadd.f32 %v7204_v9, %v7203_v63  ;;  %v6313_v5 = vpop.f32.mrb[104].mxu0 }
 0x4a7   : > { %v8187_v51 = vpop.eup %8186  ;;  %v6409_v33 = vmul.f32 0.6931472, %v8185_v30  ;;  %8194 = vlog2.f32 %v6313_v5  ;;  %v6315_v25 = vpop.f32.mrb[105].mxu0 }
 0x4a8   : > { %v7068_v16 = vpop.f32.mrb[116].mxu1  ;;  %v7144_v15 = vmul.f32 0.6931472, %v8187_v51 }
 0x4a9   : > { %8196 = vlog2.f32 %v7068_v16  ;;  %v7070_v37 = vpop.f32.mrb[117].mxu1  ;;  %v6471_v53 = vsel %vm16476_vm10, %v6409_v33, 0.0  ;;  %vm16490_vm10 = vmmov %vm16429_vm0 }
 0x4aa   : > { %v8189_v45 = vpop.eup %8188  ;;  %v6472_v56 = vadd.f32 %v6471_v53, %v6470_v55  ;;  %v7206_v60 = vsel %vm16477_vm3, %v7144_v15, 0.0  ;;  %vm16491_vm3 = vmmov %vm16429_vm0 }
 0x4ab   : > { %v8191_v44 = vpop.eup %8190  ;;  %v6411_v52 = vmul.f32 0.6931472, %v8189_v45  ;;  %v7207_v50 = vadd.f32 %v7206_v60, %v7205_v35  ;;  %v7073_v21 = vpop.f32.mrb[118].mxu1 }
 0x4ac   : > { %v7146_v47 = vmul.f32 0.6931472, %v8191_v44  ;;  %8198 = vlog2.f32 %v7073_v21  ;;  %v7075_v11 = vpop.f32.mrb[119].mxu1 }
 0x4ad   : > { %v6473_v12 = vsel %vm16478_vm15, %v6411_v52, 0.0  ;;  %v6318_v61 = vpop.f32.mrb[106].mxu0  ;;  %vm16492_vm15 = vmmov %vm16429_vm0 }
 0x4ae   : > { %v8193_v40 = vpop.eup %8192  ;;  %v6474_v26 = vadd.f32 %v6473_v12, %v6472_v56  ;;  %8200 = vlog2.f32 %v6318_v61  ;;  %v6320_v13 = vpop.f32.mrb[107].mxu0  ;;  %v7208_v7 = vsel %vm16429_vm0, %v7146_v47, 0.0 }
 0x4af   : > { %v7209_v28 = vadd.f32 %v7208_v7, %v7207_v50  ;;  %v7148_v43 = vmul.f32 0.6931472, %v8193_v40  ;;  %v7078_v49 = vpop.f32.mrb[120].mxu1 }
 0x4b0   : > { %8202 = vlog2.f32 %v7078_v49  ;;  %v7080_v14 = vpop.f32.mrb[121].mxu1 }
 0x4b1   : > { %v8195_v19 = vpop.eup %8194  ;;  %v7210_v3 = vsel %vm16479_vm1, %v7148_v43, 0.0  ;;  %vm16493_vm1 = vmmov %vm16429_vm0 }
 0x4b2   : > { %v6413_v46 = vmul.f32 0.6931472, %v8195_v19  ;;  %v7211_v20 = vadd.f32 %v7210_v3, %v7209_v28 }
 0x4b3   : > { %v8197_v31 = vpop.eup %8196  ;;  %v6323_v29 = vpop.f32.mrb[108].mxu0 }
 0x4b4   : > { %v7150_v36 = vmul.f32 0.6931472, %v8197_v31  ;;  %v7083_v8 = vpop.f32.mrb[122].mxu1  ;;  %v6475_v22 = vsel %vm16480_vm6, %v6413_v46, 0.0  ;;  %8204 = vlog2.f32 %v6323_v29  ;;  %v6325_v57 = vpop.f32.mrb[109].mxu0  ;;  %vm16494_vm6 = vmmov %vm16429_vm0 }
 0x4b5   : > { %v7085_v38 = vpop.f32.mrb[123].mxu1  ;;  %v6476_v54 = vadd.f32 %v6475_v22, %v6474_v26  ;;  %8206 = vlog2.f32 %v7083_v8 }
 0x4b6   : > { %v7212_v17 = vsel %vm16481_vm4, %v7150_v36, 0.0  ;;  %v8199_v59 = vpop.eup %8198  ;;  %vm16495_vm4 = vmmov %vm16429_vm0 }
 0x4b7   : > { %v7213_v41 = vadd.f32 %v7212_v17, %v7211_v20  ;;  %v6328_v48 = vpop.f32.mrb[110].mxu0  ;;  %v7152_v58 = vmul.f32 0.6931472, %v8199_v59 }
 0x4b8   : > { %v8201_v27 = vpop.eup %8200  ;;  %8208 = vlog2.f32 %v6328_v48  ;;  %v6330_v34 = vpop.f32.mrb[111].mxu0 }
 0x4b9   : > { %v7088_v62 = vpop.f32.mrb[124].mxu1  ;;  %v6415_v0 = vmul.f32 0.6931472, %v8201_v27  ;;  %v7214_v10 = vsel %vm16482_vm12, %v7152_v58, 0.0  ;;  %vm16496_vm12 = vmmov %vm16429_vm0 }
 0x4ba   : > { %8210 = vlog2.f32 %v7088_v62  ;;  %v7090_v4 = vpop.f32.mrb[125].mxu1  ;;  %v8203_v18 = vpop.eup %8202  ;;  %v7215_v6 = vadd.f32 %v7214_v10, %v7213_v41 }
 0x4bb   : > { %v6477_v42 = vsel %vm16483_vm11, %v6415_v0, 0.0  ;;  %v6333_v23 = vpop.f32.mrb[112].mxu0  ;;  %v7154_v1 = vmul.f32 0.6931472, %v8203_v18 }
 0x4bc   : > { %v6478_v55 = vadd.f32 %v6477_v42, %v6476_v54  ;;  %8212 = vlog2.f32 %v6333_v23  ;;  %v6335_v2 = vpop.f32.mrb[113].mxu0 }
 0x4bd   : > { %v7216_v63 = vsel %vm16484_vm5, %v7154_v1, 0.0 }
 0x4be   : > { %v8205_v24 = vpop.eup %8204  ;;  %v7217_v39 = vadd.f32 %v7216_v63, %v7215_v6 }
 0x4bf   : > { %v8207_v32 = vpop.eup %8206  ;;  %v6417_v9 = vmul.f32 0.6931472, %v8205_v24  ;;  %v6338_v30 = vpop.f32.mrb[114].mxu0 }
 0x4c0   : > { %8214 = vlog2.f32 %v6338_v30  ;;  %v6340_v35 = vpop.f32.mrb[115].mxu0  ;;  %v7156_v5 = vmul.f32 0.6931472, %v8207_v32 }
 0x4c1   : > { %v6479_v51 = vsel %vm16485_vm7, %v6417_v9, 0.0 }
 0x4c2   : > { %v8209_v33 = vpop.eup %8208  ;;  %v6480_v25 = vadd.f32 %v6479_v51, %v6478_v55  ;;  %v7218_v16 = vsel %vm16486_vm9, %v7156_v5, 0.0 }
 0x4c3   : > { %v7093_v15 = vpop.f32.mrb[126].mxu1  ;;  %v6419_v53 = vmul.f32 0.6931472, %v8209_v33  ;;  %v6343_v45 = vpop.f32.mrb[116].mxu0  ;;  %v7219_v56 = vadd.f32 %v7218_v16, %v7217_v39 }
 0x4c4   : > { %v8211_v37 = vpop.eup %8210  ;;  %8216 = vlog2.f32 %v7093_v15  ;;  %v7095_v60 = vpop.f32.mrb[127].mxu1 }
 0x4c5   : > { %8218 = vlog2.f32 %v6343_v45  ;;  %v6345_v44 = vpop.f32.mrb[117].mxu0  ;;  %v7158_v52 = vmul.f32 0.6931472, %v8211_v37  ;;  %v6481_v50 = vsel %vm16487_vm13, %v6419_v53, 0.0 }
 0x4c6   : > { %v8213_v21 = vpop.eup %8212  ;;  %v6482_v47 = vadd.f32 %v6481_v50, %v6480_v25 }
 0x4c7   : > { %v7220_v11 = vsel %vm16488_vm8, %v7158_v52, 0.0  ;;  %v6421_v12 = vmul.f32 0.6931472, %v8213_v21  ;;  %v6348_v61 = vpop.f32.mrb[118].mxu0 }
 0x4c8   : > { %v7221_v40 = vadd.f32 %v7220_v11, %v7219_v56  ;;  %8220 = vlog2.f32 %v6348_v61  ;;  %v6350_v26 = vpop.f32.mrb[119].mxu0 }
 0x4c9   : > { %v6483_v13 = vsel %vm16489_vm14, %v6421_v12, 0.0 }
 0x4ca   : > { %v8215_v7 = vpop.eup %8214  ;;  %v6484_v28 = vadd.f32 %v6483_v13, %v6482_v47 }
 0x4cb   : > { %v6423_v43 = vmul.f32 0.6931472, %v8215_v7  ;;  %v6353_v49 = vpop.f32.mrb[120].mxu0 }
 0x4cc   : > { %8222 = vlog2.f32 %v6353_v49  ;;  %v6355_v14 = vpop.f32.mrb[121].mxu0 }
 0x4cd   : > { %v6485_v3 = vsel %vm16490_vm10, %v6423_v43, 0.0 }
 0x4ce   : > { %v8217_v19 = vpop.eup %8216  ;;  %v6486_v46 = vadd.f32 %v6485_v3, %v6484_v28 }
 0x4cf   : > { %v8219_v31 = vpop.eup %8218  ;;  %v7160_v20 = vmul.f32 0.6931472, %v8217_v19  ;;  %v6358_v36 = vpop.f32.mrb[122].mxu0 }
 0x4d0   : > { %v6425_v29 = vmul.f32 0.6931472, %v8219_v31  ;;  %8224 = vlog2.f32 %v6358_v36  ;;  %v6360_v22 = vpop.f32.mrb[123].mxu0 }
 0x4d1   : > { %v7222_v8 = vsel %vm16491_vm3, %v7160_v20, 0.0 }
 0x4d2   : > { %v6487_v57 = vsel %vm16492_vm15, %v6425_v29, 0.0  ;;  %v7223_v38 = vadd.f32 %v7222_v8, %v7221_v40  ;;  %v8221_v54 = vpop.eup %8220 }
 0x4d3   : > { %v6488_v17 = vadd.f32 %v6487_v57, %v6486_v46  ;;  %v6427_v59 = vmul.f32 0.6931472, %v8221_v54  ;;  %v6363_v41 = vpop.f32.mrb[124].mxu0 }
 0x4d4   : > { %8226 = vlog2.f32 %v6363_v41  ;;  %v6365_v48 = vpop.f32.mrb[125].mxu0  ;;  %v7224_v42 = vrot.slane %v7223_v38, 4 }
 0x4d5   : > { %v6489_v58 = vsel %vm16429_vm0, %v6427_v59, 0.0 }
 0x4d6   : > { %v8223_v27 = vpop.eup %8222  ;;  %v6490_v34 = vadd.f32 %v6489_v58, %v6488_v17  ;;  %v7225_v63 = vadd.f32 %v7224_v42, %v7223_v38 }
 0x4d7   : > { %v6429_v62 = vmul.f32 0.6931472, %v8223_v27  ;;  %v6368_v0 = vpop.f32.mrb[126].mxu0 }
 0x4d8   : > { %8228 = vlog2.f32 %v6368_v0  ;;  %v6370_v10 = vpop.f32.mrb[127].mxu0  ;;  %v7226_v30 = vrot.slane %v7225_v63, 2 }
 0x4d9   : > { %v6491_v4 = vsel %vm16493_vm1, %v6429_v62, 0.0 }
 0x4da   : > { %v8225_v18 = vpop.eup %8224  ;;  %v6492_v6 = vadd.f32 %v6491_v4, %v6490_v34  ;;  %v7227_v33 = vadd.f32 %v7226_v30, %v7225_v63 }
 0x4db   : > { %v6431_v23 = vmul.f32 0.6931472, %v8225_v18 }
 0x4dc   : > { %v7228_v15 = vrot.slane %v7227_v33, 1 }
 0x4dd   : > { %v6493_v1 = vsel %vm16494_vm6, %v6431_v23, 0.0 }
 0x4de   : > { %v8227_v55 = vpop.eup %8226  ;;  %v6494_v2 = vadd.f32 %v6493_v1, %v6492_v6  ;;  %v7229_v45 = vadd.f32 %v7228_v15, %v7227_v33 }
 0x4df   : > { %v6433_v24 = vmul.f32 0.6931472, %v8227_v55 }
 0x4e0   : > { %v7230_v44 = vmul.f32 -0.0044527627, %v7229_v45 }
 0x4e1   : > { %v6495_v39 = vsel %vm16495_vm4, %v6433_v24, 0.0 }
 0x4e2   : > { %v8229_v32 = vpop.eup %8228  ;;  %v6496_v9 = vadd.f32 %v6495_v39, %v6494_v2  ;;  %v7231_v21 = vadd.f32 6.589511, %v7230_v44 }
 0x4e3   : > { %v6435_v35 = vmul.f32 0.6931472, %v8229_v32 }
 0x4e4   : > { %7821 = vst.msk [vmem:[%s14664_s27 + $0x3] sm:$0x1] %vm5057_vm2, %v7231_v21 }
 0x4e5   : > { %v6497_v5 = vsel %vm16496_vm12, %v6435_v35, 0.0 }
 0x4e6   : > { %v6498_v51 = vadd.f32 %v6497_v5, %v6496_v9 }
 0x4e8   : > { %v6499_v25 = vrot.slane %v6498_v51, 4 }
 0x4ea   : > { %v6500_v16 = vadd.f32 %v6499_v25, %v6498_v51 }
 0x4ec   : > { %v6501_v37 = vrot.slane %v6500_v16, 2 }
 0x4ee   : > { %v6502_v53 = vadd.f32 %v6501_v37, %v6500_v16 }
 0x4f0   : > { %v6503_v56 = vrot.slane %v6502_v53, 1 }
 0x4f2   : > { %v6504_v60 = vadd.f32 %v6503_v56, %v6502_v53 }
 0x4f4   : > { %v6505_v52 = vmul.f32 -0.0044527627, %v6504_v60 }
 0x4f6   : > { %v6506_v50 = vadd.f32 6.589511, %v6505_v52 }
 0x4f8   : > { %7692 = vst.msk [vmem:[%s14664_s27 + $0x2] sm:$0x1] %vm5057_vm2, %v6506_v50 }
 0x4f9 PF: > { %s12_s9 = sadd.s32 1, %s8244_s9  }
 0x4fa   : > { %p9_p4 = scmp.ge.s32.totalorder %s12_s9, 4  }
 0x4fc   :  { %11 = sbr.rel (!%p9_p4) target bundleno = 1 (0x1), region = 64 }

</bundles_post_ra>
